<compile_context>
chip_gen: v7x
topology: tpu7x:2x2x1
jax: 0.10.0
libtpu: 0.0.40
codegen_flags: <defaults>
</compile_context>

<pallas_src>
import math
import functools

import jax
import jax.numpy as jnp
from jax.experimental import pallas as pl
from jax.experimental.pallas import tpu as pltpu  # noqa: F401  (kept for optional tuning)

# ----------------------------- configuration --------------------------------
INPUT_DIM = 8
TIME_DIM = 32           # == HIDDEN so the no-mismatch branch of forward() applies
HIDDEN = 32
OUTPUT_DIM = 1
NUM_LAYERS = 3
NUM_HEADS = 8
HEAD_DIM = HIDDEN // NUM_HEADS
BATCH = 2
SEQ = 8
MAX_TIME = 5000
LN_EPS = 1e-5


# ------------------------------- kernel --------------------------------------
def _layernorm(x, w, b, eps=LN_EPS):
    mu = jnp.mean(x, axis=-1, keepdims=True)
    var = jnp.mean((x - mu) ** 2, axis=-1, keepdims=True)
    return (x - mu) * jax.lax.rsqrt(var + eps) * w + b


def fused_forward_kernel(x_ref, temb_ref, fw_ref, fb_ref,
                         wq_ref, wk_ref, wv_ref, bq_ref, bk_ref, bv_ref,
                         wo_ref, bo_ref,
                         ln1w_ref, ln1b_ref, w1_ref, b1_ref, w2_ref, b2_ref,
                         ln2w_ref, ln2b_ref,
                         hw1t_ref, hw1f_ref, hb1_ref, hlnw_ref, hlnb_ref,
                         hw2_ref, hb2_ref, o_ref,
                         *, batch, seq, nhead, head_dim, num_layers):
    hidden = nhead * head_dim
    scale = 1.0 / math.sqrt(head_dim)

    # ---- feature encoding (linear fallback) + time-embedding add -------------
    feat = jnp.dot(x_ref[...], fw_ref[...],
                   preferred_element_type=jnp.float32) + fb_ref[...]      # (B*S, H)
    h = feat + temb_ref[...]                                              # (B*S, H)

    # ---- StockTransformer: statically unrolled encoder layers ----------------
    for l in range(num_layers):
        wq, wk, wv = wq_ref[l], wk_ref[l], wv_ref[l]        # (nhead, H, hd)
        bq, bk, bv = bq_ref[l], bk_ref[l], bv_ref[l]        # (nhead, 1, hd)
        wo = wo_ref[l]                                      # (nhead, hd, H)

        attn_rows = []
        for b in range(batch):                              # B=2, static unroll
            xb = h[b * seq:(b + 1) * seq]                                  # (S, H)
            xbb = jnp.broadcast_to(xb[None, :, :], (nhead, seq, hidden))   # (nh, S, H)
            # QKV directly in head-major layout (no lane slicing of a fused qkv).
            q = jnp.einsum('hsk,hkd->hsd', xbb, wq,
                           preferred_element_type=jnp.float32) + bq        # (nh, S, hd)
            k = jnp.einsum('hsk,hkd->hsd', xbb, wk,
                           preferred_element_type=jnp.float32) + bk
            v = jnp.einsum('hsk,hkd->hsd', xbb, wv,
                           preferred_element_type=jnp.float32) + bv
            s = jnp.einsum('hqd,hkd->hqk', q * scale, k,
                           preferred_element_type=jnp.float32)             # (nh, S, S)
            s = s - jnp.max(s, axis=-1, keepdims=True)
            p = jnp.exp(s)
            p = p / jnp.sum(p, axis=-1, keepdims=True)
            ctx = jnp.einsum('hqk,hkd->hqd', p, v,
                             preferred_element_type=jnp.float32)           # (nh, S, hd)
            # Output projection folded per head, then summed over heads
            # (mathematically identical to concat(heads) @ Wo, but no concat/relayout).
            proj = jnp.einsum('hqd,hdj->hqj', ctx, wo,
                              preferred_element_type=jnp.float32)          # (nh, S, H)
            attn_rows.append(jnp.sum(proj, axis=0))                        # (S, H)
        attn = jnp.concatenate(attn_rows, axis=0) + bo_ref[l]              # (B*S, H)

        # post-norm residual structure of nn.TransformerEncoderLayer (eval mode)
        src = _layernorm(h + attn, ln1w_ref[l], ln1b_ref[l])
        ff = jnp.dot(src, w1_ref[l], preferred_element_type=jnp.float32) + b1_ref[l]
        ff = jnp.maximum(ff, 0.0)
        ff = jnp.dot(ff, w2_ref[l], preferred_element_type=jnp.float32) + b2_ref[l]
        h = _layernorm(src + ff, ln2w_ref[l], ln2b_ref[l])

    # ---- prediction head: cat([transformer_out, feat]) @ W1 done as a split dot
    ph = (jnp.dot(h, hw1t_ref[...], preferred_element_type=jnp.float32)
          + jnp.dot(feat, hw1f_ref[...], preferred_element_type=jnp.float32)
          + hb1_ref[...])
    ph = _layernorm(ph, hlnw_ref[...], hlnb_ref[...])
    ph = jnp.maximum(ph, 0.0)
    # Final Linear(H, 1) as a lane-reduction -> (B, S) output (no last-dim-1 store).
    y = jnp.sum(ph.reshape(batch, seq, hidden) * hw2_ref[...], axis=-1) + hb2_ref[...]
    o_ref[...] = y


# ------------------------------ parameters -----------------------------------
def init_params(key):
    def dense(k, shape, scale=0.05):
        return scale * jax.random.normal(k, shape, jnp.float32)

    L, NH, HD, H, F = NUM_LAYERS, NUM_HEADS, HEAD_DIM, HIDDEN, 4 * HIDDEN
    ks = jax.random.split(key, 11)
    zeros = lambda s: jnp.zeros(s, jnp.float32)
    ones = lambda s: jnp.ones(s, jnp.float32)

    # NOTE: attention weights are stored head-major:
    #   wq[l, h] == Wq_full[:, h*HD:(h+1)*HD]     (likewise wk, wv)
    #   wo[l, h] == Wo_full[h*HD:(h+1)*HD, :]
    # If porting a real nn.MultiheadAttention checkpoint, its in_proj_weight is
    # (3H, H) applied as x @ W^T — transpose/reorder accordingly before stacking.
    return {
        "time_table": dense(ks[0], (MAX_TIME, TIME_DIM)),
        # TODO(synk): CNNFeatureEncoder class definition not provided; using the
        # module's own documented fallback nn.Linear(input_dim, hidden_dim).
        "feat_w": dense(ks[1], (INPUT_DIM, H)),
        "feat_b": zeros((1, H)),
        "wq": dense(ks[2], (L, NH, H, HD)),
        "wk": dense(ks[3], (L, NH, H, HD)),
        "wv": dense(ks[4], (L, NH, H, HD)),
        "bq": zeros((L, NH, 1, HD)),
        "bk": zeros((L, NH, 1, HD)),
        "bv": zeros((L, NH, 1, HD)),
        "wo": dense(ks[5], (L, NH, HD, H)),
        "bo": zeros((L, 1, H)),
        "ln1w": ones((L, 1, H)), "ln1b": zeros((L, 1, H)),
        "w1": dense(ks[6], (L, H, F)), "b1": zeros((L, 1, F)),
        "w2": dense(ks[7], (L, F, H)), "b2": zeros((L, 1, H)),
        "ln2w": ones((L, 1, H)), "ln2b": zeros((L, 1, H)),
        # prediction head; W1 of Linear(2H, H) pre-split into [time-half, feature-half]
        "hw1_time": dense(ks[8], (H, H)),
        "hw1_feat": dense(ks[9], (H, H)),
        "hb1": zeros((1, H)),
        "hlnw": ones((1, H)), "hlnb": zeros((1, H)),
        "hw2": dense(ks[10], (1, H)),      # Linear(H, 1) weight stored as a row
        "hb2": zeros((1, 1)),
    }


# ------------------------------- forward --------------------------------------
@jax.jit
def stock_prediction_forward(params, x, time_indices):
    B, S, _ = x.shape
    # skip_anomaly_filter / missing-anomaly-filter fallback: x passes through unchanged.
    x2d = x.reshape(B * S, INPUT_DIM)

    # Time encoder fallback: nn.Embedding(5000, time_dim) lookup (tiny XLA gather,
    # consumed directly inside the fused kernel — the +time_emb add happens in VMEM).
    temb = jnp.take(params["time_table"], time_indices.reshape(-1), axis=0)  # (B*S, TIME_DIM)

    kern = functools.partial(
        fused_forward_kernel, batch=B, seq=S,
        nhead=NUM_HEADS, head_dim=HEAD_DIM, num_layers=NUM_LAYERS)

    # TODO(synk): HierarchicalTemporalAttention and CoAttentionModule class definitions
    # were not provided; their exception-fallback pass-through is folded into the kernel
    # (enhanced_time = transformer output, enhanced_features = feature embeddings).
    y = pl.pallas_call(
        kern,
        out_shape=jax.ShapeDtypeStruct((B, S), jnp.float32),
    )(x2d, temb,
      params["feat_w"], params["feat_b"],
      params["wq"], params["wk"], params["wv"],
      params["bq"], params["bk"], params["bv"],
      params["wo"], params["bo"],
      params["ln1w"], params["ln1b"],
      params["w1"], params["b1"], params["w2"], params["b2"],
      params["ln2w"], params["ln2b"],
      params["hw1_time"], params["hw1_feat"], params["hb1"],
      params["hlnw"], params["hlnb"], params["hw2"], params["hb2"])

    return y[..., None]                                   # (B, S, OUTPUT_DIM)


# --------------------------------- main ----------------------------------------
if __name__ == "__main__":
    key = jax.random.PRNGKey(0)
    pkey, xkey, tkey = jax.random.split(key, 3)

    params = init_params(pkey)
    x = jax.random.normal(xkey, (BATCH, SEQ, INPUT_DIM), jnp.float32)
    time_indices = jax.random.randint(tkey, (BATCH, SEQ), 0, MAX_TIME, jnp.int32)

    preds = stock_prediction_forward(params, x, time_indices)
    preds = jax.block_until_ready(preds)
    assert preds.shape == (BATCH, SEQ, OUTPUT_DIM)
    assert bool(jnp.all(jnp.isfinite(preds)))
    print("KERNEL_OK")
</pallas_src>

<mosaic_0001>
module attributes {stable_mosaic.version = 11 : i64} {
  func.func @fused_forward_kernel(%arg0: memref<16x8xf32, #tpu.memory_space<vmem>>, %arg1: memref<16x32xf32, #tpu.memory_space<vmem>>, %arg2: memref<8x32xf32, #tpu.memory_space<vmem>>, %arg3: memref<1x32xf32, #tpu.memory_space<vmem>>, %arg4: memref<3x8x32x4xf32, #tpu.memory_space<vmem>>, %arg5: memref<3x8x32x4xf32, #tpu.memory_space<vmem>>, %arg6: memref<3x8x32x4xf32, #tpu.memory_space<vmem>>, %arg7: memref<3x8x1x4xf32, #tpu.memory_space<vmem>>, %arg8: memref<3x8x1x4xf32, #tpu.memory_space<vmem>>, %arg9: memref<3x8x1x4xf32, #tpu.memory_space<vmem>>, %arg10: memref<3x8x4x32xf32, #tpu.memory_space<vmem>>, %arg11: memref<3x1x32xf32, #tpu.memory_space<vmem>>, %arg12: memref<3x1x32xf32, #tpu.memory_space<vmem>>, %arg13: memref<3x1x32xf32, #tpu.memory_space<vmem>>, %arg14: memref<3x32x128xf32, #tpu.memory_space<vmem>>, %arg15: memref<3x1x128xf32, #tpu.memory_space<vmem>>, %arg16: memref<3x128x32xf32, #tpu.memory_space<vmem>>, %arg17: memref<3x1x32xf32, #tpu.memory_space<vmem>>, %arg18: memref<3x1x32xf32, #tpu.memory_space<vmem>>, %arg19: memref<3x1x32xf32, #tpu.memory_space<vmem>>, %arg20: memref<32x32xf32, #tpu.memory_space<vmem>>, %arg21: memref<32x32xf32, #tpu.memory_space<vmem>>, %arg22: memref<1x32xf32, #tpu.memory_space<vmem>>, %arg23: memref<1x32xf32, #tpu.memory_space<vmem>>, %arg24: memref<1x32xf32, #tpu.memory_space<vmem>>, %arg25: memref<1x32xf32, #tpu.memory_space<vmem>>, %arg26: memref<1x1xf32, #tpu.memory_space<vmem>>, %arg27: memref<2x8xf32, #tpu.memory_space<vmem>>) attributes {dimension_semantics = [], scalar_prefetch = 0 : i64, scratch_operands = 0 : i64, tpu.core_type = #tpu.core_type<tc>} {
    %c0 = arith.constant 0 : index
    %c0_0 = arith.constant 0 : index
    %0 = vector.load %arg0[%c0, %c0_0] : memref<16x8xf32, #tpu.memory_space<vmem>>, vector<16x8xf32>
    %c0_1 = arith.constant 0 : index
    %c0_2 = arith.constant 0 : index
    %1 = vector.load %arg2[%c0_1, %c0_2] : memref<8x32xf32, #tpu.memory_space<vmem>>, vector<8x32xf32>
    %cst = arith.constant dense<0.000000e+00> : vector<16x32xf32>
    %2 = tpu.matmul %0, %1, %cst {dimension_numbers = #tpu.dot_dimension_numbers<[1], [0], [0], [1], [0, 0, 1, 1], [], []>} : vector<16x8xf32>, vector<8x32xf32>, vector<16x32xf32> -> vector<16x32xf32>
    %c0_3 = arith.constant 0 : index
    %c0_4 = arith.constant 0 : index
    %3 = vector.load %arg3[%c0_3, %c0_4] : memref<1x32xf32, #tpu.memory_space<vmem>>, vector<1x32xf32>
    %4 = vector.broadcast %3 : vector<1x32xf32> to vector<16x32xf32>
    %5 = arith.addf %2, %4 : vector<16x32xf32>
    %c0_5 = arith.constant 0 : index
    %c0_6 = arith.constant 0 : index
    %6 = vector.load %arg1[%c0_5, %c0_6] : memref<16x32xf32, #tpu.memory_space<vmem>>, vector<16x32xf32>
    %7 = arith.addf %5, %6 : vector<16x32xf32>
    %c0_7 = arith.constant 0 : index
    %c0_8 = arith.constant 0 : index
    %c0_9 = arith.constant 0 : index
    %c0_10 = arith.constant 0 : index
    %8 = vector.load %arg4[%c0_7, %c0_8, %c0_9, %c0_10] : memref<3x8x32x4xf32, #tpu.memory_space<vmem>>, vector<1x8x32x4xf32>
    %9 = vector.shape_cast %8 : vector<1x8x32x4xf32> to vector<8x32x4xf32>
    %c0_11 = arith.constant 0 : index
    %c0_12 = arith.constant 0 : index
    %c0_13 = arith.constant 0 : index
    %c0_14 = arith.constant 0 : index
    %10 = vector.load %arg5[%c0_11, %c0_12, %c0_13, %c0_14] : memref<3x8x32x4xf32, #tpu.memory_space<vmem>>, vector<1x8x32x4xf32>
    %11 = vector.shape_cast %10 : vector<1x8x32x4xf32> to vector<8x32x4xf32>
    %c0_15 = arith.constant 0 : index
    %c0_16 = arith.constant 0 : index
    %c0_17 = arith.constant 0 : index
    %c0_18 = arith.constant 0 : index
    %12 = vector.load %arg6[%c0_15, %c0_16, %c0_17, %c0_18] : memref<3x8x32x4xf32, #tpu.memory_space<vmem>>, vector<1x8x32x4xf32>
    %13 = vector.shape_cast %12 : vector<1x8x32x4xf32> to vector<8x32x4xf32>
    %c0_19 = arith.constant 0 : index
    %c0_20 = arith.constant 0 : index
    %c0_21 = arith.constant 0 : index
    %c0_22 = arith.constant 0 : index
    %14 = vector.load %arg7[%c0_19, %c0_20, %c0_21, %c0_22] : memref<3x8x1x4xf32, #tpu.memory_space<vmem>>, vector<1x8x1x4xf32>
    %15 = vector.shape_cast %14 : vector<1x8x1x4xf32> to vector<8x1x4xf32>
    %c0_23 = arith.constant 0 : index
    %c0_24 = arith.constant 0 : index
    %c0_25 = arith.constant 0 : index
    %c0_26 = arith.constant 0 : index
    %16 = vector.load %arg8[%c0_23, %c0_24, %c0_25, %c0_26] : memref<3x8x1x4xf32, #tpu.memory_space<vmem>>, vector<1x8x1x4xf32>
    %17 = vector.shape_cast %16 : vector<1x8x1x4xf32> to vector<8x1x4xf32>
    %c0_27 = arith.constant 0 : index
    %c0_28 = arith.constant 0 : index
    %c0_29 = arith.constant 0 : index
    %c0_30 = arith.constant 0 : index
    %18 = vector.load %arg9[%c0_27, %c0_28, %c0_29, %c0_30] : memref<3x8x1x4xf32, #tpu.memory_space<vmem>>, vector<1x8x1x4xf32>
    %19 = vector.shape_cast %18 : vector<1x8x1x4xf32> to vector<8x1x4xf32>
    %c0_31 = arith.constant 0 : index
    %c0_32 = arith.constant 0 : index
    %c0_33 = arith.constant 0 : index
    %c0_34 = arith.constant 0 : index
    %20 = vector.load %arg10[%c0_31, %c0_32, %c0_33, %c0_34] : memref<3x8x4x32xf32, #tpu.memory_space<vmem>>, vector<1x8x4x32xf32>
    %21 = vector.shape_cast %20 : vector<1x8x4x32xf32> to vector<8x4x32xf32>
    %22 = vector.extract_strided_slice %7 {offsets = [0, 0], sizes = [8, 32], strides = [1, 1]} : vector<16x32xf32> to vector<8x32xf32>
    %23 = vector.shape_cast %22 : vector<8x32xf32> to vector<1x8x32xf32>
    %24 = vector.shape_cast %23 : vector<1x8x32xf32> to vector<1x8x32xf32>
    %25 = vector.broadcast %24 : vector<1x8x32xf32> to vector<8x8x32xf32>
    "tpu.trace_start"() <{level = 10 : i32, message = "hsk,hkd->hsd"}> : () -> ()
    %cst_35 = arith.constant dense<0.000000e+00> : vector<8x8x4xf32>
    %26 = tpu.matmul %25, %9, %cst_35 {dimension_numbers = #tpu.dot_dimension_numbers<[2], [1], [1], [2], [0, 0, 0, 1, 1, 2], [0], [0]>} : vector<8x8x32xf32>, vector<8x32x4xf32>, vector<8x8x4xf32> -> vector<8x8x4xf32>
    "tpu.trace_stop"() : () -> ()
    %27 = vector.broadcast %15 : vector<8x1x4xf32> to vector<8x8x4xf32>
    %28 = arith.addf %26, %27 : vector<8x8x4xf32>
    "tpu.trace_start"() <{level = 10 : i32, message = "hsk,hkd->hsd"}> : () -> ()
    %cst_36 = arith.constant dense<0.000000e+00> : vector<8x8x4xf32>
    %29 = tpu.matmul %25, %11, %cst_36 {dimension_numbers = #tpu.dot_dimension_numbers<[2], [1], [1], [2], [0, 0, 0, 1, 1, 2], [0], [0]>} : vector<8x8x32xf32>, vector<8x32x4xf32>, vector<8x8x4xf32> -> vector<8x8x4xf32>
    "tpu.trace_stop"() : () -> ()
    %30 = vector.broadcast %17 : vector<8x1x4xf32> to vector<8x8x4xf32>
    %31 = arith.addf %29, %30 : vector<8x8x4xf32>
    "tpu.trace_start"() <{level = 10 : i32, message = "hsk,hkd->hsd"}> : () -> ()
    %cst_37 = arith.constant dense<0.000000e+00> : vector<8x8x4xf32>
    %32 = tpu.matmul %25, %13, %cst_37 {dimension_numbers = #tpu.dot_dimension_numbers<[2], [1], [1], [2], [0, 0, 0, 1, 1, 2], [0], [0]>} : vector<8x8x32xf32>, vector<8x32x4xf32>, vector<8x8x4xf32> -> vector<8x8x4xf32>
    "tpu.trace_stop"() : () -> ()
    %33 = vector.broadcast %19 : vector<8x1x4xf32> to vector<8x8x4xf32>
    %34 = arith.addf %32, %33 : vector<8x8x4xf32>
    %cst_38 = arith.constant 5.000000e-01 : f32
    %35 = vector.broadcast %cst_38 : f32 to vector<8x8x4xf32>
    %36 = arith.mulf %28, %35 : vector<8x8x4xf32>
    "tpu.trace_start"() <{level = 10 : i32, message = "hqd,hkd->hqk"}> : () -> ()
    %cst_39 = arith.constant dense<0.000000e+00> : vector<8x8x8xf32>
    %37 = tpu.matmul %36, %31, %cst_39 {dimension_numbers = #tpu.dot_dimension_numbers<[2], [2], [1], [1], [0, 0, 0, 1, 1, 1], [0], [0]>} : vector<8x8x4xf32>, vector<8x8x4xf32>, vector<8x8x8xf32> -> vector<8x8x8xf32>
    "tpu.trace_stop"() : () -> ()
    %cst_40 = arith.constant dense<0xFF800000> : vector<8x8xf32>
    %38 = vector.multi_reduction <maximumf>, %37, %cst_40 [2] : vector<8x8x8xf32> to vector<8x8xf32>
    %39 = vector.shape_cast %38 : vector<8x8xf32> to vector<8x8x1xf32>
    %40 = vector.broadcast %39 : vector<8x8x1xf32> to vector<8x8x8xf32>
    %41 = arith.subf %37, %40 : vector<8x8x8xf32>
    %42 = math.exp %41 : vector<8x8x8xf32>
    %cst_41 = arith.constant dense<0.000000e+00> : vector<8x8xf32>
    %43 = vector.multi_reduction <add>, %42, %cst_41 [2] : vector<8x8x8xf32> to vector<8x8xf32>
    %44 = vector.shape_cast %43 : vector<8x8xf32> to vector<8x8x1xf32>
    %45 = vector.broadcast %44 : vector<8x8x1xf32> to vector<8x8x8xf32>
    %46 = arith.divf %42, %45 : vector<8x8x8xf32>
    "tpu.trace_start"() <{level = 10 : i32, message = "hqk,hkd->hqd"}> : () -> ()
    %cst_42 = arith.constant dense<0.000000e+00> : vector<8x8x4xf32>
    %47 = tpu.matmul %46, %34, %cst_42 {dimension_numbers = #tpu.dot_dimension_numbers<[2], [1], [1], [2], [0, 0, 0, 1, 1, 2], [0], [0]>} : vector<8x8x8xf32>, vector<8x8x4xf32>, vector<8x8x4xf32> -> vector<8x8x4xf32>
    "tpu.trace_stop"() : () -> ()
    "tpu.trace_start"() <{level = 10 : i32, message = "hqd,hdj->hqj"}> : () -> ()
    %cst_43 = arith.constant dense<0.000000e+00> : vector<8x8x32xf32>
    %48 = tpu.matmul %47, %21, %cst_43 {dimension_numbers = #tpu.dot_dimension_numbers<[2], [1], [1], [2], [0, 0, 0, 1, 1, 2], [0], [0]>} : vector<8x8x4xf32>, vector<8x4x32xf32>, vector<8x8x32xf32> -> vector<8x8x32xf32>
    "tpu.trace_stop"() : () -> ()
    %cst_44 = arith.constant dense<0.000000e+00> : vector<8x32xf32>
    %49 = vector.multi_reduction <add>, %48, %cst_44 [0] : vector<8x8x32xf32> to vector<8x32xf32>
    %50 = vector.extract_strided_slice %7 {offsets = [8, 0], sizes = [8, 32], strides = [1, 1]} : vector<16x32xf32> to vector<8x32xf32>
    %51 = vector.shape_cast %50 : vector<8x32xf32> to vector<1x8x32xf32>
    %52 = vector.shape_cast %51 : vector<1x8x32xf32> to vector<1x8x32xf32>
    %53 = vector.broadcast %52 : vector<1x8x32xf32> to vector<8x8x32xf32>
    "tpu.trace_start"() <{level = 10 : i32, message = "hsk,hkd->hsd"}> : () -> ()
    %cst_45 = arith.constant dense<0.000000e+00> : vector<8x8x4xf32>
    %54 = tpu.matmul %53, %9, %cst_45 {dimension_numbers = #tpu.dot_dimension_numbers<[2], [1], [1], [2], [0, 0, 0, 1, 1, 2], [0], [0]>} : vector<8x8x32xf32>, vector<8x32x4xf32>, vector<8x8x4xf32> -> vector<8x8x4xf32>
    "tpu.trace_stop"() : () -> ()
    %55 = vector.broadcast %15 : vector<8x1x4xf32> to vector<8x8x4xf32>
    %56 = arith.addf %54, %55 : vector<8x8x4xf32>
    "tpu.trace_start"() <{level = 10 : i32, message = "hsk,hkd->hsd"}> : () -> ()
    %cst_46 = arith.constant dense<0.000000e+00> : vector<8x8x4xf32>
    %57 = tpu.matmul %53, %11, %cst_46 {dimension_numbers = #tpu.dot_dimension_numbers<[2], [1], [1], [2], [0, 0, 0, 1, 1, 2], [0], [0]>} : vector<8x8x32xf32>, vector<8x32x4xf32>, vector<8x8x4xf32> -> vector<8x8x4xf32>
    "tpu.trace_stop"() : () -> ()
    %58 = vector.broadcast %17 : vector<8x1x4xf32> to vector<8x8x4xf32>
    %59 = arith.addf %57, %58 : vector<8x8x4xf32>
    "tpu.trace_start"() <{level = 10 : i32, message = "hsk,hkd->hsd"}> : () -> ()
    %cst_47 = arith.constant dense<0.000000e+00> : vector<8x8x4xf32>
    %60 = tpu.matmul %53, %13, %cst_47 {dimension_numbers = #tpu.dot_dimension_numbers<[2], [1], [1], [2], [0, 0, 0, 1, 1, 2], [0], [0]>} : vector<8x8x32xf32>, vector<8x32x4xf32>, vector<8x8x4xf32> -> vector<8x8x4xf32>
    "tpu.trace_stop"() : () -> ()
    %61 = vector.broadcast %19 : vector<8x1x4xf32> to vector<8x8x4xf32>
    %62 = arith.addf %60, %61 : vector<8x8x4xf32>
    %cst_48 = arith.constant 5.000000e-01 : f32
    %63 = vector.broadcast %cst_48 : f32 to vector<8x8x4xf32>
    %64 = arith.mulf %56, %63 : vector<8x8x4xf32>
    "tpu.trace_start"() <{level = 10 : i32, message = "hqd,hkd->hqk"}> : () -> ()
    %cst_49 = arith.constant dense<0.000000e+00> : vector<8x8x8xf32>
    %65 = tpu.matmul %64, %59, %cst_49 {dimension_numbers = #tpu.dot_dimension_numbers<[2], [2], [1], [1], [0, 0, 0, 1, 1, 1], [0], [0]>} : vector<8x8x4xf32>, vector<8x8x4xf32>, vector<8x8x8xf32> -> vector<8x8x8xf32>
    "tpu.trace_stop"() : () -> ()
    %cst_50 = arith.constant dense<0xFF800000> : vector<8x8xf32>
    %66 = vector.multi_reduction <maximumf>, %65, %cst_50 [2] : vector<8x8x8xf32> to vector<8x8xf32>
    %67 = vector.shape_cast %66 : vector<8x8xf32> to vector<8x8x1xf32>
    %68 = vector.broadcast %67 : vector<8x8x1xf32> to vector<8x8x8xf32>
    %69 = arith.subf %65, %68 : vector<8x8x8xf32>
    %70 = math.exp %69 : vector<8x8x8xf32>
    %cst_51 = arith.constant dense<0.000000e+00> : vector<8x8xf32>
    %71 = vector.multi_reduction <add>, %70, %cst_51 [2] : vector<8x8x8xf32> to vector<8x8xf32>
    %72 = vector.shape_cast %71 : vector<8x8xf32> to vector<8x8x1xf32>
    %73 = vector.broadcast %72 : vector<8x8x1xf32> to vector<8x8x8xf32>
    %74 = arith.divf %70, %73 : vector<8x8x8xf32>
    "tpu.trace_start"() <{level = 10 : i32, message = "hqk,hkd->hqd"}> : () -> ()
    %cst_52 = arith.constant dense<0.000000e+00> : vector<8x8x4xf32>
    %75 = tpu.matmul %74, %62, %cst_52 {dimension_numbers = #tpu.dot_dimension_numbers<[2], [1], [1], [2], [0, 0, 0, 1, 1, 2], [0], [0]>} : vector<8x8x8xf32>, vector<8x8x4xf32>, vector<8x8x4xf32> -> vector<8x8x4xf32>
    "tpu.trace_stop"() : () -> ()
    "tpu.trace_start"() <{level = 10 : i32, message = "hqd,hdj->hqj"}> : () -> ()
    %cst_53 = arith.constant dense<0.000000e+00> : vector<8x8x32xf32>
    %76 = tpu.matmul %75, %21, %cst_53 {dimension_numbers = #tpu.dot_dimension_numbers<[2], [1], [1], [2], [0, 0, 0, 1, 1, 2], [0], [0]>} : vector<8x8x4xf32>, vector<8x4x32xf32>, vector<8x8x32xf32> -> vector<8x8x32xf32>
    "tpu.trace_stop"() : () -> ()
    %cst_54 = arith.constant dense<0.000000e+00> : vector<8x32xf32>
    %77 = vector.multi_reduction <add>, %76, %cst_54 [0] : vector<8x8x32xf32> to vector<8x32xf32>
    %78 = tpu.concatenate %49, %77 in 0 : vector<8x32xf32>, vector<8x32xf32> -> vector<16x32xf32>
    %c0_55 = arith.constant 0 : index
    %c0_56 = arith.constant 0 : index
    %c0_57 = arith.constant 0 : index
    %79 = vector.load %arg11[%c0_55, %c0_56, %c0_57] : memref<3x1x32xf32, #tpu.memory_space<vmem>>, vector<1x1x32xf32>
    %80 = vector.shape_cast %79 : vector<1x1x32xf32> to vector<1x32xf32>
    %81 = vector.broadcast %80 : vector<1x32xf32> to vector<16x32xf32>
    %82 = arith.addf %78, %81 : vector<16x32xf32>
    %83 = arith.addf %7, %82 : vector<16x32xf32>
    %c0_58 = arith.constant 0 : index
    %c0_59 = arith.constant 0 : index
    %c0_60 = arith.constant 0 : index
    %84 = vector.load %arg12[%c0_58, %c0_59, %c0_60] : memref<3x1x32xf32, #tpu.memory_space<vmem>>, vector<1x1x32xf32>
    %85 = vector.shape_cast %84 : vector<1x1x32xf32> to vector<1x32xf32>
    %c0_61 = arith.constant 0 : index
    %c0_62 = arith.constant 0 : index
    %c0_63 = arith.constant 0 : index
    %86 = vector.load %arg13[%c0_61, %c0_62, %c0_63] : memref<3x1x32xf32, #tpu.memory_space<vmem>>, vector<1x1x32xf32>
    %87 = vector.shape_cast %86 : vector<1x1x32xf32> to vector<1x32xf32>
    %cst_64 = arith.constant dense<0.000000e+00> : vector<16xf32>
    %88 = vector.multi_reduction <add>, %83, %cst_64 [1] : vector<16x32xf32> to vector<16xf32>
    %89 = vector.shape_cast %88 : vector<16xf32> to vector<16x1xf32>
    %cst_65 = arith.constant 3.200000e+01 : f32
    %90 = vector.broadcast %cst_65 : f32 to vector<16x1xf32>
    %91 = arith.divf %89, %90 : vector<16x1xf32>
    %92 = vector.broadcast %91 : vector<16x1xf32> to vector<16x32xf32>
    %93 = arith.subf %83, %92 : vector<16x32xf32>
    %94 = arith.mulf %93, %93 : vector<16x32xf32>
    %cst_66 = arith.constant dense<0.000000e+00> : vector<16xf32>
    %95 = vector.multi_reduction <add>, %94, %cst_66 [1] : vector<16x32xf32> to vector<16xf32>
    %96 = vector.shape_cast %95 : vector<16xf32> to vector<16x1xf32>
    %cst_67 = arith.constant 3.200000e+01 : f32
    %97 = vector.broadcast %cst_67 : f32 to vector<16x1xf32>
    %98 = arith.divf %96, %97 : vector<16x1xf32>
    %99 = vector.broadcast %91 : vector<16x1xf32> to vector<16x32xf32>
    %100 = arith.subf %83, %99 : vector<16x32xf32>
    %cst_68 = arith.constant 9.99999974E-6 : f32
    %101 = vector.broadcast %cst_68 : f32 to vector<16x1xf32>
    %102 = arith.addf %98, %101 : vector<16x1xf32>
    %103 = math.rsqrt %102 : vector<16x1xf32>
    %104 = vector.broadcast %103 : vector<16x1xf32> to vector<16x32xf32>
    %105 = arith.mulf %100, %104 : vector<16x32xf32>
    %106 = vector.broadcast %85 : vector<1x32xf32> to vector<16x32xf32>
    %107 = arith.mulf %105, %106 : vector<16x32xf32>
    %108 = vector.broadcast %87 : vector<1x32xf32> to vector<16x32xf32>
    %109 = arith.addf %107, %108 : vector<16x32xf32>
    %c0_69 = arith.constant 0 : index
    %c0_70 = arith.constant 0 : index
    %c0_71 = arith.constant 0 : index
    %110 = vector.load %arg14[%c0_69, %c0_70, %c0_71] : memref<3x32x128xf32, #tpu.memory_space<vmem>>, vector<1x32x128xf32>
    %111 = vector.shape_cast %110 : vector<1x32x128xf32> to vector<32x128xf32>
    %cst_72 = arith.constant dense<0.000000e+00> : vector<16x128xf32>
    %112 = tpu.matmul %109, %111, %cst_72 {dimension_numbers = #tpu.dot_dimension_numbers<[1], [0], [0], [1], [0, 0, 1, 1], [], []>} : vector<16x32xf32>, vector<32x128xf32>, vector<16x128xf32> -> vector<16x128xf32>
    %c0_73 = arith.constant 0 : index
    %c0_74 = arith.constant 0 : index
    %c0_75 = arith.constant 0 : index
    %113 = vector.load %arg15[%c0_73, %c0_74, %c0_75] : memref<3x1x128xf32, #tpu.memory_space<vmem>>, vector<1x1x128xf32>
    %114 = vector.shape_cast %113 : vector<1x1x128xf32> to vector<1x128xf32>
    %115 = vector.broadcast %114 : vector<1x128xf32> to vector<16x128xf32>
    %116 = arith.addf %112, %115 : vector<16x128xf32>
    %cst_76 = arith.constant 0.000000e+00 : f32
    %117 = vector.broadcast %cst_76 : f32 to vector<16x128xf32>
    %118 = arith.maximumf %116, %117 : vector<16x128xf32>
    %c0_77 = arith.constant 0 : index
    %c0_78 = arith.constant 0 : index
    %c0_79 = arith.constant 0 : index
    %119 = vector.load %arg16[%c0_77, %c0_78, %c0_79] : memref<3x128x32xf32, #tpu.memory_space<vmem>>, vector<1x128x32xf32>
    %120 = vector.shape_cast %119 : vector<1x128x32xf32> to vector<128x32xf32>
    %cst_80 = arith.constant dense<0.000000e+00> : vector<16x32xf32>
    %121 = tpu.matmul %118, %120, %cst_80 {dimension_numbers = #tpu.dot_dimension_numbers<[1], [0], [0], [1], [0, 0, 1, 1], [], []>} : vector<16x128xf32>, vector<128x32xf32>, vector<16x32xf32> -> vector<16x32xf32>
    %c0_81 = arith.constant 0 : index
    %c0_82 = arith.constant 0 : index
    %c0_83 = arith.constant 0 : index
    %122 = vector.load %arg17[%c0_81, %c0_82, %c0_83] : memref<3x1x32xf32, #tpu.memory_space<vmem>>, vector<1x1x32xf32>
    %123 = vector.shape_cast %122 : vector<1x1x32xf32> to vector<1x32xf32>
    %124 = vector.broadcast %123 : vector<1x32xf32> to vector<16x32xf32>
    %125 = arith.addf %121, %124 : vector<16x32xf32>
    %126 = arith.addf %109, %125 : vector<16x32xf32>
    %c0_84 = arith.constant 0 : index
    %c0_85 = arith.constant 0 : index
    %c0_86 = arith.constant 0 : index
    %127 = vector.load %arg18[%c0_84, %c0_85, %c0_86] : memref<3x1x32xf32, #tpu.memory_space<vmem>>, vector<1x1x32xf32>
    %128 = vector.shape_cast %127 : vector<1x1x32xf32> to vector<1x32xf32>
    %c0_87 = arith.constant 0 : index
    %c0_88 = arith.constant 0 : index
    %c0_89 = arith.constant 0 : index
    %129 = vector.load %arg19[%c0_87, %c0_88, %c0_89] : memref<3x1x32xf32, #tpu.memory_space<vmem>>, vector<1x1x32xf32>
    %130 = vector.shape_cast %129 : vector<1x1x32xf32> to vector<1x32xf32>
    %cst_90 = arith.constant dense<0.000000e+00> : vector<16xf32>
    %131 = vector.multi_reduction <add>, %126, %cst_90 [1] : vector<16x32xf32> to vector<16xf32>
    %132 = vector.shape_cast %131 : vector<16xf32> to vector<16x1xf32>
    %cst_91 = arith.constant 3.200000e+01 : f32
    %133 = vector.broadcast %cst_91 : f32 to vector<16x1xf32>
    %134 = arith.divf %132, %133 : vector<16x1xf32>
    %135 = vector.broadcast %134 : vector<16x1xf32> to vector<16x32xf32>
    %136 = arith.subf %126, %135 : vector<16x32xf32>
    %137 = arith.mulf %136, %136 : vector<16x32xf32>
    %cst_92 = arith.constant dense<0.000000e+00> : vector<16xf32>
    %138 = vector.multi_reduction <add>, %137, %cst_92 [1] : vector<16x32xf32> to vector<16xf32>
    %139 = vector.shape_cast %138 : vector<16xf32> to vector<16x1xf32>
    %cst_93 = arith.constant 3.200000e+01 : f32
    %140 = vector.broadcast %cst_93 : f32 to vector<16x1xf32>
    %141 = arith.divf %139, %140 : vector<16x1xf32>
    %142 = vector.broadcast %134 : vector<16x1xf32> to vector<16x32xf32>
    %143 = arith.subf %126, %142 : vector<16x32xf32>
    %cst_94 = arith.constant 9.99999974E-6 : f32
    %144 = vector.broadcast %cst_94 : f32 to vector<16x1xf32>
    %145 = arith.addf %141, %144 : vector<16x1xf32>
    %146 = math.rsqrt %145 : vector<16x1xf32>
    %147 = vector.broadcast %146 : vector<16x1xf32> to vector<16x32xf32>
    %148 = arith.mulf %143, %147 : vector<16x32xf32>
    %149 = vector.broadcast %128 : vector<1x32xf32> to vector<16x32xf32>
    %150 = arith.mulf %148, %149 : vector<16x32xf32>
    %151 = vector.broadcast %130 : vector<1x32xf32> to vector<16x32xf32>
    %152 = arith.addf %150, %151 : vector<16x32xf32>
    %c1 = arith.constant 1 : index
    %c0_95 = arith.constant 0 : index
    %c0_96 = arith.constant 0 : index
    %c0_97 = arith.constant 0 : index
    %153 = vector.load %arg4[%c1, %c0_95, %c0_96, %c0_97] : memref<3x8x32x4xf32, #tpu.memory_space<vmem>>, vector<1x8x32x4xf32>
    %154 = vector.shape_cast %153 : vector<1x8x32x4xf32> to vector<8x32x4xf32>
    %c1_98 = arith.constant 1 : index
    %c0_99 = arith.constant 0 : index
    %c0_100 = arith.constant 0 : index
    %c0_101 = arith.constant 0 : index
    %155 = vector.load %arg5[%c1_98, %c0_99, %c0_100, %c0_101] : memref<3x8x32x4xf32, #tpu.memory_space<vmem>>, vector<1x8x32x4xf32>
    %156 = vector.shape_cast %155 : vector<1x8x32x4xf32> to vector<8x32x4xf32>
    %c1_102 = arith.constant 1 : index
    %c0_103 = arith.constant 0 : index
    %c0_104 = arith.constant 0 : index
    %c0_105 = arith.constant 0 : index
    %157 = vector.load %arg6[%c1_102, %c0_103, %c0_104, %c0_105] : memref<3x8x32x4xf32, #tpu.memory_space<vmem>>, vector<1x8x32x4xf32>
    %158 = vector.shape_cast %157 : vector<1x8x32x4xf32> to vector<8x32x4xf32>
    %c1_106 = arith.constant 1 : index
    %c0_107 = arith.constant 0 : index
    %c0_108 = arith.constant 0 : index
    %c0_109 = arith.constant 0 : index
    %159 = vector.load %arg7[%c1_106, %c0_107, %c0_108, %c0_109] : memref<3x8x1x4xf32, #tpu.memory_space<vmem>>, vector<1x8x1x4xf32>
    %160 = vector.shape_cast %159 : vector<1x8x1x4xf32> to vector<8x1x4xf32>
    %c1_110 = arith.constant 1 : index
    %c0_111 = arith.constant 0 : index
    %c0_112 = arith.constant 0 : index
    %c0_113 = arith.constant 0 : index
    %161 = vector.load %arg8[%c1_110, %c0_111, %c0_112, %c0_113] : memref<3x8x1x4xf32, #tpu.memory_space<vmem>>, vector<1x8x1x4xf32>
    %162 = vector.shape_cast %161 : vector<1x8x1x4xf32> to vector<8x1x4xf32>
    %c1_114 = arith.constant 1 : index
    %c0_115 = arith.constant 0 : index
    %c0_116 = arith.constant 0 : index
    %c0_117 = arith.constant 0 : index
    %163 = vector.load %arg9[%c1_114, %c0_115, %c0_116, %c0_117] : memref<3x8x1x4xf32, #tpu.memory_space<vmem>>, vector<1x8x1x4xf32>
    %164 = vector.shape_cast %163 : vector<1x8x1x4xf32> to vector<8x1x4xf32>
    %c1_118 = arith.constant 1 : index
    %c0_119 = arith.constant 0 : index
    %c0_120 = arith.constant 0 : index
    %c0_121 = arith.constant 0 : index
    %165 = vector.load %arg10[%c1_118, %c0_119, %c0_120, %c0_121] : memref<3x8x4x32xf32, #tpu.memory_space<vmem>>, vector<1x8x4x32xf32>
    %166 = vector.shape_cast %165 : vector<1x8x4x32xf32> to vector<8x4x32xf32>
    %167 = vector.extract_strided_slice %152 {offsets = [0, 0], sizes = [8, 32], strides = [1, 1]} : vector<16x32xf32> to vector<8x32xf32>
    %168 = vector.shape_cast %167 : vector<8x32xf32> to vector<1x8x32xf32>
    %169 = vector.shape_cast %168 : vector<1x8x32xf32> to vector<1x8x32xf32>
    %170 = vector.broadcast %169 : vector<1x8x32xf32> to vector<8x8x32xf32>
    "tpu.trace_start"() <{level = 10 : i32, message = "hsk,hkd->hsd"}> : () -> ()
    %cst_122 = arith.constant dense<0.000000e+00> : vector<8x8x4xf32>
    %171 = tpu.matmul %170, %154, %cst_122 {dimension_numbers = #tpu.dot_dimension_numbers<[2], [1], [1], [2], [0, 0, 0, 1, 1, 2], [0], [0]>} : vector<8x8x32xf32>, vector<8x32x4xf32>, vector<8x8x4xf32> -> vector<8x8x4xf32>
    "tpu.trace_stop"() : () -> ()
    %172 = vector.broadcast %160 : vector<8x1x4xf32> to vector<8x8x4xf32>
    %173 = arith.addf %171, %172 : vector<8x8x4xf32>
    "tpu.trace_start"() <{level = 10 : i32, message = "hsk,hkd->hsd"}> : () -> ()
    %cst_123 = arith.constant dense<0.000000e+00> : vector<8x8x4xf32>
    %174 = tpu.matmul %170, %156, %cst_123 {dimension_numbers = #tpu.dot_dimension_numbers<[2], [1], [1], [2], [0, 0, 0, 1, 1, 2], [0], [0]>} : vector<8x8x32xf32>, vector<8x32x4xf32>, vector<8x8x4xf32> -> vector<8x8x4xf32>
    "tpu.trace_stop"() : () -> ()
    %175 = vector.broadcast %162 : vector<8x1x4xf32> to vector<8x8x4xf32>
    %176 = arith.addf %174, %175 : vector<8x8x4xf32>
    "tpu.trace_start"() <{level = 10 : i32, message = "hsk,hkd->hsd"}> : () -> ()
    %cst_124 = arith.constant dense<0.000000e+00> : vector<8x8x4xf32>
    %177 = tpu.matmul %170, %158, %cst_124 {dimension_numbers = #tpu.dot_dimension_numbers<[2], [1], [1], [2], [0, 0, 0, 1, 1, 2], [0], [0]>} : vector<8x8x32xf32>, vector<8x32x4xf32>, vector<8x8x4xf32> -> vector<8x8x4xf32>
    "tpu.trace_stop"() : () -> ()
    %178 = vector.broadcast %164 : vector<8x1x4xf32> to vector<8x8x4xf32>
    %179 = arith.addf %177, %178 : vector<8x8x4xf32>
    %cst_125 = arith.constant 5.000000e-01 : f32
    %180 = vector.broadcast %cst_125 : f32 to vector<8x8x4xf32>
    %181 = arith.mulf %173, %180 : vector<8x8x4xf32>
    "tpu.trace_start"() <{level = 10 : i32, message = "hqd,hkd->hqk"}> : () -> ()
    %cst_126 = arith.constant dense<0.000000e+00> : vector<8x8x8xf32>
    %182 = tpu.matmul %181, %176, %cst_126 {dimension_numbers = #tpu.dot_dimension_numbers<[2], [2], [1], [1], [0, 0, 0, 1, 1, 1], [0], [0]>} : vector<8x8x4xf32>, vector<8x8x4xf32>, vector<8x8x8xf32> -> vector<8x8x8xf32>
    "tpu.trace_stop"() : () -> ()
    %cst_127 = arith.constant dense<0xFF800000> : vector<8x8xf32>
    %183 = vector.multi_reduction <maximumf>, %182, %cst_127 [2] : vector<8x8x8xf32> to vector<8x8xf32>
    %184 = vector.shape_cast %183 : vector<8x8xf32> to vector<8x8x1xf32>
    %185 = vector.broadcast %184 : vector<8x8x1xf32> to vector<8x8x8xf32>
    %186 = arith.subf %182, %185 : vector<8x8x8xf32>
    %187 = math.exp %186 : vector<8x8x8xf32>
    %cst_128 = arith.constant dense<0.000000e+00> : vector<8x8xf32>
    %188 = vector.multi_reduction <add>, %187, %cst_128 [2] : vector<8x8x8xf32> to vector<8x8xf32>
    %189 = vector.shape_cast %188 : vector<8x8xf32> to vector<8x8x1xf32>
    %190 = vector.broadcast %189 : vector<8x8x1xf32> to vector<8x8x8xf32>
    %191 = arith.divf %187, %190 : vector<8x8x8xf32>
    "tpu.trace_start"() <{level = 10 : i32, message = "hqk,hkd->hqd"}> : () -> ()
    %cst_129 = arith.constant dense<0.000000e+00> : vector<8x8x4xf32>
    %192 = tpu.matmul %191, %179, %cst_129 {dimension_numbers = #tpu.dot_dimension_numbers<[2], [1], [1], [2], [0, 0, 0, 1, 1, 2], [0], [0]>} : vector<8x8x8xf32>, vector<8x8x4xf32>, vector<8x8x4xf32> -> vector<8x8x4xf32>
    "tpu.trace_stop"() : () -> ()
    "tpu.trace_start"() <{level = 10 : i32, message = "hqd,hdj->hqj"}> : () -> ()
    %cst_130 = arith.constant dense<0.000000e+00> : vector<8x8x32xf32>
    %193 = tpu.matmul %192, %166, %cst_130 {dimension_numbers = #tpu.dot_dimension_numbers<[2], [1], [1], [2], [0, 0, 0, 1, 1, 2], [0], [0]>} : vector<8x8x4xf32>, vector<8x4x32xf32>, vector<8x8x32xf32> -> vector<8x8x32xf32>
    "tpu.trace_stop"() : () -> ()
    %cst_131 = arith.constant dense<0.000000e+00> : vector<8x32xf32>
    %194 = vector.multi_reduction <add>, %193, %cst_131 [0] : vector<8x8x32xf32> to vector<8x32xf32>
    %195 = vector.extract_strided_slice %152 {offsets = [8, 0], sizes = [8, 32], strides = [1, 1]} : vector<16x32xf32> to vector<8x32xf32>
    %196 = vector.shape_cast %195 : vector<8x32xf32> to vector<1x8x32xf32>
    %197 = vector.shape_cast %196 : vector<1x8x32xf32> to vector<1x8x32xf32>
    %198 = vector.broadcast %197 : vector<1x8x32xf32> to vector<8x8x32xf32>
    "tpu.trace_start"() <{level = 10 : i32, message = "hsk,hkd->hsd"}> : () -> ()
    %cst_132 = arith.constant dense<0.000000e+00> : vector<8x8x4xf32>
    %199 = tpu.matmul %198, %154, %cst_132 {dimension_numbers = #tpu.dot_dimension_numbers<[2], [1], [1], [2], [0, 0, 0, 1, 1, 2], [0], [0]>} : vector<8x8x32xf32>, vector<8x32x4xf32>, vector<8x8x4xf32> -> vector<8x8x4xf32>
    "tpu.trace_stop"() : () -> ()
    %200 = vector.broadcast %160 : vector<8x1x4xf32> to vector<8x8x4xf32>
    %201 = arith.addf %199, %200 : vector<8x8x4xf32>
    "tpu.trace_start"() <{level = 10 : i32, message = "hsk,hkd->hsd"}> : () -> ()
    %cst_133 = arith.constant dense<0.000000e+00> : vector<8x8x4xf32>
    %202 = tpu.matmul %198, %156, %cst_133 {dimension_numbers = #tpu.dot_dimension_numbers<[2], [1], [1], [2], [0, 0, 0, 1, 1, 2], [0], [0]>} : vector<8x8x32xf32>, vector<8x32x4xf32>, vector<8x8x4xf32> -> vector<8x8x4xf32>
    "tpu.trace_stop"() : () -> ()
    %203 = vector.broadcast %162 : vector<8x1x4xf32> to vector<8x8x4xf32>
    %204 = arith.addf %202, %203 : vector<8x8x4xf32>
    "tpu.trace_start"() <{level = 10 : i32, message = "hsk,hkd->hsd"}> : () -> ()
    %cst_134 = arith.constant dense<0.000000e+00> : vector<8x8x4xf32>
    %205 = tpu.matmul %198, %158, %cst_134 {dimension_numbers = #tpu.dot_dimension_numbers<[2], [1], [1], [2], [0, 0, 0, 1, 1, 2], [0], [0]>} : vector<8x8x32xf32>, vector<8x32x4xf32>, vector<8x8x4xf32> -> vector<8x8x4xf32>
    "tpu.trace_stop"() : () -> ()
    %206 = vector.broadcast %164 : vector<8x1x4xf32> to vector<8x8x4xf32>
    %207 = arith.addf %205, %206 : vector<8x8x4xf32>
    %cst_135 = arith.constant 5.000000e-01 : f32
    %208 = vector.broadcast %cst_135 : f32 to vector<8x8x4xf32>
    %209 = arith.mulf %201, %208 : vector<8x8x4xf32>
    "tpu.trace_start"() <{level = 10 : i32, message = "hqd,hkd->hqk"}> : () -> ()
    %cst_136 = arith.constant dense<0.000000e+00> : vector<8x8x8xf32>
    %210 = tpu.matmul %209, %204, %cst_136 {dimension_numbers = #tpu.dot_dimension_numbers<[2], [2], [1], [1], [0, 0, 0, 1, 1, 1], [0], [0]>} : vector<8x8x4xf32>, vector<8x8x4xf32>, vector<8x8x8xf32> -> vector<8x8x8xf32>
    "tpu.trace_stop"() : () -> ()
    %cst_137 = arith.constant dense<0xFF800000> : vector<8x8xf32>
    %211 = vector.multi_reduction <maximumf>, %210, %cst_137 [2] : vector<8x8x8xf32> to vector<8x8xf32>
    %212 = vector.shape_cast %211 : vector<8x8xf32> to vector<8x8x1xf32>
    %213 = vector.broadcast %212 : vector<8x8x1xf32> to vector<8x8x8xf32>
    %214 = arith.subf %210, %213 : vector<8x8x8xf32>
    %215 = math.exp %214 : vector<8x8x8xf32>
    %cst_138 = arith.constant dense<0.000000e+00> : vector<8x8xf32>
    %216 = vector.multi_reduction <add>, %215, %cst_138 [2] : vector<8x8x8xf32> to vector<8x8xf32>
    %217 = vector.shape_cast %216 : vector<8x8xf32> to vector<8x8x1xf32>
    %218 = vector.broadcast %217 : vector<8x8x1xf32> to vector<8x8x8xf32>
    %219 = arith.divf %215, %218 : vector<8x8x8xf32>
    "tpu.trace_start"() <{level = 10 : i32, message = "hqk,hkd->hqd"}> : () -> ()
    %cst_139 = arith.constant dense<0.000000e+00> : vector<8x8x4xf32>
    %220 = tpu.matmul %219, %207, %cst_139 {dimension_numbers = #tpu.dot_dimension_numbers<[2], [1], [1], [2], [0, 0, 0, 1, 1, 2], [0], [0]>} : vector<8x8x8xf32>, vector<8x8x4xf32>, vector<8x8x4xf32> -> vector<8x8x4xf32>
    "tpu.trace_stop"() : () -> ()
    "tpu.trace_start"() <{level = 10 : i32, message = "hqd,hdj->hqj"}> : () -> ()
    %cst_140 = arith.constant dense<0.000000e+00> : vector<8x8x32xf32>
    %221 = tpu.matmul %220, %166, %cst_140 {dimension_numbers = #tpu.dot_dimension_numbers<[2], [1], [1], [2], [0, 0, 0, 1, 1, 2], [0], [0]>} : vector<8x8x4xf32>, vector<8x4x32xf32>, vector<8x8x32xf32> -> vector<8x8x32xf32>
    "tpu.trace_stop"() : () -> ()
    %cst_141 = arith.constant dense<0.000000e+00> : vector<8x32xf32>
    %222 = vector.multi_reduction <add>, %221, %cst_141 [0] : vector<8x8x32xf32> to vector<8x32xf32>
    %223 = tpu.concatenate %194, %222 in 0 : vector<8x32xf32>, vector<8x32xf32> -> vector<16x32xf32>
    %c1_142 = arith.constant 1 : index
    %c0_143 = arith.constant 0 : index
    %c0_144 = arith.constant 0 : index
    %224 = vector.load %arg11[%c1_142, %c0_143, %c0_144] : memref<3x1x32xf32, #tpu.memory_space<vmem>>, vector<1x1x32xf32>
    %225 = vector.shape_cast %224 : vector<1x1x32xf32> to vector<1x32xf32>
    %226 = vector.broadcast %225 : vector<1x32xf32> to vector<16x32xf32>
    %227 = arith.addf %223, %226 : vector<16x32xf32>
    %228 = arith.addf %152, %227 : vector<16x32xf32>
    %c1_145 = arith.constant 1 : index
    %c0_146 = arith.constant 0 : index
    %c0_147 = arith.constant 0 : index
    %229 = vector.load %arg12[%c1_145, %c0_146, %c0_147] : memref<3x1x32xf32, #tpu.memory_space<vmem>>, vector<1x1x32xf32>
    %230 = vector.shape_cast %229 : vector<1x1x32xf32> to vector<1x32xf32>
    %c1_148 = arith.constant 1 : index
    %c0_149 = arith.constant 0 : index
    %c0_150 = arith.constant 0 : index
    %231 = vector.load %arg13[%c1_148, %c0_149, %c0_150] : memref<3x1x32xf32, #tpu.memory_space<vmem>>, vector<1x1x32xf32>
    %232 = vector.shape_cast %231 : vector<1x1x32xf32> to vector<1x32xf32>
    %cst_151 = arith.constant dense<0.000000e+00> : vector<16xf32>
    %233 = vector.multi_reduction <add>, %228, %cst_151 [1] : vector<16x32xf32> to vector<16xf32>
    %234 = vector.shape_cast %233 : vector<16xf32> to vector<16x1xf32>
    %cst_152 = arith.constant 3.200000e+01 : f32
    %235 = vector.broadcast %cst_152 : f32 to vector<16x1xf32>
    %236 = arith.divf %234, %235 : vector<16x1xf32>
    %237 = vector.broadcast %236 : vector<16x1xf32> to vector<16x32xf32>
    %238 = arith.subf %228, %237 : vector<16x32xf32>
    %239 = arith.mulf %238, %238 : vector<16x32xf32>
    %cst_153 = arith.constant dense<0.000000e+00> : vector<16xf32>
    %240 = vector.multi_reduction <add>, %239, %cst_153 [1] : vector<16x32xf32> to vector<16xf32>
    %241 = vector.shape_cast %240 : vector<16xf32> to vector<16x1xf32>
    %cst_154 = arith.constant 3.200000e+01 : f32
    %242 = vector.broadcast %cst_154 : f32 to vector<16x1xf32>
    %243 = arith.divf %241, %242 : vector<16x1xf32>
    %244 = vector.broadcast %236 : vector<16x1xf32> to vector<16x32xf32>
    %245 = arith.subf %228, %244 : vector<16x32xf32>
    %cst_155 = arith.constant 9.99999974E-6 : f32
    %246 = vector.broadcast %cst_155 : f32 to vector<16x1xf32>
    %247 = arith.addf %243, %246 : vector<16x1xf32>
    %248 = math.rsqrt %247 : vector<16x1xf32>
    %249 = vector.broadcast %248 : vector<16x1xf32> to vector<16x32xf32>
    %250 = arith.mulf %245, %249 : vector<16x32xf32>
    %251 = vector.broadcast %230 : vector<1x32xf32> to vector<16x32xf32>
    %252 = arith.mulf %250, %251 : vector<16x32xf32>
    %253 = vector.broadcast %232 : vector<1x32xf32> to vector<16x32xf32>
    %254 = arith.addf %252, %253 : vector<16x32xf32>
    %c1_156 = arith.constant 1 : index
    %c0_157 = arith.constant 0 : index
    %c0_158 = arith.constant 0 : index
    %255 = vector.load %arg14[%c1_156, %c0_157, %c0_158] : memref<3x32x128xf32, #tpu.memory_space<vmem>>, vector<1x32x128xf32>
    %256 = vector.shape_cast %255 : vector<1x32x128xf32> to vector<32x128xf32>
    %cst_159 = arith.constant dense<0.000000e+00> : vector<16x128xf32>
    %257 = tpu.matmul %254, %256, %cst_159 {dimension_numbers = #tpu.dot_dimension_numbers<[1], [0], [0], [1], [0, 0, 1, 1], [], []>} : vector<16x32xf32>, vector<32x128xf32>, vector<16x128xf32> -> vector<16x128xf32>
    %c1_160 = arith.constant 1 : index
    %c0_161 = arith.constant 0 : index
    %c0_162 = arith.constant 0 : index
    %258 = vector.load %arg15[%c1_160, %c0_161, %c0_162] : memref<3x1x128xf32, #tpu.memory_space<vmem>>, vector<1x1x128xf32>
    %259 = vector.shape_cast %258 : vector<1x1x128xf32> to vector<1x128xf32>
    %260 = vector.broadcast %259 : vector<1x128xf32> to vector<16x128xf32>
    %261 = arith.addf %257, %260 : vector<16x128xf32>
    %cst_163 = arith.constant 0.000000e+00 : f32
    %262 = vector.broadcast %cst_163 : f32 to vector<16x128xf32>
    %263 = arith.maximumf %261, %262 : vector<16x128xf32>
    %c1_164 = arith.constant 1 : index
    %c0_165 = arith.constant 0 : index
    %c0_166 = arith.constant 0 : index
    %264 = vector.load %arg16[%c1_164, %c0_165, %c0_166] : memref<3x128x32xf32, #tpu.memory_space<vmem>>, vector<1x128x32xf32>
    %265 = vector.shape_cast %264 : vector<1x128x32xf32> to vector<128x32xf32>
    %cst_167 = arith.constant dense<0.000000e+00> : vector<16x32xf32>
    %266 = tpu.matmul %263, %265, %cst_167 {dimension_numbers = #tpu.dot_dimension_numbers<[1], [0], [0], [1], [0, 0, 1, 1], [], []>} : vector<16x128xf32>, vector<128x32xf32>, vector<16x32xf32> -> vector<16x32xf32>
    %c1_168 = arith.constant 1 : index
    %c0_169 = arith.constant 0 : index
    %c0_170 = arith.constant 0 : index
    %267 = vector.load %arg17[%c1_168, %c0_169, %c0_170] : memref<3x1x32xf32, #tpu.memory_space<vmem>>, vector<1x1x32xf32>
    %268 = vector.shape_cast %267 : vector<1x1x32xf32> to vector<1x32xf32>
    %269 = vector.broadcast %268 : vector<1x32xf32> to vector<16x32xf32>
    %270 = arith.addf %266, %269 : vector<16x32xf32>
    %271 = arith.addf %254, %270 : vector<16x32xf32>
    %c1_171 = arith.constant 1 : index
    %c0_172 = arith.constant 0 : index
    %c0_173 = arith.constant 0 : index
    %272 = vector.load %arg18[%c1_171, %c0_172, %c0_173] : memref<3x1x32xf32, #tpu.memory_space<vmem>>, vector<1x1x32xf32>
    %273 = vector.shape_cast %272 : vector<1x1x32xf32> to vector<1x32xf32>
    %c1_174 = arith.constant 1 : index
    %c0_175 = arith.constant 0 : index
    %c0_176 = arith.constant 0 : index
    %274 = vector.load %arg19[%c1_174, %c0_175, %c0_176] : memref<3x1x32xf32, #tpu.memory_space<vmem>>, vector<1x1x32xf32>
    %275 = vector.shape_cast %274 : vector<1x1x32xf32> to vector<1x32xf32>
    %cst_177 = arith.constant dense<0.000000e+00> : vector<16xf32>
    %276 = vector.multi_reduction <add>, %271, %cst_177 [1] : vector<16x32xf32> to vector<16xf32>
    %277 = vector.shape_cast %276 : vector<16xf32> to vector<16x1xf32>
    %cst_178 = arith.constant 3.200000e+01 : f32
    %278 = vector.broadcast %cst_178 : f32 to vector<16x1xf32>
    %279 = arith.divf %277, %278 : vector<16x1xf32>
    %280 = vector.broadcast %279 : vector<16x1xf32> to vector<16x32xf32>
    %281 = arith.subf %271, %280 : vector<16x32xf32>
    %282 = arith.mulf %281, %281 : vector<16x32xf32>
    %cst_179 = arith.constant dense<0.000000e+00> : vector<16xf32>
    %283 = vector.multi_reduction <add>, %282, %cst_179 [1] : vector<16x32xf32> to vector<16xf32>
    %284 = vector.shape_cast %283 : vector<16xf32> to vector<16x1xf32>
    %cst_180 = arith.constant 3.200000e+01 : f32
    %285 = vector.broadcast %cst_180 : f32 to vector<16x1xf32>
    %286 = arith.divf %284, %285 : vector<16x1xf32>
    %287 = vector.broadcast %279 : vector<16x1xf32> to vector<16x32xf32>
    %288 = arith.subf %271, %287 : vector<16x32xf32>
    %cst_181 = arith.constant 9.99999974E-6 : f32
    %289 = vector.broadcast %cst_181 : f32 to vector<16x1xf32>
    %290 = arith.addf %286, %289 : vector<16x1xf32>
    %291 = math.rsqrt %290 : vector<16x1xf32>
    %292 = vector.broadcast %291 : vector<16x1xf32> to vector<16x32xf32>
    %293 = arith.mulf %288, %292 : vector<16x32xf32>
    %294 = vector.broadcast %273 : vector<1x32xf32> to vector<16x32xf32>
    %295 = arith.mulf %293, %294 : vector<16x32xf32>
    %296 = vector.broadcast %275 : vector<1x32xf32> to vector<16x32xf32>
    %297 = arith.addf %295, %296 : vector<16x32xf32>
    %c2 = arith.constant 2 : index
    %c0_182 = arith.constant 0 : index
    %c0_183 = arith.constant 0 : index
    %c0_184 = arith.constant 0 : index
    %298 = vector.load %arg4[%c2, %c0_182, %c0_183, %c0_184] : memref<3x8x32x4xf32, #tpu.memory_space<vmem>>, vector<1x8x32x4xf32>
    %299 = vector.shape_cast %298 : vector<1x8x32x4xf32> to vector<8x32x4xf32>
    %c2_185 = arith.constant 2 : index
    %c0_186 = arith.constant 0 : index
    %c0_187 = arith.constant 0 : index
    %c0_188 = arith.constant 0 : index
    %300 = vector.load %arg5[%c2_185, %c0_186, %c0_187, %c0_188] : memref<3x8x32x4xf32, #tpu.memory_space<vmem>>, vector<1x8x32x4xf32>
    %301 = vector.shape_cast %300 : vector<1x8x32x4xf32> to vector<8x32x4xf32>
    %c2_189 = arith.constant 2 : index
    %c0_190 = arith.constant 0 : index
    %c0_191 = arith.constant 0 : index
    %c0_192 = arith.constant 0 : index
    %302 = vector.load %arg6[%c2_189, %c0_190, %c0_191, %c0_192] : memref<3x8x32x4xf32, #tpu.memory_space<vmem>>, vector<1x8x32x4xf32>
    %303 = vector.shape_cast %302 : vector<1x8x32x4xf32> to vector<8x32x4xf32>
    %c2_193 = arith.constant 2 : index
    %c0_194 = arith.constant 0 : index
    %c0_195 = arith.constant 0 : index
    %c0_196 = arith.constant 0 : index
    %304 = vector.load %arg7[%c2_193, %c0_194, %c0_195, %c0_196] : memref<3x8x1x4xf32, #tpu.memory_space<vmem>>, vector<1x8x1x4xf32>
    %305 = vector.shape_cast %304 : vector<1x8x1x4xf32> to vector<8x1x4xf32>
    %c2_197 = arith.constant 2 : index
    %c0_198 = arith.constant 0 : index
    %c0_199 = arith.constant 0 : index
    %c0_200 = arith.constant 0 : index
    %306 = vector.load %arg8[%c2_197, %c0_198, %c0_199, %c0_200] : memref<3x8x1x4xf32, #tpu.memory_space<vmem>>, vector<1x8x1x4xf32>
    %307 = vector.shape_cast %306 : vector<1x8x1x4xf32> to vector<8x1x4xf32>
    %c2_201 = arith.constant 2 : index
    %c0_202 = arith.constant 0 : index
    %c0_203 = arith.constant 0 : index
    %c0_204 = arith.constant 0 : index
    %308 = vector.load %arg9[%c2_201, %c0_202, %c0_203, %c0_204] : memref<3x8x1x4xf32, #tpu.memory_space<vmem>>, vector<1x8x1x4xf32>
    %309 = vector.shape_cast %308 : vector<1x8x1x4xf32> to vector<8x1x4xf32>
    %c2_205 = arith.constant 2 : index
    %c0_206 = arith.constant 0 : index
    %c0_207 = arith.constant 0 : index
    %c0_208 = arith.constant 0 : index
    %310 = vector.load %arg10[%c2_205, %c0_206, %c0_207, %c0_208] : memref<3x8x4x32xf32, #tpu.memory_space<vmem>>, vector<1x8x4x32xf32>
    %311 = vector.shape_cast %310 : vector<1x8x4x32xf32> to vector<8x4x32xf32>
    %312 = vector.extract_strided_slice %297 {offsets = [0, 0], sizes = [8, 32], strides = [1, 1]} : vector<16x32xf32> to vector<8x32xf32>
    %313 = vector.shape_cast %312 : vector<8x32xf32> to vector<1x8x32xf32>
    %314 = vector.shape_cast %313 : vector<1x8x32xf32> to vector<1x8x32xf32>
    %315 = vector.broadcast %314 : vector<1x8x32xf32> to vector<8x8x32xf32>
    "tpu.trace_start"() <{level = 10 : i32, message = "hsk,hkd->hsd"}> : () -> ()
    %cst_209 = arith.constant dense<0.000000e+00> : vector<8x8x4xf32>
    %316 = tpu.matmul %315, %299, %cst_209 {dimension_numbers = #tpu.dot_dimension_numbers<[2], [1], [1], [2], [0, 0, 0, 1, 1, 2], [0], [0]>} : vector<8x8x32xf32>, vector<8x32x4xf32>, vector<8x8x4xf32> -> vector<8x8x4xf32>
    "tpu.trace_stop"() : () -> ()
    %317 = vector.broadcast %305 : vector<8x1x4xf32> to vector<8x8x4xf32>
    %318 = arith.addf %316, %317 : vector<8x8x4xf32>
    "tpu.trace_start"() <{level = 10 : i32, message = "hsk,hkd->hsd"}> : () -> ()
    %cst_210 = arith.constant dense<0.000000e+00> : vector<8x8x4xf32>
    %319 = tpu.matmul %315, %301, %cst_210 {dimension_numbers = #tpu.dot_dimension_numbers<[2], [1], [1], [2], [0, 0, 0, 1, 1, 2], [0], [0]>} : vector<8x8x32xf32>, vector<8x32x4xf32>, vector<8x8x4xf32> -> vector<8x8x4xf32>
    "tpu.trace_stop"() : () -> ()
    %320 = vector.broadcast %307 : vector<8x1x4xf32> to vector<8x8x4xf32>
    %321 = arith.addf %319, %320 : vector<8x8x4xf32>
    "tpu.trace_start"() <{level = 10 : i32, message = "hsk,hkd->hsd"}> : () -> ()
    %cst_211 = arith.constant dense<0.000000e+00> : vector<8x8x4xf32>
    %322 = tpu.matmul %315, %303, %cst_211 {dimension_numbers = #tpu.dot_dimension_numbers<[2], [1], [1], [2], [0, 0, 0, 1, 1, 2], [0], [0]>} : vector<8x8x32xf32>, vector<8x32x4xf32>, vector<8x8x4xf32> -> vector<8x8x4xf32>
    "tpu.trace_stop"() : () -> ()
    %323 = vector.broadcast %309 : vector<8x1x4xf32> to vector<8x8x4xf32>
    %324 = arith.addf %322, %323 : vector<8x8x4xf32>
    %cst_212 = arith.constant 5.000000e-01 : f32
    %325 = vector.broadcast %cst_212 : f32 to vector<8x8x4xf32>
    %326 = arith.mulf %318, %325 : vector<8x8x4xf32>
    "tpu.trace_start"() <{level = 10 : i32, message = "hqd,hkd->hqk"}> : () -> ()
    %cst_213 = arith.constant dense<0.000000e+00> : vector<8x8x8xf32>
    %327 = tpu.matmul %326, %321, %cst_213 {dimension_numbers = #tpu.dot_dimension_numbers<[2], [2], [1], [1], [0, 0, 0, 1, 1, 1], [0], [0]>} : vector<8x8x4xf32>, vector<8x8x4xf32>, vector<8x8x8xf32> -> vector<8x8x8xf32>
    "tpu.trace_stop"() : () -> ()
    %cst_214 = arith.constant dense<0xFF800000> : vector<8x8xf32>
    %328 = vector.multi_reduction <maximumf>, %327, %cst_214 [2] : vector<8x8x8xf32> to vector<8x8xf32>
    %329 = vector.shape_cast %328 : vector<8x8xf32> to vector<8x8x1xf32>
    %330 = vector.broadcast %329 : vector<8x8x1xf32> to vector<8x8x8xf32>
    %331 = arith.subf %327, %330 : vector<8x8x8xf32>
    %332 = math.exp %331 : vector<8x8x8xf32>
    %cst_215 = arith.constant dense<0.000000e+00> : vector<8x8xf32>
    %333 = vector.multi_reduction <add>, %332, %cst_215 [2] : vector<8x8x8xf32> to vector<8x8xf32>
    %334 = vector.shape_cast %333 : vector<8x8xf32> to vector<8x8x1xf32>
    %335 = vector.broadcast %334 : vector<8x8x1xf32> to vector<8x8x8xf32>
    %336 = arith.divf %332, %335 : vector<8x8x8xf32>
    "tpu.trace_start"() <{level = 10 : i32, message = "hqk,hkd->hqd"}> : () -> ()
    %cst_216 = arith.constant dense<0.000000e+00> : vector<8x8x4xf32>
    %337 = tpu.matmul %336, %324, %cst_216 {dimension_numbers = #tpu.dot_dimension_numbers<[2], [1], [1], [2], [0, 0, 0, 1, 1, 2], [0], [0]>} : vector<8x8x8xf32>, vector<8x8x4xf32>, vector<8x8x4xf32> -> vector<8x8x4xf32>
    "tpu.trace_stop"() : () -> ()
    "tpu.trace_start"() <{level = 10 : i32, message = "hqd,hdj->hqj"}> : () -> ()
    %cst_217 = arith.constant dense<0.000000e+00> : vector<8x8x32xf32>
    %338 = tpu.matmul %337, %311, %cst_217 {dimension_numbers = #tpu.dot_dimension_numbers<[2], [1], [1], [2], [0, 0, 0, 1, 1, 2], [0], [0]>} : vector<8x8x4xf32>, vector<8x4x32xf32>, vector<8x8x32xf32> -> vector<8x8x32xf32>
    "tpu.trace_stop"() : () -> ()
    %cst_218 = arith.constant dense<0.000000e+00> : vector<8x32xf32>
    %339 = vector.multi_reduction <add>, %338, %cst_218 [0] : vector<8x8x32xf32> to vector<8x32xf32>
    %340 = vector.extract_strided_slice %297 {offsets = [8, 0], sizes = [8, 32], strides = [1, 1]} : vector<16x32xf32> to vector<8x32xf32>
    %341 = vector.shape_cast %340 : vector<8x32xf32> to vector<1x8x32xf32>
    %342 = vector.shape_cast %341 : vector<1x8x32xf32> to vector<1x8x32xf32>
    %343 = vector.broadcast %342 : vector<1x8x32xf32> to vector<8x8x32xf32>
    "tpu.trace_start"() <{level = 10 : i32, message = "hsk,hkd->hsd"}> : () -> ()
    %cst_219 = arith.constant dense<0.000000e+00> : vector<8x8x4xf32>
    %344 = tpu.matmul %343, %299, %cst_219 {dimension_numbers = #tpu.dot_dimension_numbers<[2], [1], [1], [2], [0, 0, 0, 1, 1, 2], [0], [0]>} : vector<8x8x32xf32>, vector<8x32x4xf32>, vector<8x8x4xf32> -> vector<8x8x4xf32>
    "tpu.trace_stop"() : () -> ()
    %345 = vector.broadcast %305 : vector<8x1x4xf32> to vector<8x8x4xf32>
    %346 = arith.addf %344, %345 : vector<8x8x4xf32>
    "tpu.trace_start"() <{level = 10 : i32, message = "hsk,hkd->hsd"}> : () -> ()
    %cst_220 = arith.constant dense<0.000000e+00> : vector<8x8x4xf32>
    %347 = tpu.matmul %343, %301, %cst_220 {dimension_numbers = #tpu.dot_dimension_numbers<[2], [1], [1], [2], [0, 0, 0, 1, 1, 2], [0], [0]>} : vector<8x8x32xf32>, vector<8x32x4xf32>, vector<8x8x4xf32> -> vector<8x8x4xf32>
    "tpu.trace_stop"() : () -> ()
    %348 = vector.broadcast %307 : vector<8x1x4xf32> to vector<8x8x4xf32>
    %349 = arith.addf %347, %348 : vector<8x8x4xf32>
    "tpu.trace_start"() <{level = 10 : i32, message = "hsk,hkd->hsd"}> : () -> ()
    %cst_221 = arith.constant dense<0.000000e+00> : vector<8x8x4xf32>
    %350 = tpu.matmul %343, %303, %cst_221 {dimension_numbers = #tpu.dot_dimension_numbers<[2], [1], [1], [2], [0, 0, 0, 1, 1, 2], [0], [0]>} : vector<8x8x32xf32>, vector<8x32x4xf32>, vector<8x8x4xf32> -> vector<8x8x4xf32>
    "tpu.trace_stop"() : () -> ()
    %351 = vector.broadcast %309 : vector<8x1x4xf32> to vector<8x8x4xf32>
    %352 = arith.addf %350, %351 : vector<8x8x4xf32>
    %cst_222 = arith.constant 5.000000e-01 : f32
    %353 = vector.broadcast %cst_222 : f32 to vector<8x8x4xf32>
    %354 = arith.mulf %346, %353 : vector<8x8x4xf32>
    "tpu.trace_start"() <{level = 10 : i32, message = "hqd,hkd->hqk"}> : () -> ()
    %cst_223 = arith.constant dense<0.000000e+00> : vector<8x8x8xf32>
    %355 = tpu.matmul %354, %349, %cst_223 {dimension_numbers = #tpu.dot_dimension_numbers<[2], [2], [1], [1], [0, 0, 0, 1, 1, 1], [0], [0]>} : vector<8x8x4xf32>, vector<8x8x4xf32>, vector<8x8x8xf32> -> vector<8x8x8xf32>
    "tpu.trace_stop"() : () -> ()
    %cst_224 = arith.constant dense<0xFF800000> : vector<8x8xf32>
    %356 = vector.multi_reduction <maximumf>, %355, %cst_224 [2] : vector<8x8x8xf32> to vector<8x8xf32>
    %357 = vector.shape_cast %356 : vector<8x8xf32> to vector<8x8x1xf32>
    %358 = vector.broadcast %357 : vector<8x8x1xf32> to vector<8x8x8xf32>
    %359 = arith.subf %355, %358 : vector<8x8x8xf32>
    %360 = math.exp %359 : vector<8x8x8xf32>
    %cst_225 = arith.constant dense<0.000000e+00> : vector<8x8xf32>
    %361 = vector.multi_reduction <add>, %360, %cst_225 [2] : vector<8x8x8xf32> to vector<8x8xf32>
    %362 = vector.shape_cast %361 : vector<8x8xf32> to vector<8x8x1xf32>
    %363 = vector.broadcast %362 : vector<8x8x1xf32> to vector<8x8x8xf32>
    %364 = arith.divf %360, %363 : vector<8x8x8xf32>
    "tpu.trace_start"() <{level = 10 : i32, message = "hqk,hkd->hqd"}> : () -> ()
    %cst_226 = arith.constant dense<0.000000e+00> : vector<8x8x4xf32>
    %365 = tpu.matmul %364, %352, %cst_226 {dimension_numbers = #tpu.dot_dimension_numbers<[2], [1], [1], [2], [0, 0, 0, 1, 1, 2], [0], [0]>} : vector<8x8x8xf32>, vector<8x8x4xf32>, vector<8x8x4xf32> -> vector<8x8x4xf32>
    "tpu.trace_stop"() : () -> ()
    "tpu.trace_start"() <{level = 10 : i32, message = "hqd,hdj->hqj"}> : () -> ()
    %cst_227 = arith.constant dense<0.000000e+00> : vector<8x8x32xf32>
    %366 = tpu.matmul %365, %311, %cst_227 {dimension_numbers = #tpu.dot_dimension_numbers<[2], [1], [1], [2], [0, 0, 0, 1, 1, 2], [0], [0]>} : vector<8x8x4xf32>, vector<8x4x32xf32>, vector<8x8x32xf32> -> vector<8x8x32xf32>
    "tpu.trace_stop"() : () -> ()
    %cst_228 = arith.constant dense<0.000000e+00> : vector<8x32xf32>
    %367 = vector.multi_reduction <add>, %366, %cst_228 [0] : vector<8x8x32xf32> to vector<8x32xf32>
    %368 = tpu.concatenate %339, %367 in 0 : vector<8x32xf32>, vector<8x32xf32> -> vector<16x32xf32>
    %c2_229 = arith.constant 2 : index
    %c0_230 = arith.constant 0 : index
    %c0_231 = arith.constant 0 : index
    %369 = vector.load %arg11[%c2_229, %c0_230, %c0_231] : memref<3x1x32xf32, #tpu.memory_space<vmem>>, vector<1x1x32xf32>
    %370 = vector.shape_cast %369 : vector<1x1x32xf32> to vector<1x32xf32>
    %371 = vector.broadcast %370 : vector<1x32xf32> to vector<16x32xf32>
    %372 = arith.addf %368, %371 : vector<16x32xf32>
    %373 = arith.addf %297, %372 : vector<16x32xf32>
    %c2_232 = arith.constant 2 : index
    %c0_233 = arith.constant 0 : index
    %c0_234 = arith.constant 0 : index
    %374 = vector.load %arg12[%c2_232, %c0_233, %c0_234] : memref<3x1x32xf32, #tpu.memory_space<vmem>>, vector<1x1x32xf32>
    %375 = vector.shape_cast %374 : vector<1x1x32xf32> to vector<1x32xf32>
    %c2_235 = arith.constant 2 : index
    %c0_236 = arith.constant 0 : index
    %c0_237 = arith.constant 0 : index
    %376 = vector.load %arg13[%c2_235, %c0_236, %c0_237] : memref<3x1x32xf32, #tpu.memory_space<vmem>>, vector<1x1x32xf32>
    %377 = vector.shape_cast %376 : vector<1x1x32xf32> to vector<1x32xf32>
    %cst_238 = arith.constant dense<0.000000e+00> : vector<16xf32>
    %378 = vector.multi_reduction <add>, %373, %cst_238 [1] : vector<16x32xf32> to vector<16xf32>
    %379 = vector.shape_cast %378 : vector<16xf32> to vector<16x1xf32>
    %cst_239 = arith.constant 3.200000e+01 : f32
    %380 = vector.broadcast %cst_239 : f32 to vector<16x1xf32>
    %381 = arith.divf %379, %380 : vector<16x1xf32>
    %382 = vector.broadcast %381 : vector<16x1xf32> to vector<16x32xf32>
    %383 = arith.subf %373, %382 : vector<16x32xf32>
    %384 = arith.mulf %383, %383 : vector<16x32xf32>
    %cst_240 = arith.constant dense<0.000000e+00> : vector<16xf32>
    %385 = vector.multi_reduction <add>, %384, %cst_240 [1] : vector<16x32xf32> to vector<16xf32>
    %386 = vector.shape_cast %385 : vector<16xf32> to vector<16x1xf32>
    %cst_241 = arith.constant 3.200000e+01 : f32
    %387 = vector.broadcast %cst_241 : f32 to vector<16x1xf32>
    %388 = arith.divf %386, %387 : vector<16x1xf32>
    %389 = vector.broadcast %381 : vector<16x1xf32> to vector<16x32xf32>
    %390 = arith.subf %373, %389 : vector<16x32xf32>
    %cst_242 = arith.constant 9.99999974E-6 : f32
    %391 = vector.broadcast %cst_242 : f32 to vector<16x1xf32>
    %392 = arith.addf %388, %391 : vector<16x1xf32>
    %393 = math.rsqrt %392 : vector<16x1xf32>
    %394 = vector.broadcast %393 : vector<16x1xf32> to vector<16x32xf32>
    %395 = arith.mulf %390, %394 : vector<16x32xf32>
    %396 = vector.broadcast %375 : vector<1x32xf32> to vector<16x32xf32>
    %397 = arith.mulf %395, %396 : vector<16x32xf32>
    %398 = vector.broadcast %377 : vector<1x32xf32> to vector<16x32xf32>
    %399 = arith.addf %397, %398 : vector<16x32xf32>
    %c2_243 = arith.constant 2 : index
    %c0_244 = arith.constant 0 : index
    %c0_245 = arith.constant 0 : index
    %400 = vector.load %arg14[%c2_243, %c0_244, %c0_245] : memref<3x32x128xf32, #tpu.memory_space<vmem>>, vector<1x32x128xf32>
    %401 = vector.shape_cast %400 : vector<1x32x128xf32> to vector<32x128xf32>
    %cst_246 = arith.constant dense<0.000000e+00> : vector<16x128xf32>
    %402 = tpu.matmul %399, %401, %cst_246 {dimension_numbers = #tpu.dot_dimension_numbers<[1], [0], [0], [1], [0, 0, 1, 1], [], []>} : vector<16x32xf32>, vector<32x128xf32>, vector<16x128xf32> -> vector<16x128xf32>
    %c2_247 = arith.constant 2 : index
    %c0_248 = arith.constant 0 : index
    %c0_249 = arith.constant 0 : index
    %403 = vector.load %arg15[%c2_247, %c0_248, %c0_249] : memref<3x1x128xf32, #tpu.memory_space<vmem>>, vector<1x1x128xf32>
    %404 = vector.shape_cast %403 : vector<1x1x128xf32> to vector<1x128xf32>
    %405 = vector.broadcast %404 : vector<1x128xf32> to vector<16x128xf32>
    %406 = arith.addf %402, %405 : vector<16x128xf32>
    %cst_250 = arith.constant 0.000000e+00 : f32
    %407 = vector.broadcast %cst_250 : f32 to vector<16x128xf32>
    %408 = arith.maximumf %406, %407 : vector<16x128xf32>
    %c2_251 = arith.constant 2 : index
    %c0_252 = arith.constant 0 : index
    %c0_253 = arith.constant 0 : index
    %409 = vector.load %arg16[%c2_251, %c0_252, %c0_253] : memref<3x128x32xf32, #tpu.memory_space<vmem>>, vector<1x128x32xf32>
    %410 = vector.shape_cast %409 : vector<1x128x32xf32> to vector<128x32xf32>
    %cst_254 = arith.constant dense<0.000000e+00> : vector<16x32xf32>
    %411 = tpu.matmul %408, %410, %cst_254 {dimension_numbers = #tpu.dot_dimension_numbers<[1], [0], [0], [1], [0, 0, 1, 1], [], []>} : vector<16x128xf32>, vector<128x32xf32>, vector<16x32xf32> -> vector<16x32xf32>
    %c2_255 = arith.constant 2 : index
    %c0_256 = arith.constant 0 : index
    %c0_257 = arith.constant 0 : index
    %412 = vector.load %arg17[%c2_255, %c0_256, %c0_257] : memref<3x1x32xf32, #tpu.memory_space<vmem>>, vector<1x1x32xf32>
    %413 = vector.shape_cast %412 : vector<1x1x32xf32> to vector<1x32xf32>
    %414 = vector.broadcast %413 : vector<1x32xf32> to vector<16x32xf32>
    %415 = arith.addf %411, %414 : vector<16x32xf32>
    %416 = arith.addf %399, %415 : vector<16x32xf32>
    %c2_258 = arith.constant 2 : index
    %c0_259 = arith.constant 0 : index
    %c0_260 = arith.constant 0 : index
    %417 = vector.load %arg18[%c2_258, %c0_259, %c0_260] : memref<3x1x32xf32, #tpu.memory_space<vmem>>, vector<1x1x32xf32>
    %418 = vector.shape_cast %417 : vector<1x1x32xf32> to vector<1x32xf32>
    %c2_261 = arith.constant 2 : index
    %c0_262 = arith.constant 0 : index
    %c0_263 = arith.constant 0 : index
    %419 = vector.load %arg19[%c2_261, %c0_262, %c0_263] : memref<3x1x32xf32, #tpu.memory_space<vmem>>, vector<1x1x32xf32>
    %420 = vector.shape_cast %419 : vector<1x1x32xf32> to vector<1x32xf32>
    %cst_264 = arith.constant dense<0.000000e+00> : vector<16xf32>
    %421 = vector.multi_reduction <add>, %416, %cst_264 [1] : vector<16x32xf32> to vector<16xf32>
    %422 = vector.shape_cast %421 : vector<16xf32> to vector<16x1xf32>
    %cst_265 = arith.constant 3.200000e+01 : f32
    %423 = vector.broadcast %cst_265 : f32 to vector<16x1xf32>
    %424 = arith.divf %422, %423 : vector<16x1xf32>
    %425 = vector.broadcast %424 : vector<16x1xf32> to vector<16x32xf32>
    %426 = arith.subf %416, %425 : vector<16x32xf32>
    %427 = arith.mulf %426, %426 : vector<16x32xf32>
    %cst_266 = arith.constant dense<0.000000e+00> : vector<16xf32>
    %428 = vector.multi_reduction <add>, %427, %cst_266 [1] : vector<16x32xf32> to vector<16xf32>
    %429 = vector.shape_cast %428 : vector<16xf32> to vector<16x1xf32>
    %cst_267 = arith.constant 3.200000e+01 : f32
    %430 = vector.broadcast %cst_267 : f32 to vector<16x1xf32>
    %431 = arith.divf %429, %430 : vector<16x1xf32>
    %432 = vector.broadcast %424 : vector<16x1xf32> to vector<16x32xf32>
    %433 = arith.subf %416, %432 : vector<16x32xf32>
    %cst_268 = arith.constant 9.99999974E-6 : f32
    %434 = vector.broadcast %cst_268 : f32 to vector<16x1xf32>
    %435 = arith.addf %431, %434 : vector<16x1xf32>
    %436 = math.rsqrt %435 : vector<16x1xf32>
    %437 = vector.broadcast %436 : vector<16x1xf32> to vector<16x32xf32>
    %438 = arith.mulf %433, %437 : vector<16x32xf32>
    %439 = vector.broadcast %418 : vector<1x32xf32> to vector<16x32xf32>
    %440 = arith.mulf %438, %439 : vector<16x32xf32>
    %441 = vector.broadcast %420 : vector<1x32xf32> to vector<16x32xf32>
    %442 = arith.addf %440, %441 : vector<16x32xf32>
    %c0_269 = arith.constant 0 : index
    %c0_270 = arith.constant 0 : index
    %443 = vector.load %arg20[%c0_269, %c0_270] : memref<32x32xf32, #tpu.memory_space<vmem>>, vector<32x32xf32>
    %cst_271 = arith.constant dense<0.000000e+00> : vector<16x32xf32>
    %444 = tpu.matmul %442, %443, %cst_271 {dimension_numbers = #tpu.dot_dimension_numbers<[1], [0], [0], [1], [0, 0, 1, 1], [], []>} : vector<16x32xf32>, vector<32x32xf32>, vector<16x32xf32> -> vector<16x32xf32>
    %c0_272 = arith.constant 0 : index
    %c0_273 = arith.constant 0 : index
    %445 = vector.load %arg21[%c0_272, %c0_273] : memref<32x32xf32, #tpu.memory_space<vmem>>, vector<32x32xf32>
    %cst_274 = arith.constant dense<0.000000e+00> : vector<16x32xf32>
    %446 = tpu.matmul %5, %445, %cst_274 {dimension_numbers = #tpu.dot_dimension_numbers<[1], [0], [0], [1], [0, 0, 1, 1], [], []>} : vector<16x32xf32>, vector<32x32xf32>, vector<16x32xf32> -> vector<16x32xf32>
    %447 = arith.addf %444, %446 : vector<16x32xf32>
    %c0_275 = arith.constant 0 : index
    %c0_276 = arith.constant 0 : index
    %448 = vector.load %arg22[%c0_275, %c0_276] : memref<1x32xf32, #tpu.memory_space<vmem>>, vector<1x32xf32>
    %449 = vector.broadcast %448 : vector<1x32xf32> to vector<16x32xf32>
    %450 = arith.addf %447, %449 : vector<16x32xf32>
    %c0_277 = arith.constant 0 : index
    %c0_278 = arith.constant 0 : index
    %451 = vector.load %arg23[%c0_277, %c0_278] : memref<1x32xf32, #tpu.memory_space<vmem>>, vector<1x32xf32>
    %c0_279 = arith.constant 0 : index
    %c0_280 = arith.constant 0 : index
    %452 = vector.load %arg24[%c0_279, %c0_280] : memref<1x32xf32, #tpu.memory_space<vmem>>, vector<1x32xf32>
    %cst_281 = arith.constant dense<0.000000e+00> : vector<16xf32>
    %453 = vector.multi_reduction <add>, %450, %cst_281 [1] : vector<16x32xf32> to vector<16xf32>
    %454 = vector.shape_cast %453 : vector<16xf32> to vector<16x1xf32>
    %cst_282 = arith.constant 3.200000e+01 : f32
    %455 = vector.broadcast %cst_282 : f32 to vector<16x1xf32>
    %456 = arith.divf %454, %455 : vector<16x1xf32>
    %457 = vector.broadcast %456 : vector<16x1xf32> to vector<16x32xf32>
    %458 = arith.subf %450, %457 : vector<16x32xf32>
    %459 = arith.mulf %458, %458 : vector<16x32xf32>
    %cst_283 = arith.constant dense<0.000000e+00> : vector<16xf32>
    %460 = vector.multi_reduction <add>, %459, %cst_283 [1] : vector<16x32xf32> to vector<16xf32>
    %461 = vector.shape_cast %460 : vector<16xf32> to vector<16x1xf32>
    %cst_284 = arith.constant 3.200000e+01 : f32
    %462 = vector.broadcast %cst_284 : f32 to vector<16x1xf32>
    %463 = arith.divf %461, %462 : vector<16x1xf32>
    %464 = vector.broadcast %456 : vector<16x1xf32> to vector<16x32xf32>
    %465 = arith.subf %450, %464 : vector<16x32xf32>
    %cst_285 = arith.constant 9.99999974E-6 : f32
    %466 = vector.broadcast %cst_285 : f32 to vector<16x1xf32>
    %467 = arith.addf %463, %466 : vector<16x1xf32>
    %468 = math.rsqrt %467 : vector<16x1xf32>
    %469 = vector.broadcast %468 : vector<16x1xf32> to vector<16x32xf32>
    %470 = arith.mulf %465, %469 : vector<16x32xf32>
    %471 = vector.broadcast %451 : vector<1x32xf32> to vector<16x32xf32>
    %472 = arith.mulf %470, %471 : vector<16x32xf32>
    %473 = vector.broadcast %452 : vector<1x32xf32> to vector<16x32xf32>
    %474 = arith.addf %472, %473 : vector<16x32xf32>
    %cst_286 = arith.constant 0.000000e+00 : f32
    %475 = vector.broadcast %cst_286 : f32 to vector<16x32xf32>
    %476 = arith.maximumf %474, %475 : vector<16x32xf32>
    %477 = vector.shape_cast %476 : vector<16x32xf32> to vector<2x8x32xf32>
    %c0_287 = arith.constant 0 : index
    %c0_288 = arith.constant 0 : index
    %478 = vector.load %arg25[%c0_287, %c0_288] : memref<1x32xf32, #tpu.memory_space<vmem>>, vector<1x32xf32>
    %479 = vector.shape_cast %478 : vector<1x32xf32> to vector<1x1x32xf32>
    %480 = vector.broadcast %479 : vector<1x1x32xf32> to vector<2x8x32xf32>
    %481 = arith.mulf %477, %480 : vector<2x8x32xf32>
    %cst_289 = arith.constant dense<0.000000e+00> : vector<2x8xf32>
    %482 = vector.multi_reduction <add>, %481, %cst_289 [2] : vector<2x8x32xf32> to vector<2x8xf32>
    %c0_290 = arith.constant 0 : index
    %c0_291 = arith.constant 0 : index
    %483 = vector.load %arg26[%c0_290, %c0_291] : memref<1x1xf32, #tpu.memory_space<vmem>>, vector<1x1xf32>
    %484 = vector.broadcast %483 : vector<1x1xf32> to vector<2x8xf32>
    %485 = arith.addf %482, %484 : vector<2x8xf32>
    %c0_292 = arith.constant 0 : index
    %c0_293 = arith.constant 0 : index
    %486 = vector.load %arg27[%c0_292, %c0_293] : memref<2x8xf32, #tpu.memory_space<vmem>>, vector<2x8xf32>
    tpu.vector_store %arg27[%c0_292, %c0_293], %485 {strides = array<i32>} : memref<2x8xf32, #tpu.memory_space<vmem>>, vector<2x8xf32>,
    return
  }
}

</mosaic_0001>

<bundles_post_ra>
// kernel: stock_prediction_forward.1
= control target key start
LH: loop header
LB: loop body
LE: loop exit
PB: predicated region body
PF: predicated region fallthrough
CT: control target
= control target key end

     0   :  { %s33988_s0 = inlined_call_operand.vmem [shape: f32[16,8], index: 0, kind: input, shape index: {}]   ;;  %s33989_s1 = inlined_call_operand.vmem [shape: f32[16,32], index: 1, kind: input, shape index: {}]   ;;  %s33990_s2 = inlined_call_operand.vmem [shape: f32[8,32], index: 2, kind: input, shape index: {}]   ;;  %s33991_s3 = inlined_call_operand.vmem [shape: f32[1,32], index: 3, kind: input, shape index: {}]   ;;  %s33992_s4 = inlined_call_operand.vmem [shape: f32[3,8,32,4], index: 4, kind: input, shape index: {}]   ;;  %s33993_s5 = inlined_call_operand.vmem [shape: f32[3,8,32,4], index: 5, kind: input, shape index: {}]   ;;  %s33994_s6 = inlined_call_operand.vmem [shape: f32[3,8,32,4], index: 6, kind: input, shape index: {}]   ;;  %s33995_s7 = inlined_call_operand.vmem [shape: f32[3,8,1,4], index: 7, kind: input, shape index: {}]   ;;  %s33996_s8 = inlined_call_operand.vmem [shape: f32[3,8,1,4], index: 8, kind: input, shape index: {}]   ;;  %s33997_s9 = inlined_call_operand.vmem [shape: f32[3,8,1,4], index: 9, kind: input, shape index: {}]   ;;  %s33998_s10 = inlined_call_operand.vmem [shape: f32[3,8,4,32], index: 10, kind: input, shape index: {}]   ;;  %s33999_s11 = inlined_call_operand.vmem [shape: f32[3,1,32], index: 11, kind: input, shape index: {}]   ;;  %s34000_s12 = inlined_call_operand.vmem [shape: f32[3,1,32], index: 12, kind: input, shape index: {}]   ;;  %s34001_s13 = inlined_call_operand.vmem [shape: f32[3,1,32], index: 13, kind: input, shape index: {}]   ;;  %s34002_s14 = inlined_call_operand.vmem [shape: f32[3,32,128], index: 14, kind: input, shape index: {}]   ;;  %s34003_s15 = inlined_call_operand.vmem [shape: f32[3,1,128], index: 15, kind: input, shape index: {}]   ;;  %s34004_s16 = inlined_call_operand.vmem [shape: f32[3,128,32], index: 16, kind: input, shape index: {}]   ;;  %s34005_s17 = inlined_call_operand.vmem [shape: f32[3,1,32], index: 17, kind: input, shape index: {}]   ;;  %s34006_s18 = inlined_call_operand.vmem [shape: f32[3,1,32], index: 18, kind: input, shape index: {}]   ;;  %s34007_s19 = inlined_call_operand.vmem [shape: f32[3,1,32], index: 19, kind: input, shape index: {}]   ;;  %s34008_s20 = inlined_call_operand.vmem [shape: f32[32,32], index: 20, kind: input, shape index: {}]   ;;  %s34009_s21 = inlined_call_operand.vmem [shape: f32[32,32], index: 21, kind: input, shape index: {}]   ;;  %s34010_s22 = inlined_call_operand.vmem [shape: f32[1,32], index: 22, kind: input, shape index: {}]   ;;  %s34011_s23 = inlined_call_operand.vmem [shape: f32[1,32], index: 23, kind: input, shape index: {}]   ;;  %s34012_s24 = inlined_call_operand.vmem [shape: f32[1,32], index: 24, kind: input, shape index: {}]   ;;  %s34013_s25 = inlined_call_operand.vmem [shape: f32[1,32], index: 25, kind: input, shape index: {}]   ;;  %s34014_s26 = inlined_call_operand.<no memory space> [shape: f32[1,1], index: 26, kind: input, shape index: {}]   ;;  %s34015_s27 = inlined_call_operand.hbm [shape: f32[2,8], index: 27, kind: output, shape index: {}]  }
   0x1   :  { %34088 = sst [smem:[#allocation27_spill]] %s33988_s0  ;;  %v32_v0 = vstv %s34014_s26 }
   0x2   :  { %34089 = sst [smem:[#allocation28_spill]] %s33989_s1  ;;  %33 = vst [vmem:[#allocation2] sm:$0x1] %v32_v0 }
   0x3   :  { %34090 = sst [smem:[#allocation29_spill]] %s33990_s2 }
   0x4   :  { %34091 = sst [smem:[#allocation30_spill]] %s33991_s3 }
   0x5   :  { %34092 = sst [smem:[#allocation31_spill]] %s33992_s4 }
   0x6   :  { %34093 = sst [smem:[#allocation32_spill]] %s33993_s5 }
   0x7   :  { %34094 = sst [smem:[#allocation33_spill]] %s33994_s6 }
   0x8   :  { %34095 = sst [smem:[#allocation34_spill]] %s33995_s7 }
   0x9   :  { %34096 = sst [smem:[#allocation35_spill]] %s33996_s8 }
   0xa   :  { %34097 = sst [smem:[#allocation36_spill]] %s33997_s9 }
   0xb   :  { %34098 = sst [smem:[#allocation37_spill]] %s33998_s10 }
   0xc   :  { %34099 = sst [smem:[#allocation38_spill]] %s33999_s11 }
   0xd   :  { %34100 = sst [smem:[#allocation39_spill]] %s34012_s24 }
   0xe   :  { %34101 = sst [smem:[#allocation40_spill]] %s34013_s25 }
   0xf   :  { %34102 = sst [smem:[#allocation41_spill]] %s34015_s27 }
  0x10   :  { %s34103_s9 = sld [smem:[#allocation29_spill]]  ;;  %s34104_s0 = sld [smem:[#allocation27_spill]]  ;;  %vm99_vm0 = vcmask 64512   ;;  %v34026_v7 = vmov 0.0|0.0  }
  0x11   :  { %s34105_s26 = sld [smem:[#allocation31_spill]]  ;;  %28060 = vmatprep.subr.bf16.mxu1 %v34026_v7 }
  0x16   :  { %v91_v1 = vld [vmem:[%s34103_s9] sm:$0xff]  ;;  %v90_v3 = vld [vmem:[%s34104_s0 + $0x8] sm:$0xff] }
  0x17   :  { %v89_v2 = vld [vmem:[%s34104_s0] sm:$0xff]  ;;  %25591 = vmatprep.subr.mxu0 %v91_v1  ;;  %v186_v5 = vld [vmem:[%s34105_s26 + $0x8] sm:$0xff] }
  0x18   :  { %25593 = vmatprep.mubr.msk.f32.mxu0 %vm99_vm0, %v89_v2  ;;  %v185_v4 = vld [vmem:[%s34105_s26] sm:$0xff]  ;;  %25592 = vmatpush3.msra.mxu0 %v91_v1  ;;  %v190_v9 = vld [vmem:[%s34105_s26 + $0x28] sm:$0xff] }
  0x19   :  { %v189_v6 = vld [vmem:[%s34105_s26 + $0x20] sm:$0xff]  ;;  %v29565_v8 = vpack.c.bf16 %v186_v5, %v185_v4 }
  0x1a   :  { %34 = vsyncpa [#allocation4], 0  ;;  %25594 = vmatmul.mubr.msk.f32.vlgmr.msra.gmra.mrb[0].mxu0 %vm99_vm0, %v90_v3  ;;  %28066 = vmatprep.subr.bf16.mxu0 %v34026_v7  ;;  %v29572_v10 = vpack.c.bf16 %v190_v9, %v189_v6  ;;  %v187_v11 = vld [vmem:[%s34105_s26 + $0x10] sm:$0xff]  ;;  %v188_v12 = vld [vmem:[%s34105_s26 + $0x18] sm:$0xff]  ;;  %vm29398_vm1 = vmmov 0   ;;  %v34032_v17 = vmov 0.0  }
  0x1b   :  { %28062 = vmatpush3.bf16.msra.mxu1 %v29565_v8  ;;  %v191_v13 = vld [vmem:[%s34105_s26 + $0x30] sm:$0xff]  ;;  %v29587_v14 = vpack.c.bf16 %v188_v12, %v187_v11  ;;  %v192_v15 = vld [vmem:[%s34105_s26 + $0x38] sm:$0xff]  ;;  %25604 = vmatprep.mubr.msk.f32.mxu1 %vm29398_vm1, %v34032_v17  ;;  %s34106_s2 = sld [smem:[#allocation30_spill]]  ;;  %v193_v19 = vld [vmem:[%s34105_s26 + $0x40] sm:$0xff]  ;;  %s34108_s29 = sld [smem:[#allocation28_spill]]  ;;  %vm361_vm2 = vcmask 261120  }
  0x1c   :  { %28068 = vmatpush3.bf16.msra.mxu0 %v29572_v10  ;;  %28063 = vmatprep.subr.bf16.mxu1 %v34026_v7  ;;  %v29592_v16 = vpack.c.bf16 %v192_v15, %v191_v13  ;;  %v194_v21 = vld [vmem:[%s34105_s26 + $0x48] sm:$0xff]  ;;  %v197_v22 = vld [vmem:[%s34105_s26 + $0x60] sm:$0xff]  ;;  %v195_v30 = vld [vmem:[%s34105_s26 + $0x50] sm:$0xff]  ;;  %s34111_s1 = sld [smem:[#allocation32_spill]]  ;;  %s34113_s10 = sld [smem:[#allocation33_spill]]  ;;  %vm2149_vm3 = vcmask 31744  }
  0x1d   :  { %28069 = vmatprep.subr.bf16.mxu0 %v34026_v7  ;;  %25615 = vmatprep.mubr.msk.f32.mxu0 %vm29398_vm1, %v34032_v17  ;;  %v198_v23 = vld [vmem:[%s34105_s26 + $0x68] sm:$0xff]  ;;  %v29624_v28 = vpack.c.bf16 %v194_v21, %v193_v19  ;;  %v196_v32 = vld [vmem:[%s34105_s26 + $0x58] sm:$0xff]  ;;  %v199_v33 = vld [vmem:[%s34105_s26 + $0x70] sm:$0xff]  ;;  %s34130_s7 = sld [smem:[#allocation34_spill]]  ;;  %s34131_s30 = sld [smem:[#allocation35_spill]]  ;;  %vm3433_vm4 = vcmask 1043456  }
  0x1e   :  { %v29626_v29 = vpack.c.bf16 %v198_v23, %v197_v22  ;;  %v200_v34 = vld [vmem:[%s34105_s26 + $0x78] sm:$0xff]  ;;  %v29649_v35 = vpack.c.bf16 %v196_v32, %v195_v30  ;;  %v201_v37 = vld [vmem:[%s34105_s26 + $0x80] sm:$0xff]  ;;  %v202_v38 = vld [vmem:[%s34105_s26 + $0x88] sm:$0xff]  ;;  %s34133_s9 = sld [smem:[#allocation36_spill]]  ;;  %s34135_s4 = sld [smem:[#allocation37_spill]]  ;;  %vm23672_vm5 = vcmask 1041409  }
  0x1f   :  { %28065 = vmatpush3.bf16.msra.mxu1 %v29587_v14  ;;  %v29651_v36 = vpack.c.bf16 %v200_v34, %v199_v33  ;;  %v205_v39 = vld [vmem:[%s34105_s26 + $0xa0] sm:$0xff]  ;;  %v206_v40 = vld [vmem:[%s34105_s26 + $0xa8] sm:$0xff]  ;;  %v29673_v41 = vpack.c.bf16 %v202_v38, %v201_v37  ;;  %v203_v43 = vld [vmem:[%s34105_s26 + $0x90] sm:$0xff]  ;;  %s34231_s5 = sld [smem:[#allocation39_spill]]  ;;  %s34232_s24 = sld [smem:[#allocation40_spill]]  ;;  %vm23675_vm6 = vcmask 58368  }
  0x20   :  { %28071 = vmatpush3.bf16.msra.mxu0 %v29592_v16  ;;  %28072 = vmatprep.subr.bf16.mxu1 %v34026_v7  ;;  %v29675_v42 = vpack.c.bf16 %v206_v40, %v205_v39  ;;  %v204_v44 = vld [vmem:[%s34105_s26 + $0x98] sm:$0xff]  ;;  %v207_v45 = vld [vmem:[%s34105_s26 + $0xb0] sm:$0xff]  ;;  %v209_v49 = vld [vmem:[%s34105_s26 + $0xc0] sm:$0xff] }
  0x21   :  { %28078 = vmatprep.subr.bf16.mxu0 %v34026_v7  ;;  %v23691_v18 = vld [vmem:[%s34106_s2] ss:$0 sm:$0xff]  ;;  %v208_v46 = vld [vmem:[%s34105_s26 + $0xb8] sm:$0xff]  ;;  %v29697_v47 = vpack.c.bf16 %v204_v44, %v203_v43  ;;  %v210_v50 = vld [vmem:[%s34105_s26 + $0xc8] sm:$0xff] }
  0x22   :  { %v181_v26 = vld [vmem:[%s34108_s29] sm:$0xff]  ;;  %v29699_v48 = vpack.c.bf16 %v208_v46, %v207_v45  ;;  %v214_v52 = vld [vmem:[%s34105_s26 + $0xe8] sm:$0xff]  ;;  %v29721_v53 = vpack.c.bf16 %v210_v50, %v209_v49  ;;  %v211_v55 = vld [vmem:[%s34105_s26 + $0xd0] sm:$0xff] }
  0x23   :  { %v213_v51 = vld [vmem:[%s34105_s26 + $0xe0] sm:$0xff]  ;;  %v212_v56 = vld [vmem:[%s34105_s26 + $0xd8] sm:$0xff]  ;;  %v215_v57 = vld [vmem:[%s34105_s26 + $0xf0] sm:$0xff] }
  0x24   :  { %v29723_v54 = vpack.c.bf16 %v214_v52, %v213_v51  ;;  %v216_v58 = vld [vmem:[%s34105_s26 + $0xf8] sm:$0xff]  ;;  %v29745_v59 = vpack.c.bf16 %v212_v56, %v211_v55  ;;  %v217_v61 = vld [vmem:[%s34111_s1] sm:$0xff]  ;;  %v218_v62 = vld [vmem:[%s34111_s1 + $0x8] sm:$0xff] }
  0x25   :  { %v29747_v60 = vpack.c.bf16 %v216_v58, %v215_v57  ;;  %v221_v63 = vld [vmem:[%s34111_s1 + $0x20] sm:$0xff]  ;;  %v222_v0 = vld [vmem:[%s34111_s1 + $0x28] sm:$0xff]  ;;  %v29769_v1 = vpack.c.bf16 %v218_v62, %v217_v61  ;;  %v219_v3 = vld [vmem:[%s34111_s1 + $0x10] sm:$0xff] }
  0x26   :  { %v29771_v2 = vpack.c.bf16 %v222_v0, %v221_v63  ;;  %v220_v4 = vld [vmem:[%s34111_s1 + $0x18] sm:$0xff]  ;;  %v223_v5 = vld [vmem:[%s34111_s1 + $0x30] sm:$0xff]  ;;  %v225_v12 = vld [vmem:[%s34111_s1 + $0x40] sm:$0xff] }
  0x27   :  { %v224_v6 = vld [vmem:[%s34111_s1 + $0x38] sm:$0xff]  ;;  %v29793_v9 = vpack.c.bf16 %v220_v4, %v219_v3  ;;  %v226_v13 = vld [vmem:[%s34111_s1 + $0x48] sm:$0xff]  ;;  %v229_v15 = vld [vmem:[%s34111_s1 + $0x60] sm:$0xff] }
  0x28   :  { %v29795_v11 = vpack.c.bf16 %v224_v6, %v223_v5  ;;  %v29817_v19 = vpack.c.bf16 %v226_v13, %v225_v12  ;;  %v227_v21 = vld [vmem:[%s34111_s1 + $0x50] sm:$0xff]  ;;  %v228_v22 = vld [vmem:[%s34111_s1 + $0x58] sm:$0xff]  ;;  %v233_v32 = vld [vmem:[%s34111_s1 + $0x80] sm:$0xff] }
  0x29   :  { %v231_v23 = vld [vmem:[%s34111_s1 + $0x70] sm:$0xff]  ;;  %v234_v33 = vld [vmem:[%s34111_s1 + $0x88] sm:$0xff]  ;;  %v237_v34 = vld [vmem:[%s34111_s1 + $0xa0] sm:$0xff] }
  0x2a   :  { %v238_v37 = vld [vmem:[%s34111_s1 + $0xa8] sm:$0xff]  ;;  %v29865_v38 = vpack.c.bf16 %v234_v33, %v233_v32  ;;  %v235_v40 = vld [vmem:[%s34111_s1 + $0x90] sm:$0xff]  ;;  %v236_v43 = vld [vmem:[%s34111_s1 + $0x98] sm:$0xff] }
  0x2b   :  { %v29867_v39 = vpack.c.bf16 %v238_v37, %v237_v34  ;;  %v239_v44 = vld [vmem:[%s34111_s1 + $0xb0] sm:$0xff]  ;;  %v240_v45 = vld [vmem:[%s34111_s1 + $0xb8] sm:$0xff]  ;;  %v29889_v46 = vpack.c.bf16 %v236_v43, %v235_v40  ;;  %v241_v50 = vld [vmem:[%s34111_s1 + $0xc0] sm:$0xff] }
  0x2c   :  { %v29891_v49 = vpack.c.bf16 %v240_v45, %v239_v44  ;;  %v242_v51 = vld [vmem:[%s34111_s1 + $0xc8] sm:$0xff]  ;;  %v245_v52 = vld [vmem:[%s34111_s1 + $0xe0] sm:$0xff]  ;;  %v243_v58 = vld [vmem:[%s34111_s1 + $0xd0] sm:$0xff] }
  0x2d   :  { %v246_v55 = vld [vmem:[%s34111_s1 + $0xe8] sm:$0xff]  ;;  %v29913_v56 = vpack.c.bf16 %v242_v51, %v241_v50  ;;  %v244_v61 = vld [vmem:[%s34111_s1 + $0xd8] sm:$0xff]  ;;  %v247_v62 = vld [vmem:[%s34111_s1 + $0xf0] sm:$0xff] }
  0x2e   :  { %v29915_v57 = vpack.c.bf16 %v246_v55, %v245_v52  ;;  %v248_v63 = vld [vmem:[%s34111_s1 + $0xf8] sm:$0xff]  ;;  %v29937_v0 = vpack.c.bf16 %v244_v61, %v243_v58  ;;  %v249_v4 = vld [vmem:[%s34113_s10] sm:$0xff]  ;;  %v250_v5 = vld [vmem:[%s34113_s10 + $0x8] sm:$0xff] }
  0x2f   :  { %v29939_v3 = vpack.c.bf16 %v248_v63, %v247_v62  ;;  %v253_v6 = vld [vmem:[%s34113_s10 + $0x20] sm:$0xff]  ;;  %v254_v12 = vld [vmem:[%s34113_s10 + $0x28] sm:$0xff]  ;;  %v29961_v13 = vpack.c.bf16 %v250_v5, %v249_v4  ;;  %v259_v45 = vld [vmem:[%s34113_s10 + $0x50] sm:$0xff] }
  0x30   :  { %34112 = vst [vmem:[#allocation9_spill] sm:$0xff] %v29937_v0  ;;  %v257_v33 = vld [vmem:[%s34113_s10 + $0x40] sm:$0xff]  ;;  %v258_v34 = vld [vmem:[%s34113_s10 + $0x48] sm:$0xff]  ;;  %v260_v50 = vld [vmem:[%s34113_s10 + $0x58] sm:$0xff] }
  0x31   :  { %34114 = vst [vmem:[#allocation10_spill] sm:$0xff] %v29961_v13  ;;  %v261_v37 = vld [vmem:[%s34113_s10 + $0x60] sm:$0xff]  ;;  %v262_v40 = vld [vmem:[%s34113_s10 + $0x68] sm:$0xff]  ;;  %v30009_v43 = vpack.c.bf16 %v258_v34, %v257_v33  ;;  %v263_v51 = vld [vmem:[%s34113_s10 + $0x70] sm:$0xff]  ;;  %v30033_v55 = vpack.c.bf16 %v260_v50, %v259_v45 }
  0x32   :  { %v30011_v44 = vpack.c.bf16 %v262_v40, %v261_v37  ;;  %v264_v52 = vld [vmem:[%s34113_s10 + $0x78] sm:$0xff]  ;;  %v265_v61 = vld [vmem:[%s34113_s10 + $0x80] sm:$0xff]  ;;  %v266_v62 = vld [vmem:[%s34113_s10 + $0x88] sm:$0xff] }
  0x33   :  { %34118 = vst [vmem:[#allocation14_spill] sm:$0xff] %v30009_v43  ;;  %34120 = vst [vmem:[#allocation16_spill] sm:$0xff] %v30033_v55  ;;  %v30035_v58 = vpack.c.bf16 %v264_v52, %v263_v51  ;;  %v269_v63 = vld [vmem:[%s34113_s10 + $0xa0] sm:$0xff]  ;;  %v270_v4 = vld [vmem:[%s34113_s10 + $0xa8] sm:$0xff]  ;;  %v30057_v5 = vpack.c.bf16 %v266_v62, %v265_v61 }
  0x34   :  { %34119 = vst [vmem:[#allocation15_spill] sm:$0xff] %v30011_v44  ;;  %v273_v34 = vld [vmem:[%s34113_s10 + $0xc0] sm:$0xff]  ;;  %v274_v37 = vld [vmem:[%s34113_s10 + $0xc8] sm:$0xff]  ;;  %v275_v52 = vld [vmem:[%s34113_s10 + $0xd0] sm:$0xff] }
  0x35   :  { %34121 = vst [vmem:[#allocation17_spill] sm:$0xff] %v30035_v58  ;;  %34122 = vst [vmem:[#allocation18_spill] sm:$0xff] %v30057_v5  ;;  %v277_v40 = vld [vmem:[%s34113_s10 + $0xe0] sm:$0xff]  ;;  %v278_v45 = vld [vmem:[%s34113_s10 + $0xe8] sm:$0xff]  ;;  %v30105_v50 = vpack.c.bf16 %v274_v37, %v273_v34 }
  0x36   :  { %v30107_v51 = vpack.c.bf16 %v278_v45, %v277_v40  ;;  %v276_v61 = vld [vmem:[%s34113_s10 + $0xd8] sm:$0xff]  ;;  %v279_v62 = vld [vmem:[%s34113_s10 + $0xf0] sm:$0xff] }
  0x37   :  { %34126 = vst [vmem:[#allocation22_spill] sm:$0xff] %v30105_v50 }
  0x38   :  { %34127 = vst [vmem:[#allocation23_spill] sm:$0xff] %v30107_v51 }
  0xed   :  { %v25595_v20 = vpop.f32.mrb[0].mxu0 }
  0xee   :  { %v29617_v24 = vadd.f32 %v25595_v20, %v23691_v18  ;;  %v172_v25 = vpop.f32.mrb[1].mxu0 }
  0xef   :  { %v29622_v27 = vadd.f32 %v23691_v18, %v172_v25  ;;  %v230_v18 = vld [vmem:[%s34111_s1 + $0x68] sm:$0xff]  ;;  %v232_v25 = vld [vmem:[%s34111_s1 + $0x78] sm:$0xff] }
  0xf0   :  { %34107 = vst [vmem:[#allocation6_spill] sm:$0xff] %v29617_v24  ;;  %v29819_v20 = vpack.c.bf16 %v230_v18, %v229_v15  ;;  %v29843_v30 = vpack.c.bf16 %v232_v25, %v231_v23  ;;  %v29963_v15 = vpack.c.bf16 %v254_v12, %v253_v6  ;;  %v251_v18 = vld [vmem:[%s34113_s10 + $0x10] sm:$0xff]  ;;  %v256_v23 = vld [vmem:[%s34113_s10 + $0x38] sm:$0xff]  ;;  %v30059_v6 = vpack.c.bf16 %v270_v4, %v269_v63 }
  0xf1   :  { %34109 = vst [vmem:[#allocation7_spill] sm:$0xff] %v29622_v27  ;;  %v29632_v31 = vadd.f32 %v181_v26, %v29622_v27  ;;  %v29841_v26 = vpack.c.bf16 %v228_v22, %v227_v21  ;;  %v252_v21 = vld [vmem:[%s34113_s10 + $0x18] sm:$0xff]  ;;  %v255_v22 = vld [vmem:[%s34113_s10 + $0x30] sm:$0xff]  ;;  %v30129_v4 = vpack.c.bf16 %v276_v61, %v275_v52 }
  0xf2   :  { %34115 = vst [vmem:[#allocation11_spill] sm:$0xff] %v29963_v15  ;;  %v29985_v25 = vpack.c.bf16 %v252_v21, %v251_v18  ;;  %v29987_v32 = vpack.c.bf16 %v256_v23, %v255_v22  ;;  %34123 = vst [vmem:[#allocation19_spill] sm:$0xff] %v30059_v6  ;;  %v267_v12 = vld [vmem:[%s34113_s10 + $0x90] sm:$0xff]  ;;  %v268_v18 = vld [vmem:[%s34113_s10 + $0x98] sm:$0xff] }
  0xf3   :  { %34110 = vst [vmem:[#allocation8_spill] sm:$0xff] %v29632_v31  ;;  %25605 = vmatmul.mubr.msk.f32.vlgmr.msra.gmra.mrb[0].mxu1 %vm361_vm2, %v29632_v31  ;;  %25616 = vmatmul.mubr.msk.f32.vlgmr.msra.gmra.mrb[2].mxu0 %vm361_vm2, %v29632_v31  ;;  %v271_v21 = vld [vmem:[%s34113_s10 + $0xb0] sm:$0xff]  ;;  %v272_v22 = vld [vmem:[%s34113_s10 + $0xb8] sm:$0xff]  ;;  %v30081_v23 = vpack.c.bf16 %v268_v18, %v267_v12  ;;  %34128 = vst [vmem:[#allocation24_spill] sm:$0xff] %v30129_v4 }
  0xf4   :  { %28074 = vmatpush3.bf16.msra.mxu1 %v29624_v28  ;;  %28080 = vmatpush3.bf16.msra.mxu0 %v29626_v29  ;;  %34116 = vst [vmem:[#allocation12_spill] sm:$0xff] %v29985_v25  ;;  %34117 = vst [vmem:[#allocation13_spill] sm:$0xff] %v29987_v32  ;;  %v30083_v33 = vpack.c.bf16 %v272_v22, %v271_v21  ;;  %v280_v63 = vld [vmem:[%s34113_s10 + $0xf8] sm:$0xff] }
  0xf5   :  { %28075 = vmatprep.subr.bf16.mxu1 %v34026_v7  ;;  %28081 = vmatprep.subr.bf16.mxu0 %v34026_v7  ;;  %34124 = vst [vmem:[#allocation20_spill] sm:$0xff] %v30081_v23  ;;  %v30131_v12 = vpack.c.bf16 %v280_v63, %v279_v62 }
  0xf6   :  { %25626 = vmatprep.mubr.msk.f32.mxu1 %vm29398_vm1, %v34032_v17  ;;  %25637 = vmatprep.mubr.msk.f32.mxu0 %vm29398_vm1, %v34032_v17  ;;  %34125 = vst [vmem:[#allocation21_spill] sm:$0xff] %v30083_v33 }
  0xf7   :  { %34129 = vst [vmem:[#allocation25_spill] sm:$0xff] %v30131_v12 }
  0xf8   :  { %28077 = vmatpush3.bf16.msra.mxu1 %v29649_v35  ;;  %28083 = vmatpush3.bf16.msra.mxu0 %v29651_v36 }
  0xf9   :  { %28084 = vmatprep.subr.bf16.mxu1 %v34026_v7  ;;  %28090 = vmatprep.subr.bf16.mxu0 %v34026_v7 }
  0xfb   :  { %25627 = vmatmul.mubr.msk.f32.vlgmr.msra.gmra.mrb[2].mxu1 %vm361_vm2, %v29632_v31  ;;  %25638 = vmatmul.mubr.msk.f32.vlgmr.msra.gmra.mrb[4].mxu0 %vm361_vm2, %v29632_v31 }
  0xfc   :  { %28086 = vmatpush3.bf16.msra.mxu1 %v29673_v41  ;;  %28092 = vmatpush3.bf16.msra.mxu0 %v29675_v42 }
  0xfd   :  { %28087 = vmatprep.subr.bf16.mxu1 %v34026_v7  ;;  %28093 = vmatprep.subr.bf16.mxu0 %v34026_v7 }
  0xfe   :  { %25648 = vmatprep.mubr.msk.f32.mxu1 %vm29398_vm1, %v34032_v17  ;;  %25659 = vmatprep.mubr.msk.f32.mxu0 %vm29398_vm1, %v34032_v17 }
 0x100   :  { %28089 = vmatpush3.bf16.msra.mxu1 %v29697_v47  ;;  %28095 = vmatpush3.bf16.msra.mxu0 %v29699_v48 }
 0x101   :  { %28096 = vmatprep.subr.bf16.mxu1 %v34026_v7  ;;  %28102 = vmatprep.subr.bf16.mxu0 %v34026_v7 }
 0x103   :  { %25649 = vmatmul.mubr.msk.f32.vlgmr.msra.gmra.mrb[4].mxu1 %vm361_vm2, %v29632_v31  ;;  %25660 = vmatmul.mubr.msk.f32.vlgmr.msra.gmra.mrb[6].mxu0 %vm361_vm2, %v29632_v31 }
 0x104   :  { %28098 = vmatpush3.bf16.msra.mxu1 %v29721_v53  ;;  %28104 = vmatpush3.bf16.msra.mxu0 %v29723_v54 }
 0x105   :  { %28099 = vmatprep.subr.bf16.mxu1 %v34026_v7  ;;  %28105 = vmatprep.subr.bf16.mxu0 %v34026_v7 }
 0x106   :  { %25670 = vmatprep.mubr.msk.f32.mxu1 %vm29398_vm1, %v34032_v17  ;;  %25681 = vmatprep.mubr.msk.f32.mxu0 %vm29398_vm1, %v34032_v17 }
 0x108   :  { %28101 = vmatpush3.bf16.msra.mxu1 %v29745_v59  ;;  %28107 = vmatpush3.bf16.msra.mxu0 %v29747_v60 }
 0x109   :  { %28108 = vmatprep.subr.bf16.mxu1 %v34026_v7  ;;  %28114 = vmatprep.subr.bf16.mxu0 %v34026_v7 }
 0x10b   :  { %25671 = vmatmul.mubr.msk.f32.vlgmr.msra.gmra.mrb[6].mxu1 %vm361_vm2, %v29632_v31  ;;  %25682 = vmatmul.mubr.msk.f32.vlgmr.msra.gmra.mrb[8].mxu0 %vm361_vm2, %v29632_v31 }
 0x10c   :  { %28110 = vmatpush3.bf16.msra.mxu1 %v29769_v1  ;;  %28116 = vmatpush3.bf16.msra.mxu0 %v29771_v2 }
 0x10d   :  { %28111 = vmatprep.subr.bf16.mxu1 %v34026_v7  ;;  %28117 = vmatprep.subr.bf16.mxu0 %v34026_v7 }
 0x10e   :  { %25692 = vmatprep.mubr.msk.f32.mxu1 %vm29398_vm1, %v34032_v17  ;;  %25703 = vmatprep.mubr.msk.f32.mxu0 %vm29398_vm1, %v34032_v17 }
 0x110   :  { %28113 = vmatpush3.bf16.msra.mxu1 %v29793_v9  ;;  %28119 = vmatpush3.bf16.msra.mxu0 %v29795_v11 }
 0x111   :  { %28120 = vmatprep.subr.bf16.mxu1 %v34026_v7  ;;  %28126 = vmatprep.subr.bf16.mxu0 %v34026_v7 }
 0x113   :  { %25693 = vmatmul.mubr.msk.f32.vlgmr.msra.gmra.mrb[8].mxu1 %vm361_vm2, %v29632_v31  ;;  %25704 = vmatmul.mubr.msk.f32.vlgmr.msra.gmra.mrb[10].mxu0 %vm361_vm2, %v29632_v31 }
 0x114   :  { %28122 = vmatpush3.bf16.msra.mxu1 %v29817_v19  ;;  %28128 = vmatpush3.bf16.msra.mxu0 %v29819_v20 }
 0x115   :  { %28123 = vmatprep.subr.bf16.mxu1 %v34026_v7  ;;  %28129 = vmatprep.subr.bf16.mxu0 %v34026_v7 }
 0x116   :  { %25714 = vmatprep.mubr.msk.f32.mxu1 %vm29398_vm1, %v34032_v17  ;;  %25725 = vmatprep.mubr.msk.f32.mxu0 %vm29398_vm1, %v34032_v17 }
 0x118   :  { %28125 = vmatpush3.bf16.msra.mxu1 %v29841_v26  ;;  %28131 = vmatpush3.bf16.msra.mxu0 %v29843_v30 }
 0x119   :  { %28132 = vmatprep.subr.bf16.mxu1 %v34026_v7  ;;  %28138 = vmatprep.subr.bf16.mxu0 %v34026_v7 }
 0x11b   :  { %25715 = vmatmul.mubr.msk.f32.vlgmr.msra.gmra.mrb[10].mxu1 %vm361_vm2, %v29632_v31  ;;  %25726 = vmatmul.mubr.msk.f32.vlgmr.msra.gmra.mrb[12].mxu0 %vm361_vm2, %v29632_v31 }
 0x11c   :  { %28134 = vmatpush3.bf16.msra.mxu1 %v29865_v38  ;;  %28140 = vmatpush3.bf16.msra.mxu0 %v29867_v39 }
 0x11d   :  { %28135 = vmatprep.subr.bf16.mxu1 %v34026_v7  ;;  %28141 = vmatprep.subr.bf16.mxu0 %v34026_v7 }
 0x11e   :  { %25736 = vmatprep.mubr.msk.f32.mxu1 %vm29398_vm1, %v34032_v17  ;;  %25747 = vmatprep.mubr.msk.f32.mxu0 %vm29398_vm1, %v34032_v17 }
 0x120   :  { %28137 = vmatpush3.bf16.msra.mxu1 %v29889_v46  ;;  %28143 = vmatpush3.bf16.msra.mxu0 %v29891_v49 }
 0x121   :  { %28144 = vmatprep.subr.bf16.mxu1 %v34026_v7  ;;  %28150 = vmatprep.subr.bf16.mxu0 %v34026_v7 }
 0x123   :  { %25737 = vmatmul.mubr.msk.f32.vlgmr.msra.gmra.mrb[12].mxu1 %vm361_vm2, %v29632_v31  ;;  %25748 = vmatmul.mubr.msk.f32.vlgmr.msra.gmra.mrb[14].mxu0 %vm361_vm2, %v29632_v31 }
 0x124   :  { %28146 = vmatpush3.bf16.msra.mxu1 %v29913_v56  ;;  %28152 = vmatpush3.bf16.msra.mxu0 %v29915_v57 }
 0x125   :  { %28147 = vmatprep.subr.bf16.mxu1 %v34026_v7  ;;  %28153 = vmatprep.subr.bf16.mxu0 %v34026_v7 }
 0x126   :  { %25758 = vmatprep.mubr.msk.f32.mxu1 %vm29398_vm1, %v34032_v17  ;;  %25769 = vmatprep.mubr.msk.f32.mxu0 %vm29398_vm1, %v34032_v17 }
 0x128   :  { %28149 = vmatpush3.bf16.msra.mxu1 %v29937_v0  ;;  %28155 = vmatpush3.bf16.msra.mxu0 %v29939_v3 }
 0x129   :  { %28156 = vmatprep.subr.bf16.mxu1 %v34026_v7  ;;  %28162 = vmatprep.subr.bf16.mxu0 %v34026_v7 }
 0x12b   :  { %25759 = vmatmul.mubr.msk.f32.vlgmr.msra.gmra.mrb[14].mxu1 %vm361_vm2, %v29632_v31  ;;  %25770 = vmatmul.mubr.msk.f32.vlgmr.msra.gmra.mrb[16].mxu0 %vm361_vm2, %v29632_v31 }
 0x12c   :  { %28158 = vmatpush3.bf16.msra.mxu1 %v29961_v13  ;;  %28164 = vmatpush3.bf16.msra.mxu0 %v29963_v15 }
 0x12d   :  { %28159 = vmatprep.subr.bf16.mxu1 %v34026_v7  ;;  %28165 = vmatprep.subr.bf16.mxu0 %v34026_v7 }
 0x12e   :  { %25780 = vmatprep.mubr.msk.f32.mxu1 %vm29398_vm1, %v34032_v17  ;;  %25791 = vmatprep.mubr.msk.f32.mxu0 %vm29398_vm1, %v34032_v17 }
 0x130   :  { %28161 = vmatpush3.bf16.msra.mxu1 %v29985_v25  ;;  %28167 = vmatpush3.bf16.msra.mxu0 %v29987_v32 }
 0x131   :  { %28168 = vmatprep.subr.bf16.mxu1 %v34026_v7  ;;  %28174 = vmatprep.subr.bf16.mxu0 %v34026_v7 }
 0x133   :  { %25781 = vmatmul.mubr.msk.f32.vlgmr.msra.gmra.mrb[16].mxu1 %vm361_vm2, %v29632_v31  ;;  %25792 = vmatmul.mubr.msk.f32.vlgmr.msra.gmra.mrb[18].mxu0 %vm361_vm2, %v29632_v31 }
 0x134   :  { %28170 = vmatpush3.bf16.msra.mxu1 %v30009_v43  ;;  %28176 = vmatpush3.bf16.msra.mxu0 %v30011_v44 }
 0x135   :  { %28171 = vmatprep.subr.bf16.mxu1 %v34026_v7  ;;  %28177 = vmatprep.subr.bf16.mxu0 %v34026_v7 }
 0x136   :  { %25802 = vmatprep.mubr.msk.f32.mxu1 %vm29398_vm1, %v34032_v17  ;;  %25813 = vmatprep.mubr.msk.f32.mxu0 %vm29398_vm1, %v34032_v17 }
 0x138   :  { %28173 = vmatpush3.bf16.msra.mxu1 %v30033_v55  ;;  %28179 = vmatpush3.bf16.msra.mxu0 %v30035_v58 }
 0x139   :  { %28180 = vmatprep.subr.bf16.mxu1 %v34026_v7  ;;  %28186 = vmatprep.subr.bf16.mxu0 %v34026_v7 }
 0x13b   :  { %25803 = vmatmul.mubr.msk.f32.vlgmr.msra.gmra.mrb[18].mxu1 %vm361_vm2, %v29632_v31  ;;  %25814 = vmatmul.mubr.msk.f32.vlgmr.msra.gmra.mrb[20].mxu0 %vm361_vm2, %v29632_v31 }
 0x13c   :  { %28182 = vmatpush3.bf16.msra.mxu1 %v30057_v5  ;;  %28188 = vmatpush3.bf16.msra.mxu0 %v30059_v6 }
 0x13d   :  { %28183 = vmatprep.subr.bf16.mxu1 %v34026_v7  ;;  %28189 = vmatprep.subr.bf16.mxu0 %v34026_v7 }
 0x13e   :  { %25824 = vmatprep.mubr.msk.f32.mxu1 %vm29398_vm1, %v34032_v17  ;;  %25835 = vmatprep.mubr.msk.f32.mxu0 %vm29398_vm1, %v34032_v17 }
 0x140   :  { %28185 = vmatpush3.bf16.msra.mxu1 %v30081_v23  ;;  %28191 = vmatpush3.bf16.msra.mxu0 %v30083_v33  ;;  %v34132_v33 = vmov 0.0  }
 0x141   :  { %28192 = vmatprep.subr.bf16.mxu1 %v34026_v7  ;;  %28198 = vmatprep.subr.bf16.mxu0 %v34026_v7 }
 0x143   :  { %25825 = vmatmul.mubr.msk.f32.vlgmr.msra.gmra.mrb[20].mxu1 %vm361_vm2, %v29632_v31  ;;  %25836 = vmatmul.mubr.msk.f32.vlgmr.msra.gmra.mrb[22].mxu0 %vm361_vm2, %v29632_v31 }
 0x144   :  { %28194 = vmatpush3.bf16.msra.mxu1 %v30105_v50  ;;  %28200 = vmatpush3.bf16.msra.mxu0 %v30107_v51 }
 0x145   :  { %28195 = vmatprep.subr.bf16.mxu1 %v34026_v7  ;;  %28201 = vmatprep.subr.bf16.mxu0 %v34026_v7 }
 0x146   :  { %25846 = vmatprep.mubr.msk.f32.mxu1 %vm29398_vm1, %v34032_v17  ;;  %25857 = vmatprep.mubr.msk.f32.mxu0 %vm29398_vm1, %v34032_v17 }
 0x148   :  { %28197 = vmatpush3.bf16.msra.mxu1 %v30129_v4  ;;  %28203 = vmatpush3.bf16.msra.mxu0 %v30131_v12 }
 0x149   :  { %25860 = vmatprep.subr.mxu1 %v34032_v17  ;;  %25875 = vmatprep.subr.mxu0 %v34032_v17 }
 0x14b   :  { %25847 = vmatmul.mubr.msk.f32.vlgmr.msra.gmra.mrb[22].mxu1 %vm361_vm2, %v29632_v31  ;;  %25858 = vmatmul.mubr.msk.f32.vlgmr.msra.gmra.mrb[24].mxu0 %vm361_vm2, %v29632_v31 }
 0x14c   :  { %25862 = vmatprep.mubr.msk.f32.mxu1 %vm29398_vm1, %v34032_v17  ;;  %25877 = vmatprep.mubr.msk.f32.mxu0 %vm29398_vm1, %v34032_v17  ;;  %v23694_v17 = vld [vmem:[%s34130_s7] ss:$0 sm:$0xff] }
 0x1c6   :  { %v431_v18 = vpop.f32.mrb[0].mxu1  ;;  %v501_v21 = vpop.f32.mrb[2].mxu0 }
 0x1c7   :  { %v25606_v22 = vpop.f32.mrb[1].mxu1  ;;  %v25617_v34 = vpop.f32.mrb[3].mxu0 }
 0x1c8   :  { %v23710_v22 = vld [vmem:[%s34131_s30] ss:$0 sm:$0xff]  ;;  %v432_v34 = vadd.f32 %v23694_v17, %v431_v18  ;;  %v23696_v17 = vld [vmem:[%s34130_s7 + $0x2] ss:$0 sm:$0xff]  ;;  %v23697_v18 = vld [vmem:[%s34130_s7 + $0x3] ss:$0 sm:$0xff] }
 0x1ca   :  { %v2141_v51 = vmul.f32 0.5, %v432_v34 }
 0x1ce   :  { %v571_v37 = vpop.f32.mrb[2].mxu1  ;;  %v641_v40 = vpop.f32.mrb[4].mxu0 }
 0x1cf   :  { %v25628_v45 = vpop.f32.mrb[3].mxu1  ;;  %v25639_v52 = vpop.f32.mrb[5].mxu0 }
 0x1d6   :  { %v711_v61 = vpop.f32.mrb[4].mxu1  ;;  %v781_v62 = vpop.f32.mrb[6].mxu0 }
 0x1d7   :  { %v25650_v63 = vpop.f32.mrb[5].mxu1  ;;  %v25661_v7 = vpop.f32.mrb[7].mxu0 }
 0x1d8   :  { %v23695_v7 = vld [vmem:[%s34130_s7 + $0x1] ss:$0 sm:$0xff] }
 0x1d9   :  { %v502_v23 = vadd.f32 %v23695_v7, %v501_v21  ;;  %v23713_v21 = vld [vmem:[%s34131_s30 + $0x3] ss:$0 sm:$0xff]  ;;  %v642_v7 = vadd.f32 %v23697_v18, %v641_v40  ;;  %v23715_v40 = vld [vmem:[%s34131_s30 + $0x5] ss:$0 sm:$0xff] }
 0x1db   :  { %v2142_v34 = vmul.f32 0.5, %v502_v23  ;;  %v2144_v6 = vmul.f32 0.5, %v642_v7  ;;  %v23698_v23 = vld [vmem:[%s34130_s7 + $0x4] ss:$0 sm:$0xff] }
 0x1de   :  { %v30151_v27 = vpop.f32.mrb[6].mxu1  ;;  %v30153_v31 = vpop.f32.mrb[8].mxu0 }
 0x1df   :  { %v25672_v4 = vpop.f32.mrb[7].mxu1  ;;  %v25683_v12 = vpop.f32.mrb[9].mxu0 }
 0x1e0   :  { %v23711_v12 = vld [vmem:[%s34131_s30 + $0x1] ss:$0 sm:$0xff] }
 0x1e6   :  { %v1039_v45 = vpop.f32.mrb[8].mxu1  ;;  %v1109_v52 = vpop.f32.mrb[10].mxu0 }
 0x1e7   :  { %v1040_v63 = vadd.f32 %v23710_v22, %v1039_v45  ;;  %v25694_v50 = vpop.f32.mrb[9].mxu1  ;;  %v25705_v4 = vpop.f32.mrb[11].mxu0  ;;  %v23712_v22 = vld [vmem:[%s34131_s30 + $0x2] ss:$0 sm:$0xff]  ;;  %v572_v45 = vadd.f32 %v23696_v17, %v571_v37  ;;  %v23714_v37 = vld [vmem:[%s34131_s30 + $0x4] ss:$0 sm:$0xff]  ;;  %v712_v17 = vadd.f32 %v23698_v23, %v711_v61 }
 0x1e8   :  { %v1110_v50 = vadd.f32 %v23711_v12, %v1109_v52  ;;  %v23700_v61 = vld [vmem:[%s34130_s7 + $0x6] ss:$0 sm:$0xff] }
 0x1e9   :  { %25861 = vmatpush3.xpose.msk.msra.mxu1 %vm2149_vm3, %v1040_v63 }
 0x1ea   :  { %25865 = vmatprep.subr.mxu1 %v34132_v33 }
 0x1ec   :  { %25863 = vmatmul.mubr.msk.f32.vlgmr.msra.gmra.mrb[24].mxu1 %vm2149_vm3, %v2141_v51 }
 0x1ed   :  { %25866 = vmatpush3.xpose.msk.msra.mxu1 %vm2149_vm3, %v1110_v50  ;;  %25867 = vmatprep.mubr.msk.f32.mxu1 %vm29398_vm1, %v34132_v33  ;;  %v2143_v50 = vmul.f32 0.5, %v572_v45 }
 0x1ee   :  { %v1179_v63 = vpop.f32.mrb[10].mxu1  ;;  %v1249_v52 = vpop.f32.mrb[12].mxu0  ;;  %25870 = vmatprep.subr.mxu1 %v34132_v33 }
 0x1ef   :  { %v1180_v51 = vadd.f32 %v23712_v22, %v1179_v63  ;;  %v1250_v4 = vadd.f32 %v23713_v21, %v1249_v52  ;;  %v25716_v12 = vpop.f32.mrb[11].mxu1  ;;  %v25727_v5 = vpop.f32.mrb[13].mxu0  ;;  %v2145_v63 = vmul.f32 0.5, %v712_v17 }
 0x1f0   :  { %25868 = vmatmul.mubr.msk.f32.vlgmr.msra.gmra.mrb[26].mxu1 %vm2149_vm3, %v2142_v34  ;;  %v23699_v5 = vld [vmem:[%s34130_s7 + $0x5] ss:$0 sm:$0xff]  ;;  %v852_v12 = vadd.f32 %v23700_v61, %v30151_v27  ;;  %v23726_v27 = vld [vmem:[%s34133_s9] ss:$0 sm:$0xff] }
 0x1f1   :  { %25871 = vmatpush3.xpose.msk.msra.mxu1 %vm2149_vm3, %v1180_v51  ;;  %25876 = vmatpush3.xpose.msk.msra.mxu0 %vm2149_vm3, %v1250_v4  ;;  %v782_v18 = vadd.f32 %v23699_v5, %v781_v62  ;;  %v23701_v62 = vld [vmem:[%s34130_s7 + $0x7] ss:$0 sm:$0xff]  ;;  %v23716_v51 = vld [vmem:[%s34131_s30 + $0x6] ss:$0 sm:$0xff] }
 0x1f2   :  { %25872 = vmatprep.mubr.msk.f32.mxu1 %vm29398_vm1, %v34132_v33  ;;  %25880 = vmatprep.subr.mxu1 %v34132_v33  ;;  %v23717_v4 = vld [vmem:[%s34131_s30 + $0x7] ss:$0 sm:$0xff] }
 0x1f3   :  { %25885 = vmatprep.subr.mxu0 %v34132_v33  ;;  %v2146_v52 = vmul.f32 0.5, %v782_v18 }
 0x1f4   :  { %25873 = vmatmul.mubr.msk.f32.vlgmr.msra.gmra.mrb[28].mxu1 %vm2149_vm3, %v2143_v50  ;;  %25878 = vmatmul.mubr.msk.f32.vlgmr.msra.gmra.mrb[26].mxu0 %vm2149_vm3, %v2144_v6  ;;  %v922_v50 = vadd.f32 %v23701_v62, %v30153_v31  ;;  %v30247_v31 = vld [vmem:[%s34133_s9 + $0x1] ss:$0 sm:$0xff] }
 0x1f5   :  { %25882 = vmatprep.mubr.msk.f32.mxu1 %vm29398_vm1, %v34132_v33  ;;  %25887 = vmatprep.mubr.msk.f32.mxu0 %vm29398_vm1, %v34132_v33  ;;  %34134 = vst [vmem:[#allocation26_spill] sm:$0xff] %v30247_v31 }
 0x1f6   :  { %v1319_v22 = vpop.f32.mrb[12].mxu1  ;;  %v1389_v21 = vpop.f32.mrb[14].mxu0 }
 0x1f7   :  { %v1320_v34 = vadd.f32 %v23714_v37, %v1319_v22  ;;  %v1390_v6 = vadd.f32 %v23715_v40, %v1389_v21  ;;  %v25738_v45 = vpop.f32.mrb[13].mxu1  ;;  %v25749_v7 = vpop.f32.mrb[15].mxu0  ;;  %v2147_v22 = vmul.f32 0.5, %v852_v12  ;;  %v2148_v21 = vmul.f32 0.5, %v922_v50 }
 0x1f9   :  { %25881 = vmatpush3.xpose.msk.msra.mxu1 %vm2149_vm3, %v1320_v34  ;;  %25886 = vmatpush3.xpose.msk.msra.mxu0 %vm2149_vm3, %v1390_v6 }
 0x1fa   :  { %25890 = vmatprep.subr.mxu1 %v34132_v33  ;;  %25895 = vmatprep.subr.mxu0 %v34132_v33 }
 0x1fc   :  { %25883 = vmatmul.mubr.msk.f32.vlgmr.msra.gmra.mrb[30].mxu1 %vm2149_vm3, %v2145_v63  ;;  %25888 = vmatmul.mubr.msk.f32.vlgmr.msra.gmra.mrb[28].mxu0 %vm2149_vm3, %v2146_v52 }
 0x1fd   :  { %25892 = vmatprep.mubr.msk.f32.mxu1 %vm29398_vm1, %v34132_v33  ;;  %25897 = vmatprep.mubr.msk.f32.mxu0 %vm29398_vm1, %v34132_v33 }
 0x1fe   :  { %v1459_v23 = vpop.f32.mrb[14].mxu1  ;;  %v1529_v5 = vpop.f32.mrb[16].mxu0 }
 0x1ff   :  { %v1460_v37 = vadd.f32 %v23716_v51, %v1459_v23  ;;  %v1530_v40 = vadd.f32 %v23717_v4, %v1529_v5  ;;  %v25760_v17 = vpop.f32.mrb[15].mxu1  ;;  %v25771_v18 = vpop.f32.mrb[17].mxu0 }
 0x201   :  { %25891 = vmatpush3.xpose.msk.msra.mxu1 %vm2149_vm3, %v1460_v37  ;;  %25896 = vmatpush3.xpose.msk.msra.mxu0 %vm2149_vm3, %v1530_v40 }
 0x202   :  { %25900 = vmatprep.subr.mxu1 %v34132_v33  ;;  %25905 = vmatprep.subr.mxu0 %v34132_v33 }
 0x204   :  { %25893 = vmatmul.mubr.msk.f32.vlgmr.msra.gmra.mrb[32].mxu1 %vm2149_vm3, %v2147_v22  ;;  %25898 = vmatmul.mubr.msk.f32.vlgmr.msra.gmra.mrb[30].mxu0 %vm2149_vm3, %v2148_v21 }
 0x205   :  { %25902 = vmatprep.mubr.msk.f32.mxu1 %vm29398_vm1, %v34132_v33  ;;  %25907 = vmatprep.mubr.msk.f32.mxu0 %vm29398_vm1, %v34132_v33 }
 0x206   :  { %v1647_v34 = vpop.f32.mrb[16].mxu1  ;;  %v1717_v6 = vpop.f32.mrb[18].mxu0 }
 0x207   :  { %v1648_v45 = vadd.f32 %v23726_v27, %v1647_v34  ;;  %v1718_v7 = vadd.f32 %v30247_v31, %v1717_v6  ;;  %v25782_v63 = vpop.f32.mrb[17].mxu1  ;;  %v25793_v52 = vpop.f32.mrb[19].mxu0 }
 0x209   :  { %25901 = vmatpush3.msra.mxu1 %v1648_v45  ;;  %25906 = vmatpush3.msra.mxu0 %v1718_v7 }
 0x20a   :  { %25910 = vmatprep.subr.mxu1 %v34132_v33  ;;  %25915 = vmatprep.subr.mxu0 %v34132_v33 }
 0x20e   :  { %v30256_v61 = vpop.f32.mrb[18].mxu1  ;;  %v30258_v62 = vpop.f32.mrb[20].mxu0 }
 0x20f   :  { %v25804_v51 = vpop.f32.mrb[19].mxu1  ;;  %v25815_v4 = vpop.f32.mrb[21].mxu0 }
 0x216   :  { %v30260_v12 = vpop.f32.mrb[20].mxu1  ;;  %v30262_v50 = vpop.f32.mrb[22].mxu0 }
 0x217   :  { %v25826_v23 = vpop.f32.mrb[21].mxu1  ;;  %v25837_v5 = vpop.f32.mrb[23].mxu0 }
 0x21e   :  { %v30264_v37 = vpop.f32.mrb[22].mxu1  ;;  %v30266_v40 = vpop.f32.mrb[24].mxu0 }
 0x21f   :  { %v25848_v17 = vpop.f32.mrb[23].mxu1  ;;  %v25859_v18 = vpop.f32.mrb[25].mxu0 }
 0x2bf   :  { %v2222_v22 = vpop.f32.mrb[24].mxu1 }
 0x2c0   :  { %v25864_v21 = vpop.f32.mrb[25].mxu1  ;;  %v2758_v27 = vsel %vm99_vm0, %v2222_v22, -inf }
 0x2c1   :  { %2759 = vmax.xlane.f32.xlu0 %v2758_v27 }
 0x2c3   :  { %v2298_v34 = vpop.f32.mrb[26].mxu1 }
 0x2c4   :  { %v25869_v6 = vpop.f32.mrb[27].mxu1  ;;  %v2761_v45 = vsel %vm99_vm0, %v2298_v34, -inf }
 0x2c5   :  { %2762 = vmax.xlane.f32.xlu0 %v2761_v45 }
 0x2c7   :  { %v2374_v7 = vpop.f32.mrb[28].mxu1  ;;  %v2450_v63 = vpop.f32.mrb[26].mxu0 }
 0x2c8   :  { %v25874_v52 = vpop.f32.mrb[29].mxu1  ;;  %v25879_v51 = vpop.f32.mrb[27].mxu0  ;;  %v2764_v4 = vsel %vm99_vm0, %v2374_v7, -inf  ;;  %v2767_v23 = vsel %vm99_vm0, %v2450_v63, -inf }
 0x2c9   :  { %2765 = vmax.xlane.f32.xlu1 %v2764_v4 }
 0x2cd   :  { %2768 = vmax.xlane.f32.xlu1 %v2767_v23 }
 0x2cf   :  { %v2526_v5 = vpop.f32.mrb[30].mxu1  ;;  %v2602_v17 = vpop.f32.mrb[28].mxu0 }
 0x2d0   :  { %v25884_v18 = vpop.f32.mrb[31].mxu1  ;;  %v25889_v21 = vpop.f32.mrb[29].mxu0  ;;  %v2773_v27 = vsel %vm99_vm0, %v2602_v17, -inf  ;;  %v2770_v6 = vsel %vm99_vm0, %v2526_v5, -inf }
 0x2d1   :  { %2774 = vmax.xlane.f32.xlu1 %v2773_v27  ;;  %2771 = vmax.xlane.f32.xlu0 %v2770_v6 }
 0x2d7   :  { %v2678_v45 = vpop.f32.mrb[32].mxu1  ;;  %v2754_v31 = vpop.f32.mrb[30].mxu0 }
 0x2d8   :  { %v25894_v52 = vpop.f32.mrb[33].mxu1  ;;  %v25899_v51 = vpop.f32.mrb[31].mxu0  ;;  %v2779_v55 = vsel %vm99_vm0, %v2754_v31, -inf  ;;  %v2776_v4 = vsel %vm99_vm0, %v2678_v45, -inf }
 0x2d9   :  { %2780 = vmax.xlane.f32.xlu1 %v2779_v55  ;;  %2777 = vmax.xlane.f32.xlu0 %v2776_v4 }
 0x34e   :  { %v2760_v23 = vpop.xlane.xlu0 %2759 }
 0x34f   :  { %v2782_v58 = vsub.f32 %v2222_v22, %v2760_v23 }
 0x351   :  { %v2790_v18 = vmul.f32 1.442695, %v2782_v58 }
 0x352   :  { %v2763_v21 = vpop.xlane.xlu0 %2762 }
 0x353   :  { %29068 = vpow2.f32 %v2790_v18  ;;  %v2783_v43 = vsub.f32 %v2298_v34, %v2763_v21 }
 0x355   :  { %v2792_v44 = vmul.f32 1.442695, %v2783_v43 }
 0x356   :  { %v2766_v25 = vpop.xlane.xlu1 %2765 }
 0x357   :  { %29070 = vpow2.f32 %v2792_v44  ;;  %v2784_v27 = vsub.f32 %v2374_v7, %v2766_v25 }
 0x359   :  { %v2794_v6 = vmul.f32 1.442695, %v2784_v27 }
 0x35a   :  { %v2769_v32 = vpop.xlane.xlu1 %2768 }
 0x35b   :  { %29072 = vpow2.f32 %v2794_v6  ;;  %v2785_v52 = vsub.f32 %v2450_v63, %v2769_v32 }
 0x35d   :  { %v29069_v51 = vpop.eup %29068  ;;  %v2796_v13 = vmul.f32 1.442695, %v2785_v52 }
 0x35e   :  { %v2775_v15 = vpop.xlane.xlu1 %2774  ;;  %v2772_v0 = vpop.xlane.xlu0 %2771  ;;  %v2806_v55 = vsel %vm99_vm0, %v29069_v51, 0.0 }
 0x35f   :  { %29074 = vpow2.f32 %v2796_v13  ;;  %v2787_v22 = vsub.f32 %v2602_v17, %v2775_v15  ;;  %v2786_v58 = vsub.f32 %v2526_v5, %v2772_v0  ;;  %2807 = vadd.xlane.f32.xlu0 %v2806_v55 }
 0x361   :  { %v29071_v4 = vpop.eup %29070  ;;  %v2800_v34 = vmul.f32 1.442695, %v2787_v22  ;;  %v2798_v43 = vmul.f32 1.442695, %v2786_v58 }
 0x362   :  { %v2809_v44 = vsel %vm99_vm0, %v29071_v4, 0.0 }
 0x363   :  { %29076 = vpow2.f32 %v2800_v34  ;;  %2810 = vadd.xlane.f32.xlu1 %v2809_v44 }
 0x364   :  { %29078 = vpow2.f32 %v2798_v43  ;;  %v23728_v43 = vld [vmem:[%s34133_s9 + $0x2] ss:$0 sm:$0xff] }
 0x365   :  { %v29073_v25 = vpop.eup %29072 }
 0x366   :  { %v2781_v32 = vpop.xlane.xlu1 %2780  ;;  %v2778_v7 = vpop.xlane.xlu0 %2777  ;;  %v2812_v63 = vsel %vm99_vm0, %v29073_v25, 0.0 }
 0x367   :  { %v2789_v23 = vsub.f32 %v2754_v31, %v2781_v32  ;;  %v2788_v18 = vsub.f32 %v2678_v45, %v2778_v7  ;;  %2813 = vadd.xlane.f32.xlu0 %v2812_v63  ;;  %v1788_v63 = vadd.f32 %v23728_v43, %v30256_v61  ;;  %v23732_v43 = vld [vmem:[%s34133_s9 + $0x6] ss:$0 sm:$0xff] }
 0x369   :  { %v29075_v13 = vpop.eup %29074  ;;  %v2804_v15 = vmul.f32 1.442695, %v2789_v23  ;;  %v2802_v0 = vmul.f32 1.442695, %v2788_v18  ;;  %v30303_v23 = vld [vmem:[%s34133_s9 + $0x3] ss:$0 sm:$0xff] }
 0x36a   :  { %v2815_v5 = vsel %vm99_vm0, %v29075_v13, 0.0  ;;  %v1858_v61 = vadd.f32 %v30303_v23, %v30258_v62  ;;  %v30322_v62 = vld [vmem:[%s34133_s9 + $0x5] ss:$0 sm:$0xff] }
 0x36b   :  { %29080 = vpow2.f32 %v2804_v15  ;;  %2816 = vadd.xlane.f32.xlu1 %v2815_v5  ;;  %v23730_v5 = vld [vmem:[%s34133_s9 + $0x4] ss:$0 sm:$0xff] }
 0x36c   :  { %29082 = vpow2.f32 %v2802_v0 }
 0x36d   :  { %v30280_v17 = vpop.eup %29076 }
 0x36e   :  { %v30282_v21 = vpop.eup %29078  ;;  %v2821_v27 = vsel %vm99_vm0, %v30280_v17, 0.0 }
 0x36f   :  { %2822 = vadd.xlane.f32.xlu1 %v2821_v27  ;;  %v2818_v31 = vsel %vm99_vm0, %v30282_v21, 0.0 }
 0x370   :  { %2819 = vadd.xlane.f32.xlu0 %v2818_v31  ;;  %v1928_v31 = vadd.f32 %v23730_v5, %v30260_v12  ;;  %v309_v5 = vld [vmem:[%s34135_s4 + $0x10] sm:$0xf] }
 0x375   :  { %v30288_v45 = vpop.eup %29080 }
 0x376   :  { %v30290_v6 = vpop.eup %29082  ;;  %v2827_v52 = vsel %vm99_vm0, %v30288_v45, 0.0 }
 0x377   :  { %2828 = vadd.xlane.f32.xlu1 %v2827_v52  ;;  %v2824_v55 = vsel %vm99_vm0, %v30290_v6, 0.0 }
 0x378   :  { %2825 = vadd.xlane.f32.xlu0 %v2824_v55 }
 0x3ec   :  { %v2808_v22 = vpop.xlane.xlu0 %2807 }
 0x3ed   :  { %29084 = vrcp.f32 %v2808_v22 }
 0x3f0   :  { %v2811_v58 = vpop.xlane.xlu1 %2810 }
 0x3f1   :  { %29086 = vrcp.f32 %v2811_v58  ;;  %v23733_v58 = vld [vmem:[%s34133_s9 + $0x7] ss:$0 sm:$0xff] }
 0x3f4   :  { %v2814_v34 = vpop.xlane.xlu0 %2813 }
 0x3f5   :  { %29088 = vrcp.f32 %v2814_v34 }
 0x3f7   :  { %v29085_v44 = vpop.eup %29084 }
 0x3f8   :  { %v2817_v32 = vpop.xlane.xlu1 %2816  ;;  %v2831_v7 = vmul.f32 %v29085_v44, %v29069_v51  ;;  %v2138_v44 = vadd.f32 %v23733_v58, %v30266_v40 }
 0x3f9   :  { %29090 = vrcp.f32 %v2817_v32 }
 0x3fa   :  { %25903 = vmatmul.mubr.msk.f32.vlgmr.msra.gmra.mrb[34].mxu1 %vm99_vm0, %v2831_v7  ;;  %v2068_v7 = vadd.f32 %v23732_v43, %v30264_v37 }
 0x3fb   :  { %v29087_v18 = vpop.eup %29086  ;;  %25911 = vmatpush3.msra.mxu1 %v1788_v63  ;;  %25912 = vmatprep.mubr.msk.f32.mxu1 %vm29398_vm1, %v34132_v33  ;;  %v30363_v63 = vld [vmem:[%s34135_s4] sm:$0xf] }
 0x3fc   :  { %v2823_v15 = vpop.xlane.xlu1 %2822  ;;  %v2833_v0 = vmul.f32 %v29087_v18, %v29071_v4  ;;  %25920 = vmatprep.subr.mxu1 %v34132_v33 }
 0x3fd   :  { %29092 = vrcp.f32 %v2823_v15  ;;  %v2820_v51 = vpop.xlane.xlu0 %2819 }
 0x3fe   :  { %29094 = vrcp.f32 %v2820_v51  ;;  %25908 = vmatmul.mubr.msk.f32.vlgmr.msra.gmra.mrb[32].mxu0 %vm99_vm0, %v2833_v0  ;;  %v30386_v0 = vld [vmem:[%s34135_s4 + $0xc] sm:$0xf] }
 0x3ff   :  { %v29089_v27 = vpop.eup %29088  ;;  %25916 = vmatpush3.msra.mxu0 %v1858_v61  ;;  %25917 = vmatprep.mubr.msk.f32.mxu0 %vm29398_vm1, %v34132_v33 }
 0x400   :  { %v2835_v4 = vmul.f32 %v29089_v27, %v29073_v25  ;;  %25925 = vmatprep.subr.mxu0 %v34132_v33  ;;  %v1998_v25 = vadd.f32 %v30322_v62, %v30262_v50 }
 0x402   :  { %25913 = vmatmul.mubr.msk.f32.vlgmr.msra.gmra.mrb[36].mxu1 %vm99_vm0, %v2835_v4 }
 0x403   :  { %v29091_v52 = vpop.eup %29090  ;;  %25921 = vmatpush3.msra.mxu1 %v1928_v31  ;;  %25922 = vmatprep.mubr.msk.f32.mxu1 %vm29398_vm1, %v34132_v33  ;;  %v30405_v31 = vld [vmem:[%s34135_s4 + $0x14] sm:$0xf] }
 0x404   :  { %v2829_v55 = vpop.xlane.xlu1 %2828  ;;  %v2837_v22 = vmul.f32 %v29091_v52, %v29075_v13  ;;  %25930 = vmatprep.subr.mxu1 %v34132_v33 }
 0x405   :  { %29096 = vrcp.f32 %v2829_v55  ;;  %v2826_v12 = vpop.xlane.xlu0 %2825 }
 0x406   :  { %29098 = vrcp.f32 %v2826_v12  ;;  %25918 = vmatmul.mubr.msk.f32.vlgmr.msra.gmra.mrb[34].mxu0 %vm99_vm0, %v2837_v22  ;;  %v312_v22 = vld [vmem:[%s34135_s4 + $0x1c] sm:$0xf]  ;;  %v311_v12 = vld [vmem:[%s34135_s4 + $0x18] sm:$0xf] }
 0x407   :  { %v29093_v34 = vpop.eup %29092  ;;  %25926 = vmatpush3.msra.mxu0 %v1998_v25  ;;  %25927 = vmatprep.mubr.msk.f32.mxu0 %vm29398_vm1, %v34132_v33 }
 0x408   :  { %v29095_v13 = vpop.eup %29094  ;;  %25935 = vmatprep.subr.mxu0 %v34132_v33  ;;  %v2841_v50 = vmul.f32 %v29093_v34, %v30280_v17 }
 0x409   :  { %v2839_v32 = vmul.f32 %v29095_v13, %v30282_v21  ;;  %v34136_v13 = vmov 0.0|0.0  }
 0x40a   :  { %25928 = vmatmul.mubr.msk.f32.vlgmr.msra.gmra.mrb[36].mxu0 %vm99_vm0, %v2841_v50 }
 0x40b   :  { %25923 = vmatmul.mubr.msk.f32.vlgmr.msra.gmra.mrb[38].mxu1 %vm99_vm0, %v2839_v32  ;;  %25936 = vmatpush3.msra.mxu0 %v2138_v44 }
 0x40c   :  { %25931 = vmatpush3.msra.mxu1 %v2068_v7  ;;  %25932 = vmatprep.mubr.msk.f32.mxu1 %vm29398_vm1, %v34132_v33 }
 0x40d   :  { %25937 = vmatprep.mubr.msk.f32.mxu0 %vm29398_vm1, %v34132_v33  ;;  %25940 = vmatprep.subr.mxu1 %v34132_v33 }
 0x40e   :  { %25945 = vmatprep.subr.mxu0 %v34132_v33 }
 0x40f   :  { %v29097_v40 = vpop.eup %29096 }
 0x410   :  { %v29099_v17 = vpop.eup %29098  ;;  %v2845_v37 = vmul.f32 %v29097_v40, %v30288_v45  ;;  %v30371_v45 = vld [vmem:[%s34135_s4 + $0x4] sm:$0xf]  ;;  %v182_v40 = vld [vmem:[%s34108_s29 + $0x8] sm:$0xff]  ;;  %s34155_s29 = sld [smem:[#allocation38_spill]] }
 0x411   :  { %v2843_v21 = vmul.f32 %v29099_v17, %v30290_v6  ;;  %v307_v6 = vld [vmem:[%s34135_s4 + $0x8] sm:$0xf] }
 0x412   :  { %25938 = vmatmul.mubr.msk.f32.vlgmr.msra.gmra.mrb[38].mxu0 %vm99_vm0, %v2845_v37 }
 0x413   :  { %25933 = vmatmul.mubr.msk.f32.vlgmr.msra.gmra.mrb[40].mxu1 %vm99_vm0, %v2843_v21  ;;  %25947 = vmatprep.mubr.msk.f32.mxu0 %vm29398_vm1, %v34132_v33 }
 0x414   :  { %25942 = vmatprep.mubr.msk.f32.mxu1 %vm29398_vm1, %v34132_v33  ;;  %25941 = vmatpush3.msk.msra.mxu1 %vm3433_vm4, %v30363_v63 }
 0x415   :  { %25950 = vmatprep.subr.mxu1 %v34132_v33  ;;  %25946 = vmatpush3.msk.msra.mxu0 %vm3433_vm4, %v30371_v45 }
 0x416   :  { %25955 = vmatprep.subr.mxu0 %v34132_v33 }
 0x4cd   :  { %v2915_v18 = vpop.f32.mrb[34].mxu1 }
 0x4ce   :  { %v25904_v15 = vpop.f32.mrb[35].mxu1  ;;  %25943 = vmatmul.mubr.msk.f32.vlgmr.msra.gmra.mrb[42].mxu1 %vm2149_vm3, %v2915_v18 }
 0x4cf   :  { %25951 = vmatpush3.msk.msra.mxu1 %vm3433_vm4, %v307_v6  ;;  %25952 = vmatprep.mubr.msk.f32.mxu1 %vm29398_vm1, %v34132_v33 }
 0x4d0   :  { %25960 = vmatprep.subr.mxu1 %v34132_v33 }
 0x4d1   :  { %v2988_v61 = vpop.f32.mrb[32].mxu0 }
 0x4d2   :  { %v25909_v51 = vpop.f32.mrb[33].mxu0  ;;  %25948 = vmatmul.mubr.msk.f32.vlgmr.msra.gmra.mrb[40].mxu0 %vm2149_vm3, %v2988_v61 }
 0x4d3   :  { %25956 = vmatpush3.msk.msra.mxu0 %vm3433_vm4, %v30386_v0  ;;  %25957 = vmatprep.mubr.msk.f32.mxu0 %vm29398_vm1, %v34132_v33 }
 0x4d4   :  { %25965 = vmatprep.subr.mxu0 %v34132_v33 }
 0x4d5   :  { %v3061_v27 = vpop.f32.mrb[36].mxu1 }
 0x4d6   :  { %v25914_v4 = vpop.f32.mrb[37].mxu1  ;;  %25953 = vmatmul.mubr.msk.f32.vlgmr.msra.gmra.mrb[44].mxu1 %vm2149_vm3, %v3061_v27 }
 0x4d7   :  { %25961 = vmatpush3.msk.msra.mxu1 %vm3433_vm4, %v309_v5  ;;  %25962 = vmatprep.mubr.msk.f32.mxu1 %vm29398_vm1, %v34132_v33 }
 0x4d8   :  { %25970 = vmatprep.subr.mxu1 %v34132_v33 }
 0x4d9   :  { %v3134_v52 = vpop.f32.mrb[34].mxu0 }
 0x4da   :  { %v25919_v55 = vpop.f32.mrb[35].mxu0  ;;  %25958 = vmatmul.mubr.msk.f32.vlgmr.msra.gmra.mrb[42].mxu0 %vm2149_vm3, %v3134_v52 }
 0x4db   :  { %25966 = vmatpush3.msk.msra.mxu0 %vm3433_vm4, %v30405_v31  ;;  %25967 = vmatprep.mubr.msk.f32.mxu0 %vm29398_vm1, %v34132_v33 }
 0x4dc   :  { %25975 = vmatprep.subr.mxu0 %v34132_v33 }
 0x4dd   :  { %v3280_v25 = vpop.f32.mrb[36].mxu0 }
 0x4de   :  { %v3207_v58 = vpop.f32.mrb[38].mxu1  ;;  %v25929_v34 = vpop.f32.mrb[37].mxu0  ;;  %25968 = vmatmul.mubr.msk.f32.vlgmr.msra.gmra.mrb[44].mxu0 %vm2149_vm3, %v3280_v25 }
 0x4df   :  { %v25924_v43 = vpop.f32.mrb[39].mxu1  ;;  %25963 = vmatmul.mubr.msk.f32.vlgmr.msra.gmra.mrb[46].mxu1 %vm2149_vm3, %v3207_v58  ;;  %25976 = vmatpush3.msk.msra.mxu0 %vm3433_vm4, %v312_v22 }
 0x4e0   :  { %25971 = vmatpush3.msk.msra.mxu1 %vm3433_vm4, %v311_v12  ;;  %25972 = vmatprep.mubr.msk.f32.mxu1 %vm29398_vm1, %v34132_v33 }
 0x4e1   :  { %25977 = vmatprep.mubr.msk.f32.mxu0 %vm29398_vm1, %v34132_v33  ;;  %28204 = vmatprep.subr.bf16.mxu1 %v34136_v13 }
 0x4e2   :  { %28210 = vmatprep.subr.bf16.mxu0 %v34136_v13 }
 0x4e5   :  { %v3426_v50 = vpop.f32.mrb[38].mxu0 }
 0x4e6   :  { %v3353_v44 = vpop.f32.mrb[40].mxu1  ;;  %v25939_v32 = vpop.f32.mrb[39].mxu0  ;;  %25978 = vmatmul.mubr.msk.f32.vlgmr.msra.gmra.mrb[46].mxu0 %vm2149_vm3, %v3426_v50 }
 0x4e7   :  { %v25934_v7 = vpop.f32.mrb[41].mxu1  ;;  %25973 = vmatmul.mubr.msk.f32.vlgmr.msra.gmra.mrb[48].mxu1 %vm2149_vm3, %v3353_v44  ;;  %28212 = vmatpush3.bf16.msra.mxu0 %v29572_v10  ;;  %v30445_v10 = vadd.f32 %v182_v40, %v29617_v24 }
 0x4e8   :  { %28206 = vmatpush3.bf16.msra.mxu1 %v29565_v8  ;;  %28213 = vmatprep.subr.bf16.mxu0 %v34136_v13  ;;  %v34137_v8 = vld [vmem:[#allocation9_spill] sm:$0xff] }
 0x4e9   :  { %28207 = vmatprep.subr.bf16.mxu1 %v34136_v13  ;;  %25988 = vmatprep.mubr.msk.f32.mxu1 %vm29398_vm1, %v34132_v33 }
 0x4ea   :  { %25999 = vmatprep.mubr.msk.f32.mxu0 %vm29398_vm1, %v34132_v33 }
 0x4eb   :  { %28215 = vmatpush3.bf16.msra.mxu0 %v29592_v16  ;;  %v34139_v16 = vld [vmem:[#allocation10_spill] sm:$0xff] }
 0x4ec   :  { %28209 = vmatpush3.bf16.msra.mxu1 %v29587_v14  ;;  %28222 = vmatprep.subr.bf16.mxu0 %v34136_v13  ;;  %v34138_v14 = vld [vmem:[#allocation11_spill] sm:$0xff] }
 0x4ed   :  { %28216 = vmatprep.subr.bf16.mxu1 %v34136_v13 }
 0x4ee   :  { %26000 = vmatmul.mubr.msk.f32.vlgmr.msra.gmra.mrb[48].mxu0 %vm361_vm2, %v30445_v10 }
 0x4ef   :  { %25989 = vmatmul.mubr.msk.f32.vlgmr.msra.gmra.mrb[50].mxu1 %vm361_vm2, %v30445_v10  ;;  %28224 = vmatpush3.bf16.msra.mxu0 %v29626_v29  ;;  %v34141_v29 = vld [vmem:[#allocation12_spill] sm:$0xff] }
 0x4f0   :  { %28218 = vmatpush3.bf16.msra.mxu1 %v29624_v28  ;;  %28225 = vmatprep.subr.bf16.mxu0 %v34136_v13  ;;  %v34140_v28 = vld [vmem:[#allocation13_spill] sm:$0xff] }
 0x4f1   :  { %28219 = vmatprep.subr.bf16.mxu1 %v34136_v13  ;;  %26010 = vmatprep.mubr.msk.f32.mxu1 %vm29398_vm1, %v34132_v33 }
 0x4f2   :  { %26021 = vmatprep.mubr.msk.f32.mxu0 %vm29398_vm1, %v34132_v33 }
 0x4f3   :  { %28227 = vmatpush3.bf16.msra.mxu0 %v29651_v36  ;;  %v34143_v36 = vld [vmem:[#allocation14_spill] sm:$0xff] }
 0x4f4   :  { %28221 = vmatpush3.bf16.msra.mxu1 %v29649_v35  ;;  %28234 = vmatprep.subr.bf16.mxu0 %v34136_v13  ;;  %v34142_v35 = vld [vmem:[#allocation15_spill] sm:$0xff] }
 0x4f5   :  { %28228 = vmatprep.subr.bf16.mxu1 %v34136_v13 }
 0x4f6   :  { %26022 = vmatmul.mubr.msk.f32.vlgmr.msra.gmra.mrb[50].mxu0 %vm361_vm2, %v30445_v10 }
 0x4f7   :  { %26011 = vmatmul.mubr.msk.f32.vlgmr.msra.gmra.mrb[52].mxu1 %vm361_vm2, %v30445_v10  ;;  %28236 = vmatpush3.bf16.msra.mxu0 %v29675_v42  ;;  %v34145_v42 = vld [vmem:[#allocation16_spill] sm:$0xff] }
 0x4f8   :  { %28230 = vmatpush3.bf16.msra.mxu1 %v29673_v41  ;;  %28237 = vmatprep.subr.bf16.mxu0 %v34136_v13  ;;  %v34144_v41 = vld [vmem:[#allocation17_spill] sm:$0xff] }
 0x4f9   :  { %28231 = vmatprep.subr.bf16.mxu1 %v34136_v13  ;;  %26032 = vmatprep.mubr.msk.f32.mxu1 %vm29398_vm1, %v34132_v33 }
 0x4fa   :  { %26043 = vmatprep.mubr.msk.f32.mxu0 %vm29398_vm1, %v34132_v33 }
 0x4fb   :  { %28239 = vmatpush3.bf16.msra.mxu0 %v29699_v48  ;;  %v34147_v48 = vld [vmem:[#allocation18_spill] sm:$0xff] }
 0x4fc   :  { %28233 = vmatpush3.bf16.msra.mxu1 %v29697_v47  ;;  %28246 = vmatprep.subr.bf16.mxu0 %v34136_v13  ;;  %v34146_v47 = vld [vmem:[#allocation19_spill] sm:$0xff] }
 0x4fd   :  { %28240 = vmatprep.subr.bf16.mxu1 %v34136_v13 }
 0x4fe   :  { %26044 = vmatmul.mubr.msk.f32.vlgmr.msra.gmra.mrb[52].mxu0 %vm361_vm2, %v30445_v10 }
 0x4ff   :  { %26033 = vmatmul.mubr.msk.f32.vlgmr.msra.gmra.mrb[54].mxu1 %vm361_vm2, %v30445_v10  ;;  %28248 = vmatpush3.bf16.msra.mxu0 %v29723_v54  ;;  %v34149_v54 = vld [vmem:[#allocation20_spill] sm:$0xff] }
 0x500   :  { %28242 = vmatpush3.bf16.msra.mxu1 %v29721_v53  ;;  %28249 = vmatprep.subr.bf16.mxu0 %v34136_v13  ;;  %v34148_v53 = vld [vmem:[#allocation21_spill] sm:$0xff] }
 0x501   :  { %28243 = vmatprep.subr.bf16.mxu1 %v34136_v13  ;;  %26054 = vmatprep.mubr.msk.f32.mxu1 %vm29398_vm1, %v34132_v33 }
 0x502   :  { %26065 = vmatprep.mubr.msk.f32.mxu0 %vm29398_vm1, %v34132_v33 }
 0x503   :  { %28251 = vmatpush3.bf16.msra.mxu0 %v29747_v60  ;;  %v34151_v60 = vld [vmem:[#allocation22_spill] sm:$0xff] }
 0x504   :  { %28245 = vmatpush3.bf16.msra.mxu1 %v29745_v59  ;;  %28258 = vmatprep.subr.bf16.mxu0 %v34136_v13  ;;  %v34150_v59 = vld [vmem:[#allocation23_spill] sm:$0xff] }
 0x505   :  { %28252 = vmatprep.subr.bf16.mxu1 %v34136_v13 }
 0x506   :  { %26066 = vmatmul.mubr.msk.f32.vlgmr.msra.gmra.mrb[54].mxu0 %vm361_vm2, %v30445_v10 }
 0x507   :  { %26055 = vmatmul.mubr.msk.f32.vlgmr.msra.gmra.mrb[56].mxu1 %vm361_vm2, %v30445_v10  ;;  %28260 = vmatpush3.bf16.msra.mxu0 %v29771_v2  ;;  %v34153_v2 = vld [vmem:[#allocation24_spill] sm:$0xff] }
 0x508   :  { %28254 = vmatpush3.bf16.msra.mxu1 %v29769_v1  ;;  %28261 = vmatprep.subr.bf16.mxu0 %v34136_v13  ;;  %v34152_v1 = vld [vmem:[#allocation25_spill] sm:$0xff] }
 0x509   :  { %28255 = vmatprep.subr.bf16.mxu1 %v34136_v13  ;;  %26076 = vmatprep.mubr.msk.f32.mxu1 %vm29398_vm1, %v34132_v33 }
 0x50a   :  { %26087 = vmatprep.mubr.msk.f32.mxu0 %vm29398_vm1, %v34132_v33 }
 0x50b   :  { %28263 = vmatpush3.bf16.msra.mxu0 %v29795_v11 }
 0x50c   :  { %28257 = vmatpush3.bf16.msra.mxu1 %v29793_v9  ;;  %28270 = vmatprep.subr.bf16.mxu0 %v34136_v13 }
 0x50d   :  { %28264 = vmatprep.subr.bf16.mxu1 %v34136_v13 }
 0x50e   :  { %26088 = vmatmul.mubr.msk.f32.vlgmr.msra.gmra.mrb[56].mxu0 %vm361_vm2, %v30445_v10 }
 0x50f   :  { %26077 = vmatmul.mubr.msk.f32.vlgmr.msra.gmra.mrb[58].mxu1 %vm361_vm2, %v30445_v10  ;;  %28272 = vmatpush3.bf16.msra.mxu0 %v29819_v20 }
 0x510   :  { %28266 = vmatpush3.bf16.msra.mxu1 %v29817_v19  ;;  %28273 = vmatprep.subr.bf16.mxu0 %v34136_v13 }
 0x511   :  { %28267 = vmatprep.subr.bf16.mxu1 %v34136_v13  ;;  %26098 = vmatprep.mubr.msk.f32.mxu1 %vm29398_vm1, %v34132_v33 }
 0x512   :  { %26109 = vmatprep.mubr.msk.f32.mxu0 %vm29398_vm1, %v34132_v33 }
 0x513   :  { %28275 = vmatpush3.bf16.msra.mxu0 %v29843_v30 }
 0x514   :  { %28269 = vmatpush3.bf16.msra.mxu1 %v29841_v26  ;;  %28282 = vmatprep.subr.bf16.mxu0 %v34136_v13 }
 0x515   :  { %28276 = vmatprep.subr.bf16.mxu1 %v34136_v13 }
 0x516   :  { %26110 = vmatmul.mubr.msk.f32.vlgmr.msra.gmra.mrb[58].mxu0 %vm361_vm2, %v30445_v10 }
 0x517   :  { %26099 = vmatmul.mubr.msk.f32.vlgmr.msra.gmra.mrb[60].mxu1 %vm361_vm2, %v30445_v10  ;;  %28284 = vmatpush3.bf16.msra.mxu0 %v29867_v39 }
 0x518   :  { %28278 = vmatpush3.bf16.msra.mxu1 %v29865_v38  ;;  %28285 = vmatprep.subr.bf16.mxu0 %v34136_v13 }
 0x519   :  { %28279 = vmatprep.subr.bf16.mxu1 %v34136_v13  ;;  %26120 = vmatprep.mubr.msk.f32.mxu1 %vm29398_vm1, %v34132_v33 }
 0x51a   :  { %26131 = vmatprep.mubr.msk.f32.mxu0 %vm29398_vm1, %v34132_v33 }
 0x51b   :  { %28287 = vmatpush3.bf16.msra.mxu0 %v29891_v49 }
 0x51c   :  { %28281 = vmatpush3.bf16.msra.mxu1 %v29889_v46  ;;  %28294 = vmatprep.subr.bf16.mxu0 %v34136_v13 }
 0x51d   :  { %28288 = vmatprep.subr.bf16.mxu1 %v34136_v13 }
 0x51e   :  { %26132 = vmatmul.mubr.msk.f32.vlgmr.msra.gmra.mrb[60].mxu0 %vm361_vm2, %v30445_v10 }
 0x51f   :  { %26121 = vmatmul.mubr.msk.f32.vlgmr.msra.gmra.mrb[62].mxu1 %vm361_vm2, %v30445_v10  ;;  %28296 = vmatpush3.bf16.msra.mxu0 %v29915_v57 }
 0x520   :  { %28290 = vmatpush3.bf16.msra.mxu1 %v29913_v56  ;;  %28297 = vmatprep.subr.bf16.mxu0 %v34136_v13 }
 0x521   :  { %28291 = vmatprep.subr.bf16.mxu1 %v34136_v13  ;;  %26142 = vmatprep.mubr.msk.f32.mxu1 %vm29398_vm1, %v34132_v33 }
 0x522   :  { %26153 = vmatprep.mubr.msk.f32.mxu0 %vm29398_vm1, %v34132_v33 }
 0x523   :  { %28299 = vmatpush3.bf16.msra.mxu0 %v29939_v3 }
 0x524   :  { %28293 = vmatpush3.bf16.msra.mxu1 %v34137_v8  ;;  %28306 = vmatprep.subr.bf16.mxu0 %v34136_v13 }
 0x525   :  { %28300 = vmatprep.subr.bf16.mxu1 %v34136_v13 }
 0x526   :  { %26154 = vmatmul.mubr.msk.f32.vlgmr.msra.gmra.mrb[62].mxu0 %vm361_vm2, %v30445_v10 }
 0x527   :  { %26143 = vmatmul.mubr.msk.f32.vlgmr.msra.gmra.mrb[64].mxu1 %vm361_vm2, %v30445_v10  ;;  %28308 = vmatpush3.bf16.msra.mxu0 %v34138_v14 }
 0x528   :  { %28302 = vmatpush3.bf16.msra.mxu1 %v34139_v16  ;;  %28309 = vmatprep.subr.bf16.mxu0 %v34136_v13 }
 0x529   :  { %28303 = vmatprep.subr.bf16.mxu1 %v34136_v13  ;;  %26164 = vmatprep.mubr.msk.f32.mxu1 %vm29398_vm1, %v34132_v33 }
 0x52a   :  { %26175 = vmatprep.mubr.msk.f32.mxu0 %vm29398_vm1, %v34132_v33 }
 0x52b   :  { %28311 = vmatpush3.bf16.msra.mxu0 %v34140_v28 }
 0x52c   :  { %28305 = vmatpush3.bf16.msra.mxu1 %v34141_v29  ;;  %28318 = vmatprep.subr.bf16.mxu0 %v34136_v13 }
 0x52d   :  { %28312 = vmatprep.subr.bf16.mxu1 %v34136_v13 }
 0x52e   :  { %26176 = vmatmul.mubr.msk.f32.vlgmr.msra.gmra.mrb[64].mxu0 %vm361_vm2, %v30445_v10 }
 0x52f   :  { %26165 = vmatmul.mubr.msk.f32.vlgmr.msra.gmra.mrb[66].mxu1 %vm361_vm2, %v30445_v10  ;;  %28320 = vmatpush3.bf16.msra.mxu0 %v34142_v35 }
 0x530   :  { %28314 = vmatpush3.bf16.msra.mxu1 %v34143_v36  ;;  %28321 = vmatprep.subr.bf16.mxu0 %v34136_v13 }
 0x531   :  { %28315 = vmatprep.subr.bf16.mxu1 %v34136_v13  ;;  %26186 = vmatprep.mubr.msk.f32.mxu1 %vm29398_vm1, %v34132_v33 }
 0x532   :  { %26197 = vmatprep.mubr.msk.f32.mxu0 %vm29398_vm1, %v34132_v33 }
 0x533   :  { %28323 = vmatpush3.bf16.msra.mxu0 %v34144_v41 }
 0x534   :  { %28317 = vmatpush3.bf16.msra.mxu1 %v34145_v42  ;;  %28330 = vmatprep.subr.bf16.mxu0 %v34136_v13 }
 0x535   :  { %28324 = vmatprep.subr.bf16.mxu1 %v34136_v13 }
 0x536   :  { %26198 = vmatmul.mubr.msk.f32.vlgmr.msra.gmra.mrb[66].mxu0 %vm361_vm2, %v30445_v10 }
 0x537   :  { %26187 = vmatmul.mubr.msk.f32.vlgmr.msra.gmra.mrb[68].mxu1 %vm361_vm2, %v30445_v10  ;;  %28332 = vmatpush3.bf16.msra.mxu0 %v34146_v47 }
 0x538   :  { %28326 = vmatpush3.bf16.msra.mxu1 %v34147_v48  ;;  %28333 = vmatprep.subr.bf16.mxu0 %v34136_v13  ;;  %v29288_v48 = vld [vmem:[%s34130_s7 + $0x1] ss:$0 sm:$0xff] }
 0x539   :  { %28327 = vmatprep.subr.bf16.mxu1 %v34136_v13  ;;  %26208 = vmatprep.mubr.msk.f32.mxu1 %vm29398_vm1, %v34132_v33 }
 0x53a   :  { %26219 = vmatprep.mubr.msk.f32.mxu0 %vm29398_vm1, %v34132_v33 }
 0x53b   :  { %28335 = vmatpush3.bf16.msra.mxu0 %v34148_v53 }
 0x53c   :  { %28329 = vmatpush3.bf16.msra.mxu1 %v34149_v54  ;;  %28342 = vmatprep.subr.bf16.mxu0 %v34136_v13 }
 0x53d   :  { %28336 = vmatprep.subr.bf16.mxu1 %v34136_v13 }
 0x53e   :  { %26220 = vmatmul.mubr.msk.f32.vlgmr.msra.gmra.mrb[68].mxu0 %vm361_vm2, %v30445_v10 }
 0x53f   :  { %26209 = vmatmul.mubr.msk.f32.vlgmr.msra.gmra.mrb[70].mxu1 %vm361_vm2, %v30445_v10  ;;  %28344 = vmatpush3.bf16.msra.mxu0 %v34150_v59  ;;  %v29289_v59 = vld [vmem:[%s34130_s7] ss:$0 sm:$0xff] }
 0x540   :  { %28338 = vmatpush3.bf16.msra.mxu1 %v34151_v60  ;;  %28345 = vmatprep.subr.bf16.mxu0 %v34136_v13 }
 0x541   :  { %28339 = vmatprep.subr.bf16.mxu1 %v34136_v13  ;;  %26230 = vmatprep.mubr.msk.f32.mxu1 %vm29398_vm1, %v34132_v33 }
 0x542   :  { %26241 = vmatprep.mubr.msk.f32.mxu0 %vm29398_vm1, %v34132_v33 }
 0x543   :  { %28347 = vmatpush3.bf16.msra.mxu0 %v34152_v1 }
 0x544   :  { %28341 = vmatpush3.bf16.msra.mxu1 %v34153_v2  ;;  %26249 = vmatprep.subr.mxu0 %v34132_v33  ;;  %v29290_v2 = vld [vmem:[%s34131_s30 + $0x1] ss:$0 sm:$0xff] }
 0x545   :  { %26244 = vmatprep.subr.mxu1 %v34132_v33 }
 0x546   :  { %26242 = vmatmul.mubr.msk.f32.vlgmr.msra.gmra.mrb[70].mxu0 %vm361_vm2, %v30445_v10 }
 0x547   :  { %26231 = vmatmul.mubr.msk.f32.vlgmr.msra.gmra.mrb[72].mxu1 %vm361_vm2, %v30445_v10  ;;  %26251 = vmatprep.mubr.msk.f32.mxu0 %vm29398_vm1, %v34132_v33 }
 0x548   :  { %26246 = vmatprep.mubr.msk.f32.mxu1 %vm29398_vm1, %v34132_v33 }
 0x5a1   :  { %v3503_v9 = vpop.f32.mrb[42].mxu1 }
 0x5a2   :  { %v25944_v11 = vpop.f32.mrb[43].mxu1  ;;  %v4039_v20 = vsel %vm361_vm2, %v3503_v9, 0.0 }
 0x5a5   :  { %v3579_v19 = vpop.f32.mrb[40].mxu0 }
 0x5a6   :  { %v4040_v26 = vsel %vm361_vm2, %v3579_v19, 0.0  ;;  %v25949_v30 = vpop.f32.mrb[41].mxu0  ;;  %v29291_v19 = vld [vmem:[%s34131_s30] ss:$0 sm:$0xff] }
 0x5a7   :  { %v4041_v38 = vadd.f32 %v4040_v26, %v4039_v20 }
 0x5a9   :  { %v3655_v39 = vpop.f32.mrb[44].mxu1 }
 0x5aa   :  { %v25954_v46 = vpop.f32.mrb[45].mxu1  ;;  %v4042_v49 = vsel %vm361_vm2, %v3655_v39, 0.0  ;;  %v29292_v39 = vld [vmem:[%s34130_s7 + $0x3] ss:$0 sm:$0xff] }
 0x5ab   :  { %v4043_v56 = vadd.f32 %v4042_v49, %v4041_v38 }
 0x5ad   :  { %v3731_v57 = vpop.f32.mrb[42].mxu0 }
 0x5ae   :  { %v4044_v3 = vsel %vm361_vm2, %v3731_v57, 0.0  ;;  %v25959_v17 = vpop.f32.mrb[43].mxu0 }
 0x5af   :  { %v4045_v37 = vadd.f32 %v4044_v3, %v4043_v56  ;;  %v29293_v56 = vld [vmem:[%s34130_s7 + $0x2] ss:$0 sm:$0xff]  ;;  %v29294_v17 = vld [vmem:[%s34131_s30 + $0x3] ss:$0 sm:$0xff] }
 0x5b1   :  { %v3883_v21 = vpop.f32.mrb[44].mxu0 }
 0x5b2   :  { %v3807_v6 = vpop.f32.mrb[46].mxu1  ;;  %v25969_v18 = vpop.f32.mrb[45].mxu0  ;;  %v4048_v5 = vsel %vm361_vm2, %v3883_v21, 0.0 }
 0x5b3   :  { %v4046_v15 = vsel %vm361_vm2, %v3807_v6, 0.0  ;;  %v25964_v61 = vpop.f32.mrb[47].mxu1  ;;  %v29295_v6 = vld [vmem:[%s34131_s30 + $0x2] ss:$0 sm:$0xff] }
 0x5b4   :  { %v4047_v51 = vadd.f32 %v4046_v15, %v4045_v37 }
 0x5b6   :  { %v4049_v27 = vadd.f32 %v4048_v5, %v4047_v51  ;;  %v29296_v5 = vld [vmem:[%s34130_s7 + $0x5] ss:$0 sm:$0xff] }
 0x5b9   :  { %v4035_v4 = vpop.f32.mrb[46].mxu0 }
 0x5ba   :  { %v3959_v52 = vpop.f32.mrb[48].mxu1  ;;  %v25979_v55 = vpop.f32.mrb[47].mxu0  ;;  %v4052_v58 = vsel %vm361_vm2, %v4035_v4, 0.0 }
 0x5bb   :  { %v4050_v22 = vsel %vm361_vm2, %v3959_v52, 0.0  ;;  %v25974_v25 = vpop.f32.mrb[49].mxu1  ;;  %v29297_v52 = vld [vmem:[%s34130_s7 + $0x4] ss:$0 sm:$0xff] }
 0x5bc   :  { %v4051_v12 = vadd.f32 %v4050_v22, %v4049_v27  ;;  %v29298_v25 = vld [vmem:[%s34131_s30 + $0x5] ss:$0 sm:$0xff] }
 0x5be   :  { %v30642_v34 = vadd.f32 %v4052_v58, %v4051_v12 }
 0x5c1   :  { %v4193_v43 = vpop.f32.mrb[48].mxu0 }
 0x5c2   :  { %v4123_v50 = vpop.f32.mrb[50].mxu1  ;;  %v26001_v44 = vpop.f32.mrb[49].mxu0  ;;  %v4194_v53 = vadd.f32 %v29288_v48, %v4193_v43  ;;  %v29299_v43 = vld [vmem:[%s34131_s30 + $0x4] ss:$0 sm:$0xff] }
 0x5c3   :  { %v25990_v32 = vpop.f32.mrb[51].mxu1  ;;  %v4124_v60 = vadd.f32 %v29289_v59, %v4123_v50 }
 0x5c4   :  { %v5738_v30 = vmul.f32 0.5, %v4194_v53 }
 0x5c5   :  { %v5737_v38 = vmul.f32 0.5, %v4124_v60 }
 0x5c9   :  { %v4333_v7 = vpop.f32.mrb[50].mxu0 }
 0x5ca   :  { %v4263_v40 = vpop.f32.mrb[52].mxu1  ;;  %v26023_v8 = vpop.f32.mrb[51].mxu0  ;;  %v4334_v46 = vadd.f32 %v29292_v39, %v4333_v7 }
 0x5cb   :  { %v26012_v14 = vpop.f32.mrb[53].mxu1  ;;  %v4264_v57 = vadd.f32 %v29293_v56, %v4263_v40  ;;  %v29300_v40 = vld [vmem:[%s34130_s7 + $0x7] ss:$0 sm:$0xff] }
 0x5cc   :  { %v5740_v61 = vmul.f32 0.5, %v4334_v46 }
 0x5cd   :  { %v5739_v51 = vmul.f32 0.5, %v4264_v57 }
 0x5d1   :  { %v4473_v16 = vpop.f32.mrb[52].mxu0 }
 0x5d2   :  { %v4403_v28 = vpop.f32.mrb[54].mxu1  ;;  %v26045_v29 = vpop.f32.mrb[53].mxu0  ;;  %v4474_v27 = vadd.f32 %v29296_v5, %v4473_v16  ;;  %v29301_v16 = vld [vmem:[%s34130_s7 + $0x6] ss:$0 sm:$0xff] }
 0x5d3   :  { %v26034_v35 = vpop.f32.mrb[55].mxu1  ;;  %v4404_v55 = vadd.f32 %v29297_v52, %v4403_v28 }
 0x5d4   :  { %v5742_v32 = vmul.f32 0.5, %v4474_v27  ;;  %v29302_v35 = vld [vmem:[%s34131_s30 + $0x7] ss:$0 sm:$0xff] }
 0x5d5   :  { %v5741_v7 = vmul.f32 0.5, %v4404_v55 }
 0x5d9   :  { %v30644_v36 = vpop.f32.mrb[54].mxu0 }
 0x5da   :  { %v30646_v41 = vpop.f32.mrb[56].mxu1  ;;  %v26067_v42 = vpop.f32.mrb[55].mxu0  ;;  %v4614_v8 = vadd.f32 %v29300_v40, %v30644_v36  ;;  %v29303_v36 = vld [vmem:[%s34131_s30 + $0x6] ss:$0 sm:$0xff] }
 0x5db   :  { %v26056_v47 = vpop.f32.mrb[57].mxu1  ;;  %v4544_v28 = vadd.f32 %v29301_v16, %v30646_v41 }
 0x5dd   :  { %v5743_v41 = vmul.f32 0.5, %v4544_v28 }
 0x5e1   :  { %v4753_v54 = vpop.f32.mrb[56].mxu0 }
 0x5e2   :  { %v4683_v1 = vpop.f32.mrb[58].mxu1  ;;  %v4754_v9 = vadd.f32 %v29290_v2, %v4753_v54  ;;  %v26089_v11 = vpop.f32.mrb[57].mxu0  ;;  %v5744_v54 = vmul.f32 0.5, %v4614_v8 }
 0x5e3   :  { %v4684_v20 = vadd.f32 %v29291_v19, %v4683_v1  ;;  %v26078_v26 = vpop.f32.mrb[59].mxu1  ;;  %v34154_v1 = vld [vmem:[#allocation26_spill] sm:$0xff]  ;;  %v29304_v11 = vld [vmem:[%s34133_s9] ss:$0 sm:$0xff] }
 0x5e4   :  { %26250 = vmatpush3.xpose.msk.msra.mxu0 %vm2149_vm3, %v4754_v9 }
 0x5e5   :  { %26245 = vmatpush3.xpose.msk.msra.mxu1 %vm2149_vm3, %v4684_v20  ;;  %26259 = vmatprep.subr.mxu0 %v34132_v33 }
 0x5e6   :  { %26254 = vmatprep.subr.mxu1 %v34132_v33 }
 0x5e7   :  { %26252 = vmatmul.mubr.msk.f32.vlgmr.msra.gmra.mrb[72].mxu0 %vm2149_vm3, %v5738_v30 }
 0x5e8   :  { %26247 = vmatmul.mubr.msk.f32.vlgmr.msra.gmra.mrb[74].mxu1 %vm2149_vm3, %v5737_v38  ;;  %26261 = vmatprep.mubr.msk.f32.mxu0 %vm29398_vm1, %v34132_v33 }
 0x5e9   :  { %v4893_v49 = vpop.f32.mrb[58].mxu0  ;;  %26256 = vmatprep.mubr.msk.f32.mxu1 %vm29398_vm1, %v34132_v33 }
 0x5ea   :  { %v4823_v3 = vpop.f32.mrb[60].mxu1  ;;  %v4894_v37 = vadd.f32 %v29294_v17, %v4893_v49  ;;  %v26111_v21 = vpop.f32.mrb[59].mxu0 }
 0x5eb   :  { %v4824_v18 = vadd.f32 %v29295_v6, %v4823_v3  ;;  %v26100_v15 = vpop.f32.mrb[61].mxu1 }
 0x5ec   :  { %26260 = vmatpush3.xpose.msk.msra.mxu0 %vm2149_vm3, %v4894_v37 }
 0x5ed   :  { %26255 = vmatpush3.xpose.msk.msra.mxu1 %vm2149_vm3, %v4824_v18  ;;  %26269 = vmatprep.subr.mxu0 %v34132_v33 }
 0x5ee   :  { %26264 = vmatprep.subr.mxu1 %v34132_v33 }
 0x5ef   :  { %26262 = vmatmul.mubr.msk.f32.vlgmr.msra.gmra.mrb[74].mxu0 %vm2149_vm3, %v5740_v61 }
 0x5f0   :  { %26257 = vmatmul.mubr.msk.f32.vlgmr.msra.gmra.mrb[76].mxu1 %vm2149_vm3, %v5739_v51  ;;  %26271 = vmatprep.mubr.msk.f32.mxu0 %vm29398_vm1, %v34132_v33 }
 0x5f1   :  { %v5033_v4 = vpop.f32.mrb[60].mxu0  ;;  %26266 = vmatprep.mubr.msk.f32.mxu1 %vm29398_vm1, %v34132_v33 }
 0x5f2   :  { %v4963_v22 = vpop.f32.mrb[62].mxu1  ;;  %v5034_v12 = vadd.f32 %v29298_v25, %v5033_v4  ;;  %v26133_v58 = vpop.f32.mrb[61].mxu0 }
 0x5f3   :  { %v4964_v50 = vadd.f32 %v29299_v43, %v4963_v22  ;;  %v26122_v44 = vpop.f32.mrb[63].mxu1 }
 0x5f4   :  { %26270 = vmatpush3.xpose.msk.msra.mxu0 %vm2149_vm3, %v5034_v12 }
 0x5f5   :  { %26265 = vmatpush3.xpose.msk.msra.mxu1 %vm2149_vm3, %v4964_v50  ;;  %26279 = vmatprep.subr.mxu0 %v34132_v33 }
 0x5f6   :  { %26274 = vmatprep.subr.mxu1 %v34132_v33 }
 0x5f7   :  { %26272 = vmatmul.mubr.msk.f32.vlgmr.msra.gmra.mrb[76].mxu0 %vm2149_vm3, %v5742_v32 }
 0x5f8   :  { %26267 = vmatmul.mubr.msk.f32.vlgmr.msra.gmra.mrb[78].mxu1 %vm2149_vm3, %v5741_v7  ;;  %26281 = vmatprep.mubr.msk.f32.mxu0 %vm29398_vm1, %v34132_v33 }
 0x5f9   :  { %v5173_v14 = vpop.f32.mrb[62].mxu0  ;;  %26276 = vmatprep.mubr.msk.f32.mxu1 %vm29398_vm1, %v34132_v33 }
 0x5fa   :  { %v5103_v29 = vpop.f32.mrb[64].mxu1  ;;  %v5174_v42 = vadd.f32 %v29302_v35, %v5173_v14  ;;  %v26155_v47 = vpop.f32.mrb[63].mxu0 }
 0x5fb   :  { %v5104_v48 = vadd.f32 %v29303_v36, %v5103_v29  ;;  %v26144_v53 = vpop.f32.mrb[65].mxu1 }
 0x5fc   :  { %26280 = vmatpush3.xpose.msk.msra.mxu0 %vm2149_vm3, %v5174_v42 }
 0x5fd   :  { %26275 = vmatpush3.xpose.msk.msra.mxu1 %vm2149_vm3, %v5104_v48  ;;  %26289 = vmatprep.subr.mxu0 %v34132_v33 }
 0x5fe   :  { %26284 = vmatprep.subr.mxu1 %v34132_v33 }
 0x5ff   :  { %26282 = vmatmul.mubr.msk.f32.vlgmr.msra.gmra.mrb[78].mxu0 %vm2149_vm3, %v5744_v54 }
 0x600   :  { %26277 = vmatmul.mubr.msk.f32.vlgmr.msra.gmra.mrb[80].mxu1 %vm2149_vm3, %v5743_v41  ;;  %26291 = vmatprep.mubr.msk.f32.mxu0 %vm29398_vm1, %v34132_v33 }
 0x601   :  { %v5313_v59 = vpop.f32.mrb[64].mxu0  ;;  %26286 = vmatprep.mubr.msk.f32.mxu1 %vm29398_vm1, %v34132_v33 }
 0x602   :  { %v5243_v60 = vpop.f32.mrb[66].mxu1  ;;  %v5314_v2 = vadd.f32 %v34154_v1, %v5313_v59  ;;  %v26177_v9 = vpop.f32.mrb[65].mxu0 }
 0x603   :  { %v5244_v19 = vadd.f32 %v29304_v11, %v5243_v60  ;;  %v26166_v20 = vpop.f32.mrb[67].mxu1 }
 0x604   :  { %26290 = vmatpush3.msra.mxu0 %v5314_v2 }
 0x605   :  { %26285 = vmatpush3.msra.mxu1 %v5244_v19  ;;  %26299 = vmatprep.subr.mxu0 %v34132_v33 }
 0x606   :  { %26294 = vmatprep.subr.mxu1 %v34132_v33 }
 0x609   :  { %v30744_v26 = vpop.f32.mrb[66].mxu0 }
 0x60a   :  { %v30746_v30 = vpop.f32.mrb[68].mxu1  ;;  %v26199_v38 = vpop.f32.mrb[67].mxu0 }
 0x60b   :  { %v26188_v39 = vpop.f32.mrb[69].mxu1 }
 0x611   :  { %v30748_v46 = vpop.f32.mrb[68].mxu0 }
 0x612   :  { %v30750_v49 = vpop.f32.mrb[70].mxu1  ;;  %v26221_v56 = vpop.f32.mrb[69].mxu0 }
 0x613   :  { %v26210_v57 = vpop.f32.mrb[71].mxu1 }
 0x619   :  { %v30752_v3 = vpop.f32.mrb[70].mxu0 }
 0x61a   :  { %v30754_v17 = vpop.f32.mrb[72].mxu1  ;;  %v26243_v37 = vpop.f32.mrb[71].mxu0 }
 0x61b   :  { %v26232_v21 = vpop.f32.mrb[73].mxu1 }
 0x6ba   :  { %v5893_v6 = vpop.f32.mrb[72].mxu0 }
 0x6bb   :  { %v5817_v18 = vpop.f32.mrb[74].mxu1  ;;  %v26253_v15 = vpop.f32.mrb[73].mxu0  ;;  %v6356_v61 = vsel %vm99_vm0, %v5893_v6, -inf }
 0x6bc   :  { %v26248_v51 = vpop.f32.mrb[75].mxu1  ;;  %6357 = vmax.xlane.f32.xlu1 %v6356_v61  ;;  %v6353_v5 = vsel %vm99_vm0, %v5817_v18, -inf }
 0x6bd   :  { %6354 = vmax.xlane.f32.xlu0 %v6353_v5 }
 0x6c2   :  { %v6045_v27 = vpop.f32.mrb[74].mxu0 }
 0x6c3   :  { %v5969_v4 = vpop.f32.mrb[76].mxu1  ;;  %v26263_v52 = vpop.f32.mrb[75].mxu0  ;;  %v6362_v55 = vsel %vm99_vm0, %v6045_v27, -inf }
 0x6c4   :  { %v26258_v22 = vpop.f32.mrb[77].mxu1  ;;  %6363 = vmax.xlane.f32.xlu1 %v6362_v55  ;;  %v6359_v25 = vsel %vm99_vm0, %v5969_v4, -inf }
 0x6c5   :  { %6360 = vmax.xlane.f32.xlu0 %v6359_v25 }
 0x6ca   :  { %v6197_v12 = vpop.f32.mrb[76].mxu0 }
 0x6cb   :  { %v6121_v58 = vpop.f32.mrb[78].mxu1  ;;  %v26273_v43 = vpop.f32.mrb[77].mxu0  ;;  %v6368_v50 = vsel %vm99_vm0, %v6197_v12, -inf }
 0x6cc   :  { %v26268_v44 = vpop.f32.mrb[79].mxu1  ;;  %6369 = vmax.xlane.f32.xlu1 %v6368_v50  ;;  %v6365_v32 = vsel %vm99_vm0, %v6121_v58, -inf }
 0x6cd   :  { %6366 = vmax.xlane.f32.xlu0 %v6365_v32 }
 0x6d2   :  { %v6349_v7 = vpop.f32.mrb[78].mxu0 }
 0x6d3   :  { %v6273_v40 = vpop.f32.mrb[80].mxu1  ;;  %v26283_v8 = vpop.f32.mrb[79].mxu0  ;;  %v6374_v14 = vsel %vm99_vm0, %v6349_v7, -inf }
 0x6d4   :  { %v26278_v16 = vpop.f32.mrb[81].mxu1  ;;  %6375 = vmax.xlane.f32.xlu1 %v6374_v14  ;;  %v6371_v28 = vsel %vm99_vm0, %v6273_v40, -inf }
 0x6d5   :  { %6372 = vmax.xlane.f32.xlu0 %v6371_v28 }
 0x749   :  { %v6358_v29 = vpop.xlane.xlu1 %6357 }
 0x74a   :  { %v6378_v35 = vsub.f32 %v5893_v6, %v6358_v29  ;;  %v6355_v42 = vpop.xlane.xlu0 %6354 }
 0x74b   :  { %v6377_v47 = vsub.f32 %v5817_v18, %v6355_v42 }
 0x74c   :  { %v6387_v36 = vmul.f32 1.442695, %v6378_v35 }
 0x74d   :  { %v6385_v48 = vmul.f32 1.442695, %v6377_v47 }
 0x74e   :  { %29100 = vpow2.f32 %v6387_v36  ;;  %v5454_v36 = vadd.f32 %v30303_v23, %v30744_v26 }
 0x74f   :  { %29102 = vpow2.f32 %v6385_v48 }
 0x751   :  { %v6364_v53 = vpop.xlane.xlu1 %6363 }
 0x752   :  { %v6380_v54 = vsub.f32 %v6045_v27, %v6364_v53  ;;  %v6361_v41 = vpop.xlane.xlu0 %6360  ;;  %v29305_v53 = vld [vmem:[%s34133_s9 + $0x2] ss:$0 sm:$0xff] }
 0x753   :  { %v6379_v59 = vsub.f32 %v5969_v4, %v6361_v41 }
 0x754   :  { %v6391_v60 = vmul.f32 1.442695, %v6380_v54  ;;  %v5384_v54 = vadd.f32 %v29305_v53, %v30746_v30 }
 0x755   :  { %v6389_v1 = vmul.f32 1.442695, %v6379_v59 }
 0x756   :  { %29104 = vpow2.f32 %v6391_v60  ;;  %v5594_v60 = vadd.f32 %v30322_v62, %v30748_v46 }
 0x757   :  { %29106 = vpow2.f32 %v6389_v1 }
 0x758   :  { %v29101_v2 = vpop.eup %29100 }
 0x759   :  { %v29103_v9 = vpop.eup %29102  ;;  %v6370_v11 = vpop.xlane.xlu1 %6369  ;;  %v6404_v19 = vsel %vm99_vm0, %v29101_v2, 0.0 }
 0x75a   :  { %v6382_v20 = vsub.f32 %v6197_v12, %v6370_v11  ;;  %v6367_v38 = vpop.xlane.xlu0 %6366  ;;  %6405 = vadd.xlane.f32.xlu1 %v6404_v19  ;;  %v6401_v39 = vsel %vm99_vm0, %v29103_v9, 0.0 }
 0x75b   :  { %v6381_v56 = vsub.f32 %v6121_v58, %v6367_v38  ;;  %6402 = vadd.xlane.f32.xlu0 %v6401_v39  ;;  %v30779_v58 = vld [vmem:[%s34155_s29] ss:$0 sm:$0xff] }
 0x75c   :  { %v6395_v57 = vmul.f32 1.442695, %v6382_v20  ;;  %v7631_v43 = vadd.f32 %v30779_v58, %v30642_v34  ;;  %v29307_v20 = vld [vmem:[%s34133_s9 + $0x7] ss:$0 sm:$0xff] }
 0x75d   :  { %v6393_v37 = vmul.f32 1.442695, %v6381_v56  ;;  %v5734_v38 = vadd.f32 %v29307_v20, %v30752_v3 }
 0x75e   :  { %29108 = vpow2.f32 %v6395_v57  ;;  %v29308_v57 = vld [vmem:[%s34133_s9 + $0x6] ss:$0 sm:$0xff] }
 0x75f   :  { %29110 = vpow2.f32 %v6393_v37  ;;  %v5664_v37 = vadd.f32 %v29308_v57, %v30754_v17 }
 0x760   :  { %v29105_v21 = vpop.eup %29104 }
 0x761   :  { %v29107_v6 = vpop.eup %29106  ;;  %v6376_v18 = vpop.xlane.xlu1 %6375  ;;  %v6410_v15 = vsel %vm99_vm0, %v29105_v21, 0.0 }
 0x762   :  { %v6384_v61 = vsub.f32 %v6349_v7, %v6376_v18  ;;  %v6373_v51 = vpop.xlane.xlu0 %6372  ;;  %6411 = vadd.xlane.f32.xlu1 %v6410_v15  ;;  %v6407_v5 = vsel %vm99_vm0, %v29107_v6, 0.0 }
 0x763   :  { %v6383_v27 = vsub.f32 %v6273_v40, %v6373_v51  ;;  %6408 = vadd.xlane.f32.xlu0 %v6407_v5  ;;  %v34156_v40 = vld [vmem:[#allocation8_spill] sm:$0xff] }
 0x764   :  { %v6399_v4 = vmul.f32 1.442695, %v6384_v61  ;;  %v30792_v8 = vadd.f32 %v7631_v43, %v34156_v40 }
 0x765   :  { %v6397_v52 = vmul.f32 1.442695, %v6383_v27 }
 0x766   :  { %29112 = vpow2.f32 %v6399_v4  ;;  %v7637_v14 = vsel %vm361_vm2, %v30792_v8, 0.0 }
 0x767   :  { %29114 = vpow2.f32 %v6397_v52 }
 0x768   :  { %v30768_v55 = vpop.eup %29108 }
 0x769   :  { %v30770_v22 = vpop.eup %29110  ;;  %v6416_v25 = vsel %vm99_vm0, %v30768_v55, 0.0 }
 0x76a   :  { %6417 = vadd.xlane.f32.xlu1 %v6416_v25  ;;  %v6413_v12 = vsel %vm99_vm0, %v30770_v22, 0.0 }
 0x76b   :  { %6414 = vadd.xlane.f32.xlu0 %v6413_v12 }
 0x770   :  { %v30783_v50 = vpop.eup %29112 }
 0x771   :  { %v30785_v44 = vpop.eup %29114  ;;  %v6422_v32 = vsel %vm99_vm0, %v30783_v50, 0.0 }
 0x772   :  { %6423 = vadd.xlane.f32.xlu1 %v6422_v32  ;;  %v6419_v7 = vsel %vm99_vm0, %v30785_v44, 0.0 }
 0x773   :  { %6420 = vadd.xlane.f32.xlu0 %v6419_v7 }
 0x777   :  { %7638 = vadd.xlane.f32.xlu0 %v7637_v14  ;;  %v29311_v14 = vld [vmem:[%s34135_s4 + $0x1c] sm:$0xf] }
 0x7e7   :  { %v6406_v34 = vpop.xlane.xlu1 %6405 }
 0x7e8   :  { %29116 = vrcp.f32 %v6406_v34  ;;  %v6403_v16 = vpop.xlane.xlu0 %6402  ;;  %v30895_v34 = vld [vmem:[%s34000_s12] ss:$0 sm:$0xff] }
 0x7e9   :  { %29118 = vrcp.f32 %v6403_v16  ;;  %v29312_v16 = vld [vmem:[%s34135_s4 + $0x18] sm:$0xf] }
 0x7ef   :  { %v6412_v28 = vpop.xlane.xlu1 %6411 }
 0x7f0   :  { %29120 = vrcp.f32 %v6412_v28  ;;  %v6409_v29 = vpop.xlane.xlu0 %6408 }
 0x7f1   :  { %29122 = vrcp.f32 %v6409_v29  ;;  %v30909_v29 = vld [vmem:[%s34001_s13] ss:$0 sm:$0xff] }
 0x7f2   :  { %v29117_v35 = vpop.eup %29116 }
 0x7f3   :  { %v29119_v42 = vpop.eup %29118  ;;  %v6428_v47 = vmul.f32 %v29117_v35, %v29101_v2  ;;  %v29306_v2 = vld [vmem:[%s34133_s9 + $0x4] ss:$0 sm:$0xff] }
 0x7f4   :  { %v6426_v48 = vmul.f32 %v29119_v42, %v29103_v9  ;;  %v5524_v9 = vadd.f32 %v29306_v2, %v30750_v49 }
 0x7f5   :  { %26292 = vmatmul.mubr.msk.f32.vlgmr.msra.gmra.mrb[80].mxu0 %vm99_vm0, %v6428_v47 }
 0x7f6   :  { %26287 = vmatmul.mubr.msk.f32.vlgmr.msra.gmra.mrb[82].mxu1 %vm99_vm0, %v6426_v48  ;;  %26300 = vmatpush3.msra.mxu0 %v5454_v36 }
 0x7f7   :  { %26295 = vmatpush3.msra.mxu1 %v5384_v54  ;;  %v6418_v41 = vpop.xlane.xlu1 %6417  ;;  %26296 = vmatprep.mubr.msk.f32.mxu1 %vm29398_vm1, %v34132_v33 }
 0x7f8   :  { %29124 = vrcp.f32 %v6418_v41  ;;  %v6415_v59 = vpop.xlane.xlu0 %6414  ;;  %26301 = vmatprep.mubr.msk.f32.mxu0 %vm29398_vm1, %v34132_v33  ;;  %26304 = vmatprep.subr.mxu1 %v34132_v33 }
 0x7f9   :  { %29126 = vrcp.f32 %v6415_v59  ;;  %26309 = vmatprep.subr.mxu0 %v34132_v33 }
 0x7fa   :  { %v29121_v23 = vpop.eup %29120 }
 0x7fb   :  { %v29123_v26 = vpop.eup %29122  ;;  %v6432_v30 = vmul.f32 %v29121_v23, %v29105_v21 }
 0x7fc   :  { %v6430_v1 = vmul.f32 %v29123_v26, %v29107_v6 }
 0x7fd   :  { %26302 = vmatmul.mubr.msk.f32.vlgmr.msra.gmra.mrb[82].mxu0 %vm99_vm0, %v6432_v30 }
 0x7fe   :  { %26297 = vmatmul.mubr.msk.f32.vlgmr.msra.gmra.mrb[84].mxu1 %vm99_vm0, %v6430_v1  ;;  %26310 = vmatpush3.msra.mxu0 %v5594_v60 }
 0x7ff   :  { %26305 = vmatpush3.msra.mxu1 %v5524_v9  ;;  %v6424_v11 = vpop.xlane.xlu1 %6423  ;;  %26306 = vmatprep.mubr.msk.f32.mxu1 %vm29398_vm1, %v34132_v33 }
 0x800   :  { %29128 = vrcp.f32 %v6424_v11  ;;  %v6421_v19 = vpop.xlane.xlu0 %6420  ;;  %26311 = vmatprep.mubr.msk.f32.mxu0 %vm29398_vm1, %v34132_v33  ;;  %26314 = vmatprep.subr.mxu1 %v34132_v33 }
 0x801   :  { %29130 = vrcp.f32 %v6421_v19  ;;  %26319 = vmatprep.subr.mxu0 %v34132_v33 }
 0x802   :  { %v29125_v62 = vpop.eup %29124 }
 0x803   :  { %v29127_v46 = vpop.eup %29126  ;;  %v6436_v49 = vmul.f32 %v29125_v62, %v30768_v55 }
 0x804   :  { %v7639_v39 = vpop.xlane.xlu0 %7638  ;;  %v6434_v56 = vmul.f32 %v29127_v46, %v30770_v22 }
 0x805   :  { %v7644_v21 = vmul.f32 0.03125, %v7639_v39  ;;  %26312 = vmatmul.mubr.msk.f32.vlgmr.msra.gmra.mrb[84].mxu0 %vm99_vm0, %v6436_v49 }
 0x806   :  { %26307 = vmatmul.mubr.msk.f32.vlgmr.msra.gmra.mrb[86].mxu1 %vm99_vm0, %v6434_v56  ;;  %26320 = vmatpush3.msra.mxu0 %v5734_v38 }
 0x807   :  { %v7646_v6 = vsub.f32 %v30792_v8, %v7644_v21  ;;  %26315 = vmatpush3.msra.mxu1 %v5664_v37  ;;  %26316 = vmatprep.mubr.msk.f32.mxu1 %vm29398_vm1, %v34132_v33 }
 0x808   :  { %26321 = vmatprep.mubr.msk.f32.mxu0 %vm29398_vm1, %v34132_v33  ;;  %26324 = vmatprep.subr.mxu1 %v34132_v33 }
 0x809   :  { %v7648_v3 = vmul.f32 %v7646_v6, %v7646_v6  ;;  %26329 = vmatprep.subr.mxu0 %v34132_v33 }
 0x80a   :  { %v29129_v17 = vpop.eup %29128 }
 0x80b   :  { %v29131_v18 = vpop.eup %29130  ;;  %v6440_v15 = vmul.f32 %v29129_v17, %v30783_v50  ;;  %v7650_v61 = vsel %vm361_vm2, %v7648_v3, 0.0  ;;  %v29310_v50 = vld [vmem:[%s34135_s4 + $0x10] sm:$0xf] }
 0x80c   :  { %v6438_v51 = vmul.f32 %v29131_v18, %v30785_v44  ;;  %7651 = vadd.xlane.f32.xlu0 %v7650_v61 }
 0x80d   :  { %26322 = vmatmul.mubr.msk.f32.vlgmr.msra.gmra.mrb[86].mxu0 %vm99_vm0, %v6440_v15 }
 0x80e   :  { %26317 = vmatmul.mubr.msk.f32.vlgmr.msra.gmra.mrb[88].mxu1 %vm99_vm0, %v6438_v51  ;;  %26330 = vmatpush3.msk.msra.mxu0 %vm3433_vm4, %v30371_v45 }
 0x80f   :  { %26325 = vmatpush3.msk.msra.mxu1 %vm3433_vm4, %v30363_v63  ;;  %26326 = vmatprep.mubr.msk.f32.mxu1 %vm29398_vm1, %v34132_v33  ;;  %v29309_v63 = vld [vmem:[%s34135_s4 + $0x8] sm:$0xf] }
 0x810   :  { %26331 = vmatprep.mubr.msk.f32.mxu0 %vm29398_vm1, %v34132_v33  ;;  %26334 = vmatprep.subr.mxu1 %v34132_v33 }
 0x811   :  { %26339 = vmatprep.subr.mxu0 %v34132_v33 }
 0x899   :  { %v7652_v5 = vpop.xlane.xlu0 %7651 }
 0x89a   :  { %v7656_v27 = vmul.f32 0.03125, %v7652_v5 }
 0x89c   :  { %v7658_v4 = vadd.f32 1e-05, %v7656_v27 }
 0x89e   :  { %29132 = vrsqrt.f32 %v7658_v4 }
 0x8a8   :  { %v29133_v44 = vpop.eup %29132 }
 0x8a9   :  { %v7662_v40 = vmul.f32 %v29133_v44, %v7646_v6  ;;  %v7774_v44 = vld [vmem:[%s34004_s16] sm:$0xff] }
 0x8ab   :  { %v7670_v28 = vmul.f32 %v30895_v34, %v7662_v40  ;;  %v7777_v40 = vld [vmem:[%s34004_s16 + $0x18] sm:$0xff] }
 0x8ad   :  { %v30913_v36 = vadd.f32 %v30909_v29, %v7670_v28 }
 0x8c8   :  { %v6583_v52 = vpop.f32.mrb[80].mxu0 }
 0x8c9   :  { %v6510_v55 = vpop.f32.mrb[82].mxu1  ;;  %v26293_v22 = vpop.f32.mrb[81].mxu0  ;;  %26332 = vmatmul.mubr.msk.f32.vlgmr.msra.gmra.mrb[88].mxu0 %vm2149_vm3, %v6583_v52 }
 0x8ca   :  { %v26288_v45 = vpop.f32.mrb[83].mxu1  ;;  %26327 = vmatmul.mubr.msk.f32.vlgmr.msra.gmra.mrb[90].mxu1 %vm2149_vm3, %v6510_v55  ;;  %26340 = vmatpush3.msk.msra.mxu0 %vm3433_vm4, %v30386_v0 }
 0x8cb   :  { %26335 = vmatpush3.msk.msra.mxu1 %vm3433_vm4, %v29309_v63  ;;  %26336 = vmatprep.mubr.msk.f32.mxu1 %vm29398_vm1, %v34132_v33 }
 0x8cc   :  { %26341 = vmatprep.mubr.msk.f32.mxu0 %vm29398_vm1, %v34132_v33  ;;  %26344 = vmatprep.subr.mxu1 %v34132_v33 }
 0x8cd   :  { %26349 = vmatprep.subr.mxu0 %v34132_v33 }
 0x8d0   :  { %v6729_v25 = vpop.f32.mrb[82].mxu0 }
 0x8d1   :  { %v6656_v12 = vpop.f32.mrb[84].mxu1  ;;  %v26303_v0 = vpop.f32.mrb[83].mxu0  ;;  %26342 = vmatmul.mubr.msk.f32.vlgmr.msra.gmra.mrb[90].mxu0 %vm2149_vm3, %v6729_v25 }
 0x8d2   :  { %v26298_v43 = vpop.f32.mrb[85].mxu1  ;;  %26337 = vmatmul.mubr.msk.f32.vlgmr.msra.gmra.mrb[92].mxu1 %vm2149_vm3, %v6656_v12  ;;  %26350 = vmatpush3.msk.msra.mxu0 %vm3433_vm4, %v30405_v31  ;;  %v7680_v12 = vld [vmem:[%s34002_s14] sm:$0xff] }
 0x8d3   :  { %26345 = vmatpush3.msk.msra.mxu1 %vm3433_vm4, %v29310_v50  ;;  %26346 = vmatprep.mubr.msk.f32.mxu1 %vm29398_vm1, %v34132_v33  ;;  %v7683_v43 = vld [vmem:[%s34002_s14 + $0x18] sm:$0xff] }
 0x8d4   :  { %26351 = vmatprep.mubr.msk.f32.mxu0 %vm29398_vm1, %v34132_v33  ;;  %26354 = vmatprep.subr.mxu1 %v34132_v33 }
 0x8d5   :  { %26359 = vmatprep.subr.mxu0 %v34132_v33 }
 0x8d8   :  { %v6875_v32 = vpop.f32.mrb[84].mxu0 }
 0x8d9   :  { %v6802_v7 = vpop.f32.mrb[86].mxu1  ;;  %v26313_v31 = vpop.f32.mrb[85].mxu0  ;;  %26352 = vmatmul.mubr.msk.f32.vlgmr.msra.gmra.mrb[92].mxu0 %vm2149_vm3, %v6875_v32  ;;  %v7775_v32 = vld [vmem:[%s34004_s16 + $0x8] sm:$0xff] }
 0x8da   :  { %v26308_v8 = vpop.f32.mrb[87].mxu1  ;;  %26347 = vmatmul.mubr.msk.f32.vlgmr.msra.gmra.mrb[94].mxu1 %vm2149_vm3, %v6802_v7  ;;  %26360 = vmatpush3.msk.msra.mxu0 %vm3433_vm4, %v29311_v14  ;;  %v7776_v7 = vld [vmem:[%s34004_s16 + $0x10] sm:$0xff]  ;;  %v28356_v31 = vpack.c.bf16 %v7775_v32, %v7774_v44  ;;  %v7778_v14 = vld [vmem:[%s34004_s16 + $0x20] sm:$0xff] }
 0x8db   :  { %26355 = vmatpush3.msk.msra.mxu1 %vm3433_vm4, %v29312_v16  ;;  %26356 = vmatprep.mubr.msk.f32.mxu1 %vm29398_vm1, %v34132_v33  ;;  %v28360_v8 = vpack.c.bf16 %v7777_v40, %v7776_v7  ;;  %v7779_v16 = vld [vmem:[%s34004_s16 + $0x28] sm:$0xff] }
 0x8dc   :  { %26361 = vmatprep.mubr.msk.f32.mxu0 %vm29398_vm1, %v34132_v33  ;;  %28357 = vmatprep.subr.bf16.mxu0 %v28356_v31  ;;  %v28364_v28 = vpack.c.bf16 %v7779_v16, %v7778_v14  ;;  %v23859_v14 = vld [vmem:[%s34105_s26 + $0x120] sm:$0xff] }
 0x8e0   :  { %v7021_v35 = vpop.f32.mrb[86].mxu0 }
 0x8e1   :  { %v6948_v42 = vpop.f32.mrb[88].mxu1  ;;  %v26323_v47 = vpop.f32.mrb[87].mxu0  ;;  %26362 = vmatmul.mubr.msk.f32.vlgmr.msra.gmra.mrb[94].mxu0 %vm2149_vm3, %v7021_v35  ;;  %v7780_v35 = vld [vmem:[%s34004_s16 + $0x30] sm:$0xff] }
 0x8e2   :  { %v26318_v48 = vpop.f32.mrb[89].mxu1  ;;  %26357 = vmatmul.mubr.msk.f32.vlgmr.msra.gmra.mrb[96].mxu1 %vm2149_vm3, %v6948_v42  ;;  %28359 = vmatpush3.bf16.msra.mxu0 %v28356_v31  ;;  %v7781_v42 = vld [vmem:[%s34004_s16 + $0x38] sm:$0xff] }
 0x8e3   :  { %26372 = vmatprep.mubr.msk.f32.mxu1 %vm361_vm2, %v30913_v36  ;;  %28361 = vmatprep.subr.bf16.mxu0 %v28360_v8  ;;  %v28368_v47 = vpack.c.bf16 %v7781_v42, %v7780_v35  ;;  %v7782_v48 = vld [vmem:[%s34004_s16 + $0x40] sm:$0xff]  ;;  %v23880_v42 = vld [vmem:[%s34105_s26 + $0x1c8] sm:$0xff] }
 0x8e4   :  { %v23879_v35 = vld [vmem:[%s34105_s26 + $0x1c0] sm:$0xff] }
 0x8e6   :  { %28363 = vmatpush3.bf16.msra.mxu0 %v28360_v8  ;;  %v23853_v8 = vld [vmem:[%s34006_s18] ss:$0 sm:$0xff] }
 0x8e7   :  { %28365 = vmatprep.subr.bf16.mxu0 %v28364_v28 }
 0x8ea   :  { %28367 = vmatpush3.bf16.msra.mxu0 %v28364_v28  ;;  %v23860_v28 = vld [vmem:[%s34105_s26 + $0x128] sm:$0xff] }
 0x8eb   :  { %28369 = vmatprep.subr.bf16.mxu0 %v28368_v47 }
 0x8ee   :  { %28371 = vmatpush3.bf16.msra.mxu0 %v28368_v47  ;;  %v23854_v47 = vld [vmem:[%s34007_s19] ss:$0 sm:$0xff] }
 0x99c   :  { %v7167_v53 = vpop.f32.mrb[88].mxu0 }
 0x99d   :  { %v7094_v54 = vpop.f32.mrb[90].mxu1  ;;  %v7610_v41 = vsel %vm361_vm2, %v7167_v53, 0.0  ;;  %v26333_v59 = vpop.f32.mrb[89].mxu0  ;;  %v7783_v53 = vld [vmem:[%s34004_s16 + $0x48] sm:$0xff] }
 0x99e   :  { %v7609_v23 = vsel %vm361_vm2, %v7094_v54, 0.0  ;;  %v26328_v26 = vpop.f32.mrb[91].mxu1  ;;  %v28372_v54 = vpack.c.bf16 %v7783_v53, %v7782_v48  ;;  %v7785_v59 = vld [vmem:[%s34004_s16 + $0x58] sm:$0xff]  ;;  %v31071_v53 = vpack.c.bf16 %v23860_v28, %v23859_v14  ;;  %v23912_v14 = vld [vmem:[%s34111_s1 + $0x1c8] sm:$0xff] }
 0x99f   :  { %v7611_v30 = vadd.f32 %v7610_v41, %v7609_v23  ;;  %v7784_v41 = vld [vmem:[%s34004_s16 + $0x50] sm:$0xff]  ;;  %v7786_v26 = vld [vmem:[%s34004_s16 + $0x60] sm:$0xff] }
 0x9a0   :  { %28373 = vmatprep.subr.bf16.mxu0 %v28372_v54  ;;  %v28376_v23 = vpack.c.bf16 %v7785_v59, %v7784_v41  ;;  %v23861_v41 = vld [vmem:[%s34105_s26 + $0x130] sm:$0xff] }
 0x9a1   :  { %28375 = vmatpush3.bf16.msra.mxu0 %v28372_v54  ;;  %v31073_v54 = vpack.c.bf16 %v23880_v42, %v23879_v35  ;;  %v23885_v35 = vld [vmem:[%s34105_s26 + $0x1f0] sm:$0xff]  ;;  %v23886_v42 = vld [vmem:[%s34105_s26 + $0x1f8] sm:$0xff] }
 0x9a2   :  { %28377 = vmatprep.subr.bf16.mxu0 %v28376_v23 }
 0x9a4   :  { %v7313_v60 = vpop.f32.mrb[90].mxu0 }
 0x9a5   :  { %v7240_v1 = vpop.f32.mrb[92].mxu1  ;;  %v26343_v2 = vpop.f32.mrb[91].mxu0  ;;  %v7614_v62 = vsel %vm361_vm2, %v7313_v60, 0.0  ;;  %28379 = vmatpush3.bf16.msra.mxu0 %v28376_v23  ;;  %v23862_v23 = vld [vmem:[%s34105_s26 + $0x138] sm:$0xff] }
 0x9a6   :  { %v7612_v9 = vsel %vm361_vm2, %v7240_v1, 0.0  ;;  %v26338_v11 = vpop.f32.mrb[93].mxu1 }
 0x9a7   :  { %v7613_v19 = vadd.f32 %v7612_v9, %v7611_v30  ;;  %v7787_v30 = vld [vmem:[%s34004_s16 + $0x68] sm:$0xff] }
 0x9a8   :  { %v28380_v60 = vpack.c.bf16 %v7787_v30, %v7786_v26  ;;  %v23881_v26 = vld [vmem:[%s34105_s26 + $0x1d0] sm:$0xff]  ;;  %v23882_v30 = vld [vmem:[%s34105_s26 + $0x1d8] sm:$0xff] }
 0x9a9   :  { %v7615_v46 = vadd.f32 %v7614_v62, %v7613_v19 }
 0x9aa   :  { %28381 = vmatprep.subr.bf16.mxu0 %v28380_v60 }
 0x9ab   :  { %28383 = vmatpush3.bf16.msra.mxu0 %v28380_v60  ;;  %v31095_v60 = vpack.c.bf16 %v23862_v23, %v23861_v41  ;;  %v31287_v41 = vpack.c.bf16 %v23886_v42, %v23885_v35  ;;  %v23909_v35 = vld [vmem:[%s34111_s1 + $0x1b0] sm:$0xff]  ;;  %v23910_v42 = vld [vmem:[%s34111_s1 + $0x1b8] sm:$0xff] }
 0x9ac   :  { %v7459_v49 = vpop.f32.mrb[92].mxu0 }
 0x9ad   :  { %v7386_v20 = vpop.f32.mrb[94].mxu1  ;;  %v26353_v38 = vpop.f32.mrb[93].mxu0  ;;  %v7618_v37 = vsel %vm361_vm2, %v7459_v49, 0.0  ;;  %v7788_v49 = vld [vmem:[%s34004_s16 + $0x70] sm:$0xff] }
 0x9ae   :  { %v7616_v39 = vsel %vm361_vm2, %v7386_v20, 0.0  ;;  %v26348_v56 = vpop.f32.mrb[95].mxu1  ;;  %v7789_v20 = vld [vmem:[%s34004_s16 + $0x78] sm:$0xff] }
 0x9af   :  { %v7617_v57 = vadd.f32 %v7616_v39, %v7615_v46  ;;  %v28384_v38 = vpack.c.bf16 %v7789_v20, %v7788_v49  ;;  %v23865_v20 = vld [vmem:[%s34105_s26 + $0x150] sm:$0xff] }
 0x9b1   :  { %v7619_v21 = vadd.f32 %v7618_v37, %v7617_v57  ;;  %28385 = vmatprep.subr.bf16.mxu0 %v28384_v38 }
 0x9b2   :  { %28387 = vmatpush3.bf16.msra.mxu0 %v28384_v38  ;;  %v23866_v38 = vld [vmem:[%s34105_s26 + $0x158] sm:$0xff] }
 0x9b3   :  { %28412 = vmatprep.subr.bf16.mxu0 %v34136_v13 }
 0x9b4   :  { %v7605_v6 = vpop.f32.mrb[94].mxu0 }
 0x9b5   :  { %v7532_v3 = vpop.f32.mrb[96].mxu1  ;;  %v26363_v17 = vpop.f32.mrb[95].mxu0  ;;  %v7622_v51 = vsel %vm361_vm2, %v7605_v6, 0.0  ;;  %v23852_v6 = vld [vmem:[%s34005_s17] ss:$0 sm:$0xff] }
 0x9b6   :  { %v7620_v18 = vsel %vm361_vm2, %v7532_v3, 0.0  ;;  %v26358_v15 = vpop.f32.mrb[97].mxu1 }
 0x9b7   :  { %v7621_v61 = vadd.f32 %v7620_v18, %v7619_v21 }
 0x9b9   :  { %v7623_v5 = vadd.f32 %v7622_v51, %v7621_v61 }
 0x9bb   :  { %v7632_v27 = vadd.f32 %v30779_v58, %v7623_v5  ;;  %v7681_v58 = vld [vmem:[%s34002_s14 + $0x8] sm:$0xff] }
 0x9bc   :  { %v28348_v0 = vpack.c.bf16 %v7681_v58, %v7680_v12  ;;  %v23857_v58 = vld [vmem:[%s34105_s26 + $0x110] sm:$0xff] }
 0x9bd   :  { %v7634_v4 = vadd.f32 %v7632_v27, %v30445_v10  ;;  %v7682_v10 = vld [vmem:[%s34002_s14 + $0x10] sm:$0xff] }
 0x9be   :  { %28349 = vmatprep.subr.bf16.mxu1 %v28348_v0  ;;  %v28352_v50 = vpack.c.bf16 %v7683_v43, %v7682_v10  ;;  %v23873_v10 = vld [vmem:[%s34105_s26 + $0x190] sm:$0xff] }
 0x9bf   :  { %v7640_v52 = vsel %vm361_vm2, %v7634_v4, 0.0  ;;  %28351 = vmatpush3.bf16.msra.mxu1 %v28348_v0  ;;  %v23858_v0 = vld [vmem:[%s34105_s26 + $0x118] sm:$0xff] }
 0x9c0   :  { %7641 = vadd.xlane.f32.xlu1 %v7640_v52  ;;  %28353 = vmatprep.subr.bf16.mxu1 %v28352_v50  ;;  %v31042_v43 = vpack.c.bf16 %v23858_v0, %v23857_v58  ;;  %v23877_v58 = vld [vmem:[%s34105_s26 + $0x1b0] sm:$0xff]  ;;  %v23878_v0 = vld [vmem:[%s34105_s26 + $0x1b8] sm:$0xff] }
 0x9c3   :  { %28355 = vmatpush3.bf16.msra.mxu1 %v28352_v50  ;;  %v23874_v50 = vld [vmem:[%s34105_s26 + $0x198] sm:$0xff] }
 0x9c4   :  { %28388 = vmatprep.subr.bf16.mxu1 %v34136_v13  ;;  %v31047_v44 = vpack.c.bf16 %v23874_v50, %v23873_v10  ;;  %v23905_v10 = vld [vmem:[%s34111_s1 + $0x190] sm:$0xff]  ;;  %v23906_v50 = vld [vmem:[%s34111_s1 + $0x198] sm:$0xff] }
 0xa4d   :  { %v7642_v55 = vpop.xlane.xlu1 %7641 }
 0xa4e   :  { %v7645_v22 = vmul.f32 0.03125, %v7642_v55 }
 0xa50   :  { %v7647_v45 = vsub.f32 %v7634_v4, %v7645_v22  ;;  %v23855_v22 = vld [vmem:[%s34105_s26 + $0x100] sm:$0xff] }
 0xa52   :  { %v7649_v63 = vmul.f32 %v7647_v45, %v7647_v45 }
 0xa54   :  { %v7653_v25 = vsel %vm361_vm2, %v7649_v63, 0.0 }
 0xa55   :  { %7654 = vadd.xlane.f32.xlu1 %v7653_v25  ;;  %v23872_v25 = vld [vmem:[%s34105_s26 + $0x188] sm:$0xff] }
 0xae2   :  { %v7655_v1 = vpop.xlane.xlu1 %7654 }
 0xae3   :  { %v7657_v2 = vmul.f32 0.03125, %v7655_v1  ;;  %v31097_v1 = vpack.c.bf16 %v23882_v30, %v23881_v26  ;;  %v23891_v26 = vld [vmem:[%s34111_s1 + $0x120] sm:$0xff]  ;;  %v23892_v30 = vld [vmem:[%s34111_s1 + $0x128] sm:$0xff] }
 0xae5   :  { %v7659_v9 = vadd.f32 1e-05, %v7657_v2  ;;  %v23863_v2 = vld [vmem:[%s34105_s26 + $0x140] sm:$0xff] }
 0xae7   :  { %29134 = vrsqrt.f32 %v7659_v9  ;;  %v23864_v9 = vld [vmem:[%s34105_s26 + $0x148] sm:$0xff] }
 0xaf1   :  { %v29135_v11 = vpop.eup %29134 }
 0xaf2   :  { %v7663_v19 = vmul.f32 %v29135_v11, %v7647_v45  ;;  %v23856_v45 = vld [vmem:[%s34105_s26 + $0x108] sm:$0xff]  ;;  %v23887_v11 = vld [vmem:[%s34111_s1 + $0x100] sm:$0xff] }
 0xaf3   :  { %v31022_v63 = vpack.c.bf16 %v23856_v45, %v23855_v22  ;;  %v23903_v22 = vld [vmem:[%s34111_s1 + $0x180] sm:$0xff]  ;;  %v23904_v45 = vld [vmem:[%s34111_s1 + $0x188] sm:$0xff] }
 0xaf4   :  { %v7671_v62 = vmul.f32 %v30895_v34, %v7663_v19  ;;  %v23849_v34 = vld [vmem:[%s34003_s15] ss:$0 sm:$0xff]  ;;  %v23888_v19 = vld [vmem:[%s34111_s1 + $0x108] sm:$0xff] }
 0xaf5   :  { %v31121_v49 = vpack.c.bf16 %v23888_v19, %v23887_v11  ;;  %v31311_v11 = vpack.c.bf16 %v23892_v30, %v23891_v26  ;;  %v31431_v26 = vpack.c.bf16 %v23910_v42, %v23909_v35  ;;  %v23931_v35 = vld [vmem:[%s34113_s10 + $0x160] sm:$0xff]  ;;  %v23932_v42 = vld [vmem:[%s34113_s10 + $0x168] sm:$0xff] }
 0xaf6   :  { %v30987_v46 = vadd.f32 %v30909_v29, %v7671_v62  ;;  %v31119_v62 = vpack.c.bf16 %v23864_v9, %v23863_v2  ;;  %v23919_v2 = vld [vmem:[%s34113_s10 + $0x100] sm:$0xff]  ;;  %v23920_v9 = vld [vmem:[%s34113_s10 + $0x108] sm:$0xff] }
 0xaf7   :  { %v31313_v19 = vpack.c.bf16 %v23920_v9, %v23919_v2  ;;  %34161 = vst [vmem:[#allocation12_spill] sm:$0xff] %v31431_v26  ;;  %v23915_v2 = vld [vmem:[%s34111_s1 + $0x1e0] sm:$0xff]  ;;  %v23916_v9 = vld [vmem:[%s34111_s1 + $0x1e8] sm:$0xff] }
 0xaf8   :  { %26373 = vmatmul.mubr.msk.f32.vlgmr.msra.gmra.mrb[98].mxu1 %vm361_vm2, %v30987_v46 }
 0xaf9   :  { %26418 = vmatprep.mubr.msk.f32.mxu1 %vm29398_vm1, %v34132_v33  ;;  %28390 = vmatpush3.bf16.msra.mxu1 %v31022_v63 }
 0xafa   :  { %28391 = vmatprep.subr.bf16.mxu1 %v34136_v13 }
 0xafd   :  { %28393 = vmatpush3.bf16.msra.mxu1 %v31042_v43 }
 0xafe   :  { %28394 = vmatprep.subr.bf16.mxu1 %v34136_v13 }
 0xbcb   :  { %v26374_v29 = vpop.f32.mrb[98].mxu1 }
 0xbcc   :  { %v7769_v39 = vadd.f32 %v26374_v29, %v23849_v34  ;;  %v7763_v56 = vpop.f32.mrb[99].mxu1  ;;  %v23890_v29 = vld [vmem:[%s34111_s1 + $0x118] sm:$0xff] }
 0xbcd   :  { %v7764_v57 = vadd.f32 %v23849_v34, %v7763_v56  ;;  %v23889_v34 = vld [vmem:[%s34111_s1 + $0x110] sm:$0xff] }
 0xbce   :  { %v7773_v21 = vmax.f32 %v7769_v39, 0.0  ;;  %v31143_v39 = vpack.c.bf16 %v23866_v38, %v23865_v20  ;;  %v31145_v56 = vpack.c.bf16 %v23890_v29, %v23889_v34  ;;  %v23893_v20 = vld [vmem:[%s34111_s1 + $0x130] sm:$0xff]  ;;  %v23894_v38 = vld [vmem:[%s34111_s1 + $0x138] sm:$0xff] }
 0xbcf   :  { %v7772_v37 = vmax.f32 %v7764_v57, 0.0  ;;  %v23867_v57 = vld [vmem:[%s34105_s26 + $0x160] sm:$0xff]  ;;  %v23921_v34 = vld [vmem:[%s34113_s10 + $0x110] sm:$0xff]  ;;  %v23922_v29 = vld [vmem:[%s34113_s10 + $0x118] sm:$0xff] }
 0xbd1   :  { %26407 = vmatprep.mubr.f32.mxu0 %v7772_v37  ;;  %v23868_v37 = vld [vmem:[%s34105_s26 + $0x168] sm:$0xff] }
 0xbd2   :  { %26408 = vmatmul.mubr.f32.vlgmr.msra.gmra.mrb[96].mxu0 %v7773_v21  ;;  %v23895_v21 = vld [vmem:[%s34111_s1 + $0x140] sm:$0xff] }
 0xbd3   :  { %26462 = vmatprep.mubr.msk.f32.mxu0 %vm29398_vm1, %v34132_v33 }
 0xca5   :  { %v26409_v3 = vpop.f32.mrb[96].mxu0 }
 0xca6   :  { %v31008_v17 = vadd.f32 %v26409_v3, %v23852_v6  ;;  %v7863_v18 = vpop.f32.mrb[97].mxu0  ;;  %v31167_v3 = vpack.c.bf16 %v23868_v37, %v23867_v57  ;;  %v31335_v57 = vpack.c.bf16 %v23894_v38, %v23893_v20  ;;  %v31337_v37 = vpack.c.bf16 %v23922_v29, %v23921_v34  ;;  %v23943_v20 = vld [vmem:[%s34113_s10 + $0x1c0] sm:$0xff]  ;;  %v23944_v38 = vld [vmem:[%s34113_s10 + $0x1c8] sm:$0xff] }
 0xca7   :  { %v7864_v15 = vadd.f32 %v23852_v6, %v7863_v18  ;;  %v23896_v6 = vld [vmem:[%s34111_s1 + $0x148] sm:$0xff]  ;;  %v31455_v34 = vpack.c.bf16 %v23916_v9, %v23915_v2  ;;  %v31457_v29 = vpack.c.bf16 %v23944_v38, %v23943_v20  ;;  %v23934_v2 = vld [vmem:[%s34113_s10 + $0x178] sm:$0xff]  ;;  %v23939_v20 = vld [vmem:[%s34113_s10 + $0x1a0] sm:$0xff] }
 0xca8   :  { %v31169_v18 = vpack.c.bf16 %v23896_v6, %v23895_v21  ;;  %v23899_v21 = vld [vmem:[%s34111_s1 + $0x160] sm:$0xff]  ;;  %v23900_v6 = vld [vmem:[%s34111_s1 + $0x168] sm:$0xff] }
 0xca9   :  { %v7872_v61 = vadd.f32 %v7864_v15, %v30913_v36  ;;  %v23871_v36 = vld [vmem:[%s34105_s26 + $0x180] sm:$0xff]  ;;  %v23869_v15 = vld [vmem:[%s34105_s26 + $0x170] sm:$0xff]  ;;  %34163 = vst [vmem:[#allocation14_spill] sm:$0xff] %v31455_v34  ;;  %34164 = vst [vmem:[#allocation17_spill] sm:$0xff] %v31457_v29 }
 0xcaa   :  { %v31027_v12 = vpack.c.bf16 %v23872_v25, %v23871_v36  ;;  %v31217_v25 = vpack.c.bf16 %v23904_v45, %v23903_v22  ;;  %v23929_v22 = vld [vmem:[%s34113_s10 + $0x150] sm:$0xff]  ;;  %v23930_v45 = vld [vmem:[%s34113_s10 + $0x158] sm:$0xff]  ;;  %v23940_v38 = vld [vmem:[%s34113_s10 + $0x1a8] sm:$0xff] }
 0xcab   :  { %v7876_v51 = vsel %vm361_vm2, %v7872_v61, 0.0 }
 0xcac   :  { %7877 = vadd.xlane.f32.xlu0 %v7876_v51  ;;  %28414 = vmatpush3.bf16.msra.mxu0 %v31027_v12  ;;  %v23897_v51 = vld [vmem:[%s34111_s1 + $0x150] sm:$0xff] }
 0xcad   :  { %28415 = vmatprep.subr.bf16.mxu0 %v34136_v13 }
 0xcb0   :  { %28417 = vmatpush3.bf16.msra.mxu0 %v31047_v44 }
 0xcb1   :  { %28424 = vmatprep.subr.bf16.mxu0 %v34136_v13 }
 0xd39   :  { %v7878_v5 = vpop.xlane.xlu0 %7877 }
 0xd3a   :  { %v7882_v27 = vmul.f32 0.03125, %v7878_v5  ;;  %v23898_v5 = vld [vmem:[%s34111_s1 + $0x158] sm:$0xff] }
 0xd3c   :  { %v7884_v4 = vsub.f32 %v7872_v61, %v7882_v27  ;;  %v23870_v61 = vld [vmem:[%s34105_s26 + $0x178] sm:$0xff] }
 0xd3d   :  { %v31191_v27 = vpack.c.bf16 %v23870_v61, %v23869_v15  ;;  %v23927_v15 = vld [vmem:[%s34113_s10 + $0x140] sm:$0xff]  ;;  %v23928_v61 = vld [vmem:[%s34113_s10 + $0x148] sm:$0xff] }
 0xd3e   :  { %v7886_v52 = vmul.f32 %v7884_v4, %v7884_v4 }
 0xd40   :  { %v7888_v55 = vsel %vm361_vm2, %v7886_v52, 0.0  ;;  %v23875_v52 = vld [vmem:[%s34105_s26 + $0x1a0] sm:$0xff] }
 0xd41   :  { %7889 = vadd.xlane.f32.xlu1 %v7888_v55  ;;  %v23876_v55 = vld [vmem:[%s34105_s26 + $0x1a8] sm:$0xff] }
 0xd42   :  { %v31215_v36 = vpack.c.bf16 %v23876_v55, %v23875_v52  ;;  %v23901_v52 = vld [vmem:[%s34111_s1 + $0x170] sm:$0xff]  ;;  %v23902_v55 = vld [vmem:[%s34111_s1 + $0x178] sm:$0xff] }
 0xdce   :  { %v7890_v32 = vpop.xlane.xlu1 %7889 }
 0xdcf   :  { %v7894_v7 = vmul.f32 0.03125, %v7890_v32  ;;  %v31239_v32 = vpack.c.bf16 %v23878_v0, %v23877_v58  ;;  %v31383_v58 = vpack.c.bf16 %v23902_v55, %v23901_v52  ;;  %v31385_v0 = vpack.c.bf16 %v23930_v45, %v23929_v22  ;;  %v23923_v22 = vld [vmem:[%s34113_s10 + $0x120] sm:$0xff]  ;;  %v23924_v45 = vld [vmem:[%s34113_s10 + $0x128] sm:$0xff] }
 0xdd1   :  { %v7896_v31 = vadd.f32 1e-05, %v7894_v7  ;;  %v31241_v7 = vpack.c.bf16 %v23906_v50, %v23905_v10  ;;  %34158 = vst [vmem:[#allocation11_spill] sm:$0xff] %v31385_v0  ;;  %v23907_v10 = vld [vmem:[%s34111_s1 + $0x1a0] sm:$0xff]  ;;  %v23908_v50 = vld [vmem:[%s34111_s1 + $0x1a8] sm:$0xff] }
 0xdd3   :  { %29136 = vrsqrt.f32 %v7896_v31  ;;  %v23883_v31 = vld [vmem:[%s34105_s26 + $0x1e0] sm:$0xff] }
 0xddd   :  { %v29137_v40 = vpop.eup %29136 }
 0xdde   :  { %v7900_v16 = vmul.f32 %v29137_v40, %v7884_v4  ;;  %v31193_v4 = vpack.c.bf16 %v23898_v5, %v23897_v51  ;;  %v23884_v40 = vld [vmem:[%s34105_s26 + $0x1e8] sm:$0xff]  ;;  %v31359_v51 = vpack.c.bf16 %v23900_v6, %v23899_v21  ;;  %v31361_v5 = vpack.c.bf16 %v23928_v61, %v23927_v15  ;;  %v23917_v21 = vld [vmem:[%s34111_s1 + $0x1f0] sm:$0xff]  ;;  %v23918_v6 = vld [vmem:[%s34111_s1 + $0x1f8] sm:$0xff] }
 0xddf   :  { %v23945_v15 = vld [vmem:[%s34113_s10 + $0x1d0] sm:$0xff]  ;;  %v23946_v61 = vld [vmem:[%s34113_s10 + $0x1d8] sm:$0xff]  ;;  %v31479_v52 = vpack.c.bf16 %v23918_v6, %v23917_v21  ;;  %v31550_v21 = vpack.c.bf16 %v23940_v38, %v23939_v20 }
 0xde0   :  { %v7908_v48 = vmul.f32 %v23853_v8, %v7900_v16  ;;  %v23911_v8 = vld [vmem:[%s34111_s1 + $0x1c0] sm:$0xff]  ;;  %v31263_v16 = vpack.c.bf16 %v23884_v40, %v23883_v31  ;;  %v23936_v40 = vld [vmem:[%s34113_s10 + $0x188] sm:$0xff]  ;;  %v31481_v55 = vpack.c.bf16 %v23946_v61, %v23945_v15  ;;  %v23941_v6 = vld [vmem:[%s34113_s10 + $0x1b0] sm:$0xff] }
 0xde1   :  { %v31265_v28 = vpack.c.bf16 %v23912_v14, %v23911_v8  ;;  %v23935_v31 = vld [vmem:[%s34113_s10 + $0x180] sm:$0xff]  ;;  %v31407_v8 = vpack.c.bf16 %v23908_v50, %v23907_v10  ;;  %34165 = vst [vmem:[#allocation16_spill] sm:$0xff] %v31479_v52  ;;  %v31497_v10 = vpack.c.bf16 %v23924_v45, %v23923_v22  ;;  %v23925_v50 = vld [vmem:[%s34113_s10 + $0x130] sm:$0xff]  ;;  %34171 = vst [vmem:[#allocation22_spill] sm:$0xff] %v31550_v21 }
 0xde2   :  { %v31078_v59 = vadd.f32 %v23854_v47, %v7908_v48  ;;  %v23913_v47 = vld [vmem:[%s34111_s1 + $0x1d0] sm:$0xff]  ;;  %v23914_v48 = vld [vmem:[%s34111_s1 + $0x1d8] sm:$0xff]  ;;  %v31409_v14 = vpack.c.bf16 %v23936_v40, %v23935_v31  ;;  %34166 = vst [vmem:[#allocation19_spill] sm:$0xff] %v31481_v55  ;;  %v23947_v22 = vld [vmem:[%s34113_s10 + $0x1e0] sm:$0xff] }
 0xde3   :  { %v31289_v23 = vpack.c.bf16 %v23914_v48, %v23913_v47  ;;  %34159 = vst [vmem:[#allocation10_spill] sm:$0xff] %v31407_v8  ;;  %v23937_v47 = vld [vmem:[%s34113_s10 + $0x190] sm:$0xff]  ;;  %v23938_v48 = vld [vmem:[%s34113_s10 + $0x198] sm:$0xff]  ;;  %34167 = vst [vmem:[#allocation18_spill] sm:$0xff] %v31497_v10 }
 0xde4   :  { %34157 = vst [vmem:[#allocation9_spill] sm:$0xff] %v31078_v59  ;;  %26419 = vmatmul.mubr.msk.f32.vlgmr.msra.gmra.mrb[100].mxu1 %vm361_vm2, %v31078_v59  ;;  %26463 = vmatmul.mubr.msk.f32.vlgmr.msra.gmra.mrb[98].mxu0 %vm361_vm2, %v31078_v59  ;;  %34160 = vst [vmem:[#allocation13_spill] sm:$0xff] %v31409_v14  ;;  %v31433_v30 = vpack.c.bf16 %v23938_v48, %v23937_v47  ;;  %v23926_v31 = vld [vmem:[%s34113_s10 + $0x138] sm:$0xff]  ;;  %v31526_v47 = vpack.c.bf16 %v23932_v42, %v23931_v35  ;;  %v23933_v48 = vld [vmem:[%s34113_s10 + $0x170] sm:$0xff] }
 0xde5   :  { %28396 = vmatpush3.bf16.msra.mxu1 %v31071_v53  ;;  %28426 = vmatpush3.bf16.msra.mxu0 %v31073_v54  ;;  %v31512_v40 = vpack.c.bf16 %v23926_v31, %v23925_v50  ;;  %v31538_v9 = vpack.c.bf16 %v23934_v2, %v23933_v48  ;;  %v23942_v15 = vld [vmem:[%s34113_s10 + $0x1b8] sm:$0xff]  ;;  %v23948_v45 = vld [vmem:[%s34113_s10 + $0x1e8] sm:$0xff]  ;;  %v23949_v31 = vld [vmem:[%s34113_s10 + $0x1f0] sm:$0xff] }
 0xde6   :  { %28397 = vmatprep.subr.bf16.mxu1 %v34136_v13  ;;  %28427 = vmatprep.subr.bf16.mxu0 %v34136_v13  ;;  %34162 = vst [vmem:[#allocation15_spill] sm:$0xff] %v31433_v30  ;;  %34169 = vst [vmem:[#allocation20_spill] sm:$0xff] %v31526_v47  ;;  %v31562_v61 = vpack.c.bf16 %v23942_v15, %v23941_v6  ;;  %v31574_v50 = vpack.c.bf16 %v23948_v45, %v23947_v22  ;;  %v23950_v35 = vld [vmem:[%s34113_s10 + $0x1f8] sm:$0xff] }
 0xde7   :  { %26429 = vmatprep.mubr.msk.f32.mxu1 %vm29398_vm1, %v34132_v33  ;;  %26484 = vmatprep.mubr.msk.f32.mxu0 %vm29398_vm1, %v34132_v33  ;;  %34168 = vst [vmem:[#allocation21_spill] sm:$0xff] %v31512_v40  ;;  %34170 = vst [vmem:[#allocation23_spill] sm:$0xff] %v31538_v9  ;;  %v31586_v42 = vpack.c.bf16 %v23950_v35, %v23949_v31  ;;  %v23983_v31 = vld [vmem:[%s34130_s7 + $0x8] ss:$0 sm:$0xff] }
 0xde8   :  { %34172 = vst [vmem:[#allocation25_spill] sm:$0xff] %v31562_v61  ;;  %34173 = vst [vmem:[#allocation24_spill] sm:$0xff] %v31574_v50  ;;  %v23999_v35 = vld [vmem:[%s34131_s30 + $0x8] ss:$0 sm:$0xff] }
 0xde9   :  { %28399 = vmatpush3.bf16.msra.mxu1 %v31095_v60  ;;  %28429 = vmatpush3.bf16.msra.mxu0 %v31097_v1  ;;  %34174 = vst [vmem:[#allocation26_spill] sm:$0xff] %v31586_v42 }
 0xdea   :  { %28400 = vmatprep.subr.bf16.mxu1 %v34136_v13  ;;  %28436 = vmatprep.subr.bf16.mxu0 %v34136_v13 }
 0xdec   :  { %26430 = vmatmul.mubr.msk.f32.vlgmr.msra.gmra.mrb[102].mxu1 %vm361_vm2, %v31078_v59  ;;  %26485 = vmatmul.mubr.msk.f32.vlgmr.msra.gmra.mrb[100].mxu0 %vm361_vm2, %v31078_v59 }
 0xded   :  { %28402 = vmatpush3.bf16.msra.mxu1 %v31119_v62  ;;  %28438 = vmatpush3.bf16.msra.mxu0 %v31121_v49 }
 0xdee   :  { %28403 = vmatprep.subr.bf16.mxu1 %v34136_v13  ;;  %28439 = vmatprep.subr.bf16.mxu0 %v34136_v13 }
 0xdef   :  { %26440 = vmatprep.mubr.msk.f32.mxu1 %vm29398_vm1, %v34132_v33  ;;  %26506 = vmatprep.mubr.msk.f32.mxu0 %vm29398_vm1, %v34132_v33 }
 0xdf1   :  { %28405 = vmatpush3.bf16.msra.mxu1 %v31143_v39  ;;  %28441 = vmatpush3.bf16.msra.mxu0 %v31145_v56 }
 0xdf2   :  { %28406 = vmatprep.subr.bf16.mxu1 %v34136_v13  ;;  %28448 = vmatprep.subr.bf16.mxu0 %v34136_v13 }
 0xdf4   :  { %26441 = vmatmul.mubr.msk.f32.vlgmr.msra.gmra.mrb[104].mxu1 %vm361_vm2, %v31078_v59  ;;  %26507 = vmatmul.mubr.msk.f32.vlgmr.msra.gmra.mrb[102].mxu0 %vm361_vm2, %v31078_v59 }
 0xdf5   :  { %28408 = vmatpush3.bf16.msra.mxu1 %v31167_v3  ;;  %28450 = vmatpush3.bf16.msra.mxu0 %v31169_v18 }
 0xdf6   :  { %28409 = vmatprep.subr.bf16.mxu1 %v34136_v13  ;;  %28451 = vmatprep.subr.bf16.mxu0 %v34136_v13 }
 0xdf7   :  { %26451 = vmatprep.mubr.msk.f32.mxu1 %vm29398_vm1, %v34132_v33  ;;  %26528 = vmatprep.mubr.msk.f32.mxu0 %vm29398_vm1, %v34132_v33 }
 0xdf9   :  { %28411 = vmatpush3.bf16.msra.mxu1 %v31191_v27  ;;  %28453 = vmatpush3.bf16.msra.mxu0 %v31193_v4 }
 0xdfa   :  { %28418 = vmatprep.subr.bf16.mxu1 %v34136_v13  ;;  %28460 = vmatprep.subr.bf16.mxu0 %v34136_v13 }
 0xdfc   :  { %26452 = vmatmul.mubr.msk.f32.vlgmr.msra.gmra.mrb[106].mxu1 %vm361_vm2, %v31078_v59  ;;  %26529 = vmatmul.mubr.msk.f32.vlgmr.msra.gmra.mrb[104].mxu0 %vm361_vm2, %v31078_v59 }
 0xdfd   :  { %28420 = vmatpush3.bf16.msra.mxu1 %v31215_v36  ;;  %28462 = vmatpush3.bf16.msra.mxu0 %v31217_v25 }
 0xdfe   :  { %28421 = vmatprep.subr.bf16.mxu1 %v34136_v13  ;;  %28463 = vmatprep.subr.bf16.mxu0 %v34136_v13 }
 0xdff   :  { %26473 = vmatprep.mubr.msk.f32.mxu1 %vm29398_vm1, %v34132_v33  ;;  %26550 = vmatprep.mubr.msk.f32.mxu0 %vm29398_vm1, %v34132_v33 }
 0xe01   :  { %28423 = vmatpush3.bf16.msra.mxu1 %v31239_v32  ;;  %28465 = vmatpush3.bf16.msra.mxu0 %v31241_v7 }
 0xe02   :  { %28430 = vmatprep.subr.bf16.mxu1 %v34136_v13  ;;  %28472 = vmatprep.subr.bf16.mxu0 %v34136_v13 }
 0xe04   :  { %26474 = vmatmul.mubr.msk.f32.vlgmr.msra.gmra.mrb[108].mxu1 %vm361_vm2, %v31078_v59  ;;  %26551 = vmatmul.mubr.msk.f32.vlgmr.msra.gmra.mrb[106].mxu0 %vm361_vm2, %v31078_v59 }
 0xe05   :  { %28432 = vmatpush3.bf16.msra.mxu1 %v31263_v16  ;;  %28474 = vmatpush3.bf16.msra.mxu0 %v31265_v28 }
 0xe06   :  { %28433 = vmatprep.subr.bf16.mxu1 %v34136_v13  ;;  %28475 = vmatprep.subr.bf16.mxu0 %v34136_v13 }
 0xe07   :  { %26495 = vmatprep.mubr.msk.f32.mxu1 %vm29398_vm1, %v34132_v33  ;;  %26572 = vmatprep.mubr.msk.f32.mxu0 %vm29398_vm1, %v34132_v33 }
 0xe09   :  { %28435 = vmatpush3.bf16.msra.mxu1 %v31287_v41  ;;  %28477 = vmatpush3.bf16.msra.mxu0 %v31289_v23 }
 0xe0a   :  { %28442 = vmatprep.subr.bf16.mxu1 %v34136_v13  ;;  %28484 = vmatprep.subr.bf16.mxu0 %v34136_v13 }
 0xe0c   :  { %26496 = vmatmul.mubr.msk.f32.vlgmr.msra.gmra.mrb[110].mxu1 %vm361_vm2, %v31078_v59  ;;  %26573 = vmatmul.mubr.msk.f32.vlgmr.msra.gmra.mrb[108].mxu0 %vm361_vm2, %v31078_v59 }
 0xe0d   :  { %28444 = vmatpush3.bf16.msra.mxu1 %v31311_v11  ;;  %28486 = vmatpush3.bf16.msra.mxu0 %v31313_v19 }
 0xe0e   :  { %28445 = vmatprep.subr.bf16.mxu1 %v34136_v13  ;;  %28487 = vmatprep.subr.bf16.mxu0 %v34136_v13 }
 0xe0f   :  { %26517 = vmatprep.mubr.msk.f32.mxu1 %vm29398_vm1, %v34132_v33  ;;  %26594 = vmatprep.mubr.msk.f32.mxu0 %vm29398_vm1, %v34132_v33 }
 0xe11   :  { %28447 = vmatpush3.bf16.msra.mxu1 %v31335_v57  ;;  %28489 = vmatpush3.bf16.msra.mxu0 %v31337_v37 }
 0xe12   :  { %28454 = vmatprep.subr.bf16.mxu1 %v34136_v13  ;;  %28496 = vmatprep.subr.bf16.mxu0 %v34136_v13 }
 0xe14   :  { %26518 = vmatmul.mubr.msk.f32.vlgmr.msra.gmra.mrb[112].mxu1 %vm361_vm2, %v31078_v59  ;;  %26595 = vmatmul.mubr.msk.f32.vlgmr.msra.gmra.mrb[110].mxu0 %vm361_vm2, %v31078_v59 }
 0xe15   :  { %28456 = vmatpush3.bf16.msra.mxu1 %v31359_v51  ;;  %28498 = vmatpush3.bf16.msra.mxu0 %v31361_v5 }
 0xe16   :  { %28457 = vmatprep.subr.bf16.mxu1 %v34136_v13  ;;  %28499 = vmatprep.subr.bf16.mxu0 %v34136_v13 }
 0xe17   :  { %26539 = vmatprep.mubr.msk.f32.mxu1 %vm29398_vm1, %v34132_v33  ;;  %26616 = vmatprep.mubr.msk.f32.mxu0 %vm29398_vm1, %v34132_v33 }
 0xe19   :  { %28459 = vmatpush3.bf16.msra.mxu1 %v31383_v58  ;;  %28501 = vmatpush3.bf16.msra.mxu0 %v31385_v0 }
 0xe1a   :  { %28466 = vmatprep.subr.bf16.mxu1 %v34136_v13  ;;  %28508 = vmatprep.subr.bf16.mxu0 %v34136_v13 }
 0xe1c   :  { %26540 = vmatmul.mubr.msk.f32.vlgmr.msra.gmra.mrb[114].mxu1 %vm361_vm2, %v31078_v59  ;;  %26617 = vmatmul.mubr.msk.f32.vlgmr.msra.gmra.mrb[112].mxu0 %vm361_vm2, %v31078_v59 }
 0xe1d   :  { %28468 = vmatpush3.bf16.msra.mxu1 %v31407_v8  ;;  %28510 = vmatpush3.bf16.msra.mxu0 %v31409_v14 }
 0xe1e   :  { %28469 = vmatprep.subr.bf16.mxu1 %v34136_v13  ;;  %28511 = vmatprep.subr.bf16.mxu0 %v34136_v13 }
 0xe1f   :  { %26561 = vmatprep.mubr.msk.f32.mxu1 %vm29398_vm1, %v34132_v33  ;;  %26638 = vmatprep.mubr.msk.f32.mxu0 %vm29398_vm1, %v34132_v33 }
 0xe21   :  { %28471 = vmatpush3.bf16.msra.mxu1 %v31431_v26  ;;  %28513 = vmatpush3.bf16.msra.mxu0 %v31433_v30 }
 0xe22   :  { %28478 = vmatprep.subr.bf16.mxu1 %v34136_v13  ;;  %28520 = vmatprep.subr.bf16.mxu0 %v34136_v13 }
 0xe24   :  { %26562 = vmatmul.mubr.msk.f32.vlgmr.msra.gmra.mrb[116].mxu1 %vm361_vm2, %v31078_v59  ;;  %26639 = vmatmul.mubr.msk.f32.vlgmr.msra.gmra.mrb[114].mxu0 %vm361_vm2, %v31078_v59 }
 0xe25   :  { %28480 = vmatpush3.bf16.msra.mxu1 %v31455_v34  ;;  %28522 = vmatpush3.bf16.msra.mxu0 %v31457_v29 }
 0xe26   :  { %28481 = vmatprep.subr.bf16.mxu1 %v34136_v13  ;;  %28523 = vmatprep.subr.bf16.mxu0 %v34136_v13 }
 0xe27   :  { %26583 = vmatprep.mubr.msk.f32.mxu1 %vm29398_vm1, %v34132_v33  ;;  %26660 = vmatprep.mubr.msk.f32.mxu0 %vm29398_vm1, %v34132_v33 }
 0xe29   :  { %28483 = vmatpush3.bf16.msra.mxu1 %v31479_v52  ;;  %28525 = vmatpush3.bf16.msra.mxu0 %v31481_v55 }
 0xe2a   :  { %28490 = vmatprep.subr.bf16.mxu1 %v34136_v13  ;;  %26674 = vmatprep.subr.mxu0 %v34132_v33 }
 0xe2c   :  { %26584 = vmatmul.mubr.msk.f32.vlgmr.msra.gmra.mrb[118].mxu1 %vm361_vm2, %v31078_v59  ;;  %26661 = vmatmul.mubr.msk.f32.vlgmr.msra.gmra.mrb[116].mxu0 %vm361_vm2, %v31078_v59 }
 0xe2d   :  { %28492 = vmatpush3.bf16.msra.mxu1 %v31497_v10  ;;  %26605 = vmatprep.mubr.msk.f32.mxu1 %vm29398_vm1, %v34132_v33 }
 0xe2e   :  { %28493 = vmatprep.subr.bf16.mxu1 %v34136_v13  ;;  %26676 = vmatprep.mubr.msk.f32.mxu0 %vm29398_vm1, %v34132_v33 }
 0xe31   :  { %28495 = vmatpush3.bf16.msra.mxu1 %v31512_v40 }
 0xe32   :  { %28502 = vmatprep.subr.bf16.mxu1 %v34136_v13 }
 0xe34   :  { %26606 = vmatmul.mubr.msk.f32.vlgmr.msra.gmra.mrb[120].mxu1 %vm361_vm2, %v31078_v59 }
 0xe35   :  { %28504 = vmatpush3.bf16.msra.mxu1 %v31526_v47  ;;  %26627 = vmatprep.mubr.msk.f32.mxu1 %vm29398_vm1, %v34132_v33 }
 0xe36   :  { %28505 = vmatprep.subr.bf16.mxu1 %v34136_v13 }
 0xe39   :  { %28507 = vmatpush3.bf16.msra.mxu1 %v31538_v9 }
 0xe3a   :  { %28514 = vmatprep.subr.bf16.mxu1 %v34136_v13 }
 0xe3c   :  { %26628 = vmatmul.mubr.msk.f32.vlgmr.msra.gmra.mrb[122].mxu1 %vm361_vm2, %v31078_v59 }
 0xe3d   :  { %28516 = vmatpush3.bf16.msra.mxu1 %v31550_v21  ;;  %26649 = vmatprep.mubr.msk.f32.mxu1 %vm29398_vm1, %v34132_v33 }
 0xe3e   :  { %28517 = vmatprep.subr.bf16.mxu1 %v34136_v13 }
 0xe41   :  { %28519 = vmatpush3.bf16.msra.mxu1 %v31562_v61 }
 0xe42   :  { %28526 = vmatprep.subr.bf16.mxu1 %v34136_v13 }
 0xe44   :  { %26650 = vmatmul.mubr.msk.f32.vlgmr.msra.gmra.mrb[124].mxu1 %vm361_vm2, %v31078_v59 }
 0xe45   :  { %28528 = vmatpush3.bf16.msra.mxu1 %v31574_v50  ;;  %26671 = vmatprep.mubr.msk.f32.mxu1 %vm29398_vm1, %v34132_v33 }
 0xe46   :  { %28529 = vmatprep.subr.bf16.mxu1 %v34136_v13 }
 0xe49   :  { %28531 = vmatpush3.bf16.msra.mxu1 %v31586_v42 }
 0xe4a   :  { %26684 = vmatprep.subr.mxu1 %v34132_v33 }
 0xe4c   :  { %26672 = vmatmul.mubr.msk.f32.vlgmr.msra.gmra.mrb[126].mxu1 %vm361_vm2, %v31078_v59 }
 0xe4d   :  { %26686 = vmatprep.mubr.msk.f32.mxu1 %vm29398_vm1, %v34132_v33 }
 0xeb7   :  { %v8170_v48 = vpop.f32.mrb[100].mxu1  ;;  %v8450_v2 = vpop.f32.mrb[98].mxu0 }
 0xeb8   :  { %v26420_v20 = vpop.f32.mrb[101].mxu1  ;;  %v26464_v38 = vpop.f32.mrb[99].mxu0  ;;  %v8171_v24 = vadd.f32 %v23983_v31, %v8170_v48  ;;  %v24001_v48 = vld [vmem:[%s34131_s30 + $0xa] ss:$0 sm:$0xff]  ;;  %v23987_v31 = vld [vmem:[%s34130_s7 + $0xc] ss:$0 sm:$0xff] }
 0xeb9   :  { %v23985_v38 = vld [vmem:[%s34130_s7 + $0xa] ss:$0 sm:$0xff] }
 0xeba   :  { %v9880_v20 = vmul.f32 0.5, %v8171_v24 }
 0xebf   :  { %v8240_v6 = vpop.f32.mrb[102].mxu1  ;;  %v8590_v15 = vpop.f32.mrb[100].mxu0 }
 0xec0   :  { %v26431_v22 = vpop.f32.mrb[103].mxu1  ;;  %v26486_v45 = vpop.f32.mrb[101].mxu0 }
 0xec7   :  { %v8310_v59 = vpop.f32.mrb[104].mxu1  ;;  %v8778_v42 = vpop.f32.mrb[102].mxu0 }
 0xec8   :  { %v8779_v50 = vadd.f32 %v23999_v35, %v8778_v42  ;;  %v26442_v61 = vpop.f32.mrb[105].mxu1  ;;  %v26508_v21 = vpop.f32.mrb[103].mxu0  ;;  %v8451_v35 = vadd.f32 %v23987_v31, %v8450_v2  ;;  %v24005_v2 = vld [vmem:[%s34131_s30 + $0xe] ss:$0 sm:$0xff] }
 0xec9   :  { %v8311_v61 = vadd.f32 %v23985_v38, %v8310_v59  ;;  %v24003_v59 = vld [vmem:[%s34131_s30 + $0xc] ss:$0 sm:$0xff] }
 0xeca   :  { %26675 = vmatpush3.xpose.msk.msra.mxu0 %vm2149_vm3, %v8779_v50 }
 0xecb   :  { %26679 = vmatprep.subr.mxu0 %v34132_v33  ;;  %v9882_v45 = vmul.f32 0.5, %v8311_v61 }
 0xecd   :  { %26677 = vmatmul.mubr.msk.f32.vlgmr.msra.gmra.mrb[118].mxu0 %vm2149_vm3, %v9880_v20 }
 0xece   :  { %26681 = vmatprep.mubr.msk.f32.mxu0 %vm29398_vm1, %v34132_v33 }
 0xecf   :  { %v8380_v21 = vpop.f32.mrb[106].mxu1  ;;  %v8918_v42 = vpop.f32.mrb[104].mxu0 }
 0xed0   :  { %v8919_v50 = vadd.f32 %v24001_v48, %v8918_v42  ;;  %v26453_v24 = vpop.f32.mrb[107].mxu1  ;;  %v26530_v22 = vpop.f32.mrb[105].mxu0 }
 0xed1   :  { %v23989_v24 = vld [vmem:[%s34130_s7 + $0xe] ss:$0 sm:$0xff] }
 0xed2   :  { %26685 = vmatpush3.xpose.msk.msra.mxu1 %vm2149_vm3, %v8919_v50  ;;  %v9884_v50 = vmul.f32 0.5, %v8451_v35  ;;  %v8591_v22 = vadd.f32 %v23989_v24, %v8590_v15  ;;  %v24000_v15 = vld [vmem:[%s34131_s30 + $0x9] ss:$0 sm:$0xff] }
 0xed3   :  { %26694 = vmatprep.subr.mxu1 %v34132_v33 }
 0xed5   :  { %26687 = vmatmul.mubr.msk.f32.vlgmr.msra.gmra.mrb[128].mxu1 %vm2149_vm3, %v9882_v45 }
 0xed6   :  { %26696 = vmatprep.mubr.msk.f32.mxu1 %vm29398_vm1, %v34132_v33 }
 0xed7   :  { %v8520_v20 = vpop.f32.mrb[108].mxu1  ;;  %v9058_v38 = vpop.f32.mrb[106].mxu0 }
 0xed8   :  { %v9059_v48 = vadd.f32 %v24003_v59, %v9058_v38  ;;  %v26475_v61 = vpop.f32.mrb[109].mxu1  ;;  %v26552_v42 = vpop.f32.mrb[107].mxu0 }
 0xed9   :  { %v23984_v61 = vld [vmem:[%s34130_s7 + $0x9] ss:$0 sm:$0xff]  ;;  %v24015_v42 = vld [vmem:[%s34133_s9 + $0x8] ss:$0 sm:$0xff] }
 0xeda   :  { %26695 = vmatpush3.xpose.msk.msra.mxu1 %vm2149_vm3, %v9059_v48  ;;  %v9886_v48 = vmul.f32 0.5, %v8591_v22 }
 0xedb   :  { %26704 = vmatprep.subr.mxu1 %v34132_v33 }
 0xedd   :  { %26697 = vmatmul.mubr.msk.f32.vlgmr.msra.gmra.mrb[130].mxu1 %vm2149_vm3, %v9884_v50  ;;  %v8241_v50 = vadd.f32 %v23984_v61, %v8240_v6  ;;  %v24002_v6 = vld [vmem:[%s34131_s30 + $0xb] ss:$0 sm:$0xff] }
 0xede   :  { %26706 = vmatprep.mubr.msk.f32.mxu1 %vm29398_vm1, %v34132_v33 }
 0xedf   :  { %v8660_v45 = vpop.f32.mrb[110].mxu1  ;;  %v9198_v31 = vpop.f32.mrb[108].mxu0 }
 0xee0   :  { %v9199_v59 = vadd.f32 %v24005_v2, %v9198_v31  ;;  %v26497_v35 = vpop.f32.mrb[111].mxu1  ;;  %v26574_v38 = vpop.f32.mrb[109].mxu0 }
 0xee1   :  { %v9881_v38 = vmul.f32 0.5, %v8241_v50 }
 0xee2   :  { %26705 = vmatpush3.xpose.msk.msra.mxu1 %vm2149_vm3, %v9199_v59 }
 0xee3   :  { %26714 = vmatprep.subr.mxu1 %v34132_v33 }
 0xee5   :  { %26707 = vmatmul.mubr.msk.f32.vlgmr.msra.gmra.mrb[132].mxu1 %vm2149_vm3, %v9886_v48  ;;  %v23986_v48 = vld [vmem:[%s34130_s7 + $0xb] ss:$0 sm:$0xff] }
 0xee6   :  { %26716 = vmatprep.mubr.msk.f32.mxu1 %vm29398_vm1, %v34132_v33  ;;  %v8381_v61 = vadd.f32 %v23986_v48, %v8380_v21  ;;  %v24004_v21 = vld [vmem:[%s34131_s30 + $0xd] ss:$0 sm:$0xff] }
 0xee7   :  { %v8848_v24 = vpop.f32.mrb[112].mxu1  ;;  %v9386_v2 = vpop.f32.mrb[110].mxu0 }
 0xee8   :  { %v8849_v22 = vadd.f32 %v24000_v15, %v8848_v24  ;;  %v9387_v31 = vadd.f32 %v24015_v42, %v9386_v2  ;;  %v26519_v59 = vpop.f32.mrb[113].mxu1  ;;  %v26596_v35 = vpop.f32.mrb[111].mxu0 }
 0xeea   :  { %26680 = vmatpush3.xpose.msk.msra.mxu0 %vm2149_vm3, %v8849_v22  ;;  %26715 = vmatpush3.msra.mxu1 %v9387_v31  ;;  %v9883_v22 = vmul.f32 0.5, %v8381_v61  ;;  %v23988_v31 = vld [vmem:[%s34130_s7 + $0xd] ss:$0 sm:$0xff] }
 0xeeb   :  { %26689 = vmatprep.subr.mxu0 %v34132_v33  ;;  %26724 = vmatprep.subr.mxu1 %v34132_v33  ;;  %v8521_v59 = vadd.f32 %v23988_v31, %v8520_v20  ;;  %v24006_v20 = vld [vmem:[%s34131_s30 + $0xf] ss:$0 sm:$0xff] }
 0xeed   :  { %26682 = vmatmul.mubr.msk.f32.vlgmr.msra.gmra.mrb[120].mxu0 %vm2149_vm3, %v9881_v38 }
 0xeee   :  { %26691 = vmatprep.mubr.msk.f32.mxu0 %vm29398_vm1, %v34132_v33 }
 0xeef   :  { %v8988_v15 = vpop.f32.mrb[114].mxu1  ;;  %v31662_v42 = vpop.f32.mrb[112].mxu0 }
 0xef0   :  { %v8989_v50 = vadd.f32 %v24002_v6, %v8988_v15  ;;  %v26541_v24 = vpop.f32.mrb[115].mxu1  ;;  %v26618_v2 = vpop.f32.mrb[113].mxu0  ;;  %v9885_v15 = vmul.f32 0.5, %v8521_v59 }
 0xef2   :  { %26690 = vmatpush3.xpose.msk.msra.mxu0 %vm2149_vm3, %v8989_v50  ;;  %v23990_v50 = vld [vmem:[%s34130_s7 + $0xf] ss:$0 sm:$0xff] }
 0xef3   :  { %26699 = vmatprep.subr.mxu0 %v34132_v33  ;;  %v8661_v24 = vadd.f32 %v23990_v50, %v8660_v45 }
 0xef5   :  { %26692 = vmatmul.mubr.msk.f32.vlgmr.msra.gmra.mrb[122].mxu0 %vm2149_vm3, %v9883_v22 }
 0xef6   :  { %26701 = vmatprep.mubr.msk.f32.mxu0 %vm29398_vm1, %v34132_v33 }
 0xef7   :  { %v9128_v35 = vpop.f32.mrb[116].mxu1  ;;  %v31675_v38 = vpop.f32.mrb[114].mxu0 }
 0xef8   :  { %v9129_v48 = vadd.f32 %v24004_v21, %v9128_v35  ;;  %v26563_v6 = vpop.f32.mrb[117].mxu1  ;;  %v26640_v61 = vpop.f32.mrb[115].mxu0  ;;  %v9887_v35 = vmul.f32 0.5, %v8661_v24 }
 0xefa   :  { %26700 = vmatpush3.xpose.msk.msra.mxu0 %vm2149_vm3, %v9129_v48  ;;  %v24016_v48 = vld [vmem:[%s34133_s9 + $0x9] ss:$0 sm:$0xff] }
 0xefb   :  { %26709 = vmatprep.subr.mxu0 %v34132_v33 }
 0xefd   :  { %26702 = vmatmul.mubr.msk.f32.vlgmr.msra.gmra.mrb[124].mxu0 %vm2149_vm3, %v9885_v15 }
 0xefe   :  { %26711 = vmatprep.mubr.msk.f32.mxu0 %vm29398_vm1, %v34132_v33 }
 0xeff   :  { %v9268_v2 = vpop.f32.mrb[118].mxu1  ;;  %v31688_v22 = vpop.f32.mrb[116].mxu0 }
 0xf00   :  { %v9269_v31 = vadd.f32 %v24006_v20, %v9268_v2  ;;  %v26585_v21 = vpop.f32.mrb[119].mxu1  ;;  %v26662_v59 = vpop.f32.mrb[117].mxu0 }
 0xf02   :  { %26710 = vmatpush3.xpose.msk.msra.mxu0 %vm2149_vm3, %v9269_v31 }
 0xf03   :  { %26719 = vmatprep.subr.mxu0 %v34132_v33 }
 0xf05   :  { %26712 = vmatmul.mubr.msk.f32.vlgmr.msra.gmra.mrb[126].mxu0 %vm2149_vm3, %v9887_v35 }
 0xf06   :  { %26721 = vmatprep.mubr.msk.f32.mxu0 %vm29398_vm1, %v34132_v33 }
 0xf07   :  { %v9456_v45 = vpop.f32.mrb[120].mxu1 }
 0xf08   :  { %v9457_v6 = vadd.f32 %v24016_v48, %v9456_v45  ;;  %v26607_v61 = vpop.f32.mrb[121].mxu1 }
 0xf0a   :  { %26720 = vmatpush3.msra.mxu0 %v9457_v6 }
 0xf0b   :  { %26729 = vmatprep.subr.mxu0 %v34132_v33 }
 0xf0f   :  { %v31699_v15 = vpop.f32.mrb[122].mxu1 }
 0xf10   :  { %v26629_v50 = vpop.f32.mrb[123].mxu1 }
 0xf17   :  { %v31701_v20 = vpop.f32.mrb[124].mxu1 }
 0xf18   :  { %v26651_v24 = vpop.f32.mrb[125].mxu1 }
 0xf1f   :  { %v31703_v2 = vpop.f32.mrb[126].mxu1 }
 0xf20   :  { %v26673_v31 = vpop.f32.mrb[127].mxu1 }
 0xfa0   :  { %v9960_v21 = vpop.f32.mrb[118].mxu0 }
 0xfa1   :  { %v26678_v59 = vpop.f32.mrb[119].mxu0  ;;  %v10496_v35 = vsel %vm99_vm0, %v9960_v21, -inf }
 0xfa2   :  { %10497 = vmax.xlane.f32.xlu0 %v10496_v35 }
 0xfa8   :  { %v10112_v9 = vpop.f32.mrb[128].mxu1 }
 0xfa9   :  { %v26688_v48 = vpop.f32.mrb[129].mxu1  ;;  %v10502_v45 = vsel %vm99_vm0, %v10112_v9, -inf }
 0xfaa   :  { %10503 = vmax.xlane.f32.xlu0 %v10502_v45 }
 0xfb0   :  { %v10264_v6 = vpop.f32.mrb[130].mxu1 }
 0xfb1   :  { %v26698_v61 = vpop.f32.mrb[131].mxu1  ;;  %v10508_v50 = vsel %vm99_vm0, %v10264_v6, -inf }
 0xfb2   :  { %10509 = vmax.xlane.f32.xlu0 %v10508_v50 }
 0xfb8   :  { %v10416_v47 = vpop.f32.mrb[132].mxu1 }
 0xfb9   :  { %v26708_v24 = vpop.f32.mrb[133].mxu1  ;;  %v10514_v40 = vsel %vm99_vm0, %v10416_v47, -inf }
 0xfba   :  { %10515 = vmax.xlane.f32.xlu0 %v10514_v40 }
 0xfc0   :  { %v10036_v31 = vpop.f32.mrb[120].mxu0 }
 0xfc1   :  { %v26683_v59 = vpop.f32.mrb[121].mxu0  ;;  %v10499_v10 = vsel %vm99_vm0, %v10036_v31, -inf }
 0xfc2   :  { %10500 = vmax.xlane.f32.xlu1 %v10499_v10 }
 0xfc8   :  { %v10188_v35 = vpop.f32.mrb[122].mxu0 }
 0xfc9   :  { %v26693_v48 = vpop.f32.mrb[123].mxu0  ;;  %v10505_v55 = vsel %vm99_vm0, %v10188_v35, -inf }
 0xfca   :  { %10506 = vmax.xlane.f32.xlu1 %v10505_v55 }
 0xfd0   :  { %v10340_v45 = vpop.f32.mrb[124].mxu0 }
 0xfd1   :  { %v26703_v61 = vpop.f32.mrb[125].mxu0  ;;  %v10511_v52 = vsel %vm99_vm0, %v10340_v45, -inf }
 0xfd2   :  { %10512 = vmax.xlane.f32.xlu1 %v10511_v52 }
 0xfd8   :  { %v10492_v50 = vpop.f32.mrb[126].mxu0 }
 0xfd9   :  { %v26713_v24 = vpop.f32.mrb[127].mxu0  ;;  %v10517_v29 = vsel %vm99_vm0, %v10492_v50, -inf }
 0xfda   :  { %10518 = vmax.xlane.f32.xlu1 %v10517_v29 }
0x102f   :  { %v10498_v40 = vpop.xlane.xlu0 %10497 }
0x1030   :  { %v10520_v59 = vsub.f32 %v9960_v21, %v10498_v40 }
0x1032   :  { %v10528_v34 = vmul.f32 1.442695, %v10520_v59 }
0x1034   :  { %29138 = vpow2.f32 %v10528_v34 }
0x1037   :  { %v10504_v10 = vpop.xlane.xlu0 %10503 }
0x1038   :  { %v10522_v30 = vsub.f32 %v10112_v9, %v10504_v10 }
0x103a   :  { %v10532_v48 = vmul.f32 1.442695, %v10522_v30 }
0x103c   :  { %29140 = vpow2.f32 %v10532_v48 }
0x103e   :  { %v29139_v26 = vpop.eup %29138 }
0x103f   :  { %v10510_v55 = vpop.xlane.xlu0 %10509  ;;  %v10544_v61 = vsel %vm99_vm0, %v29139_v26, 0.0 }
0x1040   :  { %v10524_v14 = vsub.f32 %v10264_v6, %v10510_v55  ;;  %10545 = vadd.xlane.f32.xlu0 %v10544_v61 }
0x1042   :  { %v10536_v52 = vmul.f32 1.442695, %v10524_v14 }
0x1044   :  { %29142 = vpow2.f32 %v10536_v52 }
0x1046   :  { %v29141_v24 = vpop.eup %29140 }
0x1047   :  { %v10516_v8 = vpop.xlane.xlu0 %10515  ;;  %v10550_v29 = vsel %vm99_vm0, %v29141_v24, 0.0 }
0x1048   :  { %v10526_v0 = vsub.f32 %v10416_v47, %v10516_v8  ;;  %10551 = vadd.xlane.f32.xlu0 %v10550_v29 }
0x104a   :  { %v10540_v21 = vmul.f32 1.442695, %v10526_v0  ;;  %v7873_v0 = vadd.f32 %v31008_v17, %v30987_v46 }
0x104c   :  { %29144 = vpow2.f32 %v10540_v21  ;;  %v7879_v48 = vsel %vm361_vm2, %v7873_v0, 0.0 }
0x104e   :  { %v31715_v34 = vpop.eup %29142 }
0x104f   :  { %v10501_v30 = vpop.xlane.xlu1 %10500  ;;  %v10556_v9 = vsel %vm99_vm0, %v31715_v34, 0.0 }
0x1050   :  { %v10521_v40 = vsub.f32 %v10036_v31, %v10501_v30  ;;  %10557 = vadd.xlane.f32.xlu0 %v10556_v9 }
0x1052   :  { %v10530_v6 = vmul.f32 1.442695, %v10521_v40 }
0x1054   :  { %29146 = vpow2.f32 %v10530_v6 }
0x1056   :  { %v31719_v14 = vpop.eup %29144 }
0x1057   :  { %v10507_v59 = vpop.xlane.xlu1 %10506  ;;  %v10562_v10 = vsel %vm99_vm0, %v31719_v14, 0.0 }
0x1058   :  { %v10523_v8 = vsub.f32 %v10188_v35, %v10507_v59  ;;  %10563 = vadd.xlane.f32.xlu0 %v10562_v10 }
0x105a   :  { %v10534_v47 = vmul.f32 1.442695, %v10523_v8 }
0x105c   :  { %29148 = vpow2.f32 %v10534_v47  ;;  %7880 = vadd.xlane.f32.xlu0 %v7879_v48 }
0x105e   :  { %v31726_v31 = vpop.eup %29146 }
0x105f   :  { %v10513_v55 = vpop.xlane.xlu1 %10512  ;;  %v10547_v61 = vsel %vm99_vm0, %v31726_v31, 0.0 }
0x1060   :  { %v10525_v52 = vsub.f32 %v10340_v45, %v10513_v55  ;;  %10548 = vadd.xlane.f32.xlu1 %v10547_v61  ;;  %v24019_v61 = vld [vmem:[%s34133_s9 + $0xc] ss:$0 sm:$0xff] }
0x1062   :  { %v10538_v29 = vmul.f32 1.442695, %v10525_v52 }
0x1064   :  { %29150 = vpow2.f32 %v10538_v29 }
0x1066   :  { %v31730_v21 = vpop.eup %29148 }
0x1067   :  { %v10519_v46 = vpop.xlane.xlu1 %10518  ;;  %v10553_v17 = vsel %vm99_vm0, %v31730_v21, 0.0 }
0x1068   :  { %v10527_v35 = vsub.f32 %v10492_v50, %v10519_v46  ;;  %10554 = vadd.xlane.f32.xlu1 %v10553_v17  ;;  %v24017_v50 = vld [vmem:[%s34133_s9 + $0xa] ss:$0 sm:$0xff]  ;;  %v24021_v46 = vld [vmem:[%s34133_s9 + $0xe] ss:$0 sm:$0xff] }
0x1069   :  { %v9527_v48 = vadd.f32 %v24017_v50, %v31662_v42  ;;  %v24018_v50 = vld [vmem:[%s34133_s9 + $0xb] ss:$0 sm:$0xff] }
0x106a   :  { %v10542_v30 = vmul.f32 1.442695, %v10527_v35 }
0x106c   :  { %29152 = vpow2.f32 %v10542_v30 }
0x106e   :  { %v31734_v9 = vpop.eup %29150 }
0x106f   :  { %v10559_v40 = vsel %vm99_vm0, %v31734_v9, 0.0 }
0x1070   :  { %10560 = vadd.xlane.f32.xlu1 %v10559_v40 }
0x1076   :  { %v31738_v45 = vpop.eup %29152 }
0x1077   :  { %v10565_v6 = vsel %vm99_vm0, %v31738_v45, 0.0 }
0x1078   :  { %10566 = vadd.xlane.f32.xlu1 %v10565_v6 }
0x10cd   :  { %v10546_v59 = vpop.xlane.xlu0 %10545 }
0x10ce   :  { %29154 = vrcp.f32 %v10546_v59 }
0x10d5   :  { %v10552_v10 = vpop.xlane.xlu0 %10551 }
0x10d6   :  { %29156 = vrcp.f32 %v10552_v10 }
0x10d8   :  { %v29155_v8 = vpop.eup %29154 }
0x10d9   :  { %v10569_v47 = vmul.f32 %v29155_v8, %v29139_v26  ;;  %v9667_v26 = vadd.f32 %v24019_v61, %v31675_v38  ;;  %v9807_v38 = vadd.f32 %v24021_v46, %v31688_v22 }
0x10db   :  { %26717 = vmatmul.mubr.msk.f32.vlgmr.msra.gmra.mrb[134].mxu1 %vm99_vm0, %v10569_v47 }
0x10dc   :  { %26725 = vmatpush3.msra.mxu1 %v9527_v48  ;;  %26726 = vmatprep.mubr.msk.f32.mxu1 %vm29398_vm1, %v34132_v33  ;;  %v9597_v48 = vadd.f32 %v24018_v50, %v31699_v15 }
0x10dd   :  { %v10558_v55 = vpop.xlane.xlu0 %10557  ;;  %26734 = vmatprep.subr.mxu1 %v34132_v33 }
0x10de   :  { %29158 = vrcp.f32 %v10558_v55  ;;  %v24020_v55 = vld [vmem:[%s34133_s9 + $0xd] ss:$0 sm:$0xff] }
0x10e0   :  { %v29157_v52 = vpop.eup %29156 }
0x10e1   :  { %v10573_v29 = vmul.f32 %v29157_v52, %v29141_v24 }
0x10e3   :  { %26727 = vmatmul.mubr.msk.f32.vlgmr.msra.gmra.mrb[136].mxu1 %vm99_vm0, %v10573_v29  ;;  %v24022_v29 = vld [vmem:[%s34133_s9 + $0xf] ss:$0 sm:$0xff] }
0x10e4   :  { %26735 = vmatpush3.msra.mxu1 %v9667_v26  ;;  %26736 = vmatprep.mubr.msk.f32.mxu1 %vm29398_vm1, %v34132_v33 }
0x10e5   :  { %v10564_v42 = vpop.xlane.xlu0 %10563  ;;  %26744 = vmatprep.subr.mxu1 %v34132_v33 }
0x10e6   :  { %29160 = vrcp.f32 %v10564_v42 }
0x10e8   :  { %v29159_v17 = vpop.eup %29158 }
0x10e9   :  { %v10577_v35 = vmul.f32 %v29159_v17, %v31715_v34  ;;  %v7881_v24 = vpop.xlane.xlu0 %7880  ;;  %v23977_v17 = vld [vmem:[%s34135_s4 + $0x28] sm:$0xf] }
0x10ea   :  { %v7883_v30 = vmul.f32 0.03125, %v7881_v24 }
0x10eb   :  { %26737 = vmatmul.mubr.msk.f32.vlgmr.msra.gmra.mrb[138].mxu1 %vm99_vm0, %v10577_v35 }
0x10ec   :  { %v31764_v40 = vsub.f32 %v7873_v0, %v7883_v30  ;;  %26745 = vmatpush3.msra.mxu1 %v9807_v38  ;;  %26746 = vmatprep.mubr.msk.f32.mxu1 %vm29398_vm1, %v34132_v33 }
0x10ed   :  { %v10549_v6 = vpop.xlane.xlu1 %10548  ;;  %26754 = vmatprep.subr.mxu1 %v34132_v33 }
0x10ee   :  { %29162 = vrcp.f32 %v10549_v6  ;;  %v7887_v59 = vmul.f32 %v31764_v40, %v31764_v40  ;;  %v23979_v6 = vld [vmem:[%s34135_s4 + $0x30] sm:$0xf] }
0x10f0   :  { %v29161_v34 = vpop.eup %29160  ;;  %v7891_v10 = vsel %vm361_vm2, %v7887_v59, 0.0 }
0x10f1   :  { %v10581_v22 = vmul.f32 %v29161_v34, %v31719_v14  ;;  %7892 = vadd.xlane.f32.xlu1 %v7891_v10  ;;  %v23981_v10 = vld [vmem:[%s34135_s4 + $0x38] sm:$0xf] }
0x10f3   :  { %26747 = vmatmul.mubr.msk.f32.vlgmr.msra.gmra.mrb[140].mxu1 %vm99_vm0, %v10581_v22 }
0x10f4   :  { %26756 = vmatprep.mubr.msk.f32.mxu1 %vm29398_vm1, %v34132_v33 }
0x10f5   :  { %v10555_v0 = vpop.xlane.xlu1 %10554 }
0x10f6   :  { %29164 = vrcp.f32 %v10555_v0 }
0x10f8   :  { %v29163_v8 = vpop.eup %29162 }
0x10f9   :  { %v10571_v47 = vmul.f32 %v29163_v8, %v31726_v31  ;;  %v9737_v31 = vadd.f32 %v24020_v55, %v31701_v20 }
0x10fb   :  { %26722 = vmatmul.mubr.msk.f32.vlgmr.msra.gmra.mrb[128].mxu0 %vm99_vm0, %v10571_v47 }
0x10fc   :  { %26730 = vmatpush3.msra.mxu0 %v9597_v48  ;;  %26731 = vmatprep.mubr.msk.f32.mxu0 %vm29398_vm1, %v34132_v33 }
0x10fd   :  { %v10561_v14 = vpop.xlane.xlu1 %10560  ;;  %26739 = vmatprep.subr.mxu0 %v34132_v33 }
0x10fe   :  { %29166 = vrcp.f32 %v10561_v14  ;;  %v29313_v14 = vld [vmem:[%s34006_s18] ss:$0 sm:$0xff] }
0x1100   :  { %v29165_v61 = vpop.eup %29164 }
0x1101   :  { %v10575_v52 = vmul.f32 %v29165_v61, %v31730_v21  ;;  %v9877_v21 = vadd.f32 %v24022_v29, %v31703_v2  ;;  %v31810_v2 = vld [vmem:[%s34135_s4 + $0x20] sm:$0xf] }
0x1102   :  { %26755 = vmatpush3.msk.msra.mxu1 %vm3433_vm4, %v31810_v2 }
0x1103   :  { %26732 = vmatmul.mubr.msk.f32.vlgmr.msra.gmra.mrb[130].mxu0 %vm99_vm0, %v10575_v52  ;;  %26764 = vmatprep.subr.mxu1 %v34132_v33  ;;  %v31863_v52 = vld [vmem:[%s34135_s4 + $0x2c] sm:$0xf] }
0x1104   :  { %26740 = vmatpush3.msra.mxu0 %v9737_v31  ;;  %26741 = vmatprep.mubr.msk.f32.mxu0 %vm29398_vm1, %v34132_v33 }
0x1105   :  { %v10567_v15 = vpop.xlane.xlu1 %10566  ;;  %26749 = vmatprep.subr.mxu0 %v34132_v33 }
0x1106   :  { %29168 = vrcp.f32 %v10567_v15 }
0x1108   :  { %v29167_v26 = vpop.eup %29166 }
0x1109   :  { %v10579_v42 = vmul.f32 %v29167_v26, %v31734_v9  ;;  %v23976_v9 = vld [vmem:[%s34135_s4 + $0x24] sm:$0xf] }
0x110b   :  { %26742 = vmatmul.mubr.msk.f32.vlgmr.msra.gmra.mrb[132].mxu0 %vm99_vm0, %v10579_v42 }
0x110c   :  { %26750 = vmatpush3.msra.mxu0 %v9877_v21  ;;  %26751 = vmatprep.mubr.msk.f32.mxu0 %vm29398_vm1, %v34132_v33 }
0x110d   :  { %26759 = vmatprep.subr.mxu0 %v34132_v33 }
0x1110   :  { %v29169_v20 = vpop.eup %29168 }
0x1111   :  { %v10583_v46 = vmul.f32 %v29169_v20, %v31738_v45 }
0x1113   :  { %26752 = vmatmul.mubr.msk.f32.vlgmr.msra.gmra.mrb[134].mxu0 %vm99_vm0, %v10583_v46 }
0x1114   :  { %26761 = vmatprep.mubr.msk.f32.mxu0 %vm29398_vm1, %v34132_v33  ;;  %26760 = vmatpush3.msk.msra.mxu0 %vm3433_vm4, %v23976_v9 }
0x1115   :  { %26769 = vmatprep.subr.mxu0 %v34132_v33 }
0x117e   :  { %v7893_v45 = vpop.xlane.xlu1 %7892 }
0x117f   :  { %v7895_v38 = vmul.f32 0.03125, %v7893_v45 }
0x1181   :  { %v7897_v30 = vadd.f32 1e-05, %v7895_v38 }
0x1183   :  { %29170 = vrsqrt.f32 %v7897_v30 }
0x118d   :  { %v29171_v50 = vpop.eup %29170 }
0x118e   :  { %v7901_v8 = vmul.f32 %v29171_v50, %v31764_v40  ;;  %v29314_v40 = vld [vmem:[%s34007_s19] ss:$0 sm:$0xff] }
0x1190   :  { %v7909_v55 = vmul.f32 %v29313_v14, %v7901_v8 }
0x1192   :  { %v31857_v61 = vadd.f32 %v29314_v40, %v7909_v55 }
0x11ae   :  { %v10653_v35 = vpop.f32.mrb[134].mxu1 }
0x11af   :  { %v26718_v24 = vpop.f32.mrb[135].mxu1  ;;  %26757 = vmatmul.mubr.msk.f32.vlgmr.msra.gmra.mrb[142].mxu1 %vm2149_vm3, %v10653_v35 }
0x11b0   :  { %26765 = vmatpush3.msk.msra.mxu1 %vm3433_vm4, %v23977_v17  ;;  %26766 = vmatprep.mubr.msk.f32.mxu1 %vm29398_vm1, %v34132_v33 }
0x11b1   :  { %26774 = vmatprep.subr.mxu1 %v34132_v33 }
0x11b6   :  { %v10799_v59 = vpop.f32.mrb[136].mxu1 }
0x11b7   :  { %v26728_v34 = vpop.f32.mrb[137].mxu1  ;;  %26767 = vmatmul.mubr.msk.f32.vlgmr.msra.gmra.mrb[144].mxu1 %vm2149_vm3, %v10799_v59 }
0x11b8   :  { %26775 = vmatpush3.msk.msra.mxu1 %vm3433_vm4, %v23979_v6  ;;  %26776 = vmatprep.mubr.msk.f32.mxu1 %vm29398_vm1, %v34132_v33 }
0x11b9   :  { %26784 = vmatprep.subr.mxu1 %v34132_v33 }
0x11be   :  { %v10945_v22 = vpop.f32.mrb[138].mxu1 }
0x11bf   :  { %v26738_v0 = vpop.f32.mrb[139].mxu1  ;;  %26777 = vmatmul.mubr.msk.f32.vlgmr.msra.gmra.mrb[146].mxu1 %vm2149_vm3, %v10945_v22 }
0x11c0   :  { %26785 = vmatpush3.msk.msra.mxu1 %vm3433_vm4, %v23981_v10  ;;  %26786 = vmatprep.mubr.msk.f32.mxu1 %vm29398_vm1, %v34132_v33 }
0x11c1   :  { %28532 = vmatprep.subr.bf16.mxu1 %v34136_v13 }
0x11c6   :  { %v11091_v47 = vpop.f32.mrb[140].mxu1 }
0x11c7   :  { %v26748_v48 = vpop.f32.mrb[141].mxu1  ;;  %26787 = vmatmul.mubr.msk.f32.vlgmr.msra.gmra.mrb[148].mxu1 %vm2149_vm3, %v11091_v47 }
0x11c8   :  { %28534 = vmatpush3.bf16.msra.mxu1 %v31022_v63  ;;  %26802 = vmatprep.mubr.msk.f32.mxu1 %vm29398_vm1, %v34132_v33 }
0x11c9   :  { %28535 = vmatprep.subr.bf16.mxu1 %v34136_v13 }
0x11cc   :  { %28537 = vmatpush3.bf16.msra.mxu1 %v31042_v43 }
0x11cd   :  { %28544 = vmatprep.subr.bf16.mxu1 %v34136_v13 }
0x11ce   :  { %v10726_v63 = vpop.f32.mrb[128].mxu0 }
0x11cf   :  { %26803 = vmatmul.mubr.msk.f32.vlgmr.msra.gmra.mrb[150].mxu1 %vm361_vm2, %v31857_v61  ;;  %v26723_v31 = vpop.f32.mrb[129].mxu0  ;;  %26762 = vmatmul.mubr.msk.f32.vlgmr.msra.gmra.mrb[136].mxu0 %vm2149_vm3, %v10726_v63 }
0x11d0   :  { %28546 = vmatpush3.bf16.msra.mxu1 %v31119_v62  ;;  %26824 = vmatprep.mubr.msk.f32.mxu1 %vm29398_vm1, %v34132_v33  ;;  %v31882_v62 = vld [vmem:[%s34135_s4 + $0x34] sm:$0xf] }
0x11d1   :  { %28547 = vmatprep.subr.bf16.mxu1 %v34136_v13  ;;  %26770 = vmatpush3.msk.msra.mxu0 %vm3433_vm4, %v31863_v52 }
0x11d2   :  { %26771 = vmatprep.mubr.msk.f32.mxu0 %vm29398_vm1, %v34132_v33  ;;  %26779 = vmatprep.subr.mxu0 %v34132_v33 }
0x11d4   :  { %28549 = vmatpush3.bf16.msra.mxu1 %v31143_v39 }
0x11d5   :  { %28556 = vmatprep.subr.bf16.mxu1 %v34136_v13 }
0x11d6   :  { %v10872_v43 = vpop.f32.mrb[130].mxu0 }
0x11d7   :  { %26825 = vmatmul.mubr.msk.f32.vlgmr.msra.gmra.mrb[152].mxu1 %vm361_vm2, %v31857_v61  ;;  %v26733_v15 = vpop.f32.mrb[131].mxu0  ;;  %26772 = vmatmul.mubr.msk.f32.vlgmr.msra.gmra.mrb[138].mxu0 %vm2149_vm3, %v10872_v43 }
0x11d8   :  { %28558 = vmatpush3.bf16.msra.mxu1 %v31027_v12  ;;  %26846 = vmatprep.mubr.msk.f32.mxu1 %vm29398_vm1, %v34132_v33  ;;  %v31901_v12 = vld [vmem:[%s34135_s4 + $0x3c] sm:$0xf] }
0x11d9   :  { %28559 = vmatprep.subr.bf16.mxu1 %v34136_v13  ;;  %26780 = vmatpush3.msk.msra.mxu0 %vm3433_vm4, %v31882_v62 }
0x11da   :  { %26781 = vmatprep.mubr.msk.f32.mxu0 %vm29398_vm1, %v34132_v33  ;;  %26789 = vmatprep.subr.mxu0 %v34132_v33 }
0x11dc   :  { %28561 = vmatpush3.bf16.msra.mxu1 %v31047_v44 }
0x11dd   :  { %28568 = vmatprep.subr.bf16.mxu1 %v34136_v13 }
0x11de   :  { %v11018_v39 = vpop.f32.mrb[132].mxu0 }
0x11df   :  { %26847 = vmatmul.mubr.msk.f32.vlgmr.msra.gmra.mrb[154].mxu1 %vm361_vm2, %v31857_v61  ;;  %v26743_v29 = vpop.f32.mrb[133].mxu0  ;;  %26782 = vmatmul.mubr.msk.f32.vlgmr.msra.gmra.mrb[140].mxu0 %vm2149_vm3, %v11018_v39 }
0x11e0   :  { %28570 = vmatpush3.bf16.msra.mxu1 %v31073_v54  ;;  %26790 = vmatpush3.msk.msra.mxu0 %vm3433_vm4, %v31901_v12 }
0x11e1   :  { %28571 = vmatprep.subr.bf16.mxu1 %v34136_v13  ;;  %26868 = vmatprep.mubr.msk.f32.mxu1 %vm29398_vm1, %v34132_v33 }
0x11e2   :  { %26791 = vmatprep.mubr.msk.f32.mxu0 %vm29398_vm1, %v34132_v33  ;;  %28538 = vmatprep.subr.bf16.mxu0 %v34136_v13 }
0x11e4   :  { %28573 = vmatpush3.bf16.msra.mxu1 %v31097_v1  ;;  %v34177_v1 = vld [vmem:[#allocation13_spill] sm:$0xff] }
0x11e5   :  { %28580 = vmatprep.subr.bf16.mxu1 %v34136_v13 }
0x11e6   :  { %v11164_v44 = vpop.f32.mrb[134].mxu0 }
0x11e7   :  { %26869 = vmatmul.mubr.msk.f32.vlgmr.msra.gmra.mrb[156].mxu1 %vm361_vm2, %v31857_v61  ;;  %v26753_v54 = vpop.f32.mrb[135].mxu0  ;;  %26792 = vmatmul.mubr.msk.f32.vlgmr.msra.gmra.mrb[142].mxu0 %vm2149_vm3, %v11164_v44 }
0x11e8   :  { %28540 = vmatpush3.bf16.msra.mxu0 %v31071_v53  ;;  %28582 = vmatpush3.bf16.msra.mxu1 %v31121_v49  ;;  %v34175_v53 = vld [vmem:[#allocation11_spill] sm:$0xff]  ;;  %v34178_v49 = vld [vmem:[#allocation12_spill] sm:$0xff]  ;;  %v29315_v54 = vld [vmem:[%s34130_s7 + $0x8] ss:$0 sm:$0xff] }
0x11e9   :  { %28541 = vmatprep.subr.bf16.mxu0 %v34136_v13  ;;  %28583 = vmatprep.subr.bf16.mxu1 %v34136_v13 }
0x11ea   :  { %26813 = vmatprep.mubr.msk.f32.mxu0 %vm29398_vm1, %v34132_v33  ;;  %26890 = vmatprep.mubr.msk.f32.mxu1 %vm29398_vm1, %v34132_v33 }
0x11ec   :  { %28543 = vmatpush3.bf16.msra.mxu0 %v31095_v60  ;;  %28585 = vmatpush3.bf16.msra.mxu1 %v31145_v56  ;;  %v34176_v60 = vld [vmem:[#allocation10_spill] sm:$0xff]  ;;  %v34179_v56 = vld [vmem:[#allocation15_spill] sm:$0xff] }
0x11ed   :  { %28550 = vmatprep.subr.bf16.mxu0 %v34136_v13  ;;  %28592 = vmatprep.subr.bf16.mxu1 %v34136_v13 }
0x11ef   :  { %26814 = vmatmul.mubr.msk.f32.vlgmr.msra.gmra.mrb[144].mxu0 %vm361_vm2, %v31857_v61  ;;  %26891 = vmatmul.mubr.msk.f32.vlgmr.msra.gmra.mrb[158].mxu1 %vm361_vm2, %v31857_v61 }
0x11f0   :  { %28552 = vmatpush3.bf16.msra.mxu0 %v31167_v3  ;;  %28594 = vmatpush3.bf16.msra.mxu1 %v31169_v18  ;;  %v34180_v3 = vld [vmem:[#allocation14_spill] sm:$0xff]  ;;  %v34181_v18 = vld [vmem:[#allocation17_spill] sm:$0xff] }
0x11f1   :  { %28553 = vmatprep.subr.bf16.mxu0 %v34136_v13  ;;  %28595 = vmatprep.subr.bf16.mxu1 %v34136_v13 }
0x11f2   :  { %26835 = vmatprep.mubr.msk.f32.mxu0 %vm29398_vm1, %v34132_v33  ;;  %26912 = vmatprep.mubr.msk.f32.mxu1 %vm29398_vm1, %v34132_v33 }
0x11f4   :  { %28555 = vmatpush3.bf16.msra.mxu0 %v31191_v27  ;;  %28597 = vmatpush3.bf16.msra.mxu1 %v31193_v4  ;;  %v34182_v27 = vld [vmem:[#allocation16_spill] sm:$0xff]  ;;  %v34183_v4 = vld [vmem:[#allocation19_spill] sm:$0xff] }
0x11f5   :  { %28562 = vmatprep.subr.bf16.mxu0 %v34136_v13  ;;  %28604 = vmatprep.subr.bf16.mxu1 %v34136_v13 }
0x11f7   :  { %26836 = vmatmul.mubr.msk.f32.vlgmr.msra.gmra.mrb[146].mxu0 %vm361_vm2, %v31857_v61  ;;  %26913 = vmatmul.mubr.msk.f32.vlgmr.msra.gmra.mrb[160].mxu1 %vm361_vm2, %v31857_v61 }
0x11f8   :  { %28564 = vmatpush3.bf16.msra.mxu0 %v31215_v36  ;;  %28606 = vmatpush3.bf16.msra.mxu1 %v31217_v25  ;;  %v34184_v36 = vld [vmem:[#allocation18_spill] sm:$0xff]  ;;  %v34185_v25 = vld [vmem:[#allocation21_spill] sm:$0xff] }
0x11f9   :  { %28565 = vmatprep.subr.bf16.mxu0 %v34136_v13  ;;  %28607 = vmatprep.subr.bf16.mxu1 %v34136_v13 }
0x11fa   :  { %26857 = vmatprep.mubr.msk.f32.mxu0 %vm29398_vm1, %v34132_v33  ;;  %26934 = vmatprep.mubr.msk.f32.mxu1 %vm29398_vm1, %v34132_v33 }
0x11fc   :  { %28567 = vmatpush3.bf16.msra.mxu0 %v31239_v32  ;;  %28609 = vmatpush3.bf16.msra.mxu1 %v31241_v7  ;;  %v34186_v32 = vld [vmem:[#allocation20_spill] sm:$0xff]  ;;  %v34187_v7 = vld [vmem:[#allocation23_spill] sm:$0xff] }
0x11fd   :  { %28574 = vmatprep.subr.bf16.mxu0 %v34136_v13  ;;  %28616 = vmatprep.subr.bf16.mxu1 %v34136_v13 }
0x11ff   :  { %26858 = vmatmul.mubr.msk.f32.vlgmr.msra.gmra.mrb[148].mxu0 %vm361_vm2, %v31857_v61  ;;  %26935 = vmatmul.mubr.msk.f32.vlgmr.msra.gmra.mrb[162].mxu1 %vm361_vm2, %v31857_v61 }
0x1200   :  { %28576 = vmatpush3.bf16.msra.mxu0 %v31263_v16  ;;  %28618 = vmatpush3.bf16.msra.mxu1 %v31265_v28  ;;  %v34188_v16 = vld [vmem:[#allocation22_spill] sm:$0xff]  ;;  %v34189_v28 = vld [vmem:[#allocation25_spill] sm:$0xff] }
0x1201   :  { %28577 = vmatprep.subr.bf16.mxu0 %v34136_v13  ;;  %28619 = vmatprep.subr.bf16.mxu1 %v34136_v13 }
0x1202   :  { %26879 = vmatprep.mubr.msk.f32.mxu0 %vm29398_vm1, %v34132_v33  ;;  %26956 = vmatprep.mubr.msk.f32.mxu1 %vm29398_vm1, %v34132_v33 }
0x1204   :  { %28579 = vmatpush3.bf16.msra.mxu0 %v31287_v41  ;;  %28621 = vmatpush3.bf16.msra.mxu1 %v31289_v23  ;;  %v34190_v41 = vld [vmem:[#allocation24_spill] sm:$0xff]  ;;  %v34191_v23 = vld [vmem:[#allocation26_spill] sm:$0xff] }
0x1205   :  { %28586 = vmatprep.subr.bf16.mxu0 %v34136_v13  ;;  %28628 = vmatprep.subr.bf16.mxu1 %v34136_v13 }
0x1207   :  { %26880 = vmatmul.mubr.msk.f32.vlgmr.msra.gmra.mrb[150].mxu0 %vm361_vm2, %v31857_v61  ;;  %26957 = vmatmul.mubr.msk.f32.vlgmr.msra.gmra.mrb[164].mxu1 %vm361_vm2, %v31857_v61 }
0x1208   :  { %28588 = vmatpush3.bf16.msra.mxu0 %v31311_v11  ;;  %28630 = vmatpush3.bf16.msra.mxu1 %v31313_v19 }
0x1209   :  { %28589 = vmatprep.subr.bf16.mxu0 %v34136_v13  ;;  %28631 = vmatprep.subr.bf16.mxu1 %v34136_v13 }
0x120a   :  { %26901 = vmatprep.mubr.msk.f32.mxu0 %vm29398_vm1, %v34132_v33  ;;  %26978 = vmatprep.mubr.msk.f32.mxu1 %vm29398_vm1, %v34132_v33 }
0x120c   :  { %28591 = vmatpush3.bf16.msra.mxu0 %v31335_v57  ;;  %28633 = vmatpush3.bf16.msra.mxu1 %v31337_v37 }
0x120d   :  { %28598 = vmatprep.subr.bf16.mxu0 %v34136_v13  ;;  %28640 = vmatprep.subr.bf16.mxu1 %v34136_v13 }
0x120f   :  { %26902 = vmatmul.mubr.msk.f32.vlgmr.msra.gmra.mrb[152].mxu0 %vm361_vm2, %v31857_v61  ;;  %26979 = vmatmul.mubr.msk.f32.vlgmr.msra.gmra.mrb[166].mxu1 %vm361_vm2, %v31857_v61 }
0x1210   :  { %28600 = vmatpush3.bf16.msra.mxu0 %v31359_v51  ;;  %28642 = vmatpush3.bf16.msra.mxu1 %v31361_v5 }
0x1211   :  { %28601 = vmatprep.subr.bf16.mxu0 %v34136_v13  ;;  %28643 = vmatprep.subr.bf16.mxu1 %v34136_v13 }
0x1212   :  { %26923 = vmatprep.mubr.msk.f32.mxu0 %vm29398_vm1, %v34132_v33  ;;  %27000 = vmatprep.mubr.msk.f32.mxu1 %vm29398_vm1, %v34132_v33 }
0x1214   :  { %28603 = vmatpush3.bf16.msra.mxu0 %v31383_v58  ;;  %28645 = vmatpush3.bf16.msra.mxu1 %v34175_v53 }
0x1215   :  { %28610 = vmatprep.subr.bf16.mxu0 %v34136_v13  ;;  %28652 = vmatprep.subr.bf16.mxu1 %v34136_v13 }
0x1217   :  { %26924 = vmatmul.mubr.msk.f32.vlgmr.msra.gmra.mrb[154].mxu0 %vm361_vm2, %v31857_v61  ;;  %27001 = vmatmul.mubr.msk.f32.vlgmr.msra.gmra.mrb[168].mxu1 %vm361_vm2, %v31857_v61 }
0x1218   :  { %28612 = vmatpush3.bf16.msra.mxu0 %v34176_v60  ;;  %28654 = vmatpush3.bf16.msra.mxu1 %v34177_v1 }
0x1219   :  { %28613 = vmatprep.subr.bf16.mxu0 %v34136_v13  ;;  %28655 = vmatprep.subr.bf16.mxu1 %v34136_v13 }
0x121a   :  { %26945 = vmatprep.mubr.msk.f32.mxu0 %vm29398_vm1, %v34132_v33  ;;  %27022 = vmatprep.mubr.msk.f32.mxu1 %vm29398_vm1, %v34132_v33 }
0x121c   :  { %28615 = vmatpush3.bf16.msra.mxu0 %v34178_v49  ;;  %28657 = vmatpush3.bf16.msra.mxu1 %v34179_v56  ;;  %v29316_v49 = vld [vmem:[%s34131_s30 + $0x8] ss:$0 sm:$0xff] }
0x121d   :  { %28622 = vmatprep.subr.bf16.mxu0 %v34136_v13  ;;  %28664 = vmatprep.subr.bf16.mxu1 %v34136_v13 }
0x121f   :  { %26946 = vmatmul.mubr.msk.f32.vlgmr.msra.gmra.mrb[156].mxu0 %vm361_vm2, %v31857_v61  ;;  %27023 = vmatmul.mubr.msk.f32.vlgmr.msra.gmra.mrb[170].mxu1 %vm361_vm2, %v31857_v61 }
0x1220   :  { %28624 = vmatpush3.bf16.msra.mxu0 %v34180_v3  ;;  %28666 = vmatpush3.bf16.msra.mxu1 %v34181_v18 }
0x1221   :  { %28625 = vmatprep.subr.bf16.mxu0 %v34136_v13  ;;  %28667 = vmatprep.subr.bf16.mxu1 %v34136_v13 }
0x1222   :  { %26967 = vmatprep.mubr.msk.f32.mxu0 %vm29398_vm1, %v34132_v33  ;;  %27044 = vmatprep.mubr.msk.f32.mxu1 %vm29398_vm1, %v34132_v33 }
0x1224   :  { %28627 = vmatpush3.bf16.msra.mxu0 %v34182_v27  ;;  %28669 = vmatpush3.bf16.msra.mxu1 %v34183_v4  ;;  %v29317_v4 = vld [vmem:[%s34130_s7 + $0xa] ss:$0 sm:$0xff] }
0x1225   :  { %28634 = vmatprep.subr.bf16.mxu0 %v34136_v13  ;;  %27058 = vmatprep.subr.mxu1 %v34132_v33 }
0x1227   :  { %26968 = vmatmul.mubr.msk.f32.vlgmr.msra.gmra.mrb[158].mxu0 %vm361_vm2, %v31857_v61  ;;  %27045 = vmatmul.mubr.msk.f32.vlgmr.msra.gmra.mrb[172].mxu1 %vm361_vm2, %v31857_v61 }
0x1228   :  { %28636 = vmatpush3.bf16.msra.mxu0 %v34184_v36  ;;  %26989 = vmatprep.mubr.msk.f32.mxu0 %vm29398_vm1, %v34132_v33 }
0x1229   :  { %28637 = vmatprep.subr.bf16.mxu0 %v34136_v13  ;;  %27060 = vmatprep.mubr.msk.f32.mxu1 %vm29398_vm1, %v34132_v33 }
0x122c   :  { %28639 = vmatpush3.bf16.msra.mxu0 %v34185_v25 }
0x122d   :  { %28646 = vmatprep.subr.bf16.mxu0 %v34136_v13 }
0x122f   :  { %26990 = vmatmul.mubr.msk.f32.vlgmr.msra.gmra.mrb[160].mxu0 %vm361_vm2, %v31857_v61 }
0x1230   :  { %28648 = vmatpush3.bf16.msra.mxu0 %v34186_v32  ;;  %27011 = vmatprep.mubr.msk.f32.mxu0 %vm29398_vm1, %v34132_v33 }
0x1231   :  { %28649 = vmatprep.subr.bf16.mxu0 %v34136_v13 }
0x1234   :  { %28651 = vmatpush3.bf16.msra.mxu0 %v34187_v7  ;;  %v29318_v7 = vld [vmem:[%s34131_s30 + $0xa] ss:$0 sm:$0xff] }
0x1235   :  { %28658 = vmatprep.subr.bf16.mxu0 %v34136_v13 }
0x1237   :  { %27012 = vmatmul.mubr.msk.f32.vlgmr.msra.gmra.mrb[162].mxu0 %vm361_vm2, %v31857_v61 }
0x1238   :  { %28660 = vmatpush3.bf16.msra.mxu0 %v34188_v16  ;;  %27033 = vmatprep.mubr.msk.f32.mxu0 %vm29398_vm1, %v34132_v33 }
0x1239   :  { %28661 = vmatprep.subr.bf16.mxu0 %v34136_v13 }
0x123c   :  { %28663 = vmatpush3.bf16.msra.mxu0 %v34189_v28 }
0x123d   :  { %28670 = vmatprep.subr.bf16.mxu0 %v34136_v13 }
0x123f   :  { %27034 = vmatmul.mubr.msk.f32.vlgmr.msra.gmra.mrb[164].mxu0 %vm361_vm2, %v31857_v61 }
0x1240   :  { %28672 = vmatpush3.bf16.msra.mxu0 %v34190_v41  ;;  %27055 = vmatprep.mubr.msk.f32.mxu0 %vm29398_vm1, %v34132_v33 }
0x1241   :  { %28673 = vmatprep.subr.bf16.mxu0 %v34136_v13 }
0x1244   :  { %28675 = vmatpush3.bf16.msra.mxu0 %v34191_v23 }
0x1245   :  { %27063 = vmatprep.subr.mxu0 %v34132_v33 }
0x1247   :  { %27056 = vmatmul.mubr.msk.f32.vlgmr.msra.gmra.mrb[166].mxu0 %vm361_vm2, %v31857_v61 }
0x1248   :  { %27065 = vmatprep.mubr.msk.f32.mxu0 %vm29398_vm1, %v34132_v33 }
0x1282   :  { %v11240_v11 = vpop.f32.mrb[142].mxu1 }
0x1283   :  { %v26758_v19 = vpop.f32.mrb[143].mxu1  ;;  %v11776_v20 = vsel %vm361_vm2, %v11240_v11, 0.0  ;;  %v29319_v11 = vld [vmem:[%s34130_s7 + $0xc] ss:$0 sm:$0xff] }
0x128a   :  { %v11392_v57 = vpop.f32.mrb[144].mxu1 }
0x128b   :  { %v26768_v37 = vpop.f32.mrb[145].mxu1  ;;  %v11779_v35 = vsel %vm361_vm2, %v11392_v57, 0.0 }
0x1292   :  { %v11544_v51 = vpop.f32.mrb[146].mxu1 }
0x1293   :  { %v26778_v5 = vpop.f32.mrb[147].mxu1  ;;  %v11783_v22 = vsel %vm361_vm2, %v11544_v51, 0.0  ;;  %v29320_v51 = vld [vmem:[%s34131_s30 + $0xc] ss:$0 sm:$0xff] }
0x129a   :  { %v11696_v58 = vpop.f32.mrb[148].mxu1 }
0x129b   :  { %v26788_v26 = vpop.f32.mrb[149].mxu1  ;;  %v11787_v40 = vsel %vm361_vm2, %v11696_v58, 0.0 }
0x12a2   :  { %v11860_v42 = vpop.f32.mrb[150].mxu1  ;;  %v11316_v21 = vpop.f32.mrb[136].mxu0 }
0x12a3   :  { %v11777_v46 = vsel %vm361_vm2, %v11316_v21, 0.0  ;;  %v26804_v9 = vpop.f32.mrb[151].mxu1  ;;  %v26763_v45 = vpop.f32.mrb[137].mxu0  ;;  %v11861_v53 = vadd.f32 %v29315_v54, %v11860_v42  ;;  %v29321_v21 = vld [vmem:[%s34130_s7 + $0xe] ss:$0 sm:$0xff] }
0x12a4   :  { %v11778_v17 = vadd.f32 %v11777_v46, %v11776_v20  ;;  %v29322_v45 = vld [vmem:[%s34131_s30 + $0xe] ss:$0 sm:$0xff]  ;;  %v29328_v54 = vld [vmem:[%s34130_s7 + $0xd] ss:$0 sm:$0xff] }
0x12a5   :  { %v13474_v27 = vmul.f32 0.5, %v11861_v53 }
0x12a6   :  { %v11780_v24 = vadd.f32 %v11779_v35, %v11778_v17 }
0x12aa   :  { %v12000_v38 = vpop.f32.mrb[152].mxu1  ;;  %v11468_v30 = vpop.f32.mrb[138].mxu0 }
0x12ab   :  { %v11781_v6 = vsel %vm361_vm2, %v11468_v30, 0.0  ;;  %v26826_v59 = vpop.f32.mrb[153].mxu1  ;;  %v26773_v34 = vpop.f32.mrb[139].mxu0  ;;  %v12001_v36 = vadd.f32 %v29317_v4, %v12000_v38  ;;  %v29323_v30 = vld [vmem:[%s34130_s7 + $0x9] ss:$0 sm:$0xff] }
0x12ac   :  { %v11782_v10 = vadd.f32 %v11781_v6, %v11780_v24  ;;  %v29330_v4 = vld [vmem:[%s34130_s7 + $0xf] ss:$0 sm:$0xff] }
0x12ad   :  { %v13476_v23 = vmul.f32 0.5, %v12001_v36 }
0x12ae   :  { %v11784_v0 = vadd.f32 %v11783_v22, %v11782_v10  ;;  %v29324_v10 = vld [vmem:[%s34131_s30 + $0x9] ss:$0 sm:$0xff] }
0x12b2   :  { %v12140_v50 = vpop.f32.mrb[154].mxu1  ;;  %v11620_v8 = vpop.f32.mrb[140].mxu0 }
0x12b3   :  { %v11785_v47 = vsel %vm361_vm2, %v11620_v8, 0.0  ;;  %v26848_v48 = vpop.f32.mrb[155].mxu1  ;;  %v26783_v14 = vpop.f32.mrb[141].mxu0  ;;  %v12141_v19 = vadd.f32 %v29319_v11, %v12140_v50 }
0x12b4   :  { %v11786_v55 = vadd.f32 %v11785_v47, %v11784_v0  ;;  %v29325_v0 = vld [vmem:[%s34133_s9 + $0x8] ss:$0 sm:$0xff]  ;;  %v29326_v14 = vld [vmem:[%s34130_s7 + $0xb] ss:$0 sm:$0xff] }
0x12b5   :  { %v13478_v42 = vmul.f32 0.5, %v12141_v19  ;;  %v29332_v19 = vld [vmem:[%s34133_s9 + $0x9] ss:$0 sm:$0xff] }
0x12b6   :  { %v11788_v63 = vadd.f32 %v11787_v40, %v11786_v55 }
0x12ba   :  { %v12280_v31 = vpop.f32.mrb[156].mxu1  ;;  %v11772_v43 = vpop.f32.mrb[142].mxu0 }
0x12bb   :  { %v11789_v15 = vsel %vm361_vm2, %v11772_v43, 0.0  ;;  %v26870_v39 = vpop.f32.mrb[157].mxu1  ;;  %v26793_v29 = vpop.f32.mrb[143].mxu0  ;;  %v12281_v20 = vadd.f32 %v29321_v21, %v12280_v31  ;;  %v29327_v31 = vld [vmem:[%s34131_s30 + $0xb] ss:$0 sm:$0xff] }
0x12bc   :  { %v32092_v44 = vadd.f32 %v11789_v15, %v11788_v63 }
0x12bd   :  { %v13480_v38 = vmul.f32 0.5, %v12281_v20 }
0x12c2   :  { %v11930_v60 = vpop.f32.mrb[144].mxu0  ;;  %v12420_v1 = vpop.f32.mrb[158].mxu1 }
0x12c3   :  { %v12421_v56 = vadd.f32 %v29316_v49, %v12420_v1  ;;  %v26815_v3 = vpop.f32.mrb[145].mxu0  ;;  %v26892_v18 = vpop.f32.mrb[159].mxu1  ;;  %v11931_v6 = vadd.f32 %v29323_v30, %v11930_v60  ;;  %v29329_v49 = vld [vmem:[%s34131_s30 + $0xd] ss:$0 sm:$0xff] }
0x12c5   :  { %27059 = vmatpush3.xpose.msk.msra.mxu1 %vm2149_vm3, %v12421_v56  ;;  %v13475_v48 = vmul.f32 0.5, %v11931_v6 }
0x12c6   :  { %27068 = vmatprep.subr.mxu1 %v34132_v33 }
0x12c8   :  { %27061 = vmatmul.mubr.msk.f32.vlgmr.msra.gmra.mrb[174].mxu1 %vm2149_vm3, %v13474_v27 }
0x12c9   :  { %27070 = vmatprep.mubr.msk.f32.mxu1 %vm29398_vm1, %v34132_v33 }
0x12ca   :  { %v12070_v25 = vpop.f32.mrb[146].mxu0  ;;  %v12560_v32 = vpop.f32.mrb[160].mxu1 }
0x12cb   :  { %v12561_v16 = vadd.f32 %v29318_v7, %v12560_v32  ;;  %v26837_v28 = vpop.f32.mrb[147].mxu0  ;;  %v26914_v41 = vpop.f32.mrb[161].mxu1  ;;  %v12071_v55 = vadd.f32 %v29326_v14, %v12070_v25  ;;  %v29331_v7 = vld [vmem:[%s34131_s30 + $0xf] ss:$0 sm:$0xff] }
0x12cd   :  { %27069 = vmatpush3.xpose.msk.msra.mxu1 %vm2149_vm3, %v12561_v16  ;;  %v13477_v29 = vmul.f32 0.5, %v12071_v55 }
0x12ce   :  { %27078 = vmatprep.subr.mxu1 %v34132_v33 }
0x12d0   :  { %27071 = vmatmul.mubr.msk.f32.vlgmr.msra.gmra.mrb[176].mxu1 %vm2149_vm3, %v13476_v23 }
0x12d1   :  { %27080 = vmatprep.mubr.msk.f32.mxu1 %vm29398_vm1, %v34132_v33 }
0x12d2   :  { %v12210_v57 = vpop.f32.mrb[148].mxu0  ;;  %v12700_v37 = vpop.f32.mrb[162].mxu1 }
0x12d3   :  { %v12701_v5 = vadd.f32 %v29320_v51, %v12700_v37  ;;  %v26859_v58 = vpop.f32.mrb[149].mxu0  ;;  %v26936_v26 = vpop.f32.mrb[163].mxu1  ;;  %v12211_v53 = vadd.f32 %v29328_v54, %v12210_v57 }
0x12d5   :  { %27079 = vmatpush3.xpose.msk.msra.mxu1 %vm2149_vm3, %v12701_v5  ;;  %v13479_v27 = vmul.f32 0.5, %v12211_v53 }
0x12d6   :  { %27088 = vmatprep.subr.mxu1 %v34132_v33 }
0x12d8   :  { %27081 = vmatmul.mubr.msk.f32.vlgmr.msra.gmra.mrb[178].mxu1 %vm2149_vm3, %v13478_v42 }
0x12d9   :  { %27090 = vmatprep.mubr.msk.f32.mxu1 %vm29398_vm1, %v34132_v33 }
0x12da   :  { %v12350_v46 = vpop.f32.mrb[150].mxu0  ;;  %v12840_v9 = vpop.f32.mrb[164].mxu1 }
0x12db   :  { %v12841_v17 = vadd.f32 %v29322_v45, %v12840_v9  ;;  %v26881_v35 = vpop.f32.mrb[151].mxu0  ;;  %v26958_v24 = vpop.f32.mrb[165].mxu1  ;;  %v12351_v36 = vadd.f32 %v29330_v4, %v12350_v46 }
0x12dd   :  { %27089 = vmatpush3.xpose.msk.msra.mxu1 %vm2149_vm3, %v12841_v17  ;;  %v13481_v23 = vmul.f32 0.5, %v12351_v36 }
0x12de   :  { %27098 = vmatprep.subr.mxu1 %v34132_v33 }
0x12e0   :  { %27091 = vmatmul.mubr.msk.f32.vlgmr.msra.gmra.mrb[180].mxu1 %vm2149_vm3, %v13480_v38 }
0x12e1   :  { %27100 = vmatprep.mubr.msk.f32.mxu1 %vm29398_vm1, %v34132_v33 }
0x12e2   :  { %v12490_v59 = vpop.f32.mrb[152].mxu0  ;;  %v12980_v34 = vpop.f32.mrb[166].mxu1 }
0x12e3   :  { %v12491_v22 = vadd.f32 %v29324_v10, %v12490_v59  ;;  %v12981_v50 = vadd.f32 %v29325_v0, %v12980_v34  ;;  %v26903_v8 = vpop.f32.mrb[153].mxu0  ;;  %v26980_v47 = vpop.f32.mrb[167].mxu1 }
0x12e5   :  { %27064 = vmatpush3.xpose.msk.msra.mxu0 %vm2149_vm3, %v12491_v22  ;;  %27099 = vmatpush3.msra.mxu1 %v12981_v50 }
0x12e6   :  { %27073 = vmatprep.subr.mxu0 %v34132_v33  ;;  %27108 = vmatprep.subr.mxu1 %v34132_v33 }
0x12e8   :  { %27066 = vmatmul.mubr.msk.f32.vlgmr.msra.gmra.mrb[168].mxu0 %vm2149_vm3, %v13475_v48 }
0x12e9   :  { %27075 = vmatprep.mubr.msk.f32.mxu0 %vm29398_vm1, %v34132_v33 }
0x12ea   :  { %v12630_v40 = vpop.f32.mrb[154].mxu0  ;;  %v32156_v63 = vpop.f32.mrb[168].mxu1 }
0x12eb   :  { %v12631_v43 = vadd.f32 %v29327_v31, %v12630_v40  ;;  %v26925_v15 = vpop.f32.mrb[155].mxu0  ;;  %v27002_v39 = vpop.f32.mrb[169].mxu1 }
0x12ed   :  { %27074 = vmatpush3.xpose.msk.msra.mxu0 %vm2149_vm3, %v12631_v43 }
0x12ee   :  { %27083 = vmatprep.subr.mxu0 %v34132_v33 }
0x12f0   :  { %27076 = vmatmul.mubr.msk.f32.vlgmr.msra.gmra.mrb[170].mxu0 %vm2149_vm3, %v13477_v29 }
0x12f1   :  { %27085 = vmatprep.mubr.msk.f32.mxu0 %vm29398_vm1, %v34132_v33 }
0x12f2   :  { %v12770_v60 = vpop.f32.mrb[156].mxu0  ;;  %v32169_v1 = vpop.f32.mrb[170].mxu1 }
0x12f3   :  { %v12771_v56 = vadd.f32 %v29329_v49, %v12770_v60  ;;  %v26947_v3 = vpop.f32.mrb[157].mxu0  ;;  %v27024_v18 = vpop.f32.mrb[171].mxu1 }
0x12f5   :  { %27084 = vmatpush3.xpose.msk.msra.mxu0 %vm2149_vm3, %v12771_v56 }
0x12f6   :  { %27093 = vmatprep.subr.mxu0 %v34132_v33 }
0x12f8   :  { %27086 = vmatmul.mubr.msk.f32.vlgmr.msra.gmra.mrb[172].mxu0 %vm2149_vm3, %v13479_v27 }
0x12f9   :  { %27095 = vmatprep.mubr.msk.f32.mxu0 %vm29398_vm1, %v34132_v33 }
0x12fa   :  { %v12910_v25 = vpop.f32.mrb[158].mxu0  ;;  %v32182_v32 = vpop.f32.mrb[172].mxu1 }
0x12fb   :  { %v12911_v16 = vadd.f32 %v29331_v7, %v12910_v25  ;;  %v26969_v28 = vpop.f32.mrb[159].mxu0  ;;  %v27046_v41 = vpop.f32.mrb[173].mxu1 }
0x12fd   :  { %27094 = vmatpush3.xpose.msk.msra.mxu0 %vm2149_vm3, %v12911_v16 }
0x12fe   :  { %27103 = vmatprep.subr.mxu0 %v34132_v33 }
0x1300   :  { %27096 = vmatmul.mubr.msk.f32.vlgmr.msra.gmra.mrb[174].mxu0 %vm2149_vm3, %v13481_v23 }
0x1301   :  { %27105 = vmatprep.mubr.msk.f32.mxu0 %vm29398_vm1, %v34132_v33 }
0x1302   :  { %v13050_v11 = vpop.f32.mrb[160].mxu0 }
0x1303   :  { %v13051_v57 = vadd.f32 %v29332_v19, %v13050_v11  ;;  %v26991_v37 = vpop.f32.mrb[161].mxu0  ;;  %v32219_v11 = vld [vmem:[%s34155_s29 + $0x1] ss:$0 sm:$0xff] }
0x1304   :  { %v15369_v37 = vadd.f32 %v32219_v11, %v32092_v44 }
0x1305   :  { %27104 = vmatpush3.msra.mxu0 %v13051_v57 }
0x1306   :  { %27113 = vmatprep.subr.mxu0 %v34132_v33 }
0x130a   :  { %v32196_v51 = vpop.f32.mrb[162].mxu0 }
0x130b   :  { %v27013_v5 = vpop.f32.mrb[163].mxu0 }
0x1312   :  { %v32198_v58 = vpop.f32.mrb[164].mxu0 }
0x1313   :  { %v27035_v26 = vpop.f32.mrb[165].mxu0 }
0x131a   :  { %v32200_v42 = vpop.f32.mrb[166].mxu0 }
0x131b   :  { %v27057_v21 = vpop.f32.mrb[167].mxu0 }
0x139b   :  { %v13554_v20 = vpop.f32.mrb[174].mxu1 }
0x139c   :  { %v27062_v46 = vpop.f32.mrb[175].mxu1  ;;  %v14090_v9 = vsel %vm99_vm0, %v13554_v20, -inf }
0x139d   :  { %14091 = vmax.xlane.f32.xlu0 %v14090_v9 }
0x13a3   :  { %v13706_v45 = vpop.f32.mrb[176].mxu1 }
0x13a4   :  { %v27072_v17 = vpop.f32.mrb[177].mxu1  ;;  %v14096_v35 = vsel %vm99_vm0, %v13706_v45, -inf }
0x13a5   :  { %14097 = vmax.xlane.f32.xlu0 %v14096_v35 }
0x13ab   :  { %v13858_v24 = vpop.f32.mrb[178].mxu1 }
0x13ac   :  { %v27082_v38 = vpop.f32.mrb[179].mxu1  ;;  %v14102_v30 = vsel %vm99_vm0, %v13858_v24, -inf }
0x13ad   :  { %14103 = vmax.xlane.f32.xlu0 %v14102_v30 }
0x13b3   :  { %v14010_v6 = vpop.f32.mrb[180].mxu1 }
0x13b4   :  { %v27092_v59 = vpop.f32.mrb[181].mxu1  ;;  %v14108_v34 = vsel %vm99_vm0, %v14010_v6, -inf }
0x13b5   :  { %14109 = vmax.xlane.f32.xlu0 %v14108_v34 }
0x13bb   :  { %v13630_v10 = vpop.f32.mrb[168].mxu0 }
0x13bc   :  { %v27067_v22 = vpop.f32.mrb[169].mxu0  ;;  %v14093_v0 = vsel %vm99_vm0, %v13630_v10, -inf }
0x13bd   :  { %14094 = vmax.xlane.f32.xlu1 %v14093_v0 }
0x13c3   :  { %v13782_v50 = vpop.f32.mrb[170].mxu0 }
0x13c4   :  { %v27077_v8 = vpop.f32.mrb[171].mxu0  ;;  %v14099_v47 = vsel %vm99_vm0, %v13782_v50, -inf }
0x13c5   :  { %14100 = vmax.xlane.f32.xlu1 %v14099_v47 }
0x13cb   :  { %v13934_v48 = vpop.f32.mrb[172].mxu0 }
0x13cc   :  { %v27087_v14 = vpop.f32.mrb[173].mxu0  ;;  %v14105_v55 = vsel %vm99_vm0, %v13934_v48, -inf }
0x13cd   :  { %14106 = vmax.xlane.f32.xlu1 %v14105_v55 }
0x13d3   :  { %v14086_v40 = vpop.f32.mrb[174].mxu0 }
0x13d4   :  { %v27097_v31 = vpop.f32.mrb[175].mxu0  ;;  %v14111_v43 = vsel %vm99_vm0, %v14086_v40, -inf }
0x13d5   :  { %14112 = vmax.xlane.f32.xlu1 %v14111_v43  ;;  %v29333_v31 = vld [vmem:[%s34133_s9 + $0xa] ss:$0 sm:$0xff] }
0x13d6   :  { %v13121_v43 = vadd.f32 %v29333_v31, %v32156_v63 }
0x142a   :  { %v14092_v15 = vpop.xlane.xlu0 %14091 }
0x142b   :  { %v14114_v39 = vsub.f32 %v13554_v20, %v14092_v15  ;;  %v34192_v20 = vld [vmem:[#allocation9_spill] sm:$0xff] }
0x142c   :  { %v15371_v46 = vadd.f32 %v15369_v37, %v34192_v20 }
0x142d   :  { %v14122_v29 = vmul.f32 1.442695, %v14114_v39 }
0x142e   :  { %v15377_v17 = vsel %vm361_vm2, %v15371_v46, 0.0 }
0x142f   :  { %29172 = vpow2.f32 %v14122_v29 }
0x1432   :  { %v14098_v54 = vpop.xlane.xlu0 %14097 }
0x1433   :  { %v14116_v53 = vsub.f32 %v13706_v45, %v14098_v54  ;;  %v29334_v54 = vld [vmem:[%s34133_s9 + $0xc] ss:$0 sm:$0xff] }
0x1435   :  { %v14126_v60 = vmul.f32 1.442695, %v14116_v53  ;;  %v13261_v53 = vadd.f32 %v29334_v54, %v32169_v1 }
0x1437   :  { %29174 = vpow2.f32 %v14126_v60 }
0x1439   :  { %v29173_v49 = vpop.eup %29172 }
0x143a   :  { %v14104_v56 = vpop.xlane.xlu0 %14103  ;;  %v14138_v3 = vsel %vm99_vm0, %v29173_v49, 0.0 }
0x143b   :  { %v14118_v18 = vsub.f32 %v13858_v24, %v14104_v56  ;;  %14139 = vadd.xlane.f32.xlu0 %v14138_v3  ;;  %v29335_v3 = vld [vmem:[%s34133_s9 + $0xe] ss:$0 sm:$0xff] }
0x143c   :  { %v13401_v1 = vadd.f32 %v29335_v3, %v32182_v32 }
0x143d   :  { %v14130_v27 = vmul.f32 1.442695, %v14118_v18 }
0x143f   :  { %29176 = vpow2.f32 %v14130_v27 }
0x1441   :  { %v29175_v4 = vpop.eup %29174 }
0x1442   :  { %v14110_v36 = vpop.xlane.xlu0 %14109  ;;  %v14144_v25 = vsel %vm99_vm0, %v29175_v4, 0.0 }
0x1443   :  { %v14120_v7 = vsub.f32 %v14010_v6, %v14110_v36  ;;  %14145 = vadd.xlane.f32.xlu0 %v14144_v25 }
0x1445   :  { %v14134_v16 = vmul.f32 1.442695, %v14120_v7 }
0x1447   :  { %29178 = vpow2.f32 %v14134_v16 }
0x1449   :  { %v32212_v28 = vpop.eup %29176 }
0x144a   :  { %v14095_v41 = vpop.xlane.xlu1 %14094  ;;  %v14150_v23 = vsel %vm99_vm0, %v32212_v28, 0.0 }
0x144b   :  { %v14115_v19 = vsub.f32 %v13630_v10, %v14095_v41  ;;  %14151 = vadd.xlane.f32.xlu0 %v14150_v23  ;;  %v29336_v23 = vld [vmem:[%s34133_s9 + $0xb] ss:$0 sm:$0xff] }
0x144d   :  { %v14124_v57 = vmul.f32 1.442695, %v14115_v19  ;;  %v13191_v19 = vadd.f32 %v29336_v23, %v32196_v51 }
0x144f   :  { %29180 = vpow2.f32 %v14124_v57 }
0x1451   :  { %v32223_v5 = vpop.eup %29178 }
0x1452   :  { %v14101_v26 = vpop.xlane.xlu1 %14100  ;;  %v14156_v21 = vsel %vm99_vm0, %v32223_v5, 0.0 }
0x1453   :  { %v14117_v9 = vsub.f32 %v13782_v50, %v14101_v26  ;;  %14157 = vadd.xlane.f32.xlu0 %v14156_v21 }
0x1455   :  { %v14128_v45 = vmul.f32 1.442695, %v14117_v9 }
0x1457   :  { %29182 = vpow2.f32 %v14128_v45  ;;  %15378 = vadd.xlane.f32.xlu0 %v15377_v17  ;;  %v29339_v17 = vld [vmem:[%s34135_s4 + $0x24] sm:$0xf] }
0x1459   :  { %v32229_v35 = vpop.eup %29180 }
0x145a   :  { %v14107_v24 = vpop.xlane.xlu1 %14106  ;;  %v14141_v44 = vsel %vm99_vm0, %v32229_v35, 0.0 }
0x145b   :  { %v14119_v38 = vsub.f32 %v13934_v48, %v14107_v24  ;;  %14142 = vadd.xlane.f32.xlu1 %v14141_v44 }
0x145d   :  { %v14132_v30 = vmul.f32 1.442695, %v14119_v38 }
0x145f   :  { %29184 = vpow2.f32 %v14132_v30  ;;  %v29340_v30 = vld [vmem:[%s34135_s4 + $0x28] sm:$0xf] }
0x1461   :  { %v32233_v6 = vpop.eup %29182 }
0x1462   :  { %v14113_v59 = vpop.xlane.xlu1 %14112  ;;  %v14147_v34 = vsel %vm99_vm0, %v32233_v6, 0.0 }
0x1463   :  { %v14121_v10 = vsub.f32 %v14086_v40, %v14113_v59  ;;  %14148 = vadd.xlane.f32.xlu1 %v14147_v34  ;;  %v29341_v34 = vld [vmem:[%s34135_s4 + $0x30] sm:$0xf] }
0x1465   :  { %v14136_v22 = vmul.f32 1.442695, %v14121_v10 }
0x1467   :  { %29186 = vpow2.f32 %v14136_v22 }
0x1469   :  { %v32237_v0 = vpop.eup %29184 }
0x146a   :  { %v14153_v50 = vsel %vm99_vm0, %v32237_v0, 0.0 }
0x146b   :  { %14154 = vadd.xlane.f32.xlu1 %v14153_v50 }
0x1471   :  { %v32241_v8 = vpop.eup %29186 }
0x1472   :  { %v14159_v47 = vsel %vm99_vm0, %v32241_v8, 0.0 }
0x1473   :  { %14160 = vadd.xlane.f32.xlu1 %v14159_v47  ;;  %v29342_v47 = vld [vmem:[%s34135_s4 + $0x38] sm:$0xf] }
0x14c8   :  { %v14140_v48 = vpop.xlane.xlu0 %14139 }
0x14c9   :  { %29188 = vrcp.f32 %v14140_v48 }
0x14d0   :  { %v14146_v14 = vpop.xlane.xlu0 %14145 }
0x14d1   :  { %29190 = vrcp.f32 %v14146_v14  ;;  %v32351_v14 = vld [vmem:[%s34001_s13 + $0x1] ss:$0 sm:$0xff] }
0x14d3   :  { %v29189_v55 = vpop.eup %29188 }
0x14d4   :  { %v14163_v40 = vmul.f32 %v29189_v55, %v29173_v49 }
0x14d6   :  { %27101 = vmatmul.mubr.msk.f32.vlgmr.msra.gmra.mrb[182].mxu1 %vm99_vm0, %v14163_v40 }
0x14d7   :  { %27109 = vmatpush3.msra.mxu1 %v13121_v43  ;;  %27110 = vmatprep.mubr.msk.f32.mxu1 %vm29398_vm1, %v34132_v33 }
0x14d8   :  { %v14152_v15 = vpop.xlane.xlu0 %14151  ;;  %27118 = vmatprep.subr.mxu1 %v34132_v33 }
0x14d9   :  { %29192 = vrcp.f32 %v14152_v15 }
0x14db   :  { %v29191_v39 = vpop.eup %29190 }
0x14dc   :  { %v14167_v29 = vmul.f32 %v29191_v39, %v29175_v4 }
0x14de   :  { %27111 = vmatmul.mubr.msk.f32.vlgmr.msra.gmra.mrb[184].mxu1 %vm99_vm0, %v14167_v29 }
0x14df   :  { %27119 = vmatpush3.msra.mxu1 %v13261_v53  ;;  %27120 = vmatprep.mubr.msk.f32.mxu1 %vm29398_vm1, %v34132_v33 }
0x14e0   :  { %v14158_v63 = vpop.xlane.xlu0 %14157  ;;  %27128 = vmatprep.subr.mxu1 %v34132_v33 }
0x14e1   :  { %29194 = vrcp.f32 %v14158_v63 }
0x14e3   :  { %v29193_v60 = vpop.eup %29192 }
0x14e4   :  { %v14171_v49 = vmul.f32 %v29193_v60, %v32212_v28  ;;  %v15379_v56 = vpop.xlane.xlu0 %15378 }
0x14e5   :  { %v15383_v18 = vmul.f32 0.03125, %v15379_v56 }
0x14e6   :  { %27121 = vmatmul.mubr.msk.f32.vlgmr.msra.gmra.mrb[186].mxu1 %vm99_vm0, %v14171_v49 }
0x14e7   :  { %v32267_v27 = vsub.f32 %v15371_v46, %v15383_v18  ;;  %27129 = vmatpush3.msra.mxu1 %v13401_v1  ;;  %27130 = vmatprep.mubr.msk.f32.mxu1 %vm29398_vm1, %v34132_v33  ;;  %v29338_v46 = vld [vmem:[%s34133_s9 + $0xf] ss:$0 sm:$0xff] }
0x14e8   :  { %v14143_v4 = vpop.xlane.xlu1 %14142  ;;  %27138 = vmatprep.subr.mxu1 %v34132_v33  ;;  %v13471_v9 = vadd.f32 %v29338_v46, %v32200_v42 }
0x14e9   :  { %29196 = vrcp.f32 %v14143_v4  ;;  %v15387_v36 = vmul.f32 %v32267_v27, %v32267_v27 }
0x14eb   :  { %v29195_v25 = vpop.eup %29194  ;;  %v15389_v7 = vsel %vm361_vm2, %v15387_v36, 0.0 }
0x14ec   :  { %v14175_v32 = vmul.f32 %v29195_v25, %v32223_v5  ;;  %15390 = vadd.xlane.f32.xlu0 %v15389_v7  ;;  %v29337_v5 = vld [vmem:[%s34133_s9 + $0xd] ss:$0 sm:$0xff] }
0x14ed   :  { %v13331_v26 = vadd.f32 %v29337_v5, %v32198_v58 }
0x14ee   :  { %27131 = vmatmul.mubr.msk.f32.vlgmr.msra.gmra.mrb[188].mxu1 %vm99_vm0, %v14175_v32 }
0x14ef   :  { %27139 = vmatpush3.msk.msra.mxu1 %vm3433_vm4, %v31810_v2  ;;  %27140 = vmatprep.mubr.msk.f32.mxu1 %vm29398_vm1, %v34132_v33 }
0x14f0   :  { %v14149_v16 = vpop.xlane.xlu1 %14148  ;;  %27148 = vmatprep.subr.mxu1 %v34132_v33 }
0x14f1   :  { %29198 = vrcp.f32 %v14149_v16 }
0x14f3   :  { %v29197_v28 = vpop.eup %29196 }
0x14f4   :  { %v14165_v41 = vmul.f32 %v29197_v28, %v32229_v35 }
0x14f6   :  { %27106 = vmatmul.mubr.msk.f32.vlgmr.msra.gmra.mrb[176].mxu0 %vm99_vm0, %v14165_v41 }
0x14f7   :  { %27114 = vmatpush3.msra.mxu0 %v13191_v19  ;;  %27115 = vmatprep.mubr.msk.f32.mxu0 %vm29398_vm1, %v34132_v33 }
0x14f8   :  { %v14155_v2 = vpop.xlane.xlu1 %14154  ;;  %27123 = vmatprep.subr.mxu0 %v34132_v33 }
0x14f9   :  { %29200 = vrcp.f32 %v14155_v2 }
0x14fb   :  { %v29199_v57 = vpop.eup %29198 }
0x14fc   :  { %v14169_v37 = vmul.f32 %v29199_v57, %v32233_v6 }
0x14fe   :  { %27116 = vmatmul.mubr.msk.f32.vlgmr.msra.gmra.mrb[178].mxu0 %vm99_vm0, %v14169_v37 }
0x14ff   :  { %27124 = vmatpush3.msra.mxu0 %v13331_v26  ;;  %27125 = vmatprep.mubr.msk.f32.mxu0 %vm29398_vm1, %v34132_v33 }
0x1500   :  { %v14161_v51 = vpop.xlane.xlu1 %14160  ;;  %27133 = vmatprep.subr.mxu0 %v34132_v33 }
0x1501   :  { %29202 = vrcp.f32 %v14161_v51 }
0x1503   :  { %v29201_v21 = vpop.eup %29200 }
0x1504   :  { %v14173_v20 = vmul.f32 %v29201_v21, %v32237_v0 }
0x1506   :  { %27126 = vmatmul.mubr.msk.f32.vlgmr.msra.gmra.mrb[180].mxu0 %vm99_vm0, %v14173_v20 }
0x1507   :  { %27134 = vmatpush3.msra.mxu0 %v13471_v9  ;;  %27135 = vmatprep.mubr.msk.f32.mxu0 %vm29398_vm1, %v34132_v33 }
0x1508   :  { %27143 = vmatprep.subr.mxu0 %v34132_v33 }
0x150b   :  { %v29203_v58 = vpop.eup %29202 }
0x150c   :  { %v14177_v45 = vmul.f32 %v29203_v58, %v32241_v8  ;;  %v32339_v8 = vld [vmem:[%s34000_s12 + $0x1] ss:$0 sm:$0xff] }
0x150e   :  { %27136 = vmatmul.mubr.msk.f32.vlgmr.msra.gmra.mrb[182].mxu0 %vm99_vm0, %v14177_v45 }
0x150f   :  { %27144 = vmatpush3.msk.msra.mxu0 %vm3433_vm4, %v29339_v17  ;;  %27145 = vmatprep.mubr.msk.f32.mxu0 %vm29398_vm1, %v34132_v33 }
0x1510   :  { %27153 = vmatprep.subr.mxu0 %v34132_v33 }
0x1579   :  { %v15391_v42 = vpop.xlane.xlu0 %15390 }
0x157a   :  { %v15395_v35 = vmul.f32 0.03125, %v15391_v42 }
0x157c   :  { %v15397_v24 = vadd.f32 1e-05, %v15395_v35 }
0x157e   :  { %29204 = vrsqrt.f32 %v15397_v24 }
0x1588   :  { %v29205_v10 = vpop.eup %29204 }
0x1589   :  { %v15401_v0 = vmul.f32 %v29205_v10, %v32267_v27  ;;  %v24144_v10 = vld [vmem:[%s34002_s14 + $0x38] sm:$0xff] }
0x158b   :  { %v15409_v48 = vmul.f32 %v32339_v8, %v15401_v0  ;;  %v24149_v0 = vld [vmem:[%s34004_s16 + $0x80] sm:$0xff] }
0x158d   :  { %v32354_v40 = vadd.f32 %v32351_v14, %v15409_v48 }
0x15a9   :  { %v14247_v44 = vpop.f32.mrb[182].mxu1 }
0x15aa   :  { %v27102_v38 = vpop.f32.mrb[183].mxu1  ;;  %27141 = vmatmul.mubr.msk.f32.vlgmr.msra.gmra.mrb[190].mxu1 %vm2149_vm3, %v14247_v44 }
0x15ab   :  { %27149 = vmatpush3.msk.msra.mxu1 %vm3433_vm4, %v29340_v30  ;;  %27150 = vmatprep.mubr.msk.f32.mxu1 %vm29398_vm1, %v34132_v33 }
0x15ac   :  { %27158 = vmatprep.subr.mxu1 %v34132_v33 }
0x15b1   :  { %v14393_v6 = vpop.f32.mrb[184].mxu1 }
0x15b2   :  { %v27112_v59 = vpop.f32.mrb[185].mxu1  ;;  %27151 = vmatmul.mubr.msk.f32.vlgmr.msra.gmra.mrb[192].mxu1 %vm2149_vm3, %v14393_v6 }
0x15b3   :  { %27159 = vmatpush3.msk.msra.mxu1 %vm3433_vm4, %v29341_v34  ;;  %27160 = vmatprep.mubr.msk.f32.mxu1 %vm29398_vm1, %v34132_v33  ;;  %v24141_v59 = vld [vmem:[%s34002_s14 + $0x20] sm:$0xff] }
0x15b4   :  { %27168 = vmatprep.subr.mxu1 %v34132_v33 }
0x15b9   :  { %v14539_v22 = vpop.f32.mrb[186].mxu1 }
0x15ba   :  { %v27122_v50 = vpop.f32.mrb[187].mxu1  ;;  %27161 = vmatmul.mubr.msk.f32.vlgmr.msra.gmra.mrb[194].mxu1 %vm2149_vm3, %v14539_v22 }
0x15bb   :  { %27169 = vmatpush3.msk.msra.mxu1 %vm3433_vm4, %v29342_v47  ;;  %27170 = vmatprep.mubr.msk.f32.mxu1 %vm29398_vm1, %v34132_v33  ;;  %v24150_v50 = vld [vmem:[%s34004_s16 + $0x88] sm:$0xff]  ;;  %v24151_v47 = vld [vmem:[%s34004_s16 + $0x90] sm:$0xff] }
0x15bc   :  { %v28684_v48 = vpack.c.bf16 %v24150_v50, %v24149_v0 }
0x15c1   :  { %v14685_v55 = vpop.f32.mrb[188].mxu1 }
0x15c2   :  { %v27132_v31 = vpop.f32.mrb[189].mxu1  ;;  %27171 = vmatmul.mubr.msk.f32.vlgmr.msra.gmra.mrb[196].mxu1 %vm2149_vm3, %v14685_v55  ;;  %v24152_v55 = vld [vmem:[%s34004_s16 + $0x98] sm:$0xff] }
0x15c3   :  { %27186 = vmatprep.mubr.msk.f32.mxu1 %vm361_vm2, %v32354_v40  ;;  %v28688_v31 = vpack.c.bf16 %v24152_v55, %v24151_v47  ;;  %v24169_v55 = vld [vmem:[%s34006_s18 + $0x1] ss:$0 sm:$0xff] }
0x15c9   :  { %v14320_v43 = vpop.f32.mrb[176].mxu0 }
0x15ca   :  { %v27107_v15 = vpop.f32.mrb[177].mxu0  ;;  %27146 = vmatmul.mubr.msk.f32.vlgmr.msra.gmra.mrb[184].mxu0 %vm2149_vm3, %v14320_v43  ;;  %v24153_v43 = vld [vmem:[%s34004_s16 + $0xa0] sm:$0xff] }
0x15cb   :  { %27154 = vmatpush3.msk.msra.mxu0 %vm3433_vm4, %v31863_v52  ;;  %27155 = vmatprep.mubr.msk.f32.mxu0 %vm29398_vm1, %v34132_v33  ;;  %v24154_v15 = vld [vmem:[%s34004_s16 + $0xa8] sm:$0xff] }
0x15cc   :  { %27163 = vmatprep.subr.mxu0 %v34132_v33 }
0x15d1   :  { %v14466_v39 = vpop.f32.mrb[178].mxu0 }
0x15d2   :  { %v27117_v29 = vpop.f32.mrb[179].mxu0  ;;  %27156 = vmatmul.mubr.msk.f32.vlgmr.msra.gmra.mrb[186].mxu0 %vm2149_vm3, %v14466_v39  ;;  %v28692_v39 = vpack.c.bf16 %v24154_v15, %v24153_v43  ;;  %v24176_v15 = vld [vmem:[%s34105_s26 + $0x228] sm:$0xff] }
0x15d3   :  { %27164 = vmatpush3.msk.msra.mxu0 %vm3433_vm4, %v31882_v62  ;;  %27165 = vmatprep.mubr.msk.f32.mxu0 %vm29398_vm1, %v34132_v33  ;;  %v24155_v29 = vld [vmem:[%s34004_s16 + $0xb0] sm:$0xff] }
0x15d4   :  { %27173 = vmatprep.subr.mxu0 %v34132_v33 }
0x15d9   :  { %v14612_v54 = vpop.f32.mrb[180].mxu0 }
0x15da   :  { %v27127_v53 = vpop.f32.mrb[181].mxu0  ;;  %27166 = vmatmul.mubr.msk.f32.vlgmr.msra.gmra.mrb[188].mxu0 %vm2149_vm3, %v14612_v54  ;;  %v24156_v54 = vld [vmem:[%s34004_s16 + $0xb8] sm:$0xff] }
0x15db   :  { %27174 = vmatpush3.msk.msra.mxu0 %vm3433_vm4, %v31901_v12  ;;  %27175 = vmatprep.mubr.msk.f32.mxu0 %vm29398_vm1, %v34132_v33  ;;  %v28696_v53 = vpack.c.bf16 %v24156_v54, %v24155_v29  ;;  %v24196_v29 = vld [vmem:[%s34105_s26 + $0x2c8] sm:$0xff]  ;;  %v24170_v54 = vld [vmem:[%s34007_s19 + $0x1] ss:$0 sm:$0xff] }
0x15dc   :  { %28685 = vmatprep.subr.bf16.mxu0 %v28684_v48 }
0x15e1   :  { %v14758_v52 = vpop.f32.mrb[182].mxu0 }
0x15e2   :  { %v27137_v63 = vpop.f32.mrb[183].mxu0  ;;  %27176 = vmatmul.mubr.msk.f32.vlgmr.msra.gmra.mrb[190].mxu0 %vm2149_vm3, %v14758_v52  ;;  %v24157_v52 = vld [vmem:[%s34004_s16 + $0xc0] sm:$0xff] }
0x15e3   :  { %28687 = vmatpush3.bf16.msra.mxu0 %v28684_v48  ;;  %v24158_v63 = vld [vmem:[%s34004_s16 + $0xc8] sm:$0xff] }
0x15e4   :  { %28689 = vmatprep.subr.bf16.mxu0 %v28688_v31 }
0x15e7   :  { %28691 = vmatpush3.bf16.msra.mxu0 %v28688_v31  ;;  %v24175_v31 = vld [vmem:[%s34105_s26 + $0x220] sm:$0xff] }
0x15e8   :  { %28693 = vmatprep.subr.bf16.mxu0 %v28692_v39 }
0x15eb   :  { %28695 = vmatpush3.bf16.msra.mxu0 %v28692_v39  ;;  %v24195_v39 = vld [vmem:[%s34105_s26 + $0x2c0] sm:$0xff] }
0x15ec   :  { %28697 = vmatprep.subr.bf16.mxu0 %v28696_v53 }
0x15ef   :  { %28699 = vmatpush3.bf16.msra.mxu0 %v28696_v53 }
0x167d   :  { %v14831_v62 = vpop.f32.mrb[190].mxu1 }
0x167e   :  { %v27142_v60 = vpop.f32.mrb[191].mxu1  ;;  %v15346_v36 = vsel %vm361_vm2, %v14831_v62, 0.0  ;;  %v28700_v62 = vpack.c.bf16 %v24158_v63, %v24157_v52  ;;  %v32530_v52 = vpack.c.bf16 %v24176_v15, %v24175_v31  ;;  %v32532_v63 = vpack.c.bf16 %v24196_v29, %v24195_v39  ;;  %v24201_v15 = vld [vmem:[%s34105_s26 + $0x2f0] sm:$0xff]  ;;  %v24202_v39 = vld [vmem:[%s34105_s26 + $0x2f8] sm:$0xff] }
0x167f   :  { %v24159_v60 = vld [vmem:[%s34004_s16 + $0xd0] sm:$0xff] }
0x1680   :  { %28701 = vmatprep.subr.bf16.mxu0 %v28700_v62  ;;  %v24229_v29 = vld [vmem:[%s34111_s1 + $0x2d0] sm:$0xff] }
0x1681   :  { %28703 = vmatpush3.bf16.msra.mxu0 %v28700_v62  ;;  %v24177_v62 = vld [vmem:[%s34105_s26 + $0x230] sm:$0xff] }
0x1685   :  { %v14977_v49 = vpop.f32.mrb[192].mxu1 }
0x1686   :  { %v27152_v56 = vpop.f32.mrb[193].mxu1  ;;  %v15349_v32 = vsel %vm361_vm2, %v14977_v49, 0.0  ;;  %v24160_v49 = vld [vmem:[%s34004_s16 + $0xd8] sm:$0xff] }
0x1687   :  { %v28704_v56 = vpack.c.bf16 %v24160_v49, %v24159_v60  ;;  %v24178_v49 = vld [vmem:[%s34105_s26 + $0x238] sm:$0xff] }
0x1689   :  { %28705 = vmatprep.subr.bf16.mxu0 %v28704_v56 }
0x168a   :  { %28707 = vmatpush3.bf16.msra.mxu0 %v28704_v56  ;;  %v24197_v56 = vld [vmem:[%s34105_s26 + $0x2d0] sm:$0xff] }
0x168d   :  { %v15123_v3 = vpop.f32.mrb[194].mxu1 }
0x168e   :  { %v27162_v1 = vpop.f32.mrb[195].mxu1  ;;  %v15353_v2 = vsel %vm361_vm2, %v15123_v3, 0.0  ;;  %v24161_v3 = vld [vmem:[%s34004_s16 + $0xe0] sm:$0xff] }
0x168f   :  { %v24162_v1 = vld [vmem:[%s34004_s16 + $0xe8] sm:$0xff] }
0x1695   :  { %v15269_v18 = vpop.f32.mrb[196].mxu1 }
0x1696   :  { %v27172_v27 = vpop.f32.mrb[197].mxu1  ;;  %v15357_v21 = vsel %vm361_vm2, %v15269_v18, 0.0  ;;  %v28708_v18 = vpack.c.bf16 %v24162_v1, %v24161_v3  ;;  %v24198_v3 = vld [vmem:[%s34105_s26 + $0x2d8] sm:$0xff]  ;;  %v32554_v1 = vpack.c.bf16 %v24178_v49, %v24177_v62  ;;  %v24207_v49 = vld [vmem:[%s34111_s1 + $0x220] sm:$0xff] }
0x1698   :  { %28709 = vmatprep.subr.bf16.mxu0 %v28708_v18 }
0x1699   :  { %28711 = vmatpush3.bf16.msra.mxu0 %v28708_v18  ;;  %v32556_v18 = vpack.c.bf16 %v24198_v3, %v24197_v56  ;;  %v24208_v56 = vld [vmem:[%s34111_s1 + $0x228] sm:$0xff]  ;;  %v24235_v3 = vld [vmem:[%s34113_s10 + $0x200] sm:$0xff] }
0x169d   :  { %v14904_v4 = vpop.f32.mrb[184].mxu0 }
0x169e   :  { %v15347_v12 = vsel %vm361_vm2, %v14904_v4, 0.0  ;;  %v27147_v25 = vpop.f32.mrb[185].mxu0 }
0x169f   :  { %v15348_v7 = vadd.f32 %v15347_v12, %v15346_v36 }
0x16a1   :  { %v15350_v16 = vadd.f32 %v15349_v32, %v15348_v7 }
0x16a5   :  { %v15050_v28 = vpop.f32.mrb[186].mxu0 }
0x16a6   :  { %v15351_v41 = vsel %vm361_vm2, %v15050_v28, 0.0  ;;  %v27157_v23 = vpop.f32.mrb[187].mxu0  ;;  %v24164_v28 = vld [vmem:[%s34004_s16 + $0xf8] sm:$0xff] }
0x16a7   :  { %v15352_v19 = vadd.f32 %v15351_v41, %v15350_v16  ;;  %v24163_v16 = vld [vmem:[%s34004_s16 + $0xf0] sm:$0xff] }
0x16a8   :  { %v28712_v41 = vpack.c.bf16 %v24164_v28, %v24163_v16  ;;  %v24181_v16 = vld [vmem:[%s34105_s26 + $0x250] sm:$0xff]  ;;  %v24182_v28 = vld [vmem:[%s34105_s26 + $0x258] sm:$0xff] }
0x16a9   :  { %v15354_v57 = vadd.f32 %v15353_v2, %v15352_v19 }
0x16aa   :  { %28713 = vmatprep.subr.bf16.mxu0 %v28712_v41 }
0x16ab   :  { %28715 = vmatpush3.bf16.msra.mxu0 %v28712_v41  ;;  %v24205_v41 = vld [vmem:[%s34111_s1 + $0x210] sm:$0xff] }
0x16ac   :  { %28740 = vmatprep.subr.bf16.mxu0 %v34136_v13 }
0x16ad   :  { %v15196_v37 = vpop.f32.mrb[188].mxu0 }
0x16ae   :  { %v15355_v5 = vsel %vm361_vm2, %v15196_v37, 0.0  ;;  %v27167_v26 = vpop.f32.mrb[189].mxu0 }
0x16af   :  { %v15356_v51 = vadd.f32 %v15355_v5, %v15354_v57  ;;  %v24166_v5 = vld [vmem:[%s34005_s17 + $0x1] ss:$0 sm:$0xff] }
0x16b1   :  { %v15358_v20 = vadd.f32 %v15357_v21, %v15356_v51 }
0x16b5   :  { %v15342_v46 = vpop.f32.mrb[190].mxu0 }
0x16b6   :  { %v15359_v9 = vsel %vm361_vm2, %v15342_v46, 0.0  ;;  %v27177_v58 = vpop.f32.mrb[191].mxu0 }
0x16b7   :  { %v15360_v45 = vadd.f32 %v15359_v9, %v15358_v20 }
0x16b9   :  { %v15370_v17 = vadd.f32 %v32219_v11, %v15360_v45  ;;  %v24142_v11 = vld [vmem:[%s34002_s14 + $0x28] sm:$0xff] }
0x16ba   :  { %v28676_v34 = vpack.c.bf16 %v24142_v11, %v24141_v59  ;;  %v24173_v59 = vld [vmem:[%s34105_s26 + $0x210] sm:$0xff]  ;;  %v24174_v11 = vld [vmem:[%s34105_s26 + $0x218] sm:$0xff] }
0x16bb   :  { %v15372_v42 = vadd.f32 %v15370_v17, %v31857_v61  ;;  %v24143_v61 = vld [vmem:[%s34002_s14 + $0x30] sm:$0xff] }
0x16bc   :  { %28677 = vmatprep.subr.bf16.mxu1 %v28676_v34  ;;  %v28680_v22 = vpack.c.bf16 %v24144_v10, %v24143_v61  ;;  %v32501_v61 = vpack.c.bf16 %v24174_v11, %v24173_v59  ;;  %v24190_v10 = vld [vmem:[%s34105_s26 + $0x298] sm:$0xff]  ;;  %v24221_v11 = vld [vmem:[%s34111_s1 + $0x290] sm:$0xff] }
0x16bd   :  { %v15380_v35 = vsel %vm361_vm2, %v15372_v42, 0.0  ;;  %28679 = vmatpush3.bf16.msra.mxu1 %v28676_v34  ;;  %v24189_v34 = vld [vmem:[%s34105_s26 + $0x290] sm:$0xff]  ;;  %v24194_v59 = vld [vmem:[%s34105_s26 + $0x2b8] sm:$0xff] }
0x16be   :  { %15381 = vadd.xlane.f32.xlu1 %v15380_v35  ;;  %28681 = vmatprep.subr.bf16.mxu1 %v28680_v22 }
0x16c1   :  { %28683 = vmatpush3.bf16.msra.mxu1 %v28680_v22  ;;  %v32506_v22 = vpack.c.bf16 %v24190_v10, %v24189_v34  ;;  %v24222_v34 = vld [vmem:[%s34111_s1 + $0x298] sm:$0xff] }
0x16c2   :  { %28716 = vmatprep.subr.bf16.mxu1 %v34136_v13 }
0x174b   :  { %v15382_v24 = vpop.xlane.xlu1 %15381 }
0x174c   :  { %v15384_v44 = vmul.f32 0.03125, %v15382_v24  ;;  %v24171_v24 = vld [vmem:[%s34105_s26 + $0x200] sm:$0xff] }
0x174e   :  { %v15386_v38 = vsub.f32 %v15372_v42, %v15384_v44  ;;  %v24172_v44 = vld [vmem:[%s34105_s26 + $0x208] sm:$0xff] }
0x1750   :  { %v15388_v30 = vmul.f32 %v15386_v38, %v15386_v38 }
0x1752   :  { %v15392_v6 = vsel %vm361_vm2, %v15388_v30, 0.0  ;;  %v24188_v30 = vld [vmem:[%s34105_s26 + $0x288] sm:$0xff] }
0x1753   :  { %15393 = vadd.xlane.f32.xlu1 %v15392_v6 }
0x17e0   :  { %v15394_v27 = vpop.xlane.xlu1 %15393 }
0x17e1   :  { %v15396_v4 = vmul.f32 0.03125, %v15394_v27  ;;  %v24179_v27 = vld [vmem:[%s34105_s26 + $0x240] sm:$0xff] }
0x17e3   :  { %v15398_v36 = vadd.f32 1e-05, %v15396_v4  ;;  %v24180_v4 = vld [vmem:[%s34105_s26 + $0x248] sm:$0xff] }
0x17e5   :  { %29206 = vrsqrt.f32 %v15398_v36  ;;  %v24203_v36 = vld [vmem:[%s34111_s1 + $0x200] sm:$0xff] }
0x17ef   :  { %v29207_v12 = vpop.eup %29206 }
0x17f0   :  { %v15402_v25 = vmul.f32 %v29207_v12, %v15386_v38  ;;  %v32481_v38 = vpack.c.bf16 %v24172_v44, %v24171_v24  ;;  %v24204_v12 = vld [vmem:[%s34111_s1 + $0x208] sm:$0xff] }
0x17f1   :  { %v24220_v24 = vld [vmem:[%s34111_s1 + $0x288] sm:$0xff] }
0x17f2   :  { %v15410_v7 = vmul.f32 %v32339_v8, %v15402_v25  ;;  %v24146_v8 = vld [vmem:[%s34003_s15 + $0x1] ss:$0 sm:$0xff]  ;;  %v32578_v25 = vpack.c.bf16 %v24180_v4, %v24179_v27  ;;  %v24236_v27 = vld [vmem:[%s34113_s10 + $0x208] sm:$0xff]  ;;  %v32770_v4 = vpack.c.bf16 %v24208_v56, %v24207_v49 }
0x17f3   :  { %v24231_v56 = vld [vmem:[%s34111_s1 + $0x2e0] sm:$0xff] }
0x17f4   :  { %v32446_v32 = vadd.f32 %v32351_v14, %v15410_v7  ;;  %v32580_v7 = vpack.c.bf16 %v24204_v12, %v24203_v36  ;;  %v32772_v36 = vpack.c.bf16 %v24236_v27, %v24235_v3  ;;  %v24209_v12 = vld [vmem:[%s34111_s1 + $0x230] sm:$0xff]  ;;  %v24232_v3 = vld [vmem:[%s34111_s1 + $0x2e8] sm:$0xff]  ;;  %v24259_v27 = vld [vmem:[%s34113_s10 + $0x2c0] sm:$0xff] }
0x17f6   :  { %27187 = vmatmul.mubr.msk.f32.vlgmr.msra.gmra.mrb[198].mxu1 %vm361_vm2, %v32446_v32 }
0x17f7   :  { %27232 = vmatprep.mubr.msk.f32.mxu1 %vm29398_vm1, %v34132_v33  ;;  %28718 = vmatpush3.bf16.msra.mxu1 %v32481_v38 }
0x17f8   :  { %28719 = vmatprep.subr.bf16.mxu1 %v34136_v13 }
0x17fb   :  { %28721 = vmatpush3.bf16.msra.mxu1 %v32501_v61 }
0x17fc   :  { %28722 = vmatprep.subr.bf16.mxu1 %v34136_v13 }
0x18c9   :  { %v27188_v14 = vpop.f32.mrb[198].mxu1 }
0x18ca   :  { %v15510_v23 = vadd.f32 %v27188_v14, %v24146_v8  ;;  %v15504_v19 = vpop.f32.mrb[199].mxu1  ;;  %v32602_v14 = vpack.c.bf16 %v24182_v28, %v24181_v16  ;;  %v24210_v16 = vld [vmem:[%s34111_s1 + $0x238] sm:$0xff]  ;;  %v24237_v28 = vld [vmem:[%s34113_s10 + $0x210] sm:$0xff] }
0x18cb   :  { %v15505_v2 = vadd.f32 %v24146_v8, %v15504_v19  ;;  %v24206_v8 = vld [vmem:[%s34111_s1 + $0x218] sm:$0xff]  ;;  %v24183_v19 = vld [vmem:[%s34105_s26 + $0x260] sm:$0xff] }
0x18cc   :  { %v15514_v37 = vmax.f32 %v15510_v23, 0.0  ;;  %v32604_v23 = vpack.c.bf16 %v24206_v8, %v24205_v41  ;;  %v24238_v41 = vld [vmem:[%s34113_s10 + $0x218] sm:$0xff]  ;;  %v32794_v8 = vpack.c.bf16 %v24210_v16, %v24209_v12  ;;  %v24260_v12 = vld [vmem:[%s34113_s10 + $0x2c8] sm:$0xff]  ;;  %v32914_v16 = vpack.c.bf16 %v24232_v3, %v24231_v56  ;;  %v24255_v3 = vld [vmem:[%s34113_s10 + $0x2a0] sm:$0xff] }
0x18cd   :  { %v15513_v57 = vmax.f32 %v15505_v2, 0.0  ;;  %v24184_v2 = vld [vmem:[%s34105_s26 + $0x268] sm:$0xff] }
0x18ce   :  { %34199 = vst [vmem:[#allocation14_spill] sm:$0xff] %v32914_v16 }
0x18cf   :  { %27221 = vmatprep.mubr.f32.mxu0 %v15513_v57  ;;  %v24211_v57 = vld [vmem:[%s34111_s1 + $0x240] sm:$0xff] }
0x18d0   :  { %27222 = vmatmul.mubr.f32.vlgmr.msra.gmra.mrb[192].mxu0 %v15514_v37  ;;  %v24212_v37 = vld [vmem:[%s34111_s1 + $0x248] sm:$0xff] }
0x18d1   :  { %27276 = vmatprep.mubr.msk.f32.mxu0 %vm29398_vm1, %v34132_v33 }
0x19a3   :  { %v27223_v26 = vpop.f32.mrb[192].mxu0 }
0x19a4   :  { %v32467_v51 = vadd.f32 %v27223_v26, %v24166_v5  ;;  %v15606_v21 = vpop.f32.mrb[193].mxu0  ;;  %v32628_v26 = vpack.c.bf16 %v24212_v37, %v24211_v57  ;;  %v24216_v57 = vld [vmem:[%s34111_s1 + $0x268] sm:$0xff]  ;;  %v24243_v37 = vld [vmem:[%s34113_s10 + $0x240] sm:$0xff] }
0x19a5   :  { %v15607_v20 = vadd.f32 %v24166_v5, %v15606_v21  ;;  %v32626_v5 = vpack.c.bf16 %v24184_v2, %v24183_v19  ;;  %v24185_v21 = vld [vmem:[%s34105_s26 + $0x270] sm:$0xff]  ;;  %v32796_v19 = vpack.c.bf16 %v24238_v41, %v24237_v28  ;;  %v24215_v2 = vld [vmem:[%s34111_s1 + $0x260] sm:$0xff]  ;;  %v32916_v28 = vpack.c.bf16 %v24260_v12, %v24259_v27  ;;  %v24256_v27 = vld [vmem:[%s34113_s10 + $0x2a8] sm:$0xff] }
0x19a6   :  { %v24233_v41 = vld [vmem:[%s34111_s1 + $0x2f0] sm:$0xff]  ;;  %v33009_v12 = vpack.c.bf16 %v24256_v27, %v24255_v3 }
0x19a7   :  { %v15615_v46 = vadd.f32 %v15607_v20, %v32354_v40  ;;  %v24187_v40 = vld [vmem:[%s34105_s26 + $0x280] sm:$0xff]  ;;  %v24186_v20 = vld [vmem:[%s34105_s26 + $0x278] sm:$0xff]  ;;  %34200 = vst [vmem:[#allocation17_spill] sm:$0xff] %v32916_v28 }
0x19a8   :  { %v32486_v6 = vpack.c.bf16 %v24188_v30, %v24187_v40  ;;  %v24193_v30 = vld [vmem:[%s34105_s26 + $0x2b0] sm:$0xff]  ;;  %34207 = vst [vmem:[#allocation22_spill] sm:$0xff] %v33009_v12 }
0x19a9   :  { %v15621_v9 = vsel %vm361_vm2, %v15615_v46, 0.0  ;;  %v32698_v10 = vpack.c.bf16 %v24194_v59, %v24193_v30  ;;  %v24223_v59 = vld [vmem:[%s34111_s1 + $0x2a0] sm:$0xff] }
0x19aa   :  { %15622 = vadd.xlane.f32.xlu0 %v15621_v9  ;;  %28742 = vmatpush3.bf16.msra.mxu0 %v32486_v6  ;;  %v24214_v9 = vld [vmem:[%s34111_s1 + $0x258] sm:$0xff] }
0x19ab   :  { %28743 = vmatprep.subr.bf16.mxu0 %v34136_v13 }
0x19ae   :  { %28745 = vmatpush3.bf16.msra.mxu0 %v32506_v22 }
0x19af   :  { %28752 = vmatprep.subr.bf16.mxu0 %v34136_v13 }
0x1a37   :  { %v15623_v58 = vpop.xlane.xlu0 %15622 }
0x1a38   :  { %v15627_v45 = vmul.f32 0.03125, %v15623_v58  ;;  %v32650_v58 = vpack.c.bf16 %v24186_v20, %v24185_v21  ;;  %v24244_v21 = vld [vmem:[%s34113_s10 + $0x248] sm:$0xff]  ;;  %v32818_v20 = vpack.c.bf16 %v24216_v57, %v24215_v2  ;;  %v24234_v2 = vld [vmem:[%s34111_s1 + $0x2f8] sm:$0xff]  ;;  %v24261_v57 = vld [vmem:[%s34113_s10 + $0x2d0] sm:$0xff] }
0x1a3a   :  { %v15629_v17 = vsub.f32 %v15615_v46, %v15627_v45  ;;  %v24213_v46 = vld [vmem:[%s34111_s1 + $0x250] sm:$0xff] }
0x1a3b   :  { %v32652_v45 = vpack.c.bf16 %v24214_v9, %v24213_v46  ;;  %v32820_v46 = vpack.c.bf16 %v24244_v21, %v24243_v37  ;;  %v24217_v9 = vld [vmem:[%s34111_s1 + $0x270] sm:$0xff]  ;;  %v24262_v37 = vld [vmem:[%s34113_s10 + $0x2d8] sm:$0xff]  ;;  %v32938_v21 = vpack.c.bf16 %v24234_v2, %v24233_v41 }
0x1a3c   :  { %v15631_v42 = vmul.f32 %v15629_v17, %v15629_v17  ;;  %v24257_v41 = vld [vmem:[%s34113_s10 + $0x2b0] sm:$0xff]  ;;  %v24258_v2 = vld [vmem:[%s34113_s10 + $0x2b8] sm:$0xff] }
0x1a3d   :  { %34201 = vst [vmem:[#allocation16_spill] sm:$0xff] %v32938_v21 }
0x1a3e   :  { %v15633_v35 = vsel %vm361_vm2, %v15631_v42, 0.0  ;;  %v24192_v42 = vld [vmem:[%s34105_s26 + $0x2a8] sm:$0xff] }
0x1a3f   :  { %15634 = vadd.xlane.f32.xlu1 %v15633_v35  ;;  %v24219_v35 = vld [vmem:[%s34111_s1 + $0x280] sm:$0xff] }
0x1a40   :  { %v32676_v40 = vpack.c.bf16 %v24220_v24, %v24219_v35  ;;  %v24246_v35 = vld [vmem:[%s34113_s10 + $0x258] sm:$0xff] }
0x1acc   :  { %v15635_v0 = vpop.xlane.xlu1 %15634 }
0x1acd   :  { %v15639_v50 = vmul.f32 0.03125, %v15635_v0  ;;  %v32700_v0 = vpack.c.bf16 %v24222_v34, %v24221_v11  ;;  %v24224_v11 = vld [vmem:[%s34111_s1 + $0x2a8] sm:$0xff]  ;;  %v24251_v34 = vld [vmem:[%s34113_s10 + $0x280] sm:$0xff] }
0x1acf   :  { %v15641_v47 = vadd.f32 1e-05, %v15639_v50  ;;  %v24199_v50 = vld [vmem:[%s34105_s26 + $0x2e0] sm:$0xff] }
0x1ad1   :  { %29208 = vrsqrt.f32 %v15641_v47  ;;  %v24200_v47 = vld [vmem:[%s34105_s26 + $0x2e8] sm:$0xff] }
0x1ad2   :  { %v32722_v31 = vpack.c.bf16 %v24200_v47, %v24199_v50  ;;  %v24252_v50 = vld [vmem:[%s34113_s10 + $0x288] sm:$0xff]  ;;  %v32866_v47 = vpack.c.bf16 %v24224_v11, %v24223_v59  ;;  %v24241_v59 = vld [vmem:[%s34113_s10 + $0x230] sm:$0xff]  ;;  %v24242_v11 = vld [vmem:[%s34113_s10 + $0x238] sm:$0xff] }
0x1ad4   :  { %34195 = vst [vmem:[#allocation10_spill] sm:$0xff] %v32866_v47 }
0x1adb   :  { %v29209_v48 = vpop.eup %29208 }
0x1adc   :  { %v15645_v43 = vmul.f32 %v29209_v48, %v15629_v17  ;;  %v24191_v17 = vld [vmem:[%s34105_s26 + $0x2a0] sm:$0xff] }
0x1add   :  { %v32674_v44 = vpack.c.bf16 %v24192_v42, %v24191_v17  ;;  %v24227_v48 = vld [vmem:[%s34111_s1 + $0x2c0] sm:$0xff]  ;;  %v24218_v17 = vld [vmem:[%s34111_s1 + $0x278] sm:$0xff]  ;;  %v24245_v42 = vld [vmem:[%s34113_s10 + $0x250] sm:$0xff] }
0x1ade   :  { %v15653_v53 = vmul.f32 %v24169_v55, %v15645_v43  ;;  %v24228_v55 = vld [vmem:[%s34111_s1 + $0x2c8] sm:$0xff]  ;;  %v32842_v24 = vpack.c.bf16 %v24218_v17, %v24217_v9  ;;  %v32844_v30 = vpack.c.bf16 %v24246_v35, %v24245_v42  ;;  %v32940_v9 = vpack.c.bf16 %v24262_v37, %v24261_v57  ;;  %v24239_v17 = vld [vmem:[%s34113_s10 + $0x220] sm:$0xff] }
0x1adf   :  { %v32724_v43 = vpack.c.bf16 %v24228_v55, %v24227_v48  ;;  %v32868_v48 = vpack.c.bf16 %v24252_v50, %v24251_v34  ;;  %v24225_v55 = vld [vmem:[%s34111_s1 + $0x2b0] sm:$0xff]  ;;  %v24240_v42 = vld [vmem:[%s34113_s10 + $0x228] sm:$0xff]  ;;  %v32971_v34 = vpack.c.bf16 %v24242_v11, %v24241_v59  ;;  %v24247_v50 = vld [vmem:[%s34113_s10 + $0x260] sm:$0xff]  ;;  %v33021_v57 = vpack.c.bf16 %v24258_v2, %v24257_v41 }
0x1ae0   :  { %v32537_v60 = vadd.f32 %v24170_v54, %v15653_v53  ;;  %v24230_v54 = vld [vmem:[%s34111_s1 + $0x2d8] sm:$0xff]  ;;  %v32746_v53 = vpack.c.bf16 %v24202_v39, %v24201_v15  ;;  %34194 = vst [vmem:[#allocation11_spill] sm:$0xff] %v32844_v30  ;;  %v24253_v39 = vld [vmem:[%s34113_s10 + $0x290] sm:$0xff]  ;;  %34202 = vst [vmem:[#allocation19_spill] sm:$0xff] %v32940_v9  ;;  %v32956_v35 = vpack.c.bf16 %v24240_v42, %v24239_v17 }
0x1ae1   :  { %v32748_v62 = vpack.c.bf16 %v24230_v54, %v24229_v29  ;;  %34196 = vst [vmem:[#allocation13_spill] sm:$0xff] %v32868_v48  ;;  %v24226_v15 = vld [vmem:[%s34111_s1 + $0x2b8] sm:$0xff]  ;;  %34204 = vst [vmem:[#allocation21_spill] sm:$0xff] %v32971_v34  ;;  %v24263_v37 = vld [vmem:[%s34113_s10 + $0x2e0] sm:$0xff] }
0x1ae2   :  { %34193 = vst [vmem:[#allocation8_spill] sm:$0xff] %v32537_v60  ;;  %27233 = vmatmul.mubr.msk.f32.vlgmr.msra.gmra.mrb[200].mxu1 %vm361_vm2, %v32537_v60  ;;  %27277 = vmatmul.mubr.msk.f32.vlgmr.msra.gmra.mrb[194].mxu0 %vm361_vm2, %v32537_v60  ;;  %v24254_v29 = vld [vmem:[%s34113_s10 + $0x298] sm:$0xff]  ;;  %v32890_v54 = vpack.c.bf16 %v24226_v15, %v24225_v55  ;;  %34203 = vst [vmem:[#allocation18_spill] sm:$0xff] %v32956_v35  ;;  %v24248_v55 = vld [vmem:[%s34113_s10 + $0x268] sm:$0xff] }
0x1ae3   :  { %28724 = vmatpush3.bf16.msra.mxu1 %v32530_v52  ;;  %28754 = vmatpush3.bf16.msra.mxu0 %v32532_v63  ;;  %v32892_v49 = vpack.c.bf16 %v24254_v29, %v24253_v39  ;;  %v32985_v15 = vpack.c.bf16 %v24248_v55, %v24247_v50  ;;  %v24249_v39 = vld [vmem:[%s34113_s10 + $0x270] sm:$0xff]  ;;  %v24250_v29 = vld [vmem:[%s34113_s10 + $0x278] sm:$0xff]  ;;  %34208 = vst [vmem:[#allocation25_spill] sm:$0xff] %v33021_v57  ;;  %v24264_v17 = vld [vmem:[%s34113_s10 + $0x2e8] sm:$0xff] }
0x1ae4   :  { %28725 = vmatprep.subr.bf16.mxu1 %v34136_v13  ;;  %28755 = vmatprep.subr.bf16.mxu0 %v34136_v13  ;;  %34197 = vst [vmem:[#allocation12_spill] sm:$0xff] %v32890_v54  ;;  %v32997_v56 = vpack.c.bf16 %v24250_v29, %v24249_v39  ;;  %v33033_v42 = vpack.c.bf16 %v24264_v17, %v24263_v37  ;;  %v24265_v59 = vld [vmem:[%s34113_s10 + $0x2f0] sm:$0xff]  ;;  %v24266_v11 = vld [vmem:[%s34113_s10 + $0x2f8] sm:$0xff] }
0x1ae5   :  { %27243 = vmatprep.mubr.msk.f32.mxu1 %vm29398_vm1, %v34132_v33  ;;  %27298 = vmatprep.mubr.msk.f32.mxu0 %vm29398_vm1, %v34132_v33  ;;  %34198 = vst [vmem:[#allocation15_spill] sm:$0xff] %v32892_v49  ;;  %34205 = vst [vmem:[#allocation20_spill] sm:$0xff] %v32985_v15  ;;  %v33045_v50 = vpack.c.bf16 %v24266_v11, %v24265_v59  ;;  %v24299_v17 = vld [vmem:[%s34130_s7 + $0x10] ss:$0 sm:$0xff] }
0x1ae6   :  { %34206 = vst [vmem:[#allocation23_spill] sm:$0xff] %v32997_v56  ;;  %34209 = vst [vmem:[#allocation24_spill] sm:$0xff] %v33033_v42  ;;  %v24315_v59 = vld [vmem:[%s34131_s30 + $0x10] ss:$0 sm:$0xff] }
0x1ae7   :  { %28727 = vmatpush3.bf16.msra.mxu1 %v32554_v1  ;;  %28757 = vmatpush3.bf16.msra.mxu0 %v32556_v18  ;;  %34210 = vst [vmem:[#allocation26_spill] sm:$0xff] %v33045_v50 }
0x1ae8   :  { %28728 = vmatprep.subr.bf16.mxu1 %v34136_v13  ;;  %28764 = vmatprep.subr.bf16.mxu0 %v34136_v13 }
0x1aea   :  { %27244 = vmatmul.mubr.msk.f32.vlgmr.msra.gmra.mrb[202].mxu1 %vm361_vm2, %v32537_v60  ;;  %27299 = vmatmul.mubr.msk.f32.vlgmr.msra.gmra.mrb[196].mxu0 %vm361_vm2, %v32537_v60 }
0x1aeb   :  { %28730 = vmatpush3.bf16.msra.mxu1 %v32578_v25  ;;  %28766 = vmatpush3.bf16.msra.mxu0 %v32580_v7 }
0x1aec   :  { %28731 = vmatprep.subr.bf16.mxu1 %v34136_v13  ;;  %28767 = vmatprep.subr.bf16.mxu0 %v34136_v13 }
0x1aed   :  { %27254 = vmatprep.mubr.msk.f32.mxu1 %vm29398_vm1, %v34132_v33  ;;  %27320 = vmatprep.mubr.msk.f32.mxu0 %vm29398_vm1, %v34132_v33 }
0x1aef   :  { %28733 = vmatpush3.bf16.msra.mxu1 %v32602_v14  ;;  %28769 = vmatpush3.bf16.msra.mxu0 %v32604_v23 }
0x1af0   :  { %28734 = vmatprep.subr.bf16.mxu1 %v34136_v13  ;;  %28776 = vmatprep.subr.bf16.mxu0 %v34136_v13 }
0x1af2   :  { %27255 = vmatmul.mubr.msk.f32.vlgmr.msra.gmra.mrb[204].mxu1 %vm361_vm2, %v32537_v60  ;;  %27321 = vmatmul.mubr.msk.f32.vlgmr.msra.gmra.mrb[198].mxu0 %vm361_vm2, %v32537_v60 }
0x1af3   :  { %28736 = vmatpush3.bf16.msra.mxu1 %v32626_v5  ;;  %28778 = vmatpush3.bf16.msra.mxu0 %v32628_v26 }
0x1af4   :  { %28737 = vmatprep.subr.bf16.mxu1 %v34136_v13  ;;  %28779 = vmatprep.subr.bf16.mxu0 %v34136_v13 }
0x1af5   :  { %27265 = vmatprep.mubr.msk.f32.mxu1 %vm29398_vm1, %v34132_v33  ;;  %27342 = vmatprep.mubr.msk.f32.mxu0 %vm29398_vm1, %v34132_v33 }
0x1af7   :  { %28739 = vmatpush3.bf16.msra.mxu1 %v32650_v58  ;;  %28781 = vmatpush3.bf16.msra.mxu0 %v32652_v45 }
0x1af8   :  { %28746 = vmatprep.subr.bf16.mxu1 %v34136_v13  ;;  %28788 = vmatprep.subr.bf16.mxu0 %v34136_v13 }
0x1afa   :  { %27266 = vmatmul.mubr.msk.f32.vlgmr.msra.gmra.mrb[206].mxu1 %vm361_vm2, %v32537_v60  ;;  %27343 = vmatmul.mubr.msk.f32.vlgmr.msra.gmra.mrb[200].mxu0 %vm361_vm2, %v32537_v60 }
0x1afb   :  { %28748 = vmatpush3.bf16.msra.mxu1 %v32674_v44  ;;  %28790 = vmatpush3.bf16.msra.mxu0 %v32676_v40 }
0x1afc   :  { %28749 = vmatprep.subr.bf16.mxu1 %v34136_v13  ;;  %28791 = vmatprep.subr.bf16.mxu0 %v34136_v13 }
0x1afd   :  { %27287 = vmatprep.mubr.msk.f32.mxu1 %vm29398_vm1, %v34132_v33  ;;  %27364 = vmatprep.mubr.msk.f32.mxu0 %vm29398_vm1, %v34132_v33 }
0x1aff   :  { %28751 = vmatpush3.bf16.msra.mxu1 %v32698_v10  ;;  %28793 = vmatpush3.bf16.msra.mxu0 %v32700_v0 }
0x1b00   :  { %28758 = vmatprep.subr.bf16.mxu1 %v34136_v13  ;;  %28800 = vmatprep.subr.bf16.mxu0 %v34136_v13 }
0x1b02   :  { %27288 = vmatmul.mubr.msk.f32.vlgmr.msra.gmra.mrb[208].mxu1 %vm361_vm2, %v32537_v60  ;;  %27365 = vmatmul.mubr.msk.f32.vlgmr.msra.gmra.mrb[202].mxu0 %vm361_vm2, %v32537_v60 }
0x1b03   :  { %28760 = vmatpush3.bf16.msra.mxu1 %v32722_v31  ;;  %28802 = vmatpush3.bf16.msra.mxu0 %v32724_v43 }
0x1b04   :  { %28761 = vmatprep.subr.bf16.mxu1 %v34136_v13  ;;  %28803 = vmatprep.subr.bf16.mxu0 %v34136_v13 }
0x1b05   :  { %27309 = vmatprep.mubr.msk.f32.mxu1 %vm29398_vm1, %v34132_v33  ;;  %27386 = vmatprep.mubr.msk.f32.mxu0 %vm29398_vm1, %v34132_v33 }
0x1b07   :  { %28763 = vmatpush3.bf16.msra.mxu1 %v32746_v53  ;;  %28805 = vmatpush3.bf16.msra.mxu0 %v32748_v62 }
0x1b08   :  { %28770 = vmatprep.subr.bf16.mxu1 %v34136_v13  ;;  %28812 = vmatprep.subr.bf16.mxu0 %v34136_v13 }
0x1b0a   :  { %27310 = vmatmul.mubr.msk.f32.vlgmr.msra.gmra.mrb[210].mxu1 %vm361_vm2, %v32537_v60  ;;  %27387 = vmatmul.mubr.msk.f32.vlgmr.msra.gmra.mrb[204].mxu0 %vm361_vm2, %v32537_v60 }
0x1b0b   :  { %28772 = vmatpush3.bf16.msra.mxu1 %v32770_v4  ;;  %28814 = vmatpush3.bf16.msra.mxu0 %v32772_v36 }
0x1b0c   :  { %28773 = vmatprep.subr.bf16.mxu1 %v34136_v13  ;;  %28815 = vmatprep.subr.bf16.mxu0 %v34136_v13 }
0x1b0d   :  { %27331 = vmatprep.mubr.msk.f32.mxu1 %vm29398_vm1, %v34132_v33  ;;  %27408 = vmatprep.mubr.msk.f32.mxu0 %vm29398_vm1, %v34132_v33 }
0x1b0f   :  { %28775 = vmatpush3.bf16.msra.mxu1 %v32794_v8  ;;  %28817 = vmatpush3.bf16.msra.mxu0 %v32796_v19 }
0x1b10   :  { %28782 = vmatprep.subr.bf16.mxu1 %v34136_v13  ;;  %28824 = vmatprep.subr.bf16.mxu0 %v34136_v13 }
0x1b12   :  { %27332 = vmatmul.mubr.msk.f32.vlgmr.msra.gmra.mrb[212].mxu1 %vm361_vm2, %v32537_v60  ;;  %27409 = vmatmul.mubr.msk.f32.vlgmr.msra.gmra.mrb[206].mxu0 %vm361_vm2, %v32537_v60 }
0x1b13   :  { %28784 = vmatpush3.bf16.msra.mxu1 %v32818_v20  ;;  %28826 = vmatpush3.bf16.msra.mxu0 %v32820_v46 }
0x1b14   :  { %28785 = vmatprep.subr.bf16.mxu1 %v34136_v13  ;;  %28827 = vmatprep.subr.bf16.mxu0 %v34136_v13 }
0x1b15   :  { %27353 = vmatprep.mubr.msk.f32.mxu1 %vm29398_vm1, %v34132_v33  ;;  %27430 = vmatprep.mubr.msk.f32.mxu0 %vm29398_vm1, %v34132_v33 }
0x1b17   :  { %28787 = vmatpush3.bf16.msra.mxu1 %v32842_v24  ;;  %28829 = vmatpush3.bf16.msra.mxu0 %v32844_v30 }
0x1b18   :  { %28794 = vmatprep.subr.bf16.mxu1 %v34136_v13  ;;  %28836 = vmatprep.subr.bf16.mxu0 %v34136_v13 }
0x1b1a   :  { %27354 = vmatmul.mubr.msk.f32.vlgmr.msra.gmra.mrb[214].mxu1 %vm361_vm2, %v32537_v60  ;;  %27431 = vmatmul.mubr.msk.f32.vlgmr.msra.gmra.mrb[208].mxu0 %vm361_vm2, %v32537_v60 }
0x1b1b   :  { %28796 = vmatpush3.bf16.msra.mxu1 %v32866_v47  ;;  %28838 = vmatpush3.bf16.msra.mxu0 %v32868_v48 }
0x1b1c   :  { %28797 = vmatprep.subr.bf16.mxu1 %v34136_v13  ;;  %28839 = vmatprep.subr.bf16.mxu0 %v34136_v13 }
0x1b1d   :  { %27375 = vmatprep.mubr.msk.f32.mxu1 %vm29398_vm1, %v34132_v33  ;;  %27452 = vmatprep.mubr.msk.f32.mxu0 %vm29398_vm1, %v34132_v33 }
0x1b1f   :  { %28799 = vmatpush3.bf16.msra.mxu1 %v32890_v54  ;;  %28841 = vmatpush3.bf16.msra.mxu0 %v32892_v49 }
0x1b20   :  { %28806 = vmatprep.subr.bf16.mxu1 %v34136_v13  ;;  %28848 = vmatprep.subr.bf16.mxu0 %v34136_v13 }
0x1b22   :  { %27376 = vmatmul.mubr.msk.f32.vlgmr.msra.gmra.mrb[216].mxu1 %vm361_vm2, %v32537_v60  ;;  %27453 = vmatmul.mubr.msk.f32.vlgmr.msra.gmra.mrb[210].mxu0 %vm361_vm2, %v32537_v60 }
0x1b23   :  { %28808 = vmatpush3.bf16.msra.mxu1 %v32914_v16  ;;  %28850 = vmatpush3.bf16.msra.mxu0 %v32916_v28 }
0x1b24   :  { %28809 = vmatprep.subr.bf16.mxu1 %v34136_v13  ;;  %28851 = vmatprep.subr.bf16.mxu0 %v34136_v13 }
0x1b25   :  { %27397 = vmatprep.mubr.msk.f32.mxu1 %vm29398_vm1, %v34132_v33  ;;  %27474 = vmatprep.mubr.msk.f32.mxu0 %vm29398_vm1, %v34132_v33 }
0x1b27   :  { %28811 = vmatpush3.bf16.msra.mxu1 %v32938_v21  ;;  %28853 = vmatpush3.bf16.msra.mxu0 %v32940_v9 }
0x1b28   :  { %28818 = vmatprep.subr.bf16.mxu1 %v34136_v13  ;;  %27488 = vmatprep.subr.mxu0 %v34132_v33 }
0x1b2a   :  { %27398 = vmatmul.mubr.msk.f32.vlgmr.msra.gmra.mrb[218].mxu1 %vm361_vm2, %v32537_v60  ;;  %27475 = vmatmul.mubr.msk.f32.vlgmr.msra.gmra.mrb[212].mxu0 %vm361_vm2, %v32537_v60 }
0x1b2b   :  { %28820 = vmatpush3.bf16.msra.mxu1 %v32956_v35  ;;  %27419 = vmatprep.mubr.msk.f32.mxu1 %vm29398_vm1, %v34132_v33 }
0x1b2c   :  { %28821 = vmatprep.subr.bf16.mxu1 %v34136_v13  ;;  %27490 = vmatprep.mubr.msk.f32.mxu0 %vm29398_vm1, %v34132_v33 }
0x1b2f   :  { %28823 = vmatpush3.bf16.msra.mxu1 %v32971_v34 }
0x1b30   :  { %28830 = vmatprep.subr.bf16.mxu1 %v34136_v13 }
0x1b32   :  { %27420 = vmatmul.mubr.msk.f32.vlgmr.msra.gmra.mrb[220].mxu1 %vm361_vm2, %v32537_v60 }
0x1b33   :  { %28832 = vmatpush3.bf16.msra.mxu1 %v32985_v15  ;;  %27441 = vmatprep.mubr.msk.f32.mxu1 %vm29398_vm1, %v34132_v33 }
0x1b34   :  { %28833 = vmatprep.subr.bf16.mxu1 %v34136_v13 }
0x1b37   :  { %28835 = vmatpush3.bf16.msra.mxu1 %v32997_v56 }
0x1b38   :  { %28842 = vmatprep.subr.bf16.mxu1 %v34136_v13 }
0x1b3a   :  { %27442 = vmatmul.mubr.msk.f32.vlgmr.msra.gmra.mrb[222].mxu1 %vm361_vm2, %v32537_v60 }
0x1b3b   :  { %28844 = vmatpush3.bf16.msra.mxu1 %v33009_v12  ;;  %27463 = vmatprep.mubr.msk.f32.mxu1 %vm29398_vm1, %v34132_v33 }
0x1b3c   :  { %28845 = vmatprep.subr.bf16.mxu1 %v34136_v13 }
0x1b3f   :  { %28847 = vmatpush3.bf16.msra.mxu1 %v33021_v57 }
0x1b40   :  { %28854 = vmatprep.subr.bf16.mxu1 %v34136_v13 }
0x1b42   :  { %27464 = vmatmul.mubr.msk.f32.vlgmr.msra.gmra.mrb[224].mxu1 %vm361_vm2, %v32537_v60 }
0x1b43   :  { %28856 = vmatpush3.bf16.msra.mxu1 %v33033_v42  ;;  %27485 = vmatprep.mubr.msk.f32.mxu1 %vm29398_vm1, %v34132_v33 }
0x1b44   :  { %28857 = vmatprep.subr.bf16.mxu1 %v34136_v13 }
0x1b47   :  { %28859 = vmatpush3.bf16.msra.mxu1 %v33045_v50 }
0x1b48   :  { %27498 = vmatprep.subr.mxu1 %v34132_v33 }
0x1b4a   :  { %27486 = vmatmul.mubr.msk.f32.vlgmr.msra.gmra.mrb[226].mxu1 %vm361_vm2, %v32537_v60 }
0x1b4b   :  { %27500 = vmatprep.mubr.msk.f32.mxu1 %vm29398_vm1, %v34132_v33 }
0x1bb5   :  { %v15915_v55 = vpop.f32.mrb[200].mxu1  ;;  %v16195_v39 = vpop.f32.mrb[194].mxu0 }
0x1bb6   :  { %v27234_v29 = vpop.f32.mrb[201].mxu1  ;;  %v27278_v3 = vpop.f32.mrb[195].mxu0  ;;  %v15916_v11 = vadd.f32 %v24299_v17, %v15915_v55  ;;  %v24317_v55 = vld [vmem:[%s34131_s30 + $0x12] ss:$0 sm:$0xff] }
0x1bb7   :  { %v24301_v3 = vld [vmem:[%s34130_s7 + $0x12] ss:$0 sm:$0xff] }
0x1bb8   :  { %v17625_v29 = vmul.f32 0.5, %v15916_v11 }
0x1bbd   :  { %v15985_v27 = vpop.f32.mrb[202].mxu1  ;;  %v16335_v41 = vpop.f32.mrb[196].mxu0 }
0x1bbe   :  { %v27245_v2 = vpop.f32.mrb[203].mxu1  ;;  %v27300_v37 = vpop.f32.mrb[197].mxu0 }
0x1bc5   :  { %v16055_v60 = vpop.f32.mrb[204].mxu1  ;;  %v16523_v50 = vpop.f32.mrb[198].mxu0 }
0x1bc6   :  { %v16524_v42 = vadd.f32 %v24315_v59, %v16523_v50  ;;  %v27256_v57 = vpop.f32.mrb[205].mxu1  ;;  %v27322_v12 = vpop.f32.mrb[199].mxu0  ;;  %v24303_v59 = vld [vmem:[%s34130_s7 + $0x14] ss:$0 sm:$0xff] }
0x1bc7   :  { %v16056_v57 = vadd.f32 %v24301_v3, %v16055_v60  ;;  %v24319_v60 = vld [vmem:[%s34131_s30 + $0x14] ss:$0 sm:$0xff]  ;;  %v16196_v11 = vadd.f32 %v24303_v59, %v16195_v39  ;;  %v24321_v39 = vld [vmem:[%s34131_s30 + $0x16] ss:$0 sm:$0xff] }
0x1bc8   :  { %27489 = vmatpush3.xpose.msk.msra.mxu0 %vm2149_vm3, %v16524_v42 }
0x1bc9   :  { %27493 = vmatprep.subr.mxu0 %v34132_v33  ;;  %v17627_v17 = vmul.f32 0.5, %v16056_v57 }
0x1bcb   :  { %27491 = vmatmul.mubr.msk.f32.vlgmr.msra.gmra.mrb[214].mxu0 %vm2149_vm3, %v17625_v29 }
0x1bcc   :  { %27495 = vmatprep.mubr.msk.f32.mxu0 %vm29398_vm1, %v34132_v33 }
0x1bcd   :  { %v16125_v12 = vpop.f32.mrb[206].mxu1  ;;  %v16663_v50 = vpop.f32.mrb[200].mxu0 }
0x1bce   :  { %v16664_v42 = vadd.f32 %v24317_v55, %v16663_v50  ;;  %v27267_v2 = vpop.f32.mrb[207].mxu1  ;;  %v27344_v37 = vpop.f32.mrb[201].mxu0 }
0x1bcf   :  { %v24305_v2 = vld [vmem:[%s34130_s7 + $0x16] ss:$0 sm:$0xff] }
0x1bd0   :  { %27499 = vmatpush3.xpose.msk.msra.mxu1 %vm2149_vm3, %v16664_v42  ;;  %v17629_v42 = vmul.f32 0.5, %v16196_v11  ;;  %v16336_v37 = vadd.f32 %v24305_v2, %v16335_v41  ;;  %v24316_v41 = vld [vmem:[%s34131_s30 + $0x11] ss:$0 sm:$0xff] }
0x1bd1   :  { %27508 = vmatprep.subr.mxu1 %v34132_v33 }
0x1bd3   :  { %27501 = vmatmul.mubr.msk.f32.vlgmr.msra.gmra.mrb[228].mxu1 %vm2149_vm3, %v17627_v17 }
0x1bd4   :  { %27510 = vmatprep.mubr.msk.f32.mxu1 %vm29398_vm1, %v34132_v33 }
0x1bd5   :  { %v16265_v29 = vpop.f32.mrb[208].mxu1  ;;  %v16803_v3 = vpop.f32.mrb[202].mxu0 }
0x1bd6   :  { %v16804_v55 = vadd.f32 %v24319_v60, %v16803_v3  ;;  %v27289_v57 = vpop.f32.mrb[209].mxu1  ;;  %v27366_v50 = vpop.f32.mrb[203].mxu0 }
0x1bd7   :  { %v24300_v57 = vld [vmem:[%s34130_s7 + $0x11] ss:$0 sm:$0xff]  ;;  %v24331_v50 = vld [vmem:[%s34133_s9 + $0x10] ss:$0 sm:$0xff] }
0x1bd8   :  { %27509 = vmatpush3.xpose.msk.msra.mxu1 %vm2149_vm3, %v16804_v55  ;;  %v17631_v55 = vmul.f32 0.5, %v16336_v37 }
0x1bd9   :  { %27518 = vmatprep.subr.mxu1 %v34132_v33 }
0x1bdb   :  { %27511 = vmatmul.mubr.msk.f32.vlgmr.msra.gmra.mrb[230].mxu1 %vm2149_vm3, %v17629_v42  ;;  %v15986_v42 = vadd.f32 %v24300_v57, %v15985_v27  ;;  %v24318_v27 = vld [vmem:[%s34131_s30 + $0x13] ss:$0 sm:$0xff] }
0x1bdc   :  { %27520 = vmatprep.mubr.msk.f32.mxu1 %vm29398_vm1, %v34132_v33 }
0x1bdd   :  { %v16405_v17 = vpop.f32.mrb[210].mxu1  ;;  %v16943_v59 = vpop.f32.mrb[204].mxu0 }
0x1bde   :  { %v16944_v60 = vadd.f32 %v24321_v39, %v16943_v59  ;;  %v27311_v11 = vpop.f32.mrb[211].mxu1  ;;  %v27388_v3 = vpop.f32.mrb[205].mxu0 }
0x1bdf   :  { %v17626_v3 = vmul.f32 0.5, %v15986_v42 }
0x1be0   :  { %27519 = vmatpush3.xpose.msk.msra.mxu1 %vm2149_vm3, %v16944_v60 }
0x1be1   :  { %27528 = vmatprep.subr.mxu1 %v34132_v33 }
0x1be3   :  { %27521 = vmatmul.mubr.msk.f32.vlgmr.msra.gmra.mrb[232].mxu1 %vm2149_vm3, %v17631_v55  ;;  %v24302_v55 = vld [vmem:[%s34130_s7 + $0x13] ss:$0 sm:$0xff] }
0x1be4   :  { %27530 = vmatprep.mubr.msk.f32.mxu1 %vm29398_vm1, %v34132_v33  ;;  %v16126_v57 = vadd.f32 %v24302_v55, %v16125_v12  ;;  %v24320_v12 = vld [vmem:[%s34131_s30 + $0x15] ss:$0 sm:$0xff] }
0x1be5   :  { %v16593_v2 = vpop.f32.mrb[212].mxu1  ;;  %v17131_v39 = vpop.f32.mrb[206].mxu0 }
0x1be6   :  { %v16594_v37 = vadd.f32 %v24316_v41, %v16593_v2  ;;  %v17132_v59 = vadd.f32 %v24331_v50, %v17131_v39  ;;  %v27333_v60 = vpop.f32.mrb[213].mxu1  ;;  %v27410_v11 = vpop.f32.mrb[207].mxu0 }
0x1be8   :  { %27494 = vmatpush3.xpose.msk.msra.mxu0 %vm2149_vm3, %v16594_v37  ;;  %27529 = vmatpush3.msra.mxu1 %v17132_v59  ;;  %v17628_v37 = vmul.f32 0.5, %v16126_v57  ;;  %v24304_v59 = vld [vmem:[%s34130_s7 + $0x15] ss:$0 sm:$0xff] }
0x1be9   :  { %27503 = vmatprep.subr.mxu0 %v34132_v33  ;;  %27538 = vmatprep.subr.mxu1 %v34132_v33  ;;  %v16266_v60 = vadd.f32 %v24304_v59, %v16265_v29  ;;  %v24322_v29 = vld [vmem:[%s34131_s30 + $0x17] ss:$0 sm:$0xff] }
0x1beb   :  { %27496 = vmatmul.mubr.msk.f32.vlgmr.msra.gmra.mrb[216].mxu0 %vm2149_vm3, %v17626_v3 }
0x1bec   :  { %27505 = vmatprep.mubr.msk.f32.mxu0 %vm29398_vm1, %v34132_v33 }
0x1bed   :  { %v16733_v41 = vpop.f32.mrb[214].mxu1  ;;  %v33121_v50 = vpop.f32.mrb[208].mxu0 }
0x1bee   :  { %v16734_v42 = vadd.f32 %v24318_v27, %v16733_v41  ;;  %v27355_v2 = vpop.f32.mrb[215].mxu1  ;;  %v27432_v39 = vpop.f32.mrb[209].mxu0  ;;  %v17630_v41 = vmul.f32 0.5, %v16266_v60 }
0x1bf0   :  { %27504 = vmatpush3.xpose.msk.msra.mxu0 %vm2149_vm3, %v16734_v42  ;;  %v24306_v42 = vld [vmem:[%s34130_s7 + $0x17] ss:$0 sm:$0xff] }
0x1bf1   :  { %27513 = vmatprep.subr.mxu0 %v34132_v33  ;;  %v16406_v2 = vadd.f32 %v24306_v42, %v16405_v17 }
0x1bf3   :  { %27506 = vmatmul.mubr.msk.f32.vlgmr.msra.gmra.mrb[218].mxu0 %vm2149_vm3, %v17628_v37 }
0x1bf4   :  { %27515 = vmatprep.mubr.msk.f32.mxu0 %vm29398_vm1, %v34132_v33 }
0x1bf5   :  { %v16873_v11 = vpop.f32.mrb[216].mxu1  ;;  %v33134_v3 = vpop.f32.mrb[210].mxu0 }
0x1bf6   :  { %v16874_v55 = vadd.f32 %v24320_v12, %v16873_v11  ;;  %v27377_v27 = vpop.f32.mrb[217].mxu1  ;;  %v27454_v57 = vpop.f32.mrb[211].mxu0  ;;  %v17632_v11 = vmul.f32 0.5, %v16406_v2 }
0x1bf8   :  { %27514 = vmatpush3.xpose.msk.msra.mxu0 %vm2149_vm3, %v16874_v55  ;;  %v24332_v55 = vld [vmem:[%s34133_s9 + $0x11] ss:$0 sm:$0xff] }
0x1bf9   :  { %27523 = vmatprep.subr.mxu0 %v34132_v33 }
0x1bfb   :  { %27516 = vmatmul.mubr.msk.f32.vlgmr.msra.gmra.mrb[220].mxu0 %vm2149_vm3, %v17630_v41 }
0x1bfc   :  { %27525 = vmatprep.mubr.msk.f32.mxu0 %vm29398_vm1, %v34132_v33 }
0x1bfd   :  { %v17013_v39 = vpop.f32.mrb[218].mxu1  ;;  %v33147_v37 = vpop.f32.mrb[212].mxu0 }
0x1bfe   :  { %v17014_v59 = vadd.f32 %v24322_v29, %v17013_v39  ;;  %v27399_v12 = vpop.f32.mrb[219].mxu1  ;;  %v27476_v60 = vpop.f32.mrb[213].mxu0 }
0x1c00   :  { %27524 = vmatpush3.xpose.msk.msra.mxu0 %vm2149_vm3, %v17014_v59 }
0x1c01   :  { %27533 = vmatprep.subr.mxu0 %v34132_v33 }
0x1c03   :  { %27526 = vmatmul.mubr.msk.f32.vlgmr.msra.gmra.mrb[222].mxu0 %vm2149_vm3, %v17632_v11 }
0x1c04   :  { %27535 = vmatprep.mubr.msk.f32.mxu0 %vm29398_vm1, %v34132_v33 }
0x1c05   :  { %v17201_v17 = vpop.f32.mrb[220].mxu1 }
0x1c06   :  { %v17202_v27 = vadd.f32 %v24332_v55, %v17201_v17  ;;  %v27421_v57 = vpop.f32.mrb[221].mxu1 }
0x1c08   :  { %27534 = vmatpush3.msra.mxu0 %v17202_v27 }
0x1c09   :  { %27543 = vmatprep.subr.mxu0 %v34132_v33 }
0x1c0d   :  { %v33158_v41 = vpop.f32.mrb[222].mxu1 }
0x1c0e   :  { %v27443_v42 = vpop.f32.mrb[223].mxu1 }
0x1c15   :  { %v33160_v29 = vpop.f32.mrb[224].mxu1 }
0x1c16   :  { %v27465_v2 = vpop.f32.mrb[225].mxu1 }
0x1c1d   :  { %v33162_v39 = vpop.f32.mrb[226].mxu1 }
0x1c1e   :  { %v27487_v59 = vpop.f32.mrb[227].mxu1 }
0x1c9e   :  { %v17705_v12 = vpop.f32.mrb[214].mxu0 }
0x1c9f   :  { %v27492_v60 = vpop.f32.mrb[215].mxu0  ;;  %v18241_v11 = vsel %vm99_vm0, %v17705_v12, -inf }
0x1ca0   :  { %18242 = vmax.xlane.f32.xlu0 %v18241_v11 }
0x1ca6   :  { %v17857_v56 = vpop.f32.mrb[228].mxu1 }
0x1ca7   :  { %v27502_v55 = vpop.f32.mrb[229].mxu1  ;;  %v18247_v17 = vsel %vm99_vm0, %v17857_v56, -inf }
0x1ca8   :  { %18248 = vmax.xlane.f32.xlu0 %v18247_v17 }
0x1cae   :  { %v18009_v27 = vpop.f32.mrb[230].mxu1 }
0x1caf   :  { %v27512_v57 = vpop.f32.mrb[231].mxu1  ;;  %v18253_v42 = vsel %vm99_vm0, %v18009_v27, -inf }
0x1cb0   :  { %18254 = vmax.xlane.f32.xlu0 %v18253_v42 }
0x1cb6   :  { %v18161_v15 = vpop.f32.mrb[232].mxu1 }
0x1cb7   :  { %v27522_v2 = vpop.f32.mrb[233].mxu1  ;;  %v18259_v34 = vsel %vm99_vm0, %v18161_v15, -inf }
0x1cb8   :  { %18260 = vmax.xlane.f32.xlu0 %v18259_v34 }
0x1cbe   :  { %v17781_v59 = vpop.f32.mrb[216].mxu0 }
0x1cbf   :  { %v27497_v60 = vpop.f32.mrb[217].mxu0  ;;  %v18244_v35 = vsel %vm99_vm0, %v17781_v59, -inf }
0x1cc0   :  { %18245 = vmax.xlane.f32.xlu1 %v18244_v35 }
0x1cc6   :  { %v17933_v11 = vpop.f32.mrb[218].mxu0 }
0x1cc7   :  { %v27507_v55 = vpop.f32.mrb[219].mxu0  ;;  %v18250_v9 = vsel %vm99_vm0, %v17933_v11, -inf }
0x1cc8   :  { %18251 = vmax.xlane.f32.xlu1 %v18250_v9 }
0x1cce   :  { %v18085_v17 = vpop.f32.mrb[220].mxu0 }
0x1ccf   :  { %v27517_v57 = vpop.f32.mrb[221].mxu0  ;;  %v18256_v21 = vsel %vm99_vm0, %v18085_v17, -inf }
0x1cd0   :  { %18257 = vmax.xlane.f32.xlu1 %v18256_v21 }
0x1cd6   :  { %v18237_v42 = vpop.f32.mrb[222].mxu0 }
0x1cd7   :  { %v27527_v2 = vpop.f32.mrb[223].mxu0  ;;  %v18262_v28 = vsel %vm99_vm0, %v18237_v42, -inf }
0x1cd8   :  { %18263 = vmax.xlane.f32.xlu1 %v18262_v28 }
0x1d2d   :  { %v18243_v34 = vpop.xlane.xlu0 %18242 }
0x1d2e   :  { %v18265_v60 = vsub.f32 %v17705_v12, %v18243_v34 }
0x1d30   :  { %v18273_v16 = vmul.f32 1.442695, %v18265_v60 }
0x1d32   :  { %29210 = vpow2.f32 %v18273_v16 }
0x1d35   :  { %v18249_v35 = vpop.xlane.xlu0 %18248 }
0x1d36   :  { %v18267_v49 = vsub.f32 %v17857_v56, %v18249_v35 }
0x1d38   :  { %v18277_v55 = vmul.f32 1.442695, %v18267_v49 }
0x1d3a   :  { %29212 = vpow2.f32 %v18277_v55 }
0x1d3c   :  { %v29211_v54 = vpop.eup %29210 }
0x1d3d   :  { %v18255_v9 = vpop.xlane.xlu0 %18254  ;;  %v18289_v57 = vsel %vm99_vm0, %v29211_v54, 0.0 }
0x1d3e   :  { %v18269_v48 = vsub.f32 %v18009_v27, %v18255_v9  ;;  %18290 = vadd.xlane.f32.xlu0 %v18289_v57 }
0x1d40   :  { %v18281_v21 = vmul.f32 1.442695, %v18269_v48 }
0x1d42   :  { %29214 = vpow2.f32 %v18281_v21 }
0x1d44   :  { %v29213_v2 = vpop.eup %29212 }
0x1d45   :  { %v18261_v47 = vpop.xlane.xlu0 %18260  ;;  %v18295_v28 = vsel %vm99_vm0, %v29213_v2, 0.0 }
0x1d46   :  { %v18271_v30 = vsub.f32 %v18161_v15, %v18261_v47  ;;  %18296 = vadd.xlane.f32.xlu0 %v18295_v28 }
0x1d48   :  { %v18285_v12 = vmul.f32 1.442695, %v18271_v30  ;;  %v15616_v30 = vadd.f32 %v32467_v51, %v32446_v32 }
0x1d4a   :  { %29216 = vpow2.f32 %v18285_v12  ;;  %v15624_v55 = vsel %vm361_vm2, %v15616_v30, 0.0 }
0x1d4c   :  { %v33174_v16 = vpop.eup %29214 }
0x1d4d   :  { %v18246_v49 = vpop.xlane.xlu1 %18245  ;;  %v18301_v56 = vsel %vm99_vm0, %v33174_v16, 0.0 }
0x1d4e   :  { %v18266_v34 = vsub.f32 %v17781_v59, %v18246_v49  ;;  %18302 = vadd.xlane.f32.xlu0 %v18301_v56 }
0x1d50   :  { %v18275_v27 = vmul.f32 1.442695, %v18266_v34 }
0x1d52   :  { %29218 = vpow2.f32 %v18275_v27 }
0x1d54   :  { %v33178_v48 = vpop.eup %29216 }
0x1d55   :  { %v18252_v60 = vpop.xlane.xlu1 %18251  ;;  %v18307_v35 = vsel %vm99_vm0, %v33178_v48, 0.0 }
0x1d56   :  { %v18268_v47 = vsub.f32 %v17933_v11, %v18252_v60  ;;  %18308 = vadd.xlane.f32.xlu0 %v18307_v35 }
0x1d58   :  { %v18279_v15 = vmul.f32 1.442695, %v18268_v47 }
0x1d5a   :  { %29220 = vpow2.f32 %v18279_v15  ;;  %15625 = vadd.xlane.f32.xlu0 %v15624_v55 }
0x1d5c   :  { %v33185_v59 = vpop.eup %29218 }
0x1d5d   :  { %v18258_v9 = vpop.xlane.xlu1 %18257  ;;  %v18292_v57 = vsel %vm99_vm0, %v33185_v59, 0.0 }
0x1d5e   :  { %v18270_v21 = vsub.f32 %v18085_v17, %v18258_v9  ;;  %18293 = vadd.xlane.f32.xlu1 %v18292_v57  ;;  %v24335_v57 = vld [vmem:[%s34133_s9 + $0x14] ss:$0 sm:$0xff] }
0x1d60   :  { %v18283_v28 = vmul.f32 1.442695, %v18270_v21 }
0x1d62   :  { %29222 = vpow2.f32 %v18283_v28 }
0x1d64   :  { %v33189_v12 = vpop.eup %29220 }
0x1d65   :  { %v18264_v32 = vpop.xlane.xlu1 %18263  ;;  %v18298_v51 = vsel %vm99_vm0, %v33189_v12, 0.0 }
0x1d66   :  { %v18272_v11 = vsub.f32 %v18237_v42, %v18264_v32  ;;  %18299 = vadd.xlane.f32.xlu1 %v18298_v51  ;;  %v24333_v42 = vld [vmem:[%s34133_s9 + $0x12] ss:$0 sm:$0xff]  ;;  %v24337_v32 = vld [vmem:[%s34133_s9 + $0x16] ss:$0 sm:$0xff] }
0x1d67   :  { %v17272_v55 = vadd.f32 %v24333_v42, %v33121_v50  ;;  %v24334_v42 = vld [vmem:[%s34133_s9 + $0x13] ss:$0 sm:$0xff] }
0x1d68   :  { %v18287_v49 = vmul.f32 1.442695, %v18272_v11 }
0x1d6a   :  { %29224 = vpow2.f32 %v18287_v49 }
0x1d6c   :  { %v33193_v56 = vpop.eup %29222 }
0x1d6d   :  { %v18304_v34 = vsel %vm99_vm0, %v33193_v56, 0.0 }
0x1d6e   :  { %18305 = vadd.xlane.f32.xlu1 %v18304_v34 }
0x1d74   :  { %v33197_v17 = vpop.eup %29224 }
0x1d75   :  { %v18310_v27 = vsel %vm99_vm0, %v33197_v17, 0.0 }
0x1d76   :  { %18311 = vadd.xlane.f32.xlu1 %v18310_v27 }
0x1dcb   :  { %v18291_v60 = vpop.xlane.xlu0 %18290 }
0x1dcc   :  { %29226 = vrcp.f32 %v18291_v60 }
0x1dd3   :  { %v18297_v35 = vpop.xlane.xlu0 %18296 }
0x1dd4   :  { %29228 = vrcp.f32 %v18297_v35 }
0x1dd6   :  { %v29227_v47 = vpop.eup %29226 }
0x1dd7   :  { %v18314_v15 = vmul.f32 %v29227_v47, %v29211_v54  ;;  %v17412_v54 = vadd.f32 %v24335_v57, %v33134_v3  ;;  %v17552_v3 = vadd.f32 %v24337_v32, %v33147_v37 }
0x1dd9   :  { %27531 = vmatmul.mubr.msk.f32.vlgmr.msra.gmra.mrb[234].mxu1 %vm99_vm0, %v18314_v15 }
0x1dda   :  { %27539 = vmatpush3.msra.mxu1 %v17272_v55  ;;  %27540 = vmatprep.mubr.msk.f32.mxu1 %vm29398_vm1, %v34132_v33  ;;  %v17342_v55 = vadd.f32 %v24334_v42, %v33158_v41 }
0x1ddb   :  { %v18303_v9 = vpop.xlane.xlu0 %18302  ;;  %27548 = vmatprep.subr.mxu1 %v34132_v33 }
0x1ddc   :  { %29230 = vrcp.f32 %v18303_v9  ;;  %v24336_v9 = vld [vmem:[%s34133_s9 + $0x15] ss:$0 sm:$0xff] }
0x1dde   :  { %v29229_v21 = vpop.eup %29228 }
0x1ddf   :  { %v18318_v28 = vmul.f32 %v29229_v21, %v29213_v2 }
0x1de1   :  { %27541 = vmatmul.mubr.msk.f32.vlgmr.msra.gmra.mrb[236].mxu1 %vm99_vm0, %v18318_v28  ;;  %v24338_v28 = vld [vmem:[%s34133_s9 + $0x17] ss:$0 sm:$0xff] }
0x1de2   :  { %27549 = vmatpush3.msra.mxu1 %v17412_v54  ;;  %27550 = vmatprep.mubr.msk.f32.mxu1 %vm29398_vm1, %v34132_v33 }
0x1de3   :  { %v18309_v50 = vpop.xlane.xlu0 %18308  ;;  %27558 = vmatprep.subr.mxu1 %v34132_v33 }
0x1de4   :  { %29232 = vrcp.f32 %v18309_v50 }
0x1de6   :  { %v29231_v51 = vpop.eup %29230 }
0x1de7   :  { %v18322_v11 = vmul.f32 %v29231_v51, %v33174_v16  ;;  %v15626_v2 = vpop.xlane.xlu0 %15625  ;;  %v24293_v51 = vld [vmem:[%s34135_s4 + $0x48] sm:$0xf] }
0x1de8   :  { %v15628_v49 = vmul.f32 0.03125, %v15626_v2 }
0x1de9   :  { %27551 = vmatmul.mubr.msk.f32.vlgmr.msra.gmra.mrb[238].mxu1 %vm99_vm0, %v18322_v11 }
0x1dea   :  { %v33223_v34 = vsub.f32 %v15616_v30, %v15628_v49  ;;  %27559 = vmatpush3.msra.mxu1 %v17552_v3  ;;  %27560 = vmatprep.mubr.msk.f32.mxu1 %vm29398_vm1, %v34132_v33 }
0x1deb   :  { %v18294_v27 = vpop.xlane.xlu1 %18293  ;;  %27568 = vmatprep.subr.mxu1 %v34132_v33 }
0x1dec   :  { %29234 = vrcp.f32 %v18294_v27  ;;  %v15632_v60 = vmul.f32 %v33223_v34, %v33223_v34  ;;  %v24295_v27 = vld [vmem:[%s34135_s4 + $0x50] sm:$0xf] }
0x1dee   :  { %v29233_v16 = vpop.eup %29232  ;;  %v15636_v35 = vsel %vm361_vm2, %v15632_v60, 0.0 }
0x1def   :  { %v18326_v37 = vmul.f32 %v29233_v16, %v33178_v48  ;;  %15637 = vadd.xlane.f32.xlu1 %v15636_v35  ;;  %v24297_v35 = vld [vmem:[%s34135_s4 + $0x58] sm:$0xf] }
0x1df1   :  { %27561 = vmatmul.mubr.msk.f32.vlgmr.msra.gmra.mrb[240].mxu1 %vm99_vm0, %v18326_v37 }
0x1df2   :  { %27570 = vmatprep.mubr.msk.f32.mxu1 %vm29398_vm1, %v34132_v33 }
0x1df3   :  { %v18300_v30 = vpop.xlane.xlu1 %18299 }
0x1df4   :  { %29236 = vrcp.f32 %v18300_v30 }
0x1df6   :  { %v29235_v47 = vpop.eup %29234 }
0x1df7   :  { %v18316_v15 = vmul.f32 %v29235_v47, %v33185_v59  ;;  %v17482_v59 = vadd.f32 %v24336_v9, %v33160_v29 }
0x1df9   :  { %27536 = vmatmul.mubr.msk.f32.vlgmr.msra.gmra.mrb[224].mxu0 %vm99_vm0, %v18316_v15 }
0x1dfa   :  { %27544 = vmatpush3.msra.mxu0 %v17342_v55  ;;  %27545 = vmatprep.mubr.msk.f32.mxu0 %vm29398_vm1, %v34132_v33 }
0x1dfb   :  { %v18306_v48 = vpop.xlane.xlu1 %18305  ;;  %27553 = vmatprep.subr.mxu0 %v34132_v33 }
0x1dfc   :  { %29238 = vrcp.f32 %v18306_v48  ;;  %v29343_v48 = vld [vmem:[%s34006_s18 + $0x1] ss:$0 sm:$0xff] }
0x1dfe   :  { %v29237_v57 = vpop.eup %29236 }
0x1dff   :  { %v18320_v21 = vmul.f32 %v29237_v57, %v33189_v12  ;;  %v17622_v12 = vadd.f32 %v24338_v28, %v33162_v39  ;;  %v33269_v39 = vld [vmem:[%s34135_s4 + $0x40] sm:$0xf] }
0x1e00   :  { %27569 = vmatpush3.msk.msra.mxu1 %vm3433_vm4, %v33269_v39 }
0x1e01   :  { %27546 = vmatmul.mubr.msk.f32.vlgmr.msra.gmra.mrb[226].mxu0 %vm99_vm0, %v18320_v21  ;;  %27578 = vmatprep.subr.mxu1 %v34132_v33  ;;  %v33322_v21 = vld [vmem:[%s34135_s4 + $0x4c] sm:$0xf] }
0x1e02   :  { %27554 = vmatpush3.msra.mxu0 %v17482_v59  ;;  %27555 = vmatprep.mubr.msk.f32.mxu0 %vm29398_vm1, %v34132_v33 }
0x1e03   :  { %v18312_v41 = vpop.xlane.xlu1 %18311  ;;  %27563 = vmatprep.subr.mxu0 %v34132_v33 }
0x1e04   :  { %29240 = vrcp.f32 %v18312_v41 }
0x1e06   :  { %v29239_v54 = vpop.eup %29238 }
0x1e07   :  { %v18324_v50 = vmul.f32 %v29239_v54, %v33193_v56  ;;  %v24292_v56 = vld [vmem:[%s34135_s4 + $0x44] sm:$0xf] }
0x1e09   :  { %27556 = vmatmul.mubr.msk.f32.vlgmr.msra.gmra.mrb[228].mxu0 %vm99_vm0, %v18324_v50 }
0x1e0a   :  { %27564 = vmatpush3.msra.mxu0 %v17622_v12  ;;  %27565 = vmatprep.mubr.msk.f32.mxu0 %vm29398_vm1, %v34132_v33 }
0x1e0b   :  { %27573 = vmatprep.subr.mxu0 %v34132_v33 }
0x1e0e   :  { %v29241_v29 = vpop.eup %29240 }
0x1e0f   :  { %v18328_v32 = vmul.f32 %v29241_v29, %v33197_v17 }
0x1e11   :  { %27566 = vmatmul.mubr.msk.f32.vlgmr.msra.gmra.mrb[230].mxu0 %vm99_vm0, %v18328_v32 }
0x1e12   :  { %27575 = vmatprep.mubr.msk.f32.mxu0 %vm29398_vm1, %v34132_v33  ;;  %27574 = vmatpush3.msk.msra.mxu0 %vm3433_vm4, %v24292_v56 }
0x1e13   :  { %27583 = vmatprep.subr.mxu0 %v34132_v33 }
0x1e7c   :  { %v15638_v17 = vpop.xlane.xlu1 %15637 }
0x1e7d   :  { %v15640_v3 = vmul.f32 0.03125, %v15638_v17 }
0x1e7f   :  { %v15642_v49 = vadd.f32 1e-05, %v15640_v3 }
0x1e81   :  { %29242 = vrsqrt.f32 %v15642_v49 }
0x1e8b   :  { %v29243_v42 = vpop.eup %29242 }
0x1e8c   :  { %v15646_v47 = vmul.f32 %v29243_v42, %v33223_v34  ;;  %v29344_v34 = vld [vmem:[%s34007_s19 + $0x1] ss:$0 sm:$0xff] }
0x1e8e   :  { %v15654_v9 = vmul.f32 %v29343_v48, %v15646_v47 }
0x1e90   :  { %v33316_v57 = vadd.f32 %v29344_v34, %v15654_v9 }
0x1eac   :  { %v18398_v11 = vpop.f32.mrb[234].mxu1 }
0x1ead   :  { %v27532_v2 = vpop.f32.mrb[235].mxu1  ;;  %27571 = vmatmul.mubr.msk.f32.vlgmr.msra.gmra.mrb[242].mxu1 %vm2149_vm3, %v18398_v11 }
0x1eae   :  { %27579 = vmatpush3.msk.msra.mxu1 %vm3433_vm4, %v24293_v51  ;;  %27580 = vmatprep.mubr.msk.f32.mxu1 %vm29398_vm1, %v34132_v33 }
0x1eaf   :  { %27588 = vmatprep.subr.mxu1 %v34132_v33 }
0x1eb4   :  { %v18544_v60 = vpop.f32.mrb[236].mxu1 }
0x1eb5   :  { %v27542_v16 = vpop.f32.mrb[237].mxu1  ;;  %27581 = vmatmul.mubr.msk.f32.vlgmr.msra.gmra.mrb[244].mxu1 %vm2149_vm3, %v18544_v60 }
0x1eb6   :  { %27589 = vmatpush3.msk.msra.mxu1 %vm3433_vm4, %v24295_v27  ;;  %27590 = vmatprep.mubr.msk.f32.mxu1 %vm29398_vm1, %v34132_v33 }
0x1eb7   :  { %27598 = vmatprep.subr.mxu1 %v34132_v33 }
0x1ebc   :  { %v18690_v37 = vpop.f32.mrb[238].mxu1 }
0x1ebd   :  { %v27552_v30 = vpop.f32.mrb[239].mxu1  ;;  %27591 = vmatmul.mubr.msk.f32.vlgmr.msra.gmra.mrb[246].mxu1 %vm2149_vm3, %v18690_v37 }
0x1ebe   :  { %27599 = vmatpush3.msk.msra.mxu1 %vm3433_vm4, %v24297_v35  ;;  %27600 = vmatprep.mubr.msk.f32.mxu1 %vm29398_vm1, %v34132_v33 }
0x1ebf   :  { %28860 = vmatprep.subr.bf16.mxu1 %v34136_v13 }
0x1ec4   :  { %v18836_v15 = vpop.f32.mrb[240].mxu1 }
0x1ec5   :  { %v27562_v55 = vpop.f32.mrb[241].mxu1  ;;  %27601 = vmatmul.mubr.msk.f32.vlgmr.msra.gmra.mrb[248].mxu1 %vm2149_vm3, %v18836_v15 }
0x1ec6   :  { %28862 = vmatpush3.bf16.msra.mxu1 %v32481_v38  ;;  %27616 = vmatprep.mubr.msk.f32.mxu1 %vm29398_vm1, %v34132_v33 }
0x1ec7   :  { %28863 = vmatprep.subr.bf16.mxu1 %v34136_v13 }
0x1eca   :  { %28865 = vmatpush3.bf16.msra.mxu1 %v32501_v61 }
0x1ecb   :  { %28872 = vmatprep.subr.bf16.mxu1 %v34136_v13 }
0x1ecc   :  { %v18471_v38 = vpop.f32.mrb[224].mxu0 }
0x1ecd   :  { %27617 = vmatmul.mubr.msk.f32.vlgmr.msra.gmra.mrb[250].mxu1 %vm361_vm2, %v33316_v57  ;;  %v27537_v59 = vpop.f32.mrb[225].mxu0  ;;  %27576 = vmatmul.mubr.msk.f32.vlgmr.msra.gmra.mrb[232].mxu0 %vm2149_vm3, %v18471_v38 }
0x1ece   :  { %28874 = vmatpush3.bf16.msra.mxu1 %v32578_v25  ;;  %27638 = vmatprep.mubr.msk.f32.mxu1 %vm29398_vm1, %v34132_v33  ;;  %v33341_v25 = vld [vmem:[%s34135_s4 + $0x54] sm:$0xf] }
0x1ecf   :  { %28875 = vmatprep.subr.bf16.mxu1 %v34136_v13  ;;  %27584 = vmatpush3.msk.msra.mxu0 %vm3433_vm4, %v33322_v21 }
0x1ed0   :  { %27585 = vmatprep.mubr.msk.f32.mxu0 %vm29398_vm1, %v34132_v33  ;;  %27593 = vmatprep.subr.mxu0 %v34132_v33 }
0x1ed2   :  { %28877 = vmatpush3.bf16.msra.mxu1 %v32602_v14 }
0x1ed3   :  { %28884 = vmatprep.subr.bf16.mxu1 %v34136_v13 }
0x1ed4   :  { %v18617_v61 = vpop.f32.mrb[226].mxu0 }
0x1ed5   :  { %27639 = vmatmul.mubr.msk.f32.vlgmr.msra.gmra.mrb[252].mxu1 %vm361_vm2, %v33316_v57  ;;  %v27547_v41 = vpop.f32.mrb[227].mxu0  ;;  %27586 = vmatmul.mubr.msk.f32.vlgmr.msra.gmra.mrb[234].mxu0 %vm2149_vm3, %v18617_v61 }
0x1ed6   :  { %28886 = vmatpush3.bf16.msra.mxu1 %v32486_v6  ;;  %27660 = vmatprep.mubr.msk.f32.mxu1 %vm29398_vm1, %v34132_v33  ;;  %v33360_v6 = vld [vmem:[%s34135_s4 + $0x5c] sm:$0xf] }
0x1ed7   :  { %28887 = vmatprep.subr.bf16.mxu1 %v34136_v13  ;;  %27594 = vmatpush3.msk.msra.mxu0 %vm3433_vm4, %v33341_v25 }
0x1ed8   :  { %27595 = vmatprep.mubr.msk.f32.mxu0 %vm29398_vm1, %v34132_v33  ;;  %27603 = vmatprep.subr.mxu0 %v34132_v33 }
0x1eda   :  { %28889 = vmatpush3.bf16.msra.mxu1 %v32506_v22 }
0x1edb   :  { %28896 = vmatprep.subr.bf16.mxu1 %v34136_v13 }
0x1edc   :  { %v18763_v14 = vpop.f32.mrb[228].mxu0 }
0x1edd   :  { %27661 = vmatmul.mubr.msk.f32.vlgmr.msra.gmra.mrb[254].mxu1 %vm361_vm2, %v33316_v57  ;;  %v27557_v28 = vpop.f32.mrb[229].mxu0  ;;  %27596 = vmatmul.mubr.msk.f32.vlgmr.msra.gmra.mrb[236].mxu0 %vm2149_vm3, %v18763_v14 }
0x1ede   :  { %28898 = vmatpush3.bf16.msra.mxu1 %v32532_v63  ;;  %27604 = vmatpush3.msk.msra.mxu0 %vm3433_vm4, %v33360_v6 }
0x1edf   :  { %28899 = vmatprep.subr.bf16.mxu1 %v34136_v13  ;;  %27682 = vmatprep.mubr.msk.f32.mxu1 %vm29398_vm1, %v34132_v33 }
0x1ee0   :  { %27605 = vmatprep.mubr.msk.f32.mxu0 %vm29398_vm1, %v34132_v33  ;;  %28866 = vmatprep.subr.bf16.mxu0 %v34136_v13 }
0x1ee2   :  { %28901 = vmatpush3.bf16.msra.mxu1 %v32556_v18  ;;  %v34213_v18 = vld [vmem:[#allocation13_spill] sm:$0xff] }
0x1ee3   :  { %28908 = vmatprep.subr.bf16.mxu1 %v34136_v13 }
0x1ee4   :  { %v18909_v22 = vpop.f32.mrb[230].mxu0 }
0x1ee5   :  { %27683 = vmatmul.mubr.msk.f32.vlgmr.msra.gmra.mrb[0].mxu1 %vm361_vm2, %v33316_v57  ;;  %v27567_v63 = vpop.f32.mrb[231].mxu0  ;;  %27606 = vmatmul.mubr.msk.f32.vlgmr.msra.gmra.mrb[238].mxu0 %vm2149_vm3, %v18909_v22  ;;  %v29345_v22 = vld [vmem:[%s34130_s7 + $0x10] ss:$0 sm:$0xff] }
0x1ee6   :  { %28868 = vmatpush3.bf16.msra.mxu0 %v32530_v52  ;;  %28910 = vmatpush3.bf16.msra.mxu1 %v32580_v7  ;;  %v34211_v52 = vld [vmem:[#allocation11_spill] sm:$0xff]  ;;  %v34214_v7 = vld [vmem:[#allocation12_spill] sm:$0xff] }
0x1ee7   :  { %28869 = vmatprep.subr.bf16.mxu0 %v34136_v13  ;;  %28911 = vmatprep.subr.bf16.mxu1 %v34136_v13 }
0x1ee8   :  { %27627 = vmatprep.mubr.msk.f32.mxu0 %vm29398_vm1, %v34132_v33  ;;  %27704 = vmatprep.mubr.msk.f32.mxu1 %vm29398_vm1, %v34132_v33 }
0x1eea   :  { %28871 = vmatpush3.bf16.msra.mxu0 %v32554_v1  ;;  %28913 = vmatpush3.bf16.msra.mxu1 %v32604_v23  ;;  %v34212_v1 = vld [vmem:[#allocation10_spill] sm:$0xff]  ;;  %v34215_v23 = vld [vmem:[#allocation15_spill] sm:$0xff] }
0x1eeb   :  { %28878 = vmatprep.subr.bf16.mxu0 %v34136_v13  ;;  %28920 = vmatprep.subr.bf16.mxu1 %v34136_v13 }
0x1eed   :  { %27628 = vmatmul.mubr.msk.f32.vlgmr.msra.gmra.mrb[240].mxu0 %vm361_vm2, %v33316_v57  ;;  %27705 = vmatmul.mubr.msk.f32.vlgmr.msra.gmra.mrb[2].mxu1 %vm361_vm2, %v33316_v57 }
0x1eee   :  { %28880 = vmatpush3.bf16.msra.mxu0 %v32626_v5  ;;  %28922 = vmatpush3.bf16.msra.mxu1 %v32628_v26  ;;  %v34216_v5 = vld [vmem:[#allocation14_spill] sm:$0xff]  ;;  %v34217_v26 = vld [vmem:[#allocation17_spill] sm:$0xff] }
0x1eef   :  { %28881 = vmatprep.subr.bf16.mxu0 %v34136_v13  ;;  %28923 = vmatprep.subr.bf16.mxu1 %v34136_v13 }
0x1ef0   :  { %27649 = vmatprep.mubr.msk.f32.mxu0 %vm29398_vm1, %v34132_v33  ;;  %27726 = vmatprep.mubr.msk.f32.mxu1 %vm29398_vm1, %v34132_v33 }
0x1ef2   :  { %28883 = vmatpush3.bf16.msra.mxu0 %v32650_v58  ;;  %28925 = vmatpush3.bf16.msra.mxu1 %v32652_v45  ;;  %v34218_v58 = vld [vmem:[#allocation16_spill] sm:$0xff]  ;;  %v34219_v45 = vld [vmem:[#allocation19_spill] sm:$0xff] }
0x1ef3   :  { %28890 = vmatprep.subr.bf16.mxu0 %v34136_v13  ;;  %28932 = vmatprep.subr.bf16.mxu1 %v34136_v13 }
0x1ef5   :  { %27650 = vmatmul.mubr.msk.f32.vlgmr.msra.gmra.mrb[242].mxu0 %vm361_vm2, %v33316_v57  ;;  %27727 = vmatmul.mubr.msk.f32.vlgmr.msra.gmra.mrb[4].mxu1 %vm361_vm2, %v33316_v57 }
0x1ef6   :  { %28892 = vmatpush3.bf16.msra.mxu0 %v32674_v44  ;;  %28934 = vmatpush3.bf16.msra.mxu1 %v32676_v40  ;;  %v34220_v44 = vld [vmem:[#allocation18_spill] sm:$0xff]  ;;  %v34221_v40 = vld [vmem:[#allocation21_spill] sm:$0xff] }
0x1ef7   :  { %28893 = vmatprep.subr.bf16.mxu0 %v34136_v13  ;;  %28935 = vmatprep.subr.bf16.mxu1 %v34136_v13 }
0x1ef8   :  { %27671 = vmatprep.mubr.msk.f32.mxu0 %vm29398_vm1, %v34132_v33  ;;  %27748 = vmatprep.mubr.msk.f32.mxu1 %vm29398_vm1, %v34132_v33 }
0x1efa   :  { %28895 = vmatpush3.bf16.msra.mxu0 %v32698_v10  ;;  %28937 = vmatpush3.bf16.msra.mxu1 %v32700_v0  ;;  %v34222_v10 = vld [vmem:[#allocation20_spill] sm:$0xff]  ;;  %v34223_v0 = vld [vmem:[#allocation23_spill] sm:$0xff] }
0x1efb   :  { %28902 = vmatprep.subr.bf16.mxu0 %v34136_v13  ;;  %28944 = vmatprep.subr.bf16.mxu1 %v34136_v13 }
0x1efd   :  { %27672 = vmatmul.mubr.msk.f32.vlgmr.msra.gmra.mrb[244].mxu0 %vm361_vm2, %v33316_v57  ;;  %27749 = vmatmul.mubr.msk.f32.vlgmr.msra.gmra.mrb[6].mxu1 %vm361_vm2, %v33316_v57 }
0x1efe   :  { %28904 = vmatpush3.bf16.msra.mxu0 %v32722_v31  ;;  %28946 = vmatpush3.bf16.msra.mxu1 %v32724_v43  ;;  %v34224_v31 = vld [vmem:[#allocation22_spill] sm:$0xff]  ;;  %v34225_v43 = vld [vmem:[#allocation25_spill] sm:$0xff] }
0x1eff   :  { %28905 = vmatprep.subr.bf16.mxu0 %v34136_v13  ;;  %28947 = vmatprep.subr.bf16.mxu1 %v34136_v13 }
0x1f00   :  { %27693 = vmatprep.mubr.msk.f32.mxu0 %vm29398_vm1, %v34132_v33  ;;  %27770 = vmatprep.mubr.msk.f32.mxu1 %vm29398_vm1, %v34132_v33 }
0x1f02   :  { %28907 = vmatpush3.bf16.msra.mxu0 %v32746_v53  ;;  %28949 = vmatpush3.bf16.msra.mxu1 %v32748_v62  ;;  %v34226_v53 = vld [vmem:[#allocation24_spill] sm:$0xff]  ;;  %v34227_v62 = vld [vmem:[#allocation26_spill] sm:$0xff] }
0x1f03   :  { %28914 = vmatprep.subr.bf16.mxu0 %v34136_v13  ;;  %28956 = vmatprep.subr.bf16.mxu1 %v34136_v13 }
0x1f05   :  { %27694 = vmatmul.mubr.msk.f32.vlgmr.msra.gmra.mrb[246].mxu0 %vm361_vm2, %v33316_v57  ;;  %27771 = vmatmul.mubr.msk.f32.vlgmr.msra.gmra.mrb[8].mxu1 %vm361_vm2, %v33316_v57 }
0x1f06   :  { %28916 = vmatpush3.bf16.msra.mxu0 %v32770_v4  ;;  %28958 = vmatpush3.bf16.msra.mxu1 %v32772_v36 }
0x1f07   :  { %28917 = vmatprep.subr.bf16.mxu0 %v34136_v13  ;;  %28959 = vmatprep.subr.bf16.mxu1 %v34136_v13 }
0x1f08   :  { %27715 = vmatprep.mubr.msk.f32.mxu0 %vm29398_vm1, %v34132_v33  ;;  %27792 = vmatprep.mubr.msk.f32.mxu1 %vm29398_vm1, %v34132_v33 }
0x1f0a   :  { %28919 = vmatpush3.bf16.msra.mxu0 %v32794_v8  ;;  %28961 = vmatpush3.bf16.msra.mxu1 %v32796_v19 }
0x1f0b   :  { %28926 = vmatprep.subr.bf16.mxu0 %v34136_v13  ;;  %28968 = vmatprep.subr.bf16.mxu1 %v34136_v13 }
0x1f0d   :  { %27716 = vmatmul.mubr.msk.f32.vlgmr.msra.gmra.mrb[248].mxu0 %vm361_vm2, %v33316_v57  ;;  %27793 = vmatmul.mubr.msk.f32.vlgmr.msra.gmra.mrb[10].mxu1 %vm361_vm2, %v33316_v57 }
0x1f0e   :  { %28928 = vmatpush3.bf16.msra.mxu0 %v32818_v20  ;;  %28970 = vmatpush3.bf16.msra.mxu1 %v32820_v46 }
0x1f0f   :  { %28929 = vmatprep.subr.bf16.mxu0 %v34136_v13  ;;  %28971 = vmatprep.subr.bf16.mxu1 %v34136_v13 }
0x1f10   :  { %27737 = vmatprep.mubr.msk.f32.mxu0 %vm29398_vm1, %v34132_v33  ;;  %27814 = vmatprep.mubr.msk.f32.mxu1 %vm29398_vm1, %v34132_v33 }
0x1f12   :  { %28931 = vmatpush3.bf16.msra.mxu0 %v32842_v24  ;;  %28973 = vmatpush3.bf16.msra.mxu1 %v34211_v52 }
0x1f13   :  { %28938 = vmatprep.subr.bf16.mxu0 %v34136_v13  ;;  %28980 = vmatprep.subr.bf16.mxu1 %v34136_v13 }
0x1f15   :  { %27738 = vmatmul.mubr.msk.f32.vlgmr.msra.gmra.mrb[250].mxu0 %vm361_vm2, %v33316_v57  ;;  %27815 = vmatmul.mubr.msk.f32.vlgmr.msra.gmra.mrb[12].mxu1 %vm361_vm2, %v33316_v57 }
0x1f16   :  { %28940 = vmatpush3.bf16.msra.mxu0 %v34212_v1  ;;  %28982 = vmatpush3.bf16.msra.mxu1 %v34213_v18  ;;  %v29346_v18 = vld [vmem:[%s34131_s30 + $0x10] ss:$0 sm:$0xff] }
0x1f17   :  { %28941 = vmatprep.subr.bf16.mxu0 %v34136_v13  ;;  %28983 = vmatprep.subr.bf16.mxu1 %v34136_v13 }
0x1f18   :  { %27759 = vmatprep.mubr.msk.f32.mxu0 %vm29398_vm1, %v34132_v33  ;;  %27836 = vmatprep.mubr.msk.f32.mxu1 %vm29398_vm1, %v34132_v33 }
0x1f1a   :  { %28943 = vmatpush3.bf16.msra.mxu0 %v34214_v7  ;;  %28985 = vmatpush3.bf16.msra.mxu1 %v34215_v23 }
0x1f1b   :  { %28950 = vmatprep.subr.bf16.mxu0 %v34136_v13  ;;  %28992 = vmatprep.subr.bf16.mxu1 %v34136_v13 }
0x1f1d   :  { %27760 = vmatmul.mubr.msk.f32.vlgmr.msra.gmra.mrb[252].mxu0 %vm361_vm2, %v33316_v57  ;;  %27837 = vmatmul.mubr.msk.f32.vlgmr.msra.gmra.mrb[14].mxu1 %vm361_vm2, %v33316_v57 }
0x1f1e   :  { %28952 = vmatpush3.bf16.msra.mxu0 %v34216_v5  ;;  %28994 = vmatpush3.bf16.msra.mxu1 %v34217_v26 }
0x1f1f   :  { %28953 = vmatprep.subr.bf16.mxu0 %v34136_v13  ;;  %28995 = vmatprep.subr.bf16.mxu1 %v34136_v13 }
0x1f20   :  { %27781 = vmatprep.mubr.msk.f32.mxu0 %vm29398_vm1, %v34132_v33  ;;  %27858 = vmatprep.mubr.msk.f32.mxu1 %vm29398_vm1, %v34132_v33 }
0x1f22   :  { %28955 = vmatpush3.bf16.msra.mxu0 %v34218_v58  ;;  %28997 = vmatpush3.bf16.msra.mxu1 %v34219_v45  ;;  %v29347_v58 = vld [vmem:[%s34130_s7 + $0x12] ss:$0 sm:$0xff] }
0x1f23   :  { %28962 = vmatprep.subr.bf16.mxu0 %v34136_v13  ;;  %27872 = vmatprep.subr.mxu1 %v34132_v33 }
0x1f25   :  { %27782 = vmatmul.mubr.msk.f32.vlgmr.msra.gmra.mrb[254].mxu0 %vm361_vm2, %v33316_v57  ;;  %27859 = vmatmul.mubr.msk.f32.vlgmr.msra.gmra.mrb[16].mxu1 %vm361_vm2, %v33316_v57 }
0x1f26   :  { %28964 = vmatpush3.bf16.msra.mxu0 %v34220_v44  ;;  %27803 = vmatprep.mubr.msk.f32.mxu0 %vm29398_vm1, %v34132_v33 }
0x1f27   :  { %28965 = vmatprep.subr.bf16.mxu0 %v34136_v13  ;;  %27874 = vmatprep.mubr.msk.f32.mxu1 %vm29398_vm1, %v34132_v33 }
0x1f2a   :  { %28967 = vmatpush3.bf16.msra.mxu0 %v34221_v40 }
0x1f2b   :  { %28974 = vmatprep.subr.bf16.mxu0 %v34136_v13 }
0x1f2d   :  { %27804 = vmatmul.mubr.msk.f32.vlgmr.msra.gmra.mrb[0].mxu0 %vm361_vm2, %v33316_v57 }
0x1f2e   :  { %28976 = vmatpush3.bf16.msra.mxu0 %v34222_v10  ;;  %27825 = vmatprep.mubr.msk.f32.mxu0 %vm29398_vm1, %v34132_v33  ;;  %v29348_v10 = vld [vmem:[%s34131_s30 + $0x12] ss:$0 sm:$0xff] }
0x1f2f   :  { %28977 = vmatprep.subr.bf16.mxu0 %v34136_v13 }
0x1f32   :  { %28979 = vmatpush3.bf16.msra.mxu0 %v34223_v0 }
0x1f33   :  { %28986 = vmatprep.subr.bf16.mxu0 %v34136_v13 }
0x1f35   :  { %27826 = vmatmul.mubr.msk.f32.vlgmr.msra.gmra.mrb[2].mxu0 %vm361_vm2, %v33316_v57 }
0x1f36   :  { %28988 = vmatpush3.bf16.msra.mxu0 %v34224_v31  ;;  %27847 = vmatprep.mubr.msk.f32.mxu0 %vm29398_vm1, %v34132_v33 }
0x1f37   :  { %28989 = vmatprep.subr.bf16.mxu0 %v34136_v13 }
0x1f3a   :  { %28991 = vmatpush3.bf16.msra.mxu0 %v34225_v43 }
0x1f3b   :  { %28998 = vmatprep.subr.bf16.mxu0 %v34136_v13 }
0x1f3d   :  { %27848 = vmatmul.mubr.msk.f32.vlgmr.msra.gmra.mrb[4].mxu0 %vm361_vm2, %v33316_v57 }
0x1f3e   :  { %29000 = vmatpush3.bf16.msra.mxu0 %v34226_v53  ;;  %27869 = vmatprep.mubr.msk.f32.mxu0 %vm29398_vm1, %v34132_v33 }
0x1f3f   :  { %29001 = vmatprep.subr.bf16.mxu0 %v34136_v13 }
0x1f42   :  { %29003 = vmatpush3.bf16.msra.mxu0 %v34227_v62  ;;  %v29349_v62 = vld [vmem:[%s34130_s7 + $0x14] ss:$0 sm:$0xff] }
0x1f43   :  { %27877 = vmatprep.subr.mxu0 %v34132_v33 }
0x1f45   :  { %27870 = vmatmul.mubr.msk.f32.vlgmr.msra.gmra.mrb[6].mxu0 %vm361_vm2, %v33316_v57 }
0x1f46   :  { %27879 = vmatprep.mubr.msk.f32.mxu0 %vm29398_vm1, %v34132_v33 }
0x1f80   :  { %v18985_v4 = vpop.f32.mrb[242].mxu1 }
0x1f81   :  { %v27572_v36 = vpop.f32.mrb[243].mxu1  ;;  %v19521_v12 = vsel %vm361_vm2, %v18985_v4, 0.0 }
0x1f88   :  { %v19137_v8 = vpop.f32.mrb[244].mxu1 }
0x1f89   :  { %v27582_v19 = vpop.f32.mrb[245].mxu1  ;;  %v19524_v51 = vsel %vm361_vm2, %v19137_v8, 0.0 }
0x1f8a   :  { %v29350_v19 = vld [vmem:[%s34131_s30 + $0x14] ss:$0 sm:$0xff] }
0x1f90   :  { %v19289_v20 = vpop.f32.mrb[246].mxu1 }
0x1f91   :  { %v27592_v46 = vpop.f32.mrb[247].mxu1  ;;  %v19528_v35 = vsel %vm361_vm2, %v19289_v20, 0.0 }
0x1f98   :  { %v19441_v24 = vpop.f32.mrb[248].mxu1 }
0x1f99   :  { %v27602_v54 = vpop.f32.mrb[249].mxu1  ;;  %v19532_v9 = vsel %vm361_vm2, %v19441_v24, 0.0 }
0x1fa0   :  { %v19605_v50 = vpop.f32.mrb[250].mxu1  ;;  %v19061_v13 = vpop.f32.mrb[232].mxu0 }
0x1fa1   :  { %v19522_v29 = vsel %vm361_vm2, %v19061_v13, 0.0  ;;  %v27618_v32 = vpop.f32.mrb[251].mxu1  ;;  %v27577_v56 = vpop.f32.mrb[233].mxu0  ;;  %v19606_v63 = vadd.f32 %v29345_v22, %v19605_v50  ;;  %v29351_v50 = vld [vmem:[%s34130_s7 + $0x16] ss:$0 sm:$0xff] }
0x1fa2   :  { %v19523_v17 = vadd.f32 %v19522_v29, %v19521_v12  ;;  %v29352_v32 = vld [vmem:[%s34131_s30 + $0x16] ss:$0 sm:$0xff] }
0x1fa3   :  { %v21219_v26 = vmul.f32 0.5, %v19606_v63 }
0x1fa4   :  { %v19525_v11 = vadd.f32 %v19524_v51, %v19523_v17 }
0x1fa8   :  { %v19745_v2 = vpop.f32.mrb[252].mxu1  ;;  %v19213_v3 = vpop.f32.mrb[234].mxu0 }
0x1fa9   :  { %v19526_v49 = vsel %vm361_vm2, %v19213_v3, 0.0  ;;  %v27640_v27 = vpop.f32.mrb[253].mxu1  ;;  %v27587_v60 = vpop.f32.mrb[235].mxu0  ;;  %v19746_v45 = vadd.f32 %v29347_v58, %v19745_v2  ;;  %v29353_v2 = vld [vmem:[%s34130_s7 + $0x11] ss:$0 sm:$0xff] }
0x1faa   :  { %v19527_v16 = vadd.f32 %v19526_v49, %v19525_v11  ;;  %v29354_v60 = vld [vmem:[%s34131_s30 + $0x11] ss:$0 sm:$0xff] }
0x1fab   :  { %v21221_v53 = vmul.f32 0.5, %v19746_v45 }
0x1fac   :  { %v19529_v37 = vadd.f32 %v19528_v35, %v19527_v16  ;;  %v29355_v35 = vld [vmem:[%s34133_s9 + $0x10] ss:$0 sm:$0xff] }
0x1fb0   :  { %v19885_v30 = vpop.f32.mrb[254].mxu1  ;;  %v19365_v42 = vpop.f32.mrb[236].mxu0 }
0x1fb1   :  { %v19530_v47 = vsel %vm361_vm2, %v19365_v42, 0.0  ;;  %v27662_v15 = vpop.f32.mrb[255].mxu1  ;;  %v27597_v55 = vpop.f32.mrb[237].mxu0  ;;  %v19886_v4 = vadd.f32 %v29349_v62, %v19885_v30  ;;  %v29362_v62 = vld [vmem:[%s34133_s9 + $0x11] ss:$0 sm:$0xff] }
0x1fb2   :  { %v19531_v48 = vadd.f32 %v19530_v47, %v19529_v37  ;;  %v29356_v15 = vld [vmem:[%s34130_s7 + $0x13] ss:$0 sm:$0xff] }
0x1fb3   :  { %v21223_v54 = vmul.f32 0.5, %v19886_v4 }
0x1fb4   :  { %v19533_v34 = vadd.f32 %v19532_v9, %v19531_v48 }
0x1fb8   :  { %v20025_v38 = vpop.f32.mrb[0].mxu1  ;;  %v19517_v59 = vpop.f32.mrb[238].mxu0 }
0x1fb9   :  { %v19534_v61 = vsel %vm361_vm2, %v19517_v59, 0.0  ;;  %v27684_v41 = vpop.f32.mrb[1].mxu1  ;;  %v27607_v14 = vpop.f32.mrb[239].mxu0  ;;  %v20026_v13 = vadd.f32 %v29351_v50, %v20025_v38 }
0x1fba   :  { %v33551_v28 = vadd.f32 %v19534_v61, %v19533_v34  ;;  %v29357_v34 = vld [vmem:[%s34131_s30 + $0x13] ss:$0 sm:$0xff]  ;;  %v29358_v14 = vld [vmem:[%s34130_s7 + $0x15] ss:$0 sm:$0xff] }
0x1fbb   :  { %v21225_v11 = vmul.f32 0.5, %v20026_v13 }
0x1fc0   :  { %v19675_v52 = vpop.f32.mrb[240].mxu0  ;;  %v20165_v1 = vpop.f32.mrb[2].mxu1 }
0x1fc1   :  { %v20166_v7 = vadd.f32 %v29346_v18, %v20165_v1  ;;  %v27629_v23 = vpop.f32.mrb[241].mxu0  ;;  %v27706_v5 = vpop.f32.mrb[3].mxu1  ;;  %v19676_v3 = vadd.f32 %v29353_v2, %v19675_v52  ;;  %v29359_v1 = vld [vmem:[%s34131_s30 + $0x15] ss:$0 sm:$0xff] }
0x1fc3   :  { %27873 = vmatpush3.xpose.msk.msra.mxu1 %vm2149_vm3, %v20166_v7  ;;  %v21220_v47 = vmul.f32 0.5, %v19676_v3 }
0x1fc4   :  { %27882 = vmatprep.subr.mxu1 %v34132_v33 }
0x1fc6   :  { %27875 = vmatmul.mubr.msk.f32.vlgmr.msra.gmra.mrb[18].mxu1 %vm2149_vm3, %v21219_v26  ;;  %v29360_v26 = vld [vmem:[%s34130_s7 + $0x17] ss:$0 sm:$0xff] }
0x1fc7   :  { %27884 = vmatprep.mubr.msk.f32.mxu1 %vm29398_vm1, %v34132_v33 }
0x1fc8   :  { %v19815_v44 = vpop.f32.mrb[242].mxu0  ;;  %v20305_v40 = vpop.f32.mrb[4].mxu1 }
0x1fc9   :  { %v20306_v0 = vadd.f32 %v29348_v10, %v20305_v40  ;;  %v27651_v31 = vpop.f32.mrb[243].mxu0  ;;  %v27728_v43 = vpop.f32.mrb[5].mxu1  ;;  %v19816_v55 = vadd.f32 %v29356_v15, %v19815_v44  ;;  %v29361_v40 = vld [vmem:[%s34131_s30 + $0x17] ss:$0 sm:$0xff] }
0x1fcb   :  { %27883 = vmatpush3.xpose.msk.msra.mxu1 %vm2149_vm3, %v20306_v0  ;;  %v21222_v41 = vmul.f32 0.5, %v19816_v55 }
0x1fcc   :  { %27892 = vmatprep.subr.mxu1 %v34132_v33 }
0x1fce   :  { %27885 = vmatmul.mubr.msk.f32.vlgmr.msra.gmra.mrb[20].mxu1 %vm2149_vm3, %v21221_v53 }
0x1fcf   :  { %27894 = vmatprep.mubr.msk.f32.mxu1 %vm29398_vm1, %v34132_v33 }
0x1fd0   :  { %v19955_v36 = vpop.f32.mrb[244].mxu0  ;;  %v20445_v8 = vpop.f32.mrb[6].mxu1 }
0x1fd1   :  { %v20446_v20 = vadd.f32 %v29350_v19, %v20445_v8  ;;  %v27673_v46 = vpop.f32.mrb[245].mxu0  ;;  %v27750_v24 = vpop.f32.mrb[7].mxu1  ;;  %v19956_v22 = vadd.f32 %v29358_v14, %v19955_v36 }
0x1fd3   :  { %27893 = vmatpush3.xpose.msk.msra.mxu1 %vm2149_vm3, %v20446_v20  ;;  %v21224_v5 = vmul.f32 0.5, %v19956_v22 }
0x1fd4   :  { %27902 = vmatprep.subr.mxu1 %v34132_v33 }
0x1fd6   :  { %27895 = vmatmul.mubr.msk.f32.vlgmr.msra.gmra.mrb[22].mxu1 %vm2149_vm3, %v21223_v54 }
0x1fd7   :  { %27904 = vmatprep.mubr.msk.f32.mxu1 %vm29398_vm1, %v34132_v33 }
0x1fd8   :  { %v20095_v12 = vpop.f32.mrb[246].mxu0  ;;  %v20585_v29 = vpop.f32.mrb[8].mxu1 }
0x1fd9   :  { %v20586_v56 = vadd.f32 %v29352_v32, %v20585_v29  ;;  %v27695_v17 = vpop.f32.mrb[247].mxu0  ;;  %v27772_v51 = vpop.f32.mrb[9].mxu1  ;;  %v20096_v58 = vadd.f32 %v29360_v26, %v20095_v12 }
0x1fdb   :  { %27903 = vmatpush3.xpose.msk.msra.mxu1 %vm2149_vm3, %v20586_v56  ;;  %v21226_v43 = vmul.f32 0.5, %v20096_v58 }
0x1fdc   :  { %27912 = vmatprep.subr.mxu1 %v34132_v33 }
0x1fde   :  { %27905 = vmatmul.mubr.msk.f32.vlgmr.msra.gmra.mrb[24].mxu1 %vm2149_vm3, %v21225_v11 }
0x1fdf   :  { %27914 = vmatprep.mubr.msk.f32.mxu1 %vm29398_vm1, %v34132_v33 }
0x1fe0   :  { %v20235_v49 = vpop.f32.mrb[248].mxu0  ;;  %v20725_v27 = vpop.f32.mrb[10].mxu1 }
0x1fe1   :  { %v20236_v16 = vadd.f32 %v29354_v60, %v20235_v49  ;;  %v20726_v37 = vadd.f32 %v29355_v35, %v20725_v27  ;;  %v27717_v30 = vpop.f32.mrb[249].mxu0  ;;  %v27794_v42 = vpop.f32.mrb[11].mxu1 }
0x1fe3   :  { %27878 = vmatpush3.xpose.msk.msra.mxu0 %vm2149_vm3, %v20236_v16  ;;  %27913 = vmatpush3.msra.mxu1 %v20726_v37 }
0x1fe4   :  { %27887 = vmatprep.subr.mxu0 %v34132_v33  ;;  %27922 = vmatprep.subr.mxu1 %v34132_v33 }
0x1fe6   :  { %27880 = vmatmul.mubr.msk.f32.vlgmr.msra.gmra.mrb[8].mxu0 %vm2149_vm3, %v21220_v47 }
0x1fe7   :  { %27889 = vmatprep.mubr.msk.f32.mxu0 %vm29398_vm1, %v34132_v33 }
0x1fe8   :  { %v20375_v48 = vpop.f32.mrb[250].mxu0  ;;  %v33615_v9 = vpop.f32.mrb[12].mxu1 }
0x1fe9   :  { %v20376_v38 = vadd.f32 %v29357_v34, %v20375_v48  ;;  %v27739_v59 = vpop.f32.mrb[251].mxu0  ;;  %v27816_v61 = vpop.f32.mrb[13].mxu1 }
0x1feb   :  { %27888 = vmatpush3.xpose.msk.msra.mxu0 %vm2149_vm3, %v20376_v38 }
0x1fec   :  { %27897 = vmatprep.subr.mxu0 %v34132_v33 }
0x1fee   :  { %27890 = vmatmul.mubr.msk.f32.vlgmr.msra.gmra.mrb[10].mxu0 %vm2149_vm3, %v21222_v41 }
0x1fef   :  { %27899 = vmatprep.mubr.msk.f32.mxu0 %vm29398_vm1, %v34132_v33 }
0x1ff0   :  { %v20515_v63 = vpop.f32.mrb[252].mxu0  ;;  %v33628_v52 = vpop.f32.mrb[14].mxu1 }
0x1ff1   :  { %v20516_v18 = vadd.f32 %v29359_v1, %v20515_v63  ;;  %v27761_v7 = vpop.f32.mrb[253].mxu0  ;;  %v27838_v23 = vpop.f32.mrb[15].mxu1 }
0x1ff3   :  { %27898 = vmatpush3.xpose.msk.msra.mxu0 %vm2149_vm3, %v20516_v18 }
0x1ff4   :  { %27907 = vmatprep.subr.mxu0 %v34132_v33 }
0x1ff6   :  { %27900 = vmatmul.mubr.msk.f32.vlgmr.msra.gmra.mrb[12].mxu0 %vm2149_vm3, %v21224_v5 }
0x1ff7   :  { %27909 = vmatprep.mubr.msk.f32.mxu0 %vm29398_vm1, %v34132_v33 }
0x1ff8   :  { %v20655_v45 = vpop.f32.mrb[254].mxu0  ;;  %v33641_v44 = vpop.f32.mrb[16].mxu1 }
0x1ff9   :  { %v20656_v10 = vadd.f32 %v29361_v40, %v20655_v45  ;;  %v27783_v0 = vpop.f32.mrb[255].mxu0  ;;  %v27860_v31 = vpop.f32.mrb[17].mxu1 }
0x1ffb   :  { %27908 = vmatpush3.xpose.msk.msra.mxu0 %vm2149_vm3, %v20656_v10 }
0x1ffc   :  { %27917 = vmatprep.subr.mxu0 %v34132_v33 }
0x1ffe   :  { %27910 = vmatmul.mubr.msk.f32.vlgmr.msra.gmra.mrb[14].mxu0 %vm2149_vm3, %v21226_v43  ;;  %v33678_v43 = vld [vmem:[%s34155_s29 + $0x2] ss:$0 sm:$0xff] }
0x1fff   :  { %27919 = vmatprep.mubr.msk.f32.mxu0 %vm29398_vm1, %v34132_v33 }
0x2000   :  { %v20795_v53 = vpop.f32.mrb[0].mxu0 }
0x2001   :  { %v20796_v4 = vadd.f32 %v29362_v62, %v20795_v53  ;;  %v27805_v36 = vpop.f32.mrb[1].mxu0 }
0x2003   :  { %27918 = vmatpush3.msra.mxu0 %v20796_v4  ;;  %v23114_v4 = vadd.f32 %v33678_v43, %v33551_v28 }
0x2004   :  { %27927 = vmatprep.subr.mxu0 %v34132_v33 }
0x2008   :  { %v33655_v8 = vpop.f32.mrb[2].mxu0 }
0x2009   :  { %v27827_v19 = vpop.f32.mrb[3].mxu0 }
0x2010   :  { %v33657_v20 = vpop.f32.mrb[4].mxu0 }
0x2011   :  { %v27849_v46 = vpop.f32.mrb[5].mxu0 }
0x2018   :  { %v33659_v24 = vpop.f32.mrb[6].mxu0 }
0x2019   :  { %v27871_v54 = vpop.f32.mrb[7].mxu0 }
0x201a   :  { %v34228_v54 = vld [vmem:[#allocation8_spill] sm:$0xff] }
0x2099   :  { %v21299_v50 = vpop.f32.mrb[18].mxu1 }
0x209a   :  { %v27876_v13 = vpop.f32.mrb[19].mxu1  ;;  %v21835_v12 = vsel %vm99_vm0, %v21299_v50, -inf }
0x209b   :  { %21836 = vmax.xlane.f32.xlu0 %v21835_v12 }
0x20a1   :  { %v21451_v29 = vpop.f32.mrb[20].mxu1 }
0x20a2   :  { %v27886_v32 = vpop.f32.mrb[21].mxu1  ;;  %v21841_v56 = vsel %vm99_vm0, %v21451_v29, -inf }
0x20a3   :  { %21842 = vmax.xlane.f32.xlu0 %v21841_v56 }
0x20a9   :  { %v21603_v17 = vpop.f32.mrb[22].mxu1 }
0x20aa   :  { %v27896_v51 = vpop.f32.mrb[23].mxu1  ;;  %v21847_v11 = vsel %vm99_vm0, %v21603_v17, -inf }
0x20ab   :  { %21848 = vmax.xlane.f32.xlu0 %v21847_v11 }
0x20b1   :  { %v21755_v2 = vpop.f32.mrb[24].mxu1 }
0x20b2   :  { %v27906_v3 = vpop.f32.mrb[25].mxu1  ;;  %v21853_v49 = vsel %vm99_vm0, %v21755_v2, -inf }
0x20b3   :  { %21854 = vmax.xlane.f32.xlu0 %v21853_v49 }
0x20b9   :  { %v21375_v27 = vpop.f32.mrb[8].mxu0 }
0x20ba   :  { %v27881_v60 = vpop.f32.mrb[9].mxu0  ;;  %v21838_v16 = vsel %vm99_vm0, %v21375_v27, -inf }
0x20bb   :  { %21839 = vmax.xlane.f32.xlu1 %v21838_v16 }
0x20c1   :  { %v21527_v35 = vpop.f32.mrb[10].mxu0 }
0x20c2   :  { %v27891_v37 = vpop.f32.mrb[11].mxu0  ;;  %v21844_v30 = vsel %vm99_vm0, %v21527_v35, -inf }
0x20c3   :  { %21845 = vmax.xlane.f32.xlu1 %v21844_v30 }
0x20c9   :  { %v21679_v42 = vpop.f32.mrb[12].mxu0 }
0x20ca   :  { %v27901_v47 = vpop.f32.mrb[13].mxu0  ;;  %v21850_v15 = vsel %vm99_vm0, %v21679_v42, -inf }
0x20cb   :  { %21851 = vmax.xlane.f32.xlu1 %v21850_v15 }
0x20d1   :  { %v21831_v55 = vpop.f32.mrb[14].mxu0 }
0x20d2   :  { %v27911_v48 = vpop.f32.mrb[15].mxu0  ;;  %v21856_v34 = vsel %vm99_vm0, %v21831_v55, -inf }
0x20d3   :  { %21857 = vmax.xlane.f32.xlu1 %v21856_v34 }
0x2128   :  { %v21837_v38 = vpop.xlane.xlu0 %21836 }
0x2129   :  { %v21859_v59 = vsub.f32 %v21299_v50, %v21837_v38  ;;  %v23116_v50 = vadd.f32 %v23114_v4, %v34228_v54  ;;  %v29367_v4 = vld [vmem:[%s34133_s9 + $0x15] ss:$0 sm:$0xff]  ;;  %v29368_v54 = vld [vmem:[%s34133_s9 + $0x17] ss:$0 sm:$0xff] }
0x212b   :  { %v21867_v61 = vmul.f32 1.442695, %v21859_v59 }
0x212d   :  { %29244 = vpow2.f32 %v21867_v61  ;;  %v29364_v61 = vld [vmem:[%s34133_s9 + $0x14] ss:$0 sm:$0xff] }
0x2130   :  { %v21843_v41 = vpop.xlane.xlu0 %21842 }
0x2131   :  { %v21861_v14 = vsub.f32 %v21451_v29, %v21843_v41  ;;  %v23122_v29 = vsel %vm361_vm2, %v23116_v50, 0.0  ;;  %v21006_v41 = vadd.f32 %v29364_v61, %v33628_v52 }
0x2133   :  { %v21871_v22 = vmul.f32 1.442695, %v21861_v14 }
0x2135   :  { %29246 = vpow2.f32 %v21871_v22 }
0x2137   :  { %v29245_v63 = vpop.eup %29244 }
0x2138   :  { %v21849_v1 = vpop.xlane.xlu0 %21848  ;;  %v21883_v18 = vsel %vm99_vm0, %v29245_v63, 0.0 }
0x2139   :  { %v21863_v7 = vsub.f32 %v21603_v17, %v21849_v1  ;;  %21884 = vadd.xlane.f32.xlu0 %v21883_v18  ;;  %v29365_v1 = vld [vmem:[%s34133_s9 + $0x16] ss:$0 sm:$0xff] }
0x213a   :  { %v21146_v52 = vadd.f32 %v29365_v1, %v33641_v44 }
0x213b   :  { %v21875_v23 = vmul.f32 1.442695, %v21863_v7 }
0x213d   :  { %29248 = vpow2.f32 %v21875_v23 }
0x213f   :  { %v29247_v5 = vpop.eup %29246 }
0x2140   :  { %v21855_v26 = vpop.xlane.xlu0 %21854  ;;  %v21889_v58 = vsel %vm99_vm0, %v29247_v5, 0.0 }
0x2141   :  { %v21865_v45 = vsub.f32 %v21755_v2, %v21855_v26  ;;  %21890 = vadd.xlane.f32.xlu0 %v21889_v58 }
0x2143   :  { %v21879_v40 = vmul.f32 1.442695, %v21865_v45 }
0x2145   :  { %29250 = vpow2.f32 %v21879_v40 }
0x2147   :  { %v33671_v10 = vpop.eup %29248 }
0x2148   :  { %v21840_v0 = vpop.xlane.xlu1 %21839  ;;  %v21895_v31 = vsel %vm99_vm0, %v33671_v10, 0.0 }
0x2149   :  { %v21860_v53 = vsub.f32 %v21375_v27, %v21840_v0  ;;  %21896 = vadd.xlane.f32.xlu0 %v21895_v31  ;;  %v29366_v0 = vld [vmem:[%s34133_s9 + $0x13] ss:$0 sm:$0xff] }
0x214a   :  { %v20936_v31 = vadd.f32 %v29366_v0, %v33655_v8 }
0x214b   :  { %v21869_v62 = vmul.f32 1.442695, %v21860_v53 }
0x214d   :  { %29252 = vpow2.f32 %v21869_v62 }
0x214f   :  { %v33682_v36 = vpop.eup %29250 }
0x2150   :  { %v21846_v19 = vpop.xlane.xlu1 %21845  ;;  %v21901_v46 = vsel %vm99_vm0, %v33682_v36, 0.0 }
0x2151   :  { %v21862_v13 = vsub.f32 %v21527_v35, %v21846_v19  ;;  %21902 = vadd.xlane.f32.xlu0 %v21901_v46 }
0x2153   :  { %v21873_v12 = vmul.f32 1.442695, %v21862_v13 }
0x2155   :  { %29254 = vpow2.f32 %v21873_v12  ;;  %23123 = vadd.xlane.f32.xlu0 %v23122_v29  ;;  %v29369_v12 = vld [vmem:[%s34135_s4 + $0x44] sm:$0xf] }
0x2157   :  { %v33688_v32 = vpop.eup %29252 }
0x2158   :  { %v21852_v56 = vpop.xlane.xlu1 %21851  ;;  %v21886_v28 = vsel %vm99_vm0, %v33688_v32, 0.0 }
0x2159   :  { %v21864_v17 = vsub.f32 %v21679_v42, %v21852_v56  ;;  %21887 = vadd.xlane.f32.xlu1 %v21886_v28 }
0x215b   :  { %v21877_v51 = vmul.f32 1.442695, %v21864_v17  ;;  %v29370_v17 = vld [vmem:[%s34135_s4 + $0x48] sm:$0xf] }
0x215d   :  { %29256 = vpow2.f32 %v21877_v51 }
0x215f   :  { %v33692_v11 = vpop.eup %29254 }
0x2160   :  { %v21858_v2 = vpop.xlane.xlu1 %21857  ;;  %v21892_v3 = vsel %vm99_vm0, %v33692_v11, 0.0 }
0x2161   :  { %v21866_v49 = vsub.f32 %v21831_v55, %v21858_v2  ;;  %21893 = vadd.xlane.f32.xlu1 %v21892_v3  ;;  %v29363_v55 = vld [vmem:[%s34133_s9 + $0x12] ss:$0 sm:$0xff] }
0x2162   :  { %v20866_v48 = vadd.f32 %v29363_v55, %v33615_v9  ;;  %v29371_v2 = vld [vmem:[%s34135_s4 + $0x50] sm:$0xf] }
0x2163   :  { %v21881_v27 = vmul.f32 1.442695, %v21866_v49 }
0x2165   :  { %29258 = vpow2.f32 %v21881_v27 }
0x2167   :  { %v33696_v60 = vpop.eup %29256 }
0x2168   :  { %v21898_v16 = vsel %vm99_vm0, %v33696_v60, 0.0 }
0x2169   :  { %21899 = vadd.xlane.f32.xlu1 %v21898_v16  ;;  %v33798_v16 = vld [vmem:[%s34000_s12 + $0x2] ss:$0 sm:$0xff] }
0x216f   :  { %v33700_v35 = vpop.eup %29258 }
0x2170   :  { %v21904_v37 = vsel %vm99_vm0, %v33700_v35, 0.0 }
0x2171   :  { %21905 = vadd.xlane.f32.xlu1 %v21904_v37 }
0x21c6   :  { %v21885_v30 = vpop.xlane.xlu0 %21884 }
0x21c7   :  { %29260 = vrcp.f32 %v21885_v30  ;;  %v33810_v30 = vld [vmem:[%s34001_s13 + $0x2] ss:$0 sm:$0xff] }
0x21ce   :  { %v21891_v42 = vpop.xlane.xlu0 %21890 }
0x21cf   :  { %29262 = vrcp.f32 %v21891_v42 }
0x21d1   :  { %v29261_v47 = vpop.eup %29260 }
0x21d2   :  { %v21908_v15 = vmul.f32 %v29261_v47, %v29245_v63 }
0x21d4   :  { %27915 = vmatmul.mubr.msk.f32.vlgmr.msra.gmra.mrb[26].mxu1 %vm99_vm0, %v21908_v15 }
0x21d5   :  { %27923 = vmatpush3.msra.mxu1 %v20866_v48  ;;  %27924 = vmatprep.mubr.msk.f32.mxu1 %vm29398_vm1, %v34132_v33 }
0x21d6   :  { %v21897_v34 = vpop.xlane.xlu0 %21896  ;;  %27932 = vmatprep.subr.mxu1 %v34132_v33 }
0x21d7   :  { %29264 = vrcp.f32 %v21897_v34 }
0x21d9   :  { %v29263_v38 = vpop.eup %29262 }
0x21da   :  { %v21912_v59 = vmul.f32 %v29263_v38, %v29247_v5 }
0x21dc   :  { %27925 = vmatmul.mubr.msk.f32.vlgmr.msra.gmra.mrb[28].mxu1 %vm99_vm0, %v21912_v59 }
0x21dd   :  { %27933 = vmatpush3.msra.mxu1 %v21006_v41  ;;  %27934 = vmatprep.mubr.msk.f32.mxu1 %vm29398_vm1, %v34132_v33 }
0x21de   :  { %v21903_v9 = vpop.xlane.xlu0 %21902  ;;  %27942 = vmatprep.subr.mxu1 %v34132_v33 }
0x21df   :  { %29266 = vrcp.f32 %v21903_v9 }
0x21e1   :  { %v29265_v14 = vpop.eup %29264 }
0x21e2   :  { %v21916_v22 = vmul.f32 %v29265_v14, %v33671_v10  ;;  %v23124_v63 = vpop.xlane.xlu0 %23123 }
0x21e3   :  { %v23128_v18 = vmul.f32 0.03125, %v23124_v63 }
0x21e4   :  { %27935 = vmatmul.mubr.msk.f32.vlgmr.msra.gmra.mrb[30].mxu1 %vm99_vm0, %v21916_v22 }
0x21e5   :  { %v33726_v7 = vsub.f32 %v23116_v50, %v23128_v18  ;;  %27943 = vmatpush3.msra.mxu1 %v21146_v52  ;;  %27944 = vmatprep.mubr.msk.f32.mxu1 %vm29398_vm1, %v34132_v33  ;;  %v21216_v50 = vadd.f32 %v29368_v54, %v33659_v24 }
0x21e6   :  { %v21888_v23 = vpop.xlane.xlu1 %21887  ;;  %27952 = vmatprep.subr.mxu1 %v34132_v33 }
0x21e7   :  { %29268 = vrcp.f32 %v21888_v23  ;;  %v23132_v5 = vmul.f32 %v33726_v7, %v33726_v7 }
0x21e9   :  { %v29267_v26 = vpop.eup %29266  ;;  %v23134_v58 = vsel %vm361_vm2, %v23132_v5, 0.0 }
0x21ea   :  { %v21920_v44 = vmul.f32 %v29267_v26, %v33682_v36  ;;  %23135 = vadd.xlane.f32.xlu0 %v23134_v58  ;;  %v21076_v36 = vadd.f32 %v29367_v4, %v33657_v20 }
0x21ec   :  { %27945 = vmatmul.mubr.msk.f32.vlgmr.msra.gmra.mrb[32].mxu1 %vm99_vm0, %v21920_v44 }
0x21ed   :  { %27953 = vmatpush3.msk.msra.mxu1 %vm3433_vm4, %v33269_v39  ;;  %27954 = vmatprep.mubr.msk.f32.mxu1 %vm29398_vm1, %v34132_v33 }
0x21ee   :  { %v21894_v45 = vpop.xlane.xlu1 %21893  ;;  %27962 = vmatprep.subr.mxu1 %v34132_v33 }
0x21ef   :  { %29270 = vrcp.f32 %v21894_v45 }
0x21f1   :  { %v29269_v40 = vpop.eup %29268 }
0x21f2   :  { %v21910_v10 = vmul.f32 %v29269_v40, %v33688_v32 }
0x21f4   :  { %27920 = vmatmul.mubr.msk.f32.vlgmr.msra.gmra.mrb[16].mxu0 %vm99_vm0, %v21910_v10 }
0x21f5   :  { %27928 = vmatpush3.msra.mxu0 %v20936_v31  ;;  %27929 = vmatprep.mubr.msk.f32.mxu0 %vm29398_vm1, %v34132_v33 }
0x21f6   :  { %v21900_v39 = vpop.xlane.xlu1 %21899  ;;  %27937 = vmatprep.subr.mxu0 %v34132_v33 }
0x21f7   :  { %29272 = vrcp.f32 %v21900_v39 }
0x21f9   :  { %v29271_v53 = vpop.eup %29270 }
0x21fa   :  { %v21914_v62 = vmul.f32 %v29271_v53, %v33692_v11 }
0x21fc   :  { %27930 = vmatmul.mubr.msk.f32.vlgmr.msra.gmra.mrb[18].mxu0 %vm99_vm0, %v21914_v62 }
0x21fd   :  { %27938 = vmatpush3.msra.mxu0 %v21076_v36  ;;  %27939 = vmatprep.mubr.msk.f32.mxu0 %vm29398_vm1, %v34132_v33 }
0x21fe   :  { %v21906_v8 = vpop.xlane.xlu1 %21905  ;;  %27947 = vmatprep.subr.mxu0 %v34132_v33 }
0x21ff   :  { %29274 = vrcp.f32 %v21906_v8 }
0x2201   :  { %v29273_v19 = vpop.eup %29272 }
0x2202   :  { %v21918_v46 = vmul.f32 %v29273_v19, %v33696_v60 }
0x2204   :  { %27940 = vmatmul.mubr.msk.f32.vlgmr.msra.gmra.mrb[20].mxu0 %vm99_vm0, %v21918_v46 }
0x2205   :  { %27948 = vmatpush3.msra.mxu0 %v21216_v50  ;;  %27949 = vmatprep.mubr.msk.f32.mxu0 %vm29398_vm1, %v34132_v33 }
0x2206   :  { %27957 = vmatprep.subr.mxu0 %v34132_v33 }
0x2209   :  { %v29275_v20 = vpop.eup %29274 }
0x220a   :  { %v21922_v13 = vmul.f32 %v29275_v20, %v33700_v35  ;;  %v29372_v35 = vld [vmem:[%s34135_s4 + $0x58] sm:$0xf] }
0x220c   :  { %27950 = vmatmul.mubr.msk.f32.vlgmr.msra.gmra.mrb[22].mxu0 %vm99_vm0, %v21922_v13 }
0x220d   :  { %27958 = vmatpush3.msk.msra.mxu0 %vm3433_vm4, %v29369_v12  ;;  %27959 = vmatprep.mubr.msk.f32.mxu0 %vm29398_vm1, %v34132_v33 }
0x220e   :  { %27967 = vmatprep.subr.mxu0 %v34132_v33 }
0x2277   :  { %v23136_v24 = vpop.xlane.xlu0 %23135 }
0x2278   :  { %v23140_v29 = vmul.f32 0.03125, %v23136_v24 }
0x227a   :  { %v23142_v32 = vadd.f32 1e-05, %v23140_v29 }
0x227c   :  { %29276 = vrsqrt.f32 %v23142_v32 }
0x2286   :  { %v29277_v3 = vpop.eup %29276 }
0x2287   :  { %v23146_v27 = vmul.f32 %v29277_v3, %v33726_v7  ;;  %v23412_v3 = vld [vmem:[%s34009_s21] sm:$0xff] }
0x2289   :  { %v23154_v37 = vmul.f32 %v33798_v16, %v23146_v27 }
0x228b   :  { %v33813_v47 = vadd.f32 %v33810_v30, %v23154_v37  ;;  %v24467_v37 = vld [vmem:[%s34004_s16 + $0x110] sm:$0xff] }
0x22a7   :  { %v21992_v56 = vpop.f32.mrb[26].mxu1 }
0x22a8   :  { %v27916_v28 = vpop.f32.mrb[27].mxu1  ;;  %27955 = vmatmul.mubr.msk.f32.vlgmr.msra.gmra.mrb[34].mxu1 %vm2149_vm3, %v21992_v56 }
0x22a9   :  { %27963 = vmatpush3.msk.msra.mxu1 %vm3433_vm4, %v29370_v17  ;;  %27964 = vmatprep.mubr.msk.f32.mxu1 %vm29398_vm1, %v34132_v33  ;;  %v24457_v17 = vld [vmem:[%s34002_s14 + $0x40] sm:$0xff] }
0x22aa   :  { %27972 = vmatprep.subr.mxu1 %v34132_v33 }
0x22af   :  { %v22138_v51 = vpop.f32.mrb[28].mxu1 }
0x22b0   :  { %v27926_v11 = vpop.f32.mrb[29].mxu1  ;;  %27965 = vmatmul.mubr.msk.f32.vlgmr.msra.gmra.mrb[36].mxu1 %vm2149_vm3, %v22138_v51 }
0x22b1   :  { %27973 = vmatpush3.msk.msra.mxu1 %vm3433_vm4, %v29371_v2  ;;  %27974 = vmatprep.mubr.msk.f32.mxu1 %vm29398_vm1, %v34132_v33  ;;  %v24460_v11 = vld [vmem:[%s34002_s14 + $0x58] sm:$0xff] }
0x22b2   :  { %27982 = vmatprep.subr.mxu1 %v34132_v33 }
0x22b7   :  { %v22284_v49 = vpop.f32.mrb[30].mxu1 }
0x22b8   :  { %v27936_v60 = vpop.f32.mrb[31].mxu1  ;;  %27975 = vmatmul.mubr.msk.f32.vlgmr.msra.gmra.mrb[38].mxu1 %vm2149_vm3, %v22284_v49  ;;  %v23413_v49 = vld [vmem:[%s34009_s21 + $0x8] sm:$0xff] }
0x22b9   :  { %27983 = vmatpush3.msk.msra.mxu1 %vm3433_vm4, %v29372_v35  ;;  %27984 = vmatprep.mubr.msk.f32.mxu1 %vm29398_vm1, %v34132_v33  ;;  %v29044_v27 = vpack.c.bf16 %v23413_v49, %v23412_v3  ;;  %v24465_v60 = vld [vmem:[%s34004_s16 + $0x100] sm:$0xff]  ;;  %v24466_v35 = vld [vmem:[%s34004_s16 + $0x108] sm:$0xff] }
0x22bf   :  { %v22430_v42 = vpop.f32.mrb[32].mxu1 }
0x22c0   :  { %v27946_v15 = vpop.f32.mrb[33].mxu1  ;;  %27985 = vmatmul.mubr.msk.f32.vlgmr.msra.gmra.mrb[40].mxu1 %vm2149_vm3, %v22430_v42  ;;  %v29012_v42 = vpack.c.bf16 %v24466_v35, %v24465_v60  ;;  %v23410_v35 = vld [vmem:[%s34008_s20 + $0x10] sm:$0xff] }
0x22c1   :  { %28000 = vmatprep.mubr.msk.f32.mxu1 %vm361_vm2, %v33813_v47  ;;  %v24468_v15 = vld [vmem:[%s34004_s16 + $0x118] sm:$0xff] }
0x22c7   :  { %v22065_v55 = vpop.f32.mrb[16].mxu0 }
0x22c8   :  { %v27921_v48 = vpop.f32.mrb[17].mxu0  ;;  %27960 = vmatmul.mubr.msk.f32.vlgmr.msra.gmra.mrb[24].mxu0 %vm2149_vm3, %v22065_v55  ;;  %v29016_v55 = vpack.c.bf16 %v24468_v15, %v24467_v37  ;;  %v23411_v37 = vld [vmem:[%s34008_s20 + $0x18] sm:$0xff] }
0x22c9   :  { %27968 = vmatpush3.msk.msra.mxu0 %vm3433_vm4, %v33322_v21  ;;  %27969 = vmatprep.mubr.msk.f32.mxu0 %vm29398_vm1, %v34132_v33  ;;  %v24469_v48 = vld [vmem:[%s34004_s16 + $0x120] sm:$0xff] }
0x22ca   :  { %27977 = vmatprep.subr.mxu0 %v34132_v33 }
0x22cf   :  { %v22211_v34 = vpop.f32.mrb[18].mxu0 }
0x22d0   :  { %v27931_v38 = vpop.f32.mrb[19].mxu0  ;;  %27970 = vmatmul.mubr.msk.f32.vlgmr.msra.gmra.mrb[26].mxu0 %vm2149_vm3, %v22211_v34  ;;  %v24470_v34 = vld [vmem:[%s34004_s16 + $0x128] sm:$0xff] }
0x22d1   :  { %27978 = vmatpush3.msk.msra.mxu0 %vm3433_vm4, %v33341_v25  ;;  %27979 = vmatprep.mubr.msk.f32.mxu0 %vm29398_vm1, %v34132_v33  ;;  %v29020_v38 = vpack.c.bf16 %v24470_v34, %v24469_v48 }
0x22d2   :  { %27987 = vmatprep.subr.mxu0 %v34132_v33 }
0x22d7   :  { %v22357_v59 = vpop.f32.mrb[20].mxu0 }
0x22d8   :  { %v27941_v61 = vpop.f32.mrb[21].mxu0  ;;  %27980 = vmatmul.mubr.msk.f32.vlgmr.msra.gmra.mrb[28].mxu0 %vm2149_vm3, %v22357_v59  ;;  %v24471_v59 = vld [vmem:[%s34004_s16 + $0x130] sm:$0xff] }
0x22d9   :  { %27988 = vmatpush3.msk.msra.mxu0 %vm3433_vm4, %v33360_v6  ;;  %27989 = vmatprep.mubr.msk.f32.mxu0 %vm29398_vm1, %v34132_v33  ;;  %v24472_v61 = vld [vmem:[%s34004_s16 + $0x138] sm:$0xff] }
0x22da   :  { %29013 = vmatprep.subr.bf16.mxu0 %v29012_v42 }
0x22df   :  { %v22503_v21 = vpop.f32.mrb[22].mxu0 }
0x22e0   :  { %v27951_v41 = vpop.f32.mrb[23].mxu0  ;;  %27990 = vmatmul.mubr.msk.f32.vlgmr.msra.gmra.mrb[30].mxu0 %vm2149_vm3, %v22503_v21  ;;  %v29024_v21 = vpack.c.bf16 %v24472_v61, %v24471_v59 }
0x22e1   :  { %29015 = vmatpush3.bf16.msra.mxu0 %v29012_v42  ;;  %v24473_v41 = vld [vmem:[%s34004_s16 + $0x140] sm:$0xff]  ;;  %v29056_v42 = vpack.c.bf16 %v23411_v37, %v23410_v35 }
0x22e2   :  { %29017 = vmatprep.subr.bf16.mxu0 %v29016_v55 }
0x22e5   :  { %29019 = vmatpush3.bf16.msra.mxu0 %v29016_v55 }
0x22e6   :  { %29021 = vmatprep.subr.bf16.mxu0 %v29020_v38 }
0x22e9   :  { %29023 = vmatpush3.bf16.msra.mxu0 %v29020_v38 }
0x22ea   :  { %29025 = vmatprep.subr.bf16.mxu0 %v29024_v21 }
0x22ed   :  { %29027 = vmatpush3.bf16.msra.mxu0 %v29024_v21  ;;  %v24485_v21 = vld [vmem:[%s34006_s18 + $0x2] ss:$0 sm:$0xff] }
0x237b   :  { %v22576_v25 = vpop.f32.mrb[34].mxu1 }
0x237c   :  { %v27956_v9 = vpop.f32.mrb[35].mxu1  ;;  %v23091_v23 = vsel %vm361_vm2, %v22576_v25, 0.0  ;;  %v24474_v25 = vld [vmem:[%s34004_s16 + $0x148] sm:$0xff] }
0x237d   :  { %v29028_v9 = vpack.c.bf16 %v24474_v25, %v24473_v41 }
0x237f   :  { %29029 = vmatprep.subr.bf16.mxu0 %v29028_v9 }
0x2380   :  { %29031 = vmatpush3.bf16.msra.mxu0 %v29028_v9 }
0x2383   :  { %v22722_v14 = vpop.f32.mrb[36].mxu1 }
0x2384   :  { %v27966_v22 = vpop.f32.mrb[37].mxu1  ;;  %v23094_v33 = vsel %vm361_vm2, %v22722_v14, 0.0  ;;  %v24475_v14 = vld [vmem:[%s34004_s16 + $0x150] sm:$0xff] }
0x2385   :  { %v24476_v22 = vld [vmem:[%s34004_s16 + $0x158] sm:$0xff] }
0x238b   :  { %v22868_v63 = vpop.f32.mrb[38].mxu1 }
0x238c   :  { %v27976_v1 = vpop.f32.mrb[39].mxu1  ;;  %v23098_v0 = vsel %vm361_vm2, %v22868_v63, 0.0  ;;  %v29032_v63 = vpack.c.bf16 %v24476_v22, %v24475_v14  ;;  %v24486_v14 = vld [vmem:[%s34007_s19 + $0x2] ss:$0 sm:$0xff] }
0x238d   :  { %v24477_v1 = vld [vmem:[%s34004_s16 + $0x160] sm:$0xff] }
0x238e   :  { %29033 = vmatprep.subr.bf16.mxu0 %v29032_v63 }
0x238f   :  { %29035 = vmatpush3.bf16.msra.mxu0 %v29032_v63 }
0x2393   :  { %v23014_v52 = vpop.f32.mrb[40].mxu1 }
0x2394   :  { %v27986_v18 = vpop.f32.mrb[41].mxu1  ;;  %v23102_v36 = vsel %vm361_vm2, %v23014_v52, 0.0  ;;  %v24478_v52 = vld [vmem:[%s34004_s16 + $0x168] sm:$0xff] }
0x2395   :  { %v29036_v18 = vpack.c.bf16 %v24478_v52, %v24477_v1 }
0x2397   :  { %29037 = vmatprep.subr.bf16.mxu0 %v29036_v18 }
0x2398   :  { %29039 = vmatpush3.bf16.msra.mxu0 %v29036_v18  ;;  %v24491_v18 = vld [vmem:[%s34010_s22] ss:$0 sm:$0xff] }
0x239b   :  { %v22649_v7 = vpop.f32.mrb[24].mxu0 }
0x239c   :  { %v23092_v6 = vsel %vm361_vm2, %v22649_v7, 0.0  ;;  %v27961_v5 = vpop.f32.mrb[25].mxu0 }
0x239d   :  { %v23093_v26 = vadd.f32 %v23092_v6, %v23091_v23 }
0x239f   :  { %v23095_v58 = vadd.f32 %v23094_v33, %v23093_v26  ;;  %v23414_v33 = vld [vmem:[%s34009_s21 + $0x10] sm:$0xff] }
0x23a3   :  { %v22795_v44 = vpop.f32.mrb[26].mxu0 }
0x23a4   :  { %v23096_v45 = vsel %vm361_vm2, %v22795_v44, 0.0  ;;  %v27971_v40 = vpop.f32.mrb[27].mxu0 }
0x23a5   :  { %v23097_v10 = vadd.f32 %v23096_v45, %v23095_v58  ;;  %v23415_v58 = vld [vmem:[%s34009_s21 + $0x18] sm:$0xff] }
0x23a6   :  { %v29048_v40 = vpack.c.bf16 %v23415_v58, %v23414_v33 }
0x23a7   :  { %v23099_v31 = vadd.f32 %v23098_v0, %v23097_v10  ;;  %v34229_v10 = vld [vmem:[#allocation7_spill] sm:$0xff]  ;;  %v34230_v0 = vld [vmem:[#allocation6_spill] sm:$0xff] }
0x23ab   :  { %v22941_v39 = vpop.f32.mrb[28].mxu0 }
0x23ac   :  { %v23100_v53 = vsel %vm361_vm2, %v22941_v39, 0.0  ;;  %v27981_v62 = vpop.f32.mrb[29].mxu0  ;;  %v24462_v39 = vld [vmem:[%s34003_s15 + $0x2] ss:$0 sm:$0xff] }
0x23ad   :  { %v23101_v4 = vadd.f32 %v23100_v53, %v23099_v31  ;;  %v24479_v31 = vld [vmem:[%s34004_s16 + $0x170] sm:$0xff] }
0x23af   :  { %v23103_v8 = vadd.f32 %v23102_v36, %v23101_v4 }
0x23b3   :  { %v23087_v19 = vpop.f32.mrb[30].mxu0 }
0x23b4   :  { %v23104_v46 = vsel %vm361_vm2, %v23087_v19, 0.0  ;;  %v27991_v54 = vpop.f32.mrb[31].mxu0 }
0x23b5   :  { %v23105_v50 = vadd.f32 %v23104_v46, %v23103_v8  ;;  %v24482_v46 = vld [vmem:[%s34005_s17 + $0x2] ss:$0 sm:$0xff] }
0x23b7   :  { %v23115_v20 = vadd.f32 %v33678_v43, %v23105_v50  ;;  %v24458_v43 = vld [vmem:[%s34002_s14 + $0x48] sm:$0xff] }
0x23b8   :  { %v29004_v51 = vpack.c.bf16 %v24458_v43, %v24457_v17 }
0x23b9   :  { %v23117_v13 = vadd.f32 %v23115_v20, %v33316_v57  ;;  %v24459_v57 = vld [vmem:[%s34002_s14 + $0x50] sm:$0xff] }
0x23ba   :  { %29005 = vmatprep.subr.bf16.mxu1 %v29004_v51  ;;  %v29008_v2 = vpack.c.bf16 %v24460_v11, %v24459_v57 }
0x23bb   :  { %v23125_v12 = vsel %vm361_vm2, %v23117_v13, 0.0  ;;  %29007 = vmatpush3.bf16.msra.mxu1 %v29004_v51 }
0x23bc   :  { %23126 = vadd.xlane.f32.xlu1 %v23125_v12  ;;  %29009 = vmatprep.subr.bf16.mxu1 %v29008_v2 }
0x23bf   :  { %29011 = vmatpush3.bf16.msra.mxu1 %v29008_v2 }
0x23c0   :  { %29045 = vmatprep.subr.bf16.mxu1 %v29044_v27 }
0x2449   :  { %v23127_v24 = vpop.xlane.xlu1 %23126 }
0x244a   :  { %v23129_v29 = vmul.f32 0.03125, %v23127_v24 }
0x244c   :  { %v23131_v32 = vsub.f32 %v23117_v13, %v23129_v29 }
0x244e   :  { %v23133_v56 = vmul.f32 %v23131_v32, %v23131_v32 }
0x2450   :  { %v23137_v28 = vsel %vm361_vm2, %v23133_v56, 0.0 }
0x2451   :  { %23138 = vadd.xlane.f32.xlu1 %v23137_v28 }
0x24de   :  { %v23139_v7 = vpop.xlane.xlu1 %23138 }
0x24df   :  { %v23141_v23 = vmul.f32 0.03125, %v23139_v7 }
0x24e1   :  { %v23143_v6 = vadd.f32 1e-05, %v23141_v23 }
0x24e3   :  { %29278 = vrsqrt.f32 %v23143_v6 }
0x24ed   :  { %v29279_v5 = vpop.eup %29278 }
0x24ee   :  { %v23147_v26 = vmul.f32 %v29279_v5, %v23131_v32 }
0x24f0   :  { %v23155_v44 = vmul.f32 %v33798_v16, %v23147_v26  ;;  %v24480_v16 = vld [vmem:[%s34004_s16 + $0x178] sm:$0xff] }
0x24f2   :  { %v23163_v45 = vadd.f32 %v33810_v30, %v23155_v44  ;;  %v29040_v30 = vpack.c.bf16 %v24480_v16, %v24479_v31 }
0x24f4   :  { %28001 = vmatmul.mubr.msk.f32.vlgmr.msra.gmra.mrb[42].mxu1 %vm361_vm2, %v23163_v45  ;;  %29041 = vmatprep.subr.bf16.mxu0 %v29040_v30 }
0x24f5   :  { %29047 = vmatpush3.bf16.msra.mxu1 %v29044_v27  ;;  %28046 = vmatprep.mubr.msk.f32.mxu1 %vm361_vm2, %v34229_v10  ;;  %v23409_v27 = vld [vmem:[%s34008_s20 + $0x8] sm:$0xff] }
0x24f6   :  { %29049 = vmatprep.subr.bf16.mxu1 %v29048_v40  ;;  %29043 = vmatpush3.bf16.msra.mxu0 %v29040_v30 }
0x24f9   :  { %29051 = vmatpush3.bf16.msra.mxu1 %v29048_v40 }
0x24fc   :  { %28047 = vmatmul.mubr.msk.f32.vlgmr.msra.gmra.mrb[44].mxu1 %vm361_vm2, %v34230_v0 }
0x25c7   :  { %v28002_v53 = vpop.f32.mrb[42].mxu1 }
0x25c8   :  { %v23255_v62 = vadd.f32 %v28002_v53, %v24462_v39  ;;  %v23249_v4 = vpop.f32.mrb[43].mxu1  ;;  %v29400_v53 = vmov 0  }
0x25c9   :  { %v23250_v36 = vadd.f32 %v24462_v39, %v23249_v4  ;;  %29067 = vset.pattern.permute.xlu0 %v29400_v53 }
0x25ca   :  { %v23259_v19 = vmax.f32 %v23255_v62, 0.0 }
0x25cb   :  { %v23258_v8 = vmax.f32 %v23250_v36, 0.0 }
0x25cd   :  { %28035 = vmatprep.mubr.f32.mxu0 %v23258_v8 }
0x25ce   :  { %28036 = vmatmul.mubr.f32.vlgmr.msra.gmra.mrb[32].mxu0 %v23259_v19 }
0x26a1   :  { %v28037_v54 = vpop.f32.mrb[32].mxu0 }
0x26a2   :  { %v23357_v50 = vadd.f32 %v28037_v54, %v24482_v46  ;;  %v23351_v20 = vpop.f32.mrb[33].mxu0 }
0x26a3   :  { %v23352_v13 = vadd.f32 %v24482_v46, %v23351_v20 }
0x26a4   :  { %v23361_v12 = vadd.f32 %v23357_v50, %v23163_v45  ;;  %v24492_v50 = vld [vmem:[%s34011_s23] ss:$0 sm:$0xff]  ;;  %s29401_s23 = smov [#allocation3]  }
0x26a5   :  { %v23360_v24 = vadd.f32 %v23352_v13, %v33813_v47  ;;  %v23408_v47 = vld [vmem:[%s34008_s20] sm:$0xff]  ;;  %s23683_s12 = sshll.u32 %s29401_s23, 4  ;;  %s23684_s12 = int_to_ptr.vmem [resolvable:$true] %s23683_s12 }
0x26a6   :  { %v23369_v29 = vsel %vm361_vm2, %v23361_v12, 0.0  ;;  %v29052_v60 = vpack.c.bf16 %v23409_v27, %v23408_v47  ;;  %v23662_v47 = vlaneseq  ;;  %s29373_s13 = scalar_lea.vmem %s23684_s12, 32  ;;  %p29378_p1 = scmp.lt.s32.totalorder %s23684_s12, %s23684_s12 }
0x26a7   :  { %23370 = vadd.xlane.f32.xlu1 %v23369_v29  ;;  %v23366_v32 = vsel %vm361_vm2, %v23360_v24, 0.0  ;;  %p29374_p0 = scmp.ne.s32.totalorder %s23684_s12, %s29373_s13  ;;  %p29379_p2 = scmp.lt.s32.totalorder %s29373_s13, %s29373_s13 }
0x26a8   :  { %23367 = vadd.xlane.f32.xlu0 %v23366_v32  ;;  %29053 = vmatprep.subr.bf16.mxu1 %v29052_v60  ;;  %v23663_v27 = vand.u32 127, %v23662_v47 }
0x26a9   :  { %29055 = vmatpush3.bf16.msra.mxu1 %v29052_v60  ;;  %v23665_v60 = vshrl.u32 %v23662_v47, 7  ;;  %p29380_p3 = por %p29379_p2, %p29378_p1 }
0x26aa   :  { %29057 = vmatprep.subr.bf16.mxu1 %v29056_v42 }
0x26ab   :  { %v23666_v37 = vsub.s32 %v23663_v27, %v23665_v60  ;;  %p29381_p4 = pnand %p29380_p3, %p29374_p0 }
0x26ad   :  { %29059 = vmatpush3.bf16.msra.mxu1 %v29056_v42 }
0x2734   :  { %v23371_v56 = vpop.xlane.xlu1 %23370 }
0x2735   :  { %v23373_v28 = vmul.f32 0.03125, %v23371_v56  ;;  %v23368_v17 = vpop.xlane.xlu0 %23367 }
0x2736   :  { %v23372_v43 = vmul.f32 0.03125, %v23368_v17 }
0x2737   :  { %v23375_v51 = vsub.f32 %v23361_v12, %v23373_v28  ;;  %v24493_v12 = vld [vmem:[%s34231_s5] ss:$0 sm:$0xff] }
0x2738   :  { %v23374_v57 = vsub.f32 %v23360_v24, %v23372_v43  ;;  %v24494_v28 = vld [vmem:[%s34232_s24] ss:$0 sm:$0xff] }
0x2739   :  { %v23377_v11 = vmul.f32 %v23375_v51, %v23375_v51 }
0x273a   :  { %v23376_v2 = vmul.f32 %v23374_v57, %v23374_v57 }
0x273b   :  { %v23381_v3 = vsel %vm361_vm2, %v23377_v11, 0.0 }
0x273c   :  { %23382 = vadd.xlane.f32.xlu1 %v23381_v3  ;;  %v23378_v49 = vsel %vm361_vm2, %v23376_v2, 0.0 }
0x273d   :  { %23379 = vadd.xlane.f32.xlu0 %v23378_v49  ;;  %v24495_v49 = vld [vmem:[#allocation2] ss:$0 sm:$0xff] }
0x27c9   :  { %v23383_v15 = vpop.xlane.xlu1 %23382 }
0x27ca   :  { %v23385_v55 = vmul.f32 0.03125, %v23383_v15  ;;  %v23380_v48 = vpop.xlane.xlu0 %23379 }
0x27cb   :  { %v23384_v34 = vmul.f32 0.03125, %v23380_v48 }
0x27cc   :  { %v23387_v38 = vadd.f32 1e-05, %v23385_v55 }
0x27cd   :  { %v23386_v59 = vadd.f32 1e-05, %v23384_v34 }
0x27ce   :  { %29280 = vrsqrt.f32 %v23387_v38 }
0x27cf   :  { %29282 = vrsqrt.f32 %v23386_v59 }
0x27d8   :  { %v29281_v61 = vpop.eup %29280 }
0x27d9   :  { %v29283_v41 = vpop.eup %29282  ;;  %v23391_v25 = vmul.f32 %v29281_v61, %v23375_v51 }
0x27da   :  { %v23390_v9 = vmul.f32 %v29283_v41, %v23374_v57 }
0x27db   :  { %v23399_v22 = vmul.f32 %v24485_v21, %v23391_v25 }
0x27dc   :  { %v23398_v63 = vmul.f32 %v24485_v21, %v23390_v9 }
0x27dd   :  { %v23407_v52 = vadd.f32 %v24486_v14, %v23399_v22 }
0x27de   :  { %v23406_v1 = vadd.f32 %v24486_v14, %v23398_v63 }
0x27e0   :  { %28057 = vmatprep.mubr.msk.f32.mxu1 %vm361_vm2, %v23406_v1 }
0x27e1   :  { %28058 = vmatmul.mubr.msk.f32.vlgmr.msra.gmra.mrb[44].mxu1 %vm361_vm2, %v23407_v52 }
0x28b4   :  { %v28059_v7 = vpop.f32.mrb[44].mxu1 }
0x28b5   :  { %v23586_v23 = vadd.f32 %v28059_v7, %v24491_v18  ;;  %v23569_v6 = vpop.f32.mrb[45].mxu1 }
0x28b6   :  { %v23585_v5 = vadd.f32 %v24491_v18, %v23569_v6 }
0x28b7   :  { %v23592_v26 = vsel %vm361_vm2, %v23586_v23, 0.0 }
0x28b8   :  { %23593 = vadd.xlane.f32.xlu1 %v23592_v26  ;;  %v23589_v33 = vsel %vm361_vm2, %v23585_v5, 0.0 }
0x28b9   :  { %23590 = vadd.xlane.f32.xlu0 %v23589_v33 }
0x2945   :  { %v23594_v58 = vpop.xlane.xlu1 %23593 }
0x2946   :  { %v23596_v44 = vmul.f32 0.03125, %v23594_v58  ;;  %v23591_v45 = vpop.xlane.xlu0 %23590 }
0x2947   :  { %v23595_v40 = vmul.f32 0.03125, %v23591_v45 }
0x2948   :  { %v23598_v10 = vsub.f32 %v23586_v23, %v23596_v44 }
0x2949   :  { %v23597_v0 = vsub.f32 %v23585_v5, %v23595_v40 }
0x294a   :  { %v23600_v31 = vmul.f32 %v23598_v10, %v23598_v10 }
0x294b   :  { %v23599_v16 = vmul.f32 %v23597_v0, %v23597_v0 }
0x294c   :  { %v23604_v30 = vsel %vm361_vm2, %v23600_v31, 0.0 }
0x294d   :  { %23605 = vadd.xlane.f32.xlu1 %v23604_v30  ;;  %v23601_v39 = vsel %vm361_vm2, %v23599_v16, 0.0 }
0x294e   :  { %23602 = vadd.xlane.f32.xlu0 %v23601_v39 }
0x29da   :  { %v23606_v62 = vpop.xlane.xlu1 %23605 }
0x29db   :  { %v23608_v4 = vmul.f32 0.03125, %v23606_v62  ;;  %v23603_v36 = vpop.xlane.xlu0 %23602 }
0x29dc   :  { %v23607_v8 = vmul.f32 0.03125, %v23603_v36 }
0x29dd   :  { %v23610_v19 = vadd.f32 1e-05, %v23608_v4 }
0x29de   :  { %v23609_v46 = vadd.f32 1e-05, %v23607_v8 }
0x29df   :  { %29284 = vrsqrt.f32 %v23610_v19 }
0x29e0   :  { %29286 = vrsqrt.f32 %v23609_v46 }
0x29e9   :  { %v29285_v54 = vpop.eup %29284 }
0x29ea   :  { %v29287_v20 = vpop.eup %29286  ;;  %v23614_v13 = vmul.f32 %v29285_v54, %v23598_v10 }
0x29eb   :  { %v23613_v24 = vmul.f32 %v29287_v20, %v23597_v0 }
0x29ec   :  { %v23622_v29 = vmul.f32 %v24492_v50, %v23614_v13 }
0x29ed   :  { %v23621_v32 = vmul.f32 %v24492_v50, %v23613_v24 }
0x29ee   :  { %v23630_v56 = vadd.f32 %v24493_v12, %v23622_v29 }
0x29ef   :  { %v23629_v17 = vadd.f32 %v24493_v12, %v23621_v32 }
0x29f0   :  { %v23632_v43 = vmax.f32 %v23630_v56, 0.0 }
0x29f1   :  { %v23631_v51 = vmax.f32 %v23629_v17, 0.0 }
0x29f2   :  { %v23641_v57 = vmul.f32 %v24494_v28, %v23632_v43 }
0x29f3   :  { %v23640_v11 = vmul.f32 %v24494_v28, %v23631_v51 }
0x29f4   :  { %v23645_v2 = vsel %vm361_vm2, %v23641_v57, 0.0 }
0x29f5   :  { %23646 = vadd.xlane.f32.xlu1 %v23645_v2  ;;  %v23642_v3 = vsel %vm361_vm2, %v23640_v11, 0.0 }
0x29f6   :  { %23643 = vadd.xlane.f32.xlu0 %v23642_v3 }
0x2a0c   :  { %23655 = vperm.xlu0 %29067, %v24495_v49  }
0x2a82   :  { %v23647_v42 = vpop.xlane.xlu1 %23646 }
0x2a83   :  { %v23644_v35 = vpop.xlane.xlu0 %23643 }
0x2a8b   :  { %v23656_v15 = vpop.permute.xlu0 %23655 }
0x2a8c   :  { %v23658_v55 = vadd.f32 %v23656_v15, %v23644_v35  ;;  %v23659_v48 = vadd.f32 %v23656_v15, %v23647_v42 }
0x2a8e   :  { %v23667_v34 = vrot.slane %v23658_v55, %v23666_v37  ;;  %v23671_v38 = vrot.slane %v23659_v48, %v23666_v37 }
0x2a90   :  { %v23673_v59 = vsel %vm23672_vm5, %v23671_v38, %v23667_v34 }
0x2a91   :  { %23676 = vst.msk [vmem:[#allocation3] sm:$0x3] %vm23675_vm6, %v23673_v59 }
0x2a92   :  { %29384 = shalt.err (!%p29381_p4)
}
0x2a93   :  { %s34233_s0 = sld [smem:[#allocation41_spill]] }
0x2a99   :  { %s29385_s6 = scalar_lea.hbm %s34233_s0, 32 }
0x2a9a   :  { %p29386_p5 = scmp.ne.s32.totalorder %s34233_s0, %s29385_s6  ;;  %p29389_p6 = scmp.lt.u32.totalorder %s29385_s6, %s34233_s0 }
0x2a9c   :  { %p29391_p7 = pnand %p29389_p6, %p29386_p5 }
0x2a9e   :  { %29394 = shalt.err (!%p29391_p7)
}
0x2a9f   :  { %23686 = dma.vmem_to_hbm [thread:$0]  %s23684_s12, 32, %s34233_s0, [#allocation4]  }
0x2aa0   :  { %29395 = dma.done.wait [#allocation4], 32  }
0x2aa1   :  { %29396 = vsyncadd [#allocation4], 4294967264 }
0x2aa2   :  { %23690 = vsyncpa [#allocation4], 1 }

</bundles_post_ra>
